<compile_context>
chip_gen: v5e
topology: v5e:2x2
jax: 0.10.0
libtpu: 0.0.40
codegen_flags: <defaults>
</compile_context>

<pallas_src>
import functools

import jax
import jax.numpy as jnp
from jax.experimental import pallas as pl
from jax.experimental.pallas import tpu as pltpu


# Optional bf16-operand MXU path.  Disabled by default so the strict f32 reference
# check below stays exact; flipping it to True relaxes the tolerance.
USE_BF16_MATMUL = False


# ------------------------------ fused kernel ---------------------------------
def _dqn_fused_kernel(
    x_ref, w1_ref, b1_ref,           # conv1: blocked input, (2, 2, s1*s1*C, 32) weight, (1, 32) bias
    w2_ref, b2_ref,                  # conv2: (KH, KW, IC, OC) weight, (1, OC) bias
    w3_ref, b3_ref,                  # conv3: (KH, KW, IC, OC) weight, (1, OC) bias
    fw1_ref, fb1_ref,                # fc1:   (n_pos, OC3, 512) weight, (1, 512) bias
    fw2_ref, fb2_ref,                # fc2:   (512, A) weight, (1, A) bias
    q_ref,                           # output: (B, A)
    h1_ref, h2_ref,                  # VMEM scratch: conv1 / conv2 activations (H, W, B, C)
    *, conv2_stride, conv3_stride, use_bf16):

    def mm(a, b):
        # MXU matmul with f32 accumulation; optionally feed bf16 operands.
        if use_bf16:
            a = a.astype(jnp.bfloat16)
            b = b.astype(jnp.bfloat16)
        return jnp.dot(a, b, preferred_element_type=jnp.float32)

    def window(ref, ki, kj, oh, ow, stride):
        # (oh, ow, B, C) window of an (H, W, B, C) ref; (strided) slicing only touches
        # the untiled leading spatial dims, lane/sublane layout is untouched.
        if stride == 1:
            return ref[pl.ds(ki, oh), pl.ds(kj, ow), :, :]
        return ref[pl.ds(ki, oh, stride=stride), pl.ds(kj, ow, stride=stride), :, :]

    # ---------------- conv1 + ReLU (stride-block decomposition, 2x2 matmuls) -------
    # x_ref: (Hb, Wb, B, F) with F = s1*s1*C; conv stride == block size, so output oy
    # uses blocks oy..oy+1 -> per-offset windows are stride-1 slices on block indices.
    kb_r, kb_c, f1, oc1 = w1_ref.shape
    oh1, ow1, bsz, _ = h1_ref.shape
    m1 = oh1 * ow1 * bsz
    acc1 = jnp.zeros((m1, oc1), jnp.float32)
    for ki in range(kb_r):
        for kj in range(kb_c):
            blk = window(x_ref, ki, kj, oh1, ow1, 1)               # (oh1, ow1, B, F)
            acc1 = acc1 + mm(blk.reshape(m1, f1), w1_ref[ki, kj])
    h1_ref[...] = jnp.maximum(acc1 + b1_ref[...], 0.0).reshape(oh1, ow1, bsz, oc1)

    # ---------------- conv2 + ReLU (per-offset matmuls, f32 accumulation) ----------
    kh2, kw2, ic2, oc2 = w2_ref.shape
    oh2, ow2, _, _ = h2_ref.shape
    m2 = oh2 * ow2 * bsz
    acc2 = jnp.zeros((m2, oc2), jnp.float32)
    for ki in range(kh2):
        for kj in range(kw2):
            blk = window(h1_ref, ki, kj, oh2, ow2, conv2_stride)   # (oh2, ow2, B, ic2)
            acc2 = acc2 + mm(blk.reshape(m2, ic2), w2_ref[ki, kj])
    h2_ref[...] = jnp.maximum(acc2 + b2_ref[...], 0.0).reshape(oh2, ow2, bsz, oc2)

    # ---------------- conv3 + ReLU --------------------------------------------------
    kh3, kw3, ic3, oc3 = w3_ref.shape
    oh3 = (oh2 - kh3) // conv3_stride + 1
    ow3 = (ow2 - kw3) // conv3_stride + 1
    m3 = oh3 * ow3 * bsz
    acc3 = jnp.zeros((m3, oc3), jnp.float32)
    for ki in range(kh3):
        for kj in range(kw3):
            blk = window(h2_ref, ki, kj, oh3, ow3, conv3_stride)   # (oh3, ow3, B, ic3)
            acc3 = acc3 + mm(blk.reshape(m3, ic3), w3_ref[ki, kj])
    h3 = jnp.maximum(acc3 + b3_ref[...], 0.0)                      # rows = (oy, ox, b)

    # ---------------- fc1 + ReLU (NCHW flatten folded into fw1 at init) ------------
    n_pos, _, hidden = fw1_ref.shape
    accf = jnp.zeros((bsz, hidden), jnp.float32)
    for p in range(n_pos):
        accf = accf + mm(h3[p * bsz:(p + 1) * bsz, :], fw1_ref[p])
    hf = jnp.maximum(accf + fb1_ref[...], 0.0)
    # Dropout(p=0.0) is the identity -> omitted.

    # ---------------- fc2 (Q head kept in f32 for exact parity) --------------------
    q = jnp.dot(hf, fw2_ref[...], preferred_element_type=jnp.float32) + fb2_ref[...]
    q_ref[...] = q.astype(q_ref.dtype)
    # TODO(synk): activations_hook / get_activations_gradient capture a backward-pass
    # gradient; there is no forward-pass Pallas equivalent, so it is omitted.


# ------------------------------ forward wrapper -------------------------------
def dqn_forward(kparams, x):
    """Fused DQNSolver forward.  x: (B, C, H, W) float32 (PyTorch NCHW layout)."""
    B, C, H, W = x.shape
    kh1, kw1, s1 = 8, 8, 4
    s2, s3 = 2, 1
    # The in-kernel conv1 stride-block trick needs kernel == 2*stride and H, W
    # divisible by the stride (true for this network / input size).
    assert kh1 == 2 * s1 and kw1 == 2 * s1 and H % s1 == 0 and W % s1 == 0
    Hb, Wb = H // s1, W // s1
    oh1, ow1 = (H - kh1) // s1 + 1, (W - kw1) // s1 + 1
    oc1 = kparams["w1"].shape[-1]
    kh2, kw2, _, oc2 = kparams["w2"].shape
    oh2, ow2 = (oh1 - kh2) // s2 + 1, (ow1 - kw2) // s2 + 1
    n_actions = kparams["fw2"].shape[1]

    # Only per-forward XLA glue: block-reshape of the raw input into
    # (Hb, Wb, B, s1*s1*C).  Batch lands on the sublane axis, per-block features on
    # the lane axis; no data duplication (unlike im2col).
    x_r = x.reshape(B, C, Hb, s1, Wb, s1).transpose(2, 4, 0, 3, 5, 1)
    x_r = x_r.reshape(Hb, Wb, B, s1 * s1 * C)

    kernel = functools.partial(
        _dqn_fused_kernel, conv2_stride=s2, conv3_stride=s3, use_bf16=USE_BF16_MATMUL)

    return pl.pallas_call(
        kernel,
        out_shape=jax.ShapeDtypeStruct((B, n_actions), jnp.float32),
        # No grid / BlockSpecs: single invocation with every operand VMEM-resident.
        scratch_shapes=[
            pltpu.VMEM((oh1, ow1, B, oc1), jnp.float32),     # conv1 activations
            pltpu.VMEM((oh2, ow2, B, oc2), jnp.float32),     # conv2 activations
        ],
    )(x_r,
      kparams["w1"], kparams["b1"],
      kparams["w2"], kparams["b2"],
      kparams["w3"], kparams["b3"],
      kparams["fw1"], kparams["fb1"],
      kparams["fw2"], kparams["fb2"])


# ------------------------------ parameters ------------------------------------
def init_params(key, in_channels, n_actions, conv_out_size):
    """Deterministic synthetic parameters in PyTorch layout/shapes."""
    ks = jax.random.split(key, 10)

    def uni(k, shape, fan_in):
        bound = 1.0 / jnp.sqrt(jnp.float32(fan_in))
        return jax.random.uniform(k, shape, jnp.float32, -bound, bound)

    p = {}
    p["w1"] = uni(ks[0], (32, in_channels, 8, 8), in_channels * 64)   # Conv2d(C, 32, 8, 4)
    p["b1"] = uni(ks[1], (32,), in_channels * 64)
    p["w2"] = uni(ks[2], (64, 32, 4, 4), 32 * 16)                     # Conv2d(32, 64, 4, 2)
    p["b2"] = uni(ks[3], (64,), 32 * 16)
    p["w3"] = uni(ks[4], (64, 64, 3, 3), 64 * 9)                      # Conv2d(64, 64, 3, 1)
    p["b3"] = uni(ks[5], (64,), 64 * 9)
    p["fw1"] = uni(ks[6], (512, conv_out_size), conv_out_size)        # Linear(conv_out, 512)
    p["fb1"] = uni(ks[7], (512,), conv_out_size)
    p["fw2"] = uni(ks[8], (n_actions, 512), 512)                      # Linear(512, n_actions)
    p["fb2"] = uni(ks[9], (n_actions,), 512)
    return p


def prepare_params(p, conv1_stride=4):
    """One-time conversion of PyTorch-layout params into kernel layout.

    Runs once at init so the per-step forward path contains no weight transposes
    or reshapes.
    """
    s1 = conv1_stride
    oc1, ic1, kh1, kw1 = p["w1"].shape
    krb, kcb = kh1 // s1, kw1 // s1
    # Split conv1's 8x8 kernel offsets into (block_offset, within-block) pairs and
    # flatten (hin, win, c) into the feature axis -- the SAME ordering the wrapper's
    # input block-reshape produces, so the per-offset matmuls line up by construction.
    w1r = p["w1"].reshape(oc1, ic1, krb, s1, kcb, s1)
    w1r = w1r.transpose(2, 4, 3, 5, 1, 0).reshape(krb, kcb, s1 * s1 * ic1, oc1)

    oc3 = p["w3"].shape[0]
    hidden, k_fc = p["fw1"].shape
    n_pos = k_fc // oc3                       # number of conv3 spatial positions
    return {
        "w1": w1r,                                           # (2, 2, s1*s1*C, 32)
        "b1": p["b1"].reshape(1, -1),
        "w2": p["w2"].transpose(2, 3, 1, 0),                 # (kh, kw, IC, OC)
        "b2": p["b2"].reshape(1, -1),
        "w3": p["w3"].transpose(2, 3, 1, 0),                 # (kh, kw, IC, OC)
        "b3": p["b3"].reshape(1, -1),
        # PyTorch .view(B, -1) flattens the conv output in (C, H, W) order; fold that
        # permutation into the fc1 weight here.
        "fw1": p["fw1"].reshape(hidden, oc3, n_pos).transpose(2, 1, 0),  # (n_pos, OC3, 512)
        "fb1": p["fb1"].reshape(1, -1),
        "fw2": p["fw2"].T,                                   # (512, A)
        "fb2": p["fb2"].reshape(1, -1),
    }


# ------------------------------ reference -------------------------------------
def dqn_forward_ref(params, x):
    dn = ("NCHW", "OIHW", "NCHW")

    def conv(x, w, b, s):
        y = jax.lax.conv_general_dilated(
            x, w, window_strides=(s, s), padding="VALID", dimension_numbers=dn)
        return jax.nn.relu(y + b[None, :, None, None])

    h = conv(x, params["w1"], params["b1"], 4)
    h = conv(h, params["w2"], params["b2"], 2)
    h = conv(h, params["w3"], params["b3"], 1)
    flat = h.reshape(x.shape[0], -1)
    h = jax.nn.relu(flat @ params["fw1"].T + params["fb1"])
    return h @ params["fw2"].T + params["fb2"]


if __name__ == "__main__":
    # input_shape=(4, 44, 44), n_actions=6.
    # conv stack: 44 -(k8 s4)-> 10 -(k4 s2)-> 4 -(k3 s1)-> 2  =>  conv_out = 64*2*2.
    # Batch 8 fills the 8 TPU sublanes (feed the MXU a real batch).
    B, C, H, W = 8, 4, 44, 44
    n_actions = 6
    conv_out_size = 64 * 2 * 2

    key = jax.random.PRNGKey(0)
    kx, kp_key = jax.random.split(key)
    x = jax.random.normal(kx, (B, C, H, W), jnp.float32)
    params = init_params(kp_key, C, n_actions, conv_out_size)
    kparams = prepare_params(params)

    q = jax.block_until_ready(jax.jit(dqn_forward)(kparams, x))

    q_ref = dqn_forward_ref(params, x)
    assert q.shape == (B, n_actions)
    tol = 2e-2 if USE_BF16_MATMUL else 1e-4
    assert jnp.allclose(q, q_ref, atol=tol, rtol=tol), "mismatch vs reference"
    print("KERNEL_OK")
</pallas_src>

<mosaic_0001>
module attributes {stable_mosaic.version = 11 : i64} {
  func.func @_dqn_fused_kernel(%arg0: memref<11x11x8x64xf32, #tpu.memory_space<vmem>>, %arg1: memref<2x2x64x32xf32, #tpu.memory_space<vmem>>, %arg2: memref<1x32xf32, #tpu.memory_space<vmem>>, %arg3: memref<4x4x32x64xf32, #tpu.memory_space<vmem>>, %arg4: memref<1x64xf32, #tpu.memory_space<vmem>>, %arg5: memref<3x3x64x64xf32, #tpu.memory_space<vmem>>, %arg6: memref<1x64xf32, #tpu.memory_space<vmem>>, %arg7: memref<4x64x512xf32, #tpu.memory_space<vmem>>, %arg8: memref<1x512xf32, #tpu.memory_space<vmem>>, %arg9: memref<512x6xf32, #tpu.memory_space<vmem>>, %arg10: memref<1x6xf32, #tpu.memory_space<vmem>>, %arg11: memref<8x6xf32, #tpu.memory_space<vmem>>, %arg12: memref<10x10x8x32xf32, #tpu.memory_space<vmem>>, %arg13: memref<4x4x8x64xf32, #tpu.memory_space<vmem>>) attributes {dimension_semantics = [], scalar_prefetch = 0 : i64, scratch_operands = 2 : i64, tpu.core_type = #tpu.core_type<tc>} {
    %cst = arith.constant 0.000000e+00 : f32
    %0 = vector.broadcast %cst : f32 to vector<800x32xf32>
    %c0 = arith.constant 0 : index
    %c0_0 = arith.constant 0 : index
    %c0_1 = arith.constant 0 : index
    %c0_2 = arith.constant 0 : index
    %1 = vector.load %arg0[%c0, %c0_0, %c0_1, %c0_2] : memref<11x11x8x64xf32, #tpu.memory_space<vmem>>, vector<10x10x8x64xf32>
    %2 = vector.shape_cast %1 : vector<10x10x8x64xf32> to vector<800x64xf32>
    %c0_3 = arith.constant 0 : index
    %c0_4 = arith.constant 0 : index
    %c0_5 = arith.constant 0 : index
    %c0_6 = arith.constant 0 : index
    %3 = vector.load %arg1[%c0_3, %c0_4, %c0_5, %c0_6] : memref<2x2x64x32xf32, #tpu.memory_space<vmem>>, vector<1x1x64x32xf32>
    %4 = vector.shape_cast %3 : vector<1x1x64x32xf32> to vector<64x32xf32>
    %cst_7 = arith.constant dense<0.000000e+00> : vector<800x32xf32>
    %5 = tpu.matmul %2, %4, %cst_7 {dimension_numbers = #tpu.dot_dimension_numbers<[1], [0], [0], [1], [0, 0, 1, 1], [], []>} : vector<800x64xf32>, vector<64x32xf32>, vector<800x32xf32> -> vector<800x32xf32>
    %6 = arith.addf %0, %5 : vector<800x32xf32>
    %c0_8 = arith.constant 0 : index
    %c1 = arith.constant 1 : index
    %c0_9 = arith.constant 0 : index
    %c0_10 = arith.constant 0 : index
    %7 = vector.load %arg0[%c0_8, %c1, %c0_9, %c0_10] : memref<11x11x8x64xf32, #tpu.memory_space<vmem>>, vector<10x10x8x64xf32>
    %8 = vector.shape_cast %7 : vector<10x10x8x64xf32> to vector<800x64xf32>
    %c0_11 = arith.constant 0 : index
    %c1_12 = arith.constant 1 : index
    %c0_13 = arith.constant 0 : index
    %c0_14 = arith.constant 0 : index
    %9 = vector.load %arg1[%c0_11, %c1_12, %c0_13, %c0_14] : memref<2x2x64x32xf32, #tpu.memory_space<vmem>>, vector<1x1x64x32xf32>
    %10 = vector.shape_cast %9 : vector<1x1x64x32xf32> to vector<64x32xf32>
    %cst_15 = arith.constant dense<0.000000e+00> : vector<800x32xf32>
    %11 = tpu.matmul %8, %10, %cst_15 {dimension_numbers = #tpu.dot_dimension_numbers<[1], [0], [0], [1], [0, 0, 1, 1], [], []>} : vector<800x64xf32>, vector<64x32xf32>, vector<800x32xf32> -> vector<800x32xf32>
    %12 = arith.addf %6, %11 : vector<800x32xf32>
    %c1_16 = arith.constant 1 : index
    %c0_17 = arith.constant 0 : index
    %c0_18 = arith.constant 0 : index
    %c0_19 = arith.constant 0 : index
    %13 = vector.load %arg0[%c1_16, %c0_17, %c0_18, %c0_19] : memref<11x11x8x64xf32, #tpu.memory_space<vmem>>, vector<10x10x8x64xf32>
    %14 = vector.shape_cast %13 : vector<10x10x8x64xf32> to vector<800x64xf32>
    %c1_20 = arith.constant 1 : index
    %c0_21 = arith.constant 0 : index
    %c0_22 = arith.constant 0 : index
    %c0_23 = arith.constant 0 : index
    %15 = vector.load %arg1[%c1_20, %c0_21, %c0_22, %c0_23] : memref<2x2x64x32xf32, #tpu.memory_space<vmem>>, vector<1x1x64x32xf32>
    %16 = vector.shape_cast %15 : vector<1x1x64x32xf32> to vector<64x32xf32>
    %cst_24 = arith.constant dense<0.000000e+00> : vector<800x32xf32>
    %17 = tpu.matmul %14, %16, %cst_24 {dimension_numbers = #tpu.dot_dimension_numbers<[1], [0], [0], [1], [0, 0, 1, 1], [], []>} : vector<800x64xf32>, vector<64x32xf32>, vector<800x32xf32> -> vector<800x32xf32>
    %18 = arith.addf %12, %17 : vector<800x32xf32>
    %c1_25 = arith.constant 1 : index
    %c1_26 = arith.constant 1 : index
    %c0_27 = arith.constant 0 : index
    %c0_28 = arith.constant 0 : index
    %19 = vector.load %arg0[%c1_25, %c1_26, %c0_27, %c0_28] : memref<11x11x8x64xf32, #tpu.memory_space<vmem>>, vector<10x10x8x64xf32>
    %20 = vector.shape_cast %19 : vector<10x10x8x64xf32> to vector<800x64xf32>
    %c1_29 = arith.constant 1 : index
    %c1_30 = arith.constant 1 : index
    %c0_31 = arith.constant 0 : index
    %c0_32 = arith.constant 0 : index
    %21 = vector.load %arg1[%c1_29, %c1_30, %c0_31, %c0_32] : memref<2x2x64x32xf32, #tpu.memory_space<vmem>>, vector<1x1x64x32xf32>
    %22 = vector.shape_cast %21 : vector<1x1x64x32xf32> to vector<64x32xf32>
    %cst_33 = arith.constant dense<0.000000e+00> : vector<800x32xf32>
    %23 = tpu.matmul %20, %22, %cst_33 {dimension_numbers = #tpu.dot_dimension_numbers<[1], [0], [0], [1], [0, 0, 1, 1], [], []>} : vector<800x64xf32>, vector<64x32xf32>, vector<800x32xf32> -> vector<800x32xf32>
    %24 = arith.addf %18, %23 : vector<800x32xf32>
    %c0_34 = arith.constant 0 : index
    %c0_35 = arith.constant 0 : index
    %25 = vector.load %arg2[%c0_34, %c0_35] : memref<1x32xf32, #tpu.memory_space<vmem>>, vector<1x32xf32>
    %26 = vector.broadcast %25 : vector<1x32xf32> to vector<800x32xf32>
    %27 = arith.addf %24, %26 : vector<800x32xf32>
    %cst_36 = arith.constant 0.000000e+00 : f32
    %28 = vector.broadcast %cst_36 : f32 to vector<800x32xf32>
    %29 = arith.maximumf %27, %28 : vector<800x32xf32>
    %30 = vector.shape_cast %29 : vector<800x32xf32> to vector<10x10x8x32xf32>
    %c0_37 = arith.constant 0 : index
    %c0_38 = arith.constant 0 : index
    %c0_39 = arith.constant 0 : index
    %c0_40 = arith.constant 0 : index
    %31 = vector.load %arg12[%c0_37, %c0_38, %c0_39, %c0_40] : memref<10x10x8x32xf32, #tpu.memory_space<vmem>>, vector<10x10x8x32xf32>
    tpu.vector_store %arg12[%c0_37, %c0_38, %c0_39, %c0_40], %30 {strides = array<i32>} : memref<10x10x8x32xf32, #tpu.memory_space<vmem>>, vector<10x10x8x32xf32>,
    %cst_41 = arith.constant 0.000000e+00 : f32
    %32 = vector.broadcast %cst_41 : f32 to vector<128x64xf32>
    %c0_42 = arith.constant 0 : index
    %c0_43 = arith.constant 0 : index
    %c0_44 = arith.constant 0 : index
    %c0_45 = arith.constant 0 : index
    %33 = tpu.strided_load %arg12[%c0_42, %c0_43, %c0_44, %c0_45] {strides = array<i32: 2, 2, 1, 1>} : memref<10x10x8x32xf32, #tpu.memory_space<vmem>>, vector<4x4x8x32xf32>
    %34 = vector.shape_cast %33 : vector<4x4x8x32xf32> to vector<128x32xf32>
    %c0_46 = arith.constant 0 : index
    %c0_47 = arith.constant 0 : index
    %c0_48 = arith.constant 0 : index
    %c0_49 = arith.constant 0 : index
    %35 = vector.load %arg3[%c0_46, %c0_47, %c0_48, %c0_49] : memref<4x4x32x64xf32, #tpu.memory_space<vmem>>, vector<1x1x32x64xf32>
    %36 = vector.shape_cast %35 : vector<1x1x32x64xf32> to vector<32x64xf32>
    %cst_50 = arith.constant dense<0.000000e+00> : vector<128x64xf32>
    %37 = tpu.matmul %34, %36, %cst_50 {dimension_numbers = #tpu.dot_dimension_numbers<[1], [0], [0], [1], [0, 0, 1, 1], [], []>} : vector<128x32xf32>, vector<32x64xf32>, vector<128x64xf32> -> vector<128x64xf32>
    %38 = arith.addf %32, %37 : vector<128x64xf32>
    %c0_51 = arith.constant 0 : index
    %c1_52 = arith.constant 1 : index
    %c0_53 = arith.constant 0 : index
    %c0_54 = arith.constant 0 : index
    %39 = tpu.strided_load %arg12[%c0_51, %c1_52, %c0_53, %c0_54] {strides = array<i32: 2, 2, 1, 1>} : memref<10x10x8x32xf32, #tpu.memory_space<vmem>>, vector<4x4x8x32xf32>
    %40 = vector.shape_cast %39 : vector<4x4x8x32xf32> to vector<128x32xf32>
    %c0_55 = arith.constant 0 : index
    %c1_56 = arith.constant 1 : index
    %c0_57 = arith.constant 0 : index
    %c0_58 = arith.constant 0 : index
    %41 = vector.load %arg3[%c0_55, %c1_56, %c0_57, %c0_58] : memref<4x4x32x64xf32, #tpu.memory_space<vmem>>, vector<1x1x32x64xf32>
    %42 = vector.shape_cast %41 : vector<1x1x32x64xf32> to vector<32x64xf32>
    %cst_59 = arith.constant dense<0.000000e+00> : vector<128x64xf32>
    %43 = tpu.matmul %40, %42, %cst_59 {dimension_numbers = #tpu.dot_dimension_numbers<[1], [0], [0], [1], [0, 0, 1, 1], [], []>} : vector<128x32xf32>, vector<32x64xf32>, vector<128x64xf32> -> vector<128x64xf32>
    %44 = arith.addf %38, %43 : vector<128x64xf32>
    %c0_60 = arith.constant 0 : index
    %c2 = arith.constant 2 : index
    %c0_61 = arith.constant 0 : index
    %c0_62 = arith.constant 0 : index
    %45 = tpu.strided_load %arg12[%c0_60, %c2, %c0_61, %c0_62] {strides = array<i32: 2, 2, 1, 1>} : memref<10x10x8x32xf32, #tpu.memory_space<vmem>>, vector<4x4x8x32xf32>
    %46 = vector.shape_cast %45 : vector<4x4x8x32xf32> to vector<128x32xf32>
    %c0_63 = arith.constant 0 : index
    %c2_64 = arith.constant 2 : index
    %c0_65 = arith.constant 0 : index
    %c0_66 = arith.constant 0 : index
    %47 = vector.load %arg3[%c0_63, %c2_64, %c0_65, %c0_66] : memref<4x4x32x64xf32, #tpu.memory_space<vmem>>, vector<1x1x32x64xf32>
    %48 = vector.shape_cast %47 : vector<1x1x32x64xf32> to vector<32x64xf32>
    %cst_67 = arith.constant dense<0.000000e+00> : vector<128x64xf32>
    %49 = tpu.matmul %46, %48, %cst_67 {dimension_numbers = #tpu.dot_dimension_numbers<[1], [0], [0], [1], [0, 0, 1, 1], [], []>} : vector<128x32xf32>, vector<32x64xf32>, vector<128x64xf32> -> vector<128x64xf32>
    %50 = arith.addf %44, %49 : vector<128x64xf32>
    %c0_68 = arith.constant 0 : index
    %c3 = arith.constant 3 : index
    %c0_69 = arith.constant 0 : index
    %c0_70 = arith.constant 0 : index
    %51 = tpu.strided_load %arg12[%c0_68, %c3, %c0_69, %c0_70] {strides = array<i32: 2, 2, 1, 1>} : memref<10x10x8x32xf32, #tpu.memory_space<vmem>>, vector<4x4x8x32xf32>
    %52 = vector.shape_cast %51 : vector<4x4x8x32xf32> to vector<128x32xf32>
    %c0_71 = arith.constant 0 : index
    %c3_72 = arith.constant 3 : index
    %c0_73 = arith.constant 0 : index
    %c0_74 = arith.constant 0 : index
    %53 = vector.load %arg3[%c0_71, %c3_72, %c0_73, %c0_74] : memref<4x4x32x64xf32, #tpu.memory_space<vmem>>, vector<1x1x32x64xf32>
    %54 = vector.shape_cast %53 : vector<1x1x32x64xf32> to vector<32x64xf32>
    %cst_75 = arith.constant dense<0.000000e+00> : vector<128x64xf32>
    %55 = tpu.matmul %52, %54, %cst_75 {dimension_numbers = #tpu.dot_dimension_numbers<[1], [0], [0], [1], [0, 0, 1, 1], [], []>} : vector<128x32xf32>, vector<32x64xf32>, vector<128x64xf32> -> vector<128x64xf32>
    %56 = arith.addf %50, %55 : vector<128x64xf32>
    %c1_76 = arith.constant 1 : index
    %c0_77 = arith.constant 0 : index
    %c0_78 = arith.constant 0 : index
    %c0_79 = arith.constant 0 : index
    %57 = tpu.strided_load %arg12[%c1_76, %c0_77, %c0_78, %c0_79] {strides = array<i32: 2, 2, 1, 1>} : memref<10x10x8x32xf32, #tpu.memory_space<vmem>>, vector<4x4x8x32xf32>
    %58 = vector.shape_cast %57 : vector<4x4x8x32xf32> to vector<128x32xf32>
    %c1_80 = arith.constant 1 : index
    %c0_81 = arith.constant 0 : index
    %c0_82 = arith.constant 0 : index
    %c0_83 = arith.constant 0 : index
    %59 = vector.load %arg3[%c1_80, %c0_81, %c0_82, %c0_83] : memref<4x4x32x64xf32, #tpu.memory_space<vmem>>, vector<1x1x32x64xf32>
    %60 = vector.shape_cast %59 : vector<1x1x32x64xf32> to vector<32x64xf32>
    %cst_84 = arith.constant dense<0.000000e+00> : vector<128x64xf32>
    %61 = tpu.matmul %58, %60, %cst_84 {dimension_numbers = #tpu.dot_dimension_numbers<[1], [0], [0], [1], [0, 0, 1, 1], [], []>} : vector<128x32xf32>, vector<32x64xf32>, vector<128x64xf32> -> vector<128x64xf32>
    %62 = arith.addf %56, %61 : vector<128x64xf32>
    %c1_85 = arith.constant 1 : index
    %c1_86 = arith.constant 1 : index
    %c0_87 = arith.constant 0 : index
    %c0_88 = arith.constant 0 : index
    %63 = tpu.strided_load %arg12[%c1_85, %c1_86, %c0_87, %c0_88] {strides = array<i32: 2, 2, 1, 1>} : memref<10x10x8x32xf32, #tpu.memory_space<vmem>>, vector<4x4x8x32xf32>
    %64 = vector.shape_cast %63 : vector<4x4x8x32xf32> to vector<128x32xf32>
    %c1_89 = arith.constant 1 : index
    %c1_90 = arith.constant 1 : index
    %c0_91 = arith.constant 0 : index
    %c0_92 = arith.constant 0 : index
    %65 = vector.load %arg3[%c1_89, %c1_90, %c0_91, %c0_92] : memref<4x4x32x64xf32, #tpu.memory_space<vmem>>, vector<1x1x32x64xf32>
    %66 = vector.shape_cast %65 : vector<1x1x32x64xf32> to vector<32x64xf32>
    %cst_93 = arith.constant dense<0.000000e+00> : vector<128x64xf32>
    %67 = tpu.matmul %64, %66, %cst_93 {dimension_numbers = #tpu.dot_dimension_numbers<[1], [0], [0], [1], [0, 0, 1, 1], [], []>} : vector<128x32xf32>, vector<32x64xf32>, vector<128x64xf32> -> vector<128x64xf32>
    %68 = arith.addf %62, %67 : vector<128x64xf32>
    %c1_94 = arith.constant 1 : index
    %c2_95 = arith.constant 2 : index
    %c0_96 = arith.constant 0 : index
    %c0_97 = arith.constant 0 : index
    %69 = tpu.strided_load %arg12[%c1_94, %c2_95, %c0_96, %c0_97] {strides = array<i32: 2, 2, 1, 1>} : memref<10x10x8x32xf32, #tpu.memory_space<vmem>>, vector<4x4x8x32xf32>
    %70 = vector.shape_cast %69 : vector<4x4x8x32xf32> to vector<128x32xf32>
    %c1_98 = arith.constant 1 : index
    %c2_99 = arith.constant 2 : index
    %c0_100 = arith.constant 0 : index
    %c0_101 = arith.constant 0 : index
    %71 = vector.load %arg3[%c1_98, %c2_99, %c0_100, %c0_101] : memref<4x4x32x64xf32, #tpu.memory_space<vmem>>, vector<1x1x32x64xf32>
    %72 = vector.shape_cast %71 : vector<1x1x32x64xf32> to vector<32x64xf32>
    %cst_102 = arith.constant dense<0.000000e+00> : vector<128x64xf32>
    %73 = tpu.matmul %70, %72, %cst_102 {dimension_numbers = #tpu.dot_dimension_numbers<[1], [0], [0], [1], [0, 0, 1, 1], [], []>} : vector<128x32xf32>, vector<32x64xf32>, vector<128x64xf32> -> vector<128x64xf32>
    %74 = arith.addf %68, %73 : vector<128x64xf32>
    %c1_103 = arith.constant 1 : index
    %c3_104 = arith.constant 3 : index
    %c0_105 = arith.constant 0 : index
    %c0_106 = arith.constant 0 : index
    %75 = tpu.strided_load %arg12[%c1_103, %c3_104, %c0_105, %c0_106] {strides = array<i32: 2, 2, 1, 1>} : memref<10x10x8x32xf32, #tpu.memory_space<vmem>>, vector<4x4x8x32xf32>
    %76 = vector.shape_cast %75 : vector<4x4x8x32xf32> to vector<128x32xf32>
    %c1_107 = arith.constant 1 : index
    %c3_108 = arith.constant 3 : index
    %c0_109 = arith.constant 0 : index
    %c0_110 = arith.constant 0 : index
    %77 = vector.load %arg3[%c1_107, %c3_108, %c0_109, %c0_110] : memref<4x4x32x64xf32, #tpu.memory_space<vmem>>, vector<1x1x32x64xf32>
    %78 = vector.shape_cast %77 : vector<1x1x32x64xf32> to vector<32x64xf32>
    %cst_111 = arith.constant dense<0.000000e+00> : vector<128x64xf32>
    %79 = tpu.matmul %76, %78, %cst_111 {dimension_numbers = #tpu.dot_dimension_numbers<[1], [0], [0], [1], [0, 0, 1, 1], [], []>} : vector<128x32xf32>, vector<32x64xf32>, vector<128x64xf32> -> vector<128x64xf32>
    %80 = arith.addf %74, %79 : vector<128x64xf32>
    %c2_112 = arith.constant 2 : index
    %c0_113 = arith.constant 0 : index
    %c0_114 = arith.constant 0 : index
    %c0_115 = arith.constant 0 : index
    %81 = tpu.strided_load %arg12[%c2_112, %c0_113, %c0_114, %c0_115] {strides = array<i32: 2, 2, 1, 1>} : memref<10x10x8x32xf32, #tpu.memory_space<vmem>>, vector<4x4x8x32xf32>
    %82 = vector.shape_cast %81 : vector<4x4x8x32xf32> to vector<128x32xf32>
    %c2_116 = arith.constant 2 : index
    %c0_117 = arith.constant 0 : index
    %c0_118 = arith.constant 0 : index
    %c0_119 = arith.constant 0 : index
    %83 = vector.load %arg3[%c2_116, %c0_117, %c0_118, %c0_119] : memref<4x4x32x64xf32, #tpu.memory_space<vmem>>, vector<1x1x32x64xf32>
    %84 = vector.shape_cast %83 : vector<1x1x32x64xf32> to vector<32x64xf32>
    %cst_120 = arith.constant dense<0.000000e+00> : vector<128x64xf32>
    %85 = tpu.matmul %82, %84, %cst_120 {dimension_numbers = #tpu.dot_dimension_numbers<[1], [0], [0], [1], [0, 0, 1, 1], [], []>} : vector<128x32xf32>, vector<32x64xf32>, vector<128x64xf32> -> vector<128x64xf32>
    %86 = arith.addf %80, %85 : vector<128x64xf32>
    %c2_121 = arith.constant 2 : index
    %c1_122 = arith.constant 1 : index
    %c0_123 = arith.constant 0 : index
    %c0_124 = arith.constant 0 : index
    %87 = tpu.strided_load %arg12[%c2_121, %c1_122, %c0_123, %c0_124] {strides = array<i32: 2, 2, 1, 1>} : memref<10x10x8x32xf32, #tpu.memory_space<vmem>>, vector<4x4x8x32xf32>
    %88 = vector.shape_cast %87 : vector<4x4x8x32xf32> to vector<128x32xf32>
    %c2_125 = arith.constant 2 : index
    %c1_126 = arith.constant 1 : index
    %c0_127 = arith.constant 0 : index
    %c0_128 = arith.constant 0 : index
    %89 = vector.load %arg3[%c2_125, %c1_126, %c0_127, %c0_128] : memref<4x4x32x64xf32, #tpu.memory_space<vmem>>, vector<1x1x32x64xf32>
    %90 = vector.shape_cast %89 : vector<1x1x32x64xf32> to vector<32x64xf32>
    %cst_129 = arith.constant dense<0.000000e+00> : vector<128x64xf32>
    %91 = tpu.matmul %88, %90, %cst_129 {dimension_numbers = #tpu.dot_dimension_numbers<[1], [0], [0], [1], [0, 0, 1, 1], [], []>} : vector<128x32xf32>, vector<32x64xf32>, vector<128x64xf32> -> vector<128x64xf32>
    %92 = arith.addf %86, %91 : vector<128x64xf32>
    %c2_130 = arith.constant 2 : index
    %c2_131 = arith.constant 2 : index
    %c0_132 = arith.constant 0 : index
    %c0_133 = arith.constant 0 : index
    %93 = tpu.strided_load %arg12[%c2_130, %c2_131, %c0_132, %c0_133] {strides = array<i32: 2, 2, 1, 1>} : memref<10x10x8x32xf32, #tpu.memory_space<vmem>>, vector<4x4x8x32xf32>
    %94 = vector.shape_cast %93 : vector<4x4x8x32xf32> to vector<128x32xf32>
    %c2_134 = arith.constant 2 : index
    %c2_135 = arith.constant 2 : index
    %c0_136 = arith.constant 0 : index
    %c0_137 = arith.constant 0 : index
    %95 = vector.load %arg3[%c2_134, %c2_135, %c0_136, %c0_137] : memref<4x4x32x64xf32, #tpu.memory_space<vmem>>, vector<1x1x32x64xf32>
    %96 = vector.shape_cast %95 : vector<1x1x32x64xf32> to vector<32x64xf32>
    %cst_138 = arith.constant dense<0.000000e+00> : vector<128x64xf32>
    %97 = tpu.matmul %94, %96, %cst_138 {dimension_numbers = #tpu.dot_dimension_numbers<[1], [0], [0], [1], [0, 0, 1, 1], [], []>} : vector<128x32xf32>, vector<32x64xf32>, vector<128x64xf32> -> vector<128x64xf32>
    %98 = arith.addf %92, %97 : vector<128x64xf32>
    %c2_139 = arith.constant 2 : index
    %c3_140 = arith.constant 3 : index
    %c0_141 = arith.constant 0 : index
    %c0_142 = arith.constant 0 : index
    %99 = tpu.strided_load %arg12[%c2_139, %c3_140, %c0_141, %c0_142] {strides = array<i32: 2, 2, 1, 1>} : memref<10x10x8x32xf32, #tpu.memory_space<vmem>>, vector<4x4x8x32xf32>
    %100 = vector.shape_cast %99 : vector<4x4x8x32xf32> to vector<128x32xf32>
    %c2_143 = arith.constant 2 : index
    %c3_144 = arith.constant 3 : index
    %c0_145 = arith.constant 0 : index
    %c0_146 = arith.constant 0 : index
    %101 = vector.load %arg3[%c2_143, %c3_144, %c0_145, %c0_146] : memref<4x4x32x64xf32, #tpu.memory_space<vmem>>, vector<1x1x32x64xf32>
    %102 = vector.shape_cast %101 : vector<1x1x32x64xf32> to vector<32x64xf32>
    %cst_147 = arith.constant dense<0.000000e+00> : vector<128x64xf32>
    %103 = tpu.matmul %100, %102, %cst_147 {dimension_numbers = #tpu.dot_dimension_numbers<[1], [0], [0], [1], [0, 0, 1, 1], [], []>} : vector<128x32xf32>, vector<32x64xf32>, vector<128x64xf32> -> vector<128x64xf32>
    %104 = arith.addf %98, %103 : vector<128x64xf32>
    %c3_148 = arith.constant 3 : index
    %c0_149 = arith.constant 0 : index
    %c0_150 = arith.constant 0 : index
    %c0_151 = arith.constant 0 : index
    %105 = tpu.strided_load %arg12[%c3_148, %c0_149, %c0_150, %c0_151] {strides = array<i32: 2, 2, 1, 1>} : memref<10x10x8x32xf32, #tpu.memory_space<vmem>>, vector<4x4x8x32xf32>
    %106 = vector.shape_cast %105 : vector<4x4x8x32xf32> to vector<128x32xf32>
    %c3_152 = arith.constant 3 : index
    %c0_153 = arith.constant 0 : index
    %c0_154 = arith.constant 0 : index
    %c0_155 = arith.constant 0 : index
    %107 = vector.load %arg3[%c3_152, %c0_153, %c0_154, %c0_155] : memref<4x4x32x64xf32, #tpu.memory_space<vmem>>, vector<1x1x32x64xf32>
    %108 = vector.shape_cast %107 : vector<1x1x32x64xf32> to vector<32x64xf32>
    %cst_156 = arith.constant dense<0.000000e+00> : vector<128x64xf32>
    %109 = tpu.matmul %106, %108, %cst_156 {dimension_numbers = #tpu.dot_dimension_numbers<[1], [0], [0], [1], [0, 0, 1, 1], [], []>} : vector<128x32xf32>, vector<32x64xf32>, vector<128x64xf32> -> vector<128x64xf32>
    %110 = arith.addf %104, %109 : vector<128x64xf32>
    %c3_157 = arith.constant 3 : index
    %c1_158 = arith.constant 1 : index
    %c0_159 = arith.constant 0 : index
    %c0_160 = arith.constant 0 : index
    %111 = tpu.strided_load %arg12[%c3_157, %c1_158, %c0_159, %c0_160] {strides = array<i32: 2, 2, 1, 1>} : memref<10x10x8x32xf32, #tpu.memory_space<vmem>>, vector<4x4x8x32xf32>
    %112 = vector.shape_cast %111 : vector<4x4x8x32xf32> to vector<128x32xf32>
    %c3_161 = arith.constant 3 : index
    %c1_162 = arith.constant 1 : index
    %c0_163 = arith.constant 0 : index
    %c0_164 = arith.constant 0 : index
    %113 = vector.load %arg3[%c3_161, %c1_162, %c0_163, %c0_164] : memref<4x4x32x64xf32, #tpu.memory_space<vmem>>, vector<1x1x32x64xf32>
    %114 = vector.shape_cast %113 : vector<1x1x32x64xf32> to vector<32x64xf32>
    %cst_165 = arith.constant dense<0.000000e+00> : vector<128x64xf32>
    %115 = tpu.matmul %112, %114, %cst_165 {dimension_numbers = #tpu.dot_dimension_numbers<[1], [0], [0], [1], [0, 0, 1, 1], [], []>} : vector<128x32xf32>, vector<32x64xf32>, vector<128x64xf32> -> vector<128x64xf32>
    %116 = arith.addf %110, %115 : vector<128x64xf32>
    %c3_166 = arith.constant 3 : index
    %c2_167 = arith.constant 2 : index
    %c0_168 = arith.constant 0 : index
    %c0_169 = arith.constant 0 : index
    %117 = tpu.strided_load %arg12[%c3_166, %c2_167, %c0_168, %c0_169] {strides = array<i32: 2, 2, 1, 1>} : memref<10x10x8x32xf32, #tpu.memory_space<vmem>>, vector<4x4x8x32xf32>
    %118 = vector.shape_cast %117 : vector<4x4x8x32xf32> to vector<128x32xf32>
    %c3_170 = arith.constant 3 : index
    %c2_171 = arith.constant 2 : index
    %c0_172 = arith.constant 0 : index
    %c0_173 = arith.constant 0 : index
    %119 = vector.load %arg3[%c3_170, %c2_171, %c0_172, %c0_173] : memref<4x4x32x64xf32, #tpu.memory_space<vmem>>, vector<1x1x32x64xf32>
    %120 = vector.shape_cast %119 : vector<1x1x32x64xf32> to vector<32x64xf32>
    %cst_174 = arith.constant dense<0.000000e+00> : vector<128x64xf32>
    %121 = tpu.matmul %118, %120, %cst_174 {dimension_numbers = #tpu.dot_dimension_numbers<[1], [0], [0], [1], [0, 0, 1, 1], [], []>} : vector<128x32xf32>, vector<32x64xf32>, vector<128x64xf32> -> vector<128x64xf32>
    %122 = arith.addf %116, %121 : vector<128x64xf32>
    %c3_175 = arith.constant 3 : index
    %c3_176 = arith.constant 3 : index
    %c0_177 = arith.constant 0 : index
    %c0_178 = arith.constant 0 : index
    %123 = tpu.strided_load %arg12[%c3_175, %c3_176, %c0_177, %c0_178] {strides = array<i32: 2, 2, 1, 1>} : memref<10x10x8x32xf32, #tpu.memory_space<vmem>>, vector<4x4x8x32xf32>
    %124 = vector.shape_cast %123 : vector<4x4x8x32xf32> to vector<128x32xf32>
    %c3_179 = arith.constant 3 : index
    %c3_180 = arith.constant 3 : index
    %c0_181 = arith.constant 0 : index
    %c0_182 = arith.constant 0 : index
    %125 = vector.load %arg3[%c3_179, %c3_180, %c0_181, %c0_182] : memref<4x4x32x64xf32, #tpu.memory_space<vmem>>, vector<1x1x32x64xf32>
    %126 = vector.shape_cast %125 : vector<1x1x32x64xf32> to vector<32x64xf32>
    %cst_183 = arith.constant dense<0.000000e+00> : vector<128x64xf32>
    %127 = tpu.matmul %124, %126, %cst_183 {dimension_numbers = #tpu.dot_dimension_numbers<[1], [0], [0], [1], [0, 0, 1, 1], [], []>} : vector<128x32xf32>, vector<32x64xf32>, vector<128x64xf32> -> vector<128x64xf32>
    %128 = arith.addf %122, %127 : vector<128x64xf32>
    %c0_184 = arith.constant 0 : index
    %c0_185 = arith.constant 0 : index
    %129 = vector.load %arg4[%c0_184, %c0_185] : memref<1x64xf32, #tpu.memory_space<vmem>>, vector<1x64xf32>
    %130 = vector.broadcast %129 : vector<1x64xf32> to vector<128x64xf32>
    %131 = arith.addf %128, %130 : vector<128x64xf32>
    %cst_186 = arith.constant 0.000000e+00 : f32
    %132 = vector.broadcast %cst_186 : f32 to vector<128x64xf32>
    %133 = arith.maximumf %131, %132 : vector<128x64xf32>
    %134 = vector.shape_cast %133 : vector<128x64xf32> to vector<4x4x8x64xf32>
    %c0_187 = arith.constant 0 : index
    %c0_188 = arith.constant 0 : index
    %c0_189 = arith.constant 0 : index
    %c0_190 = arith.constant 0 : index
    %135 = vector.load %arg13[%c0_187, %c0_188, %c0_189, %c0_190] : memref<4x4x8x64xf32, #tpu.memory_space<vmem>>, vector<4x4x8x64xf32>
    tpu.vector_store %arg13[%c0_187, %c0_188, %c0_189, %c0_190], %134 {strides = array<i32>} : memref<4x4x8x64xf32, #tpu.memory_space<vmem>>, vector<4x4x8x64xf32>,
    %cst_191 = arith.constant 0.000000e+00 : f32
    %136 = vector.broadcast %cst_191 : f32 to vector<32x64xf32>
    %c0_192 = arith.constant 0 : index
    %c0_193 = arith.constant 0 : index
    %c0_194 = arith.constant 0 : index
    %c0_195 = arith.constant 0 : index
    %137 = vector.load %arg13[%c0_192, %c0_193, %c0_194, %c0_195] : memref<4x4x8x64xf32, #tpu.memory_space<vmem>>, vector<2x2x8x64xf32>
    %138 = vector.shape_cast %137 : vector<2x2x8x64xf32> to vector<32x64xf32>
    %c0_196 = arith.constant 0 : index
    %c0_197 = arith.constant 0 : index
    %c0_198 = arith.constant 0 : index
    %c0_199 = arith.constant 0 : index
    %139 = vector.load %arg5[%c0_196, %c0_197, %c0_198, %c0_199] : memref<3x3x64x64xf32, #tpu.memory_space<vmem>>, vector<1x1x64x64xf32>
    %140 = vector.shape_cast %139 : vector<1x1x64x64xf32> to vector<64x64xf32>
    %cst_200 = arith.constant dense<0.000000e+00> : vector<32x64xf32>
    %141 = tpu.matmul %138, %140, %cst_200 {dimension_numbers = #tpu.dot_dimension_numbers<[1], [0], [0], [1], [0, 0, 1, 1], [], []>} : vector<32x64xf32>, vector<64x64xf32>, vector<32x64xf32> -> vector<32x64xf32>
    %142 = arith.addf %136, %141 : vector<32x64xf32>
    %c0_201 = arith.constant 0 : index
    %c1_202 = arith.constant 1 : index
    %c0_203 = arith.constant 0 : index
    %c0_204 = arith.constant 0 : index
    %143 = vector.load %arg13[%c0_201, %c1_202, %c0_203, %c0_204] : memref<4x4x8x64xf32, #tpu.memory_space<vmem>>, vector<2x2x8x64xf32>
    %144 = vector.shape_cast %143 : vector<2x2x8x64xf32> to vector<32x64xf32>
    %c0_205 = arith.constant 0 : index
    %c1_206 = arith.constant 1 : index
    %c0_207 = arith.constant 0 : index
    %c0_208 = arith.constant 0 : index
    %145 = vector.load %arg5[%c0_205, %c1_206, %c0_207, %c0_208] : memref<3x3x64x64xf32, #tpu.memory_space<vmem>>, vector<1x1x64x64xf32>
    %146 = vector.shape_cast %145 : vector<1x1x64x64xf32> to vector<64x64xf32>
    %cst_209 = arith.constant dense<0.000000e+00> : vector<32x64xf32>
    %147 = tpu.matmul %144, %146, %cst_209 {dimension_numbers = #tpu.dot_dimension_numbers<[1], [0], [0], [1], [0, 0, 1, 1], [], []>} : vector<32x64xf32>, vector<64x64xf32>, vector<32x64xf32> -> vector<32x64xf32>
    %148 = arith.addf %142, %147 : vector<32x64xf32>
    %c0_210 = arith.constant 0 : index
    %c2_211 = arith.constant 2 : index
    %c0_212 = arith.constant 0 : index
    %c0_213 = arith.constant 0 : index
    %149 = vector.load %arg13[%c0_210, %c2_211, %c0_212, %c0_213] : memref<4x4x8x64xf32, #tpu.memory_space<vmem>>, vector<2x2x8x64xf32>
    %150 = vector.shape_cast %149 : vector<2x2x8x64xf32> to vector<32x64xf32>
    %c0_214 = arith.constant 0 : index
    %c2_215 = arith.constant 2 : index
    %c0_216 = arith.constant 0 : index
    %c0_217 = arith.constant 0 : index
    %151 = vector.load %arg5[%c0_214, %c2_215, %c0_216, %c0_217] : memref<3x3x64x64xf32, #tpu.memory_space<vmem>>, vector<1x1x64x64xf32>
    %152 = vector.shape_cast %151 : vector<1x1x64x64xf32> to vector<64x64xf32>
    %cst_218 = arith.constant dense<0.000000e+00> : vector<32x64xf32>
    %153 = tpu.matmul %150, %152, %cst_218 {dimension_numbers = #tpu.dot_dimension_numbers<[1], [0], [0], [1], [0, 0, 1, 1], [], []>} : vector<32x64xf32>, vector<64x64xf32>, vector<32x64xf32> -> vector<32x64xf32>
    %154 = arith.addf %148, %153 : vector<32x64xf32>
    %c1_219 = arith.constant 1 : index
    %c0_220 = arith.constant 0 : index
    %c0_221 = arith.constant 0 : index
    %c0_222 = arith.constant 0 : index
    %155 = vector.load %arg13[%c1_219, %c0_220, %c0_221, %c0_222] : memref<4x4x8x64xf32, #tpu.memory_space<vmem>>, vector<2x2x8x64xf32>
    %156 = vector.shape_cast %155 : vector<2x2x8x64xf32> to vector<32x64xf32>
    %c1_223 = arith.constant 1 : index
    %c0_224 = arith.constant 0 : index
    %c0_225 = arith.constant 0 : index
    %c0_226 = arith.constant 0 : index
    %157 = vector.load %arg5[%c1_223, %c0_224, %c0_225, %c0_226] : memref<3x3x64x64xf32, #tpu.memory_space<vmem>>, vector<1x1x64x64xf32>
    %158 = vector.shape_cast %157 : vector<1x1x64x64xf32> to vector<64x64xf32>
    %cst_227 = arith.constant dense<0.000000e+00> : vector<32x64xf32>
    %159 = tpu.matmul %156, %158, %cst_227 {dimension_numbers = #tpu.dot_dimension_numbers<[1], [0], [0], [1], [0, 0, 1, 1], [], []>} : vector<32x64xf32>, vector<64x64xf32>, vector<32x64xf32> -> vector<32x64xf32>
    %160 = arith.addf %154, %159 : vector<32x64xf32>
    %c1_228 = arith.constant 1 : index
    %c1_229 = arith.constant 1 : index
    %c0_230 = arith.constant 0 : index
    %c0_231 = arith.constant 0 : index
    %161 = vector.load %arg13[%c1_228, %c1_229, %c0_230, %c0_231] : memref<4x4x8x64xf32, #tpu.memory_space<vmem>>, vector<2x2x8x64xf32>
    %162 = vector.shape_cast %161 : vector<2x2x8x64xf32> to vector<32x64xf32>
    %c1_232 = arith.constant 1 : index
    %c1_233 = arith.constant 1 : index
    %c0_234 = arith.constant 0 : index
    %c0_235 = arith.constant 0 : index
    %163 = vector.load %arg5[%c1_232, %c1_233, %c0_234, %c0_235] : memref<3x3x64x64xf32, #tpu.memory_space<vmem>>, vector<1x1x64x64xf32>
    %164 = vector.shape_cast %163 : vector<1x1x64x64xf32> to vector<64x64xf32>
    %cst_236 = arith.constant dense<0.000000e+00> : vector<32x64xf32>
    %165 = tpu.matmul %162, %164, %cst_236 {dimension_numbers = #tpu.dot_dimension_numbers<[1], [0], [0], [1], [0, 0, 1, 1], [], []>} : vector<32x64xf32>, vector<64x64xf32>, vector<32x64xf32> -> vector<32x64xf32>
    %166 = arith.addf %160, %165 : vector<32x64xf32>
    %c1_237 = arith.constant 1 : index
    %c2_238 = arith.constant 2 : index
    %c0_239 = arith.constant 0 : index
    %c0_240 = arith.constant 0 : index
    %167 = vector.load %arg13[%c1_237, %c2_238, %c0_239, %c0_240] : memref<4x4x8x64xf32, #tpu.memory_space<vmem>>, vector<2x2x8x64xf32>
    %168 = vector.shape_cast %167 : vector<2x2x8x64xf32> to vector<32x64xf32>
    %c1_241 = arith.constant 1 : index
    %c2_242 = arith.constant 2 : index
    %c0_243 = arith.constant 0 : index
    %c0_244 = arith.constant 0 : index
    %169 = vector.load %arg5[%c1_241, %c2_242, %c0_243, %c0_244] : memref<3x3x64x64xf32, #tpu.memory_space<vmem>>, vector<1x1x64x64xf32>
    %170 = vector.shape_cast %169 : vector<1x1x64x64xf32> to vector<64x64xf32>
    %cst_245 = arith.constant dense<0.000000e+00> : vector<32x64xf32>
    %171 = tpu.matmul %168, %170, %cst_245 {dimension_numbers = #tpu.dot_dimension_numbers<[1], [0], [0], [1], [0, 0, 1, 1], [], []>} : vector<32x64xf32>, vector<64x64xf32>, vector<32x64xf32> -> vector<32x64xf32>
    %172 = arith.addf %166, %171 : vector<32x64xf32>
    %c2_246 = arith.constant 2 : index
    %c0_247 = arith.constant 0 : index
    %c0_248 = arith.constant 0 : index
    %c0_249 = arith.constant 0 : index
    %173 = vector.load %arg13[%c2_246, %c0_247, %c0_248, %c0_249] : memref<4x4x8x64xf32, #tpu.memory_space<vmem>>, vector<2x2x8x64xf32>
    %174 = vector.shape_cast %173 : vector<2x2x8x64xf32> to vector<32x64xf32>
    %c2_250 = arith.constant 2 : index
    %c0_251 = arith.constant 0 : index
    %c0_252 = arith.constant 0 : index
    %c0_253 = arith.constant 0 : index
    %175 = vector.load %arg5[%c2_250, %c0_251, %c0_252, %c0_253] : memref<3x3x64x64xf32, #tpu.memory_space<vmem>>, vector<1x1x64x64xf32>
    %176 = vector.shape_cast %175 : vector<1x1x64x64xf32> to vector<64x64xf32>
    %cst_254 = arith.constant dense<0.000000e+00> : vector<32x64xf32>
    %177 = tpu.matmul %174, %176, %cst_254 {dimension_numbers = #tpu.dot_dimension_numbers<[1], [0], [0], [1], [0, 0, 1, 1], [], []>} : vector<32x64xf32>, vector<64x64xf32>, vector<32x64xf32> -> vector<32x64xf32>
    %178 = arith.addf %172, %177 : vector<32x64xf32>
    %c2_255 = arith.constant 2 : index
    %c1_256 = arith.constant 1 : index
    %c0_257 = arith.constant 0 : index
    %c0_258 = arith.constant 0 : index
    %179 = vector.load %arg13[%c2_255, %c1_256, %c0_257, %c0_258] : memref<4x4x8x64xf32, #tpu.memory_space<vmem>>, vector<2x2x8x64xf32>
    %180 = vector.shape_cast %179 : vector<2x2x8x64xf32> to vector<32x64xf32>
    %c2_259 = arith.constant 2 : index
    %c1_260 = arith.constant 1 : index
    %c0_261 = arith.constant 0 : index
    %c0_262 = arith.constant 0 : index
    %181 = vector.load %arg5[%c2_259, %c1_260, %c0_261, %c0_262] : memref<3x3x64x64xf32, #tpu.memory_space<vmem>>, vector<1x1x64x64xf32>
    %182 = vector.shape_cast %181 : vector<1x1x64x64xf32> to vector<64x64xf32>
    %cst_263 = arith.constant dense<0.000000e+00> : vector<32x64xf32>
    %183 = tpu.matmul %180, %182, %cst_263 {dimension_numbers = #tpu.dot_dimension_numbers<[1], [0], [0], [1], [0, 0, 1, 1], [], []>} : vector<32x64xf32>, vector<64x64xf32>, vector<32x64xf32> -> vector<32x64xf32>
    %184 = arith.addf %178, %183 : vector<32x64xf32>
    %c2_264 = arith.constant 2 : index
    %c2_265 = arith.constant 2 : index
    %c0_266 = arith.constant 0 : index
    %c0_267 = arith.constant 0 : index
    %185 = vector.load %arg13[%c2_264, %c2_265, %c0_266, %c0_267] : memref<4x4x8x64xf32, #tpu.memory_space<vmem>>, vector<2x2x8x64xf32>
    %186 = vector.shape_cast %185 : vector<2x2x8x64xf32> to vector<32x64xf32>
    %c2_268 = arith.constant 2 : index
    %c2_269 = arith.constant 2 : index
    %c0_270 = arith.constant 0 : index
    %c0_271 = arith.constant 0 : index
    %187 = vector.load %arg5[%c2_268, %c2_269, %c0_270, %c0_271] : memref<3x3x64x64xf32, #tpu.memory_space<vmem>>, vector<1x1x64x64xf32>
    %188 = vector.shape_cast %187 : vector<1x1x64x64xf32> to vector<64x64xf32>
    %cst_272 = arith.constant dense<0.000000e+00> : vector<32x64xf32>
    %189 = tpu.matmul %186, %188, %cst_272 {dimension_numbers = #tpu.dot_dimension_numbers<[1], [0], [0], [1], [0, 0, 1, 1], [], []>} : vector<32x64xf32>, vector<64x64xf32>, vector<32x64xf32> -> vector<32x64xf32>
    %190 = arith.addf %184, %189 : vector<32x64xf32>
    %c0_273 = arith.constant 0 : index
    %c0_274 = arith.constant 0 : index
    %191 = vector.load %arg6[%c0_273, %c0_274] : memref<1x64xf32, #tpu.memory_space<vmem>>, vector<1x64xf32>
    %192 = vector.broadcast %191 : vector<1x64xf32> to vector<32x64xf32>
    %193 = arith.addf %190, %192 : vector<32x64xf32>
    %cst_275 = arith.constant 0.000000e+00 : f32
    %194 = vector.broadcast %cst_275 : f32 to vector<32x64xf32>
    %195 = arith.maximumf %193, %194 : vector<32x64xf32>
    %cst_276 = arith.constant 0.000000e+00 : f32
    %196 = vector.broadcast %cst_276 : f32 to vector<8x512xf32>
    %197 = vector.extract_strided_slice %195 {offsets = [0, 0], sizes = [8, 64], strides = [1, 1]} : vector<32x64xf32> to vector<8x64xf32>
    %c0_277 = arith.constant 0 : index
    %c0_278 = arith.constant 0 : index
    %c0_279 = arith.constant 0 : index
    %198 = vector.load %arg7[%c0_277, %c0_278, %c0_279] : memref<4x64x512xf32, #tpu.memory_space<vmem>>, vector<1x64x512xf32>
    %199 = vector.shape_cast %198 : vector<1x64x512xf32> to vector<64x512xf32>
    %cst_280 = arith.constant dense<0.000000e+00> : vector<8x512xf32>
    %200 = tpu.matmul %197, %199, %cst_280 {dimension_numbers = #tpu.dot_dimension_numbers<[1], [0], [0], [1], [0, 0, 1, 1], [], []>} : vector<8x64xf32>, vector<64x512xf32>, vector<8x512xf32> -> vector<8x512xf32>
    %201 = arith.addf %196, %200 : vector<8x512xf32>
    %202 = vector.extract_strided_slice %195 {offsets = [8, 0], sizes = [8, 64], strides = [1, 1]} : vector<32x64xf32> to vector<8x64xf32>
    %c1_281 = arith.constant 1 : index
    %c0_282 = arith.constant 0 : index
    %c0_283 = arith.constant 0 : index
    %203 = vector.load %arg7[%c1_281, %c0_282, %c0_283] : memref<4x64x512xf32, #tpu.memory_space<vmem>>, vector<1x64x512xf32>
    %204 = vector.shape_cast %203 : vector<1x64x512xf32> to vector<64x512xf32>
    %cst_284 = arith.constant dense<0.000000e+00> : vector<8x512xf32>
    %205 = tpu.matmul %202, %204, %cst_284 {dimension_numbers = #tpu.dot_dimension_numbers<[1], [0], [0], [1], [0, 0, 1, 1], [], []>} : vector<8x64xf32>, vector<64x512xf32>, vector<8x512xf32> -> vector<8x512xf32>
    %206 = arith.addf %201, %205 : vector<8x512xf32>
    %207 = vector.extract_strided_slice %195 {offsets = [16, 0], sizes = [8, 64], strides = [1, 1]} : vector<32x64xf32> to vector<8x64xf32>
    %c2_285 = arith.constant 2 : index
    %c0_286 = arith.constant 0 : index
    %c0_287 = arith.constant 0 : index
    %208 = vector.load %arg7[%c2_285, %c0_286, %c0_287] : memref<4x64x512xf32, #tpu.memory_space<vmem>>, vector<1x64x512xf32>
    %209 = vector.shape_cast %208 : vector<1x64x512xf32> to vector<64x512xf32>
    %cst_288 = arith.constant dense<0.000000e+00> : vector<8x512xf32>
    %210 = tpu.matmul %207, %209, %cst_288 {dimension_numbers = #tpu.dot_dimension_numbers<[1], [0], [0], [1], [0, 0, 1, 1], [], []>} : vector<8x64xf32>, vector<64x512xf32>, vector<8x512xf32> -> vector<8x512xf32>
    %211 = arith.addf %206, %210 : vector<8x512xf32>
    %212 = vector.extract_strided_slice %195 {offsets = [24, 0], sizes = [8, 64], strides = [1, 1]} : vector<32x64xf32> to vector<8x64xf32>
    %c3_289 = arith.constant 3 : index
    %c0_290 = arith.constant 0 : index
    %c0_291 = arith.constant 0 : index
    %213 = vector.load %arg7[%c3_289, %c0_290, %c0_291] : memref<4x64x512xf32, #tpu.memory_space<vmem>>, vector<1x64x512xf32>
    %214 = vector.shape_cast %213 : vector<1x64x512xf32> to vector<64x512xf32>
    %cst_292 = arith.constant dense<0.000000e+00> : vector<8x512xf32>
    %215 = tpu.matmul %212, %214, %cst_292 {dimension_numbers = #tpu.dot_dimension_numbers<[1], [0], [0], [1], [0, 0, 1, 1], [], []>} : vector<8x64xf32>, vector<64x512xf32>, vector<8x512xf32> -> vector<8x512xf32>
    %216 = arith.addf %211, %215 : vector<8x512xf32>
    %c0_293 = arith.constant 0 : index
    %c0_294 = arith.constant 0 : index
    %217 = vector.load %arg8[%c0_293, %c0_294] : memref<1x512xf32, #tpu.memory_space<vmem>>, vector<1x512xf32>
    %218 = vector.broadcast %217 : vector<1x512xf32> to vector<8x512xf32>
    %219 = arith.addf %216, %218 : vector<8x512xf32>
    %cst_295 = arith.constant 0.000000e+00 : f32
    %220 = vector.broadcast %cst_295 : f32 to vector<8x512xf32>
    %221 = arith.maximumf %219, %220 : vector<8x512xf32>
    %c0_296 = arith.constant 0 : index
    %c0_297 = arith.constant 0 : index
    %222 = vector.load %arg9[%c0_296, %c0_297] : memref<512x6xf32, #tpu.memory_space<vmem>>, vector<512x6xf32>
    %cst_298 = arith.constant dense<0.000000e+00> : vector<8x6xf32>
    %223 = tpu.matmul %221, %222, %cst_298 {dimension_numbers = #tpu.dot_dimension_numbers<[1], [0], [0], [1], [0, 0, 1, 1], [], []>} : vector<8x512xf32>, vector<512x6xf32>, vector<8x6xf32> -> vector<8x6xf32>
    %c0_299 = arith.constant 0 : index
    %c0_300 = arith.constant 0 : index
    %224 = vector.load %arg10[%c0_299, %c0_300] : memref<1x6xf32, #tpu.memory_space<vmem>>, vector<1x6xf32>
    %225 = vector.broadcast %224 : vector<1x6xf32> to vector<8x6xf32>
    %226 = arith.addf %223, %225 : vector<8x6xf32>
    %c0_301 = arith.constant 0 : index
    %c0_302 = arith.constant 0 : index
    %227 = vector.load %arg11[%c0_301, %c0_302] : memref<8x6xf32, #tpu.memory_space<vmem>>, vector<8x6xf32>
    tpu.vector_store %arg11[%c0_301, %c0_302], %226 {strides = array<i32>} : memref<8x6xf32, #tpu.memory_space<vmem>>, vector<8x6xf32>,
    return
  }
}

</mosaic_0001>

<bundles_post_ra>
// kernel: dqn_forward.1
= control target key start
LH: loop header
LB: loop body
LE: loop exit
PB: predicated region body
PF: predicated region fallthrough
CT: control target
= control target key end

     0   :  { %vm257_vm0 = vcmask 523264   ;;  %s11997_s0 = inlined_call_operand.vmem [shape: f32[11,11,8,64], index: 0, kind: input, shape index: {}]   ;;  %s11998_s1 = inlined_call_operand.vmem [shape: f32[2,2,64,32], index: 1, kind: input, shape index: {}]   ;;  %s11999_s2 = inlined_call_operand.vmem [shape: f32[1,32], index: 2, kind: input, shape index: {}]   ;;  %s12000_s3 = inlined_call_operand.vmem [shape: f32[4,4,32,64], index: 3, kind: input, shape index: {}]   ;;  %s12001_s4 = inlined_call_operand.vmem [shape: f32[1,64], index: 4, kind: input, shape index: {}]   ;;  %s12002_s5 = inlined_call_operand.vmem [shape: f32[3,3,64,64], index: 5, kind: input, shape index: {}]   ;;  %s12003_s6 = inlined_call_operand.vmem [shape: f32[1,64], index: 6, kind: input, shape index: {}]   ;;  %s12004_s7 = inlined_call_operand.vmem [shape: f32[4,64,512], index: 7, kind: input, shape index: {}]   ;;  %s12005_s8 = inlined_call_operand.vmem [shape: f32[1,512], index: 8, kind: input, shape index: {}]   ;;  %s12006_s9 = inlined_call_operand.vmem [shape: f32[512,6], index: 9, kind: input, shape index: {}]   ;;  %s12007_s10 = inlined_call_operand.vmem [shape: f32[1,6], index: 10, kind: input, shape index: {}]   ;;  %s12008_s11 = inlined_call_operand.hbm [shape: f32[8,6], index: 11, kind: output, shape index: {}]  }
   0x1   :  { %v7180_v0 = vld [vmem:[%s11998_s1 + $0x78] sm:$0xff]  ;;  %v7179_v4 = vld [vmem:[%s11998_s1 + $0x70] sm:$0xff]  ;;  %v7178_v8 = vld [vmem:[%s11998_s1 + $0x68] sm:$0xff] }
   0x2   :  { %v146_v1 = vld [vmem:[%s11998_s1 + $0x38] sm:$0xff]  ;;  %566 = vmatpush.msra.mxu0 %v7180_v0  ;;  %v145_v5 = vld [vmem:[%s11998_s1 + $0x30] sm:$0xff]  ;;  %v144_v9 = vld [vmem:[%s11998_s1 + $0x28] sm:$0xff] }
   0x3   :  { %v7488_v2 = vld [vmem:[%s11998_s1 + $0xb8] sm:$0xff]  ;;  %1183 = vmatpush.msra.mxu1 %v146_v1  ;;  %v7487_v6 = vld [vmem:[%s11998_s1 + $0xb0] sm:$0xff]  ;;  %v7486_v10 = vld [vmem:[%s11998_s1 + $0xa8] sm:$0xff] }
   0x4   :  { %v7696_v3 = vld [vmem:[%s11998_s1 + $0xf8] sm:$0xff]  ;;  %1910 = vmatpush.msra.mxu2 %v7488_v2  ;;  %v7695_v7 = vld [vmem:[%s11998_s1 + $0xf0] sm:$0xff]  ;;  %567 = vmatpush.msra.mxu0 %v7179_v4  ;;  %v7694_v11 = vld [vmem:[%s11998_s1 + $0xe8] sm:$0xff] }
   0x5   :  { %2737 = vmatpush.msra.mxu3 %v7696_v3  ;;  %1184 = vmatpush.msra.mxu1 %v145_v5  ;;  %v7177_v12 = vld [vmem:[%s11998_s1 + $0x60] sm:$0xff]  ;;  %v7176_v16 = vld [vmem:[%s11998_s1 + $0x58] sm:$0xff]  ;;  %v7175_v20 = vld [vmem:[%s11998_s1 + $0x50] sm:$0xff] }
   0x6   :  { %1911 = vmatpush.msra.mxu2 %v7487_v6  ;;  %v143_v13 = vld [vmem:[%s11998_s1 + $0x20] sm:$0xff]  ;;  %568 = vmatpush.msra.mxu0 %v7178_v8  ;;  %v142_v17 = vld [vmem:[%s11998_s1 + $0x18] sm:$0xff]  ;;  %v141_v21 = vld [vmem:[%s11998_s1 + $0x10] sm:$0xff] }
   0x7   :  { %2738 = vmatpush.msra.mxu3 %v7695_v7  ;;  %1185 = vmatpush.msra.mxu1 %v144_v9  ;;  %v7485_v14 = vld [vmem:[%s11998_s1 + $0xa0] sm:$0xff]  ;;  %v7484_v18 = vld [vmem:[%s11998_s1 + $0x98] sm:$0xff]  ;;  %v7483_v22 = vld [vmem:[%s11998_s1 + $0x90] sm:$0xff] }
   0x8   :  { %v7693_v15 = vld [vmem:[%s11998_s1 + $0xe0] sm:$0xff]  ;;  %1912 = vmatpush.msra.mxu2 %v7486_v10  ;;  %569 = vmatpush.msra.mxu0 %v7177_v12  ;;  %v7692_v19 = vld [vmem:[%s11998_s1 + $0xd8] sm:$0xff]  ;;  %v7691_v23 = vld [vmem:[%s11998_s1 + $0xd0] sm:$0xff] }
   0x9   :  { %2739 = vmatpush.msra.mxu3 %v7694_v11  ;;  %1186 = vmatpush.msra.mxu1 %v143_v13  ;;  %v7174_v24 = vld [vmem:[%s11998_s1 + $0x48] sm:$0xff]  ;;  %v7173_v28 = vld [vmem:[%s11998_s1 + $0x40] sm:$0xff]  ;;  %v8533_v34 = vld [vmem:[%s11997_s0 + $0x58] sm:$0xff] }
   0xa   :  { %1913 = vmatpush.msra.mxu2 %v7485_v14  ;;  %570 = vmatpush.msra.mxu0 %v7176_v16  ;;  %v140_v25 = vld [vmem:[%s11998_s1 + $0x8] sm:$0xff]  ;;  %v139_v29 = vld [vmem:[%s11998_s1] sm:$0xff]  ;;  %v7800_v36 = vld [vmem:[%s12000_s3 + $0x38] sm:$0xff] }
   0xb   :  { %2740 = vmatpush.msra.mxu3 %v7693_v15  ;;  %1187 = vmatpush.msra.mxu1 %v142_v17  ;;  %v7482_v26 = vld [vmem:[%s11998_s1 + $0x88] sm:$0xff]  ;;  %v7481_v30 = vld [vmem:[%s11998_s1 + $0x80] sm:$0xff]  ;;  %v3470_v37 = vld [vmem:[%s12000_s3 + $0x18] sm:$0xff] }
   0xc   :  { %1914 = vmatpush.msra.mxu2 %v7484_v18  ;;  %571 = vmatpush.msra.mxu0 %v7175_v20  ;;  %v7690_v27 = vld [vmem:[%s11998_s1 + $0xc8] sm:$0xff]  ;;  %v7689_v31 = vld [vmem:[%s11998_s1 + $0xc0] sm:$0xff] }
   0xd   :  { %2741 = vmatpush.msra.mxu3 %v7692_v19  ;;  %1188 = vmatpush.msra.mxu1 %v141_v21  ;;  %v7073_v32 = vld [vmem:[%s11997_s0 + $0x8] sm:$0xff]  ;;  %v39_v33 = vld [vmem:[%s11997_s0] sm:$0xff] }
   0xe   :  { %1915 = vmatpush.msra.mxu2 %v7483_v22  ;;  %572 = vmatpush.msra.mxu0 %v7174_v24  ;;  %v8538_v35 = vld [vmem:[%s11997_s0 + $0x60] sm:$0xff] }
   0xf   :  { %2742 = vmatpush.msra.mxu3 %v7691_v23  ;;  %1189 = vmatpush.msra.mxu1 %v140_v25 }
  0x10   :  { %1916 = vmatpush.msra.mxu2 %v7482_v26  ;;  %573 = vmatpush.msra.mxu0 %v7173_v28 }
  0x11   :  { %2743 = vmatpush.msra.mxu3 %v7690_v27  ;;  %1190 = vmatpush.msra.mxu1 %v139_v29 }
  0x12   :  { %1917 = vmatpush.msra.mxu2 %v7481_v30 }
  0x13   :  { %2744 = vmatpush.msra.mxu3 %v7689_v31 }
  0x14   :  { %16 = vsyncpa [#allocation5], 0  ;;  %7181 = vmatmul.msk.f32.vlgmr.msra.gmra.mxu0 %vm257_vm0, %v7073_v32  ;;  %7281 = vmatmul.msk.f32.vlgmr.msra.gmra.mxu1 %vm257_vm0, %v39_v33  ;;  %v7074_v38 = vld [vmem:[%s11997_s0 + $0x10] sm:$0xff]  ;;  %v8558_v39 = vld [vmem:[%s11997_s0 + $0x68] sm:$0xff]  ;;  %vm3350_vm1 = vcmask 261120   ;;  %s8367_s15 = smov [#allocation4]  }
  0x15   :  { %7489 = vmatmul.msk.f32.vlgmr.msra.gmra.mxu2 %vm257_vm0, %v8533_v34  ;;  %7697 = vmatmul.msk.f32.vlgmr.msra.gmra.mxu3 %vm257_vm0, %v8538_v35  ;;  %v7075_v40 = vld [vmem:[%s11997_s0 + $0x18] sm:$0xff]  ;;  %v8572_v41 = vld [vmem:[%s11997_s0 + $0x70] sm:$0xff]  ;;  %v7076_v42 = vld [vmem:[%s11997_s0 + $0x20] sm:$0xff]  ;;  %s7062_s16 = sshll.u32 %s8367_s15, 4  ;;  %s7064_s18 = sshll.u32 %s12008_s11, 4  ;;  %vm7055_vm2 = vcmask 48128   ;;  %s7063_s16 = int_to_ptr.vmem [resolvable:$true] %s7062_s16  ;;  %s7065_s18 = int_to_ptr.hbm [resolvable:$true] %s7064_s18 }
  0x16   :  { %8325 = vmatpush.msrb.mxu2 %v7800_v36  ;;  %8329 = vmatpush.msrb.mxu3 %v3470_v37  ;;  %v8586_v43 = vld [vmem:[%s11997_s0 + $0x78] sm:$0xff]  ;;  %v7077_v44 = vld [vmem:[%s11997_s0 + $0x28] sm:$0xff]  ;;  %v8600_v45 = vld [vmem:[%s11997_s0 + $0x80] sm:$0xff] }
  0x17   :  { %3553 = vmatpush.msrb.mxu0 %v7800_v36  ;;  %3666 = vmatpush.msrb.mxu1 %v3470_v37  ;;  %v7078_v46 = vld [vmem:[%s11997_s0 + $0x30] sm:$0xff]  ;;  %v8614_v47 = vld [vmem:[%s11997_s0 + $0x88] sm:$0xff]  ;;  %v7079_v48 = vld [vmem:[%s11997_s0 + $0x38] sm:$0xff] }
  0x18   :  { %v8628_v49 = vld [vmem:[%s11997_s0 + $0x90] sm:$0xff]  ;;  %v7080_v50 = vld [vmem:[%s11997_s0 + $0x40] sm:$0xff]  ;;  %v8642_v51 = vld [vmem:[%s11997_s0 + $0x98] sm:$0xff] }
  0x19   :  { %v7081_v52 = vld [vmem:[%s11997_s0 + $0x48] sm:$0xff]  ;;  %v8656_v53 = vld [vmem:[%s11997_s0 + $0xa0] sm:$0xff]  ;;  %v7082_v54 = vld [vmem:[%s11997_s0 + $0x50] sm:$0xff] }
  0x1a   :  { %v8670_v55 = vld [vmem:[%s11997_s0 + $0xa8] sm:$0xff]  ;;  %v8681_v56 = vld [vmem:[%s11997_s0 + $0xb0] sm:$0xff]  ;;  %v8686_v57 = vld [vmem:[%s11997_s0 + $0xb8] sm:$0xff] }
  0x1b   :  { %v8699_v58 = vld [vmem:[%s11997_s0 + $0xc0] sm:$0xff]  ;;  %v8712_v59 = vld [vmem:[%s11997_s0 + $0xc8] sm:$0xff]  ;;  %v8725_v60 = vld [vmem:[%s11997_s0 + $0xd0] sm:$0xff] }
  0x1c   :  { %7182 = vmatmul.msk.f32.gmra.mxu0 %vm257_vm0, %v7074_v38  ;;  %7282 = vmatmul.msk.f32.gmra.mxu1 %vm257_vm0, %v7073_v32  ;;  %v8738_v61 = vld [vmem:[%s11997_s0 + $0xd8] sm:$0xff]  ;;  %v8751_v62 = vld [vmem:[%s11997_s0 + $0xe0] sm:$0xff]  ;;  %v8764_v1 = vld [vmem:[%s11997_s0 + $0xe8] sm:$0xff] }
  0x1d   :  { %7490 = vmatmul.msk.f32.gmra.mxu2 %vm257_vm0, %v8538_v35  ;;  %7698 = vmatmul.msk.f32.gmra.mxu3 %vm257_vm0, %v8558_v39  ;;  %v8777_v6 = vld [vmem:[%s11999_s2] ss:$0 sm:$0xff]  ;;  %v8782_v9 = vld [vmem:[%s11997_s0 + $0xf0] sm:$0xff]  ;;  %v8797_v19 = vld [vmem:[%s11997_s0 + $0xf8] sm:$0xff] }
  0x1e   :  { %v8812_v29 = vld [vmem:[%s11997_s0 + $0x100] sm:$0xff] }
  0x24   :  { %7183 = vmatmul.msk.f32.gmra.mxu0 %vm257_vm0, %v7075_v40  ;;  %7283 = vmatmul.msk.f32.gmra.mxu1 %vm257_vm0, %v7074_v38 }
  0x25   :  { %7491 = vmatmul.msk.f32.gmra.mxu2 %vm257_vm0, %v8558_v39  ;;  %7699 = vmatmul.msk.f32.gmra.mxu3 %vm257_vm0, %v8572_v41 }
  0x2c   :  { %7184 = vmatmul.msk.f32.gmra.mxu0 %vm257_vm0, %v7076_v42  ;;  %7284 = vmatmul.msk.f32.gmra.mxu1 %vm257_vm0, %v7075_v40  ;;  %v8832_v40 = vld [vmem:[%s11997_s0 + $0x110] sm:$0xff] }
  0x2d   :  { %7492 = vmatmul.msk.f32.gmra.mxu2 %vm257_vm0, %v8572_v41  ;;  %7700 = vmatmul.msk.f32.gmra.mxu3 %vm257_vm0, %v8586_v43 }
  0x34   :  { %7185 = vmatmul.msk.f32.gmra.mxu0 %vm257_vm0, %v7077_v44  ;;  %7285 = vmatmul.msk.f32.gmra.mxu1 %vm257_vm0, %v7076_v42 }
  0x35   :  { %7493 = vmatmul.msk.f32.gmra.mxu2 %vm257_vm0, %v8586_v43  ;;  %7701 = vmatmul.msk.f32.gmra.mxu3 %vm257_vm0, %v8600_v45 }
  0x3c   :  { %7186 = vmatmul.msk.f32.gmra.mxu0 %vm257_vm0, %v7078_v46  ;;  %7286 = vmatmul.msk.f32.gmra.mxu1 %vm257_vm0, %v7077_v44 }
  0x3d   :  { %7494 = vmatmul.msk.f32.gmra.mxu2 %vm257_vm0, %v8600_v45  ;;  %7702 = vmatmul.msk.f32.gmra.mxu3 %vm257_vm0, %v8614_v47 }
  0x44   :  { %7187 = vmatmul.msk.f32.gmra.mxu0 %vm257_vm0, %v7079_v48  ;;  %7287 = vmatmul.msk.f32.gmra.mxu1 %vm257_vm0, %v7078_v46 }
  0x45   :  { %7495 = vmatmul.msk.f32.gmra.mxu2 %vm257_vm0, %v8614_v47  ;;  %7703 = vmatmul.msk.f32.gmra.mxu3 %vm257_vm0, %v8628_v49 }
  0x4c   :  { %7188 = vmatmul.msk.f32.gmra.mxu0 %vm257_vm0, %v7080_v50  ;;  %7288 = vmatmul.msk.f32.gmra.mxu1 %vm257_vm0, %v7079_v48 }
  0x4d   :  { %7496 = vmatmul.msk.f32.gmra.mxu2 %vm257_vm0, %v8628_v49  ;;  %7704 = vmatmul.msk.f32.gmra.mxu3 %vm257_vm0, %v8642_v51 }
  0x54   :  { %7189 = vmatmul.msk.f32.gmra.mxu0 %vm257_vm0, %v7081_v52  ;;  %7289 = vmatmul.msk.f32.gmra.mxu1 %vm257_vm0, %v7080_v50  ;;  %v8847_v50 = vld [vmem:[%s11997_s0 + $0x118] sm:$0xff] }
  0x55   :  { %7497 = vmatmul.msk.f32.gmra.mxu2 %vm257_vm0, %v8642_v51  ;;  %7705 = vmatmul.msk.f32.gmra.mxu3 %vm257_vm0, %v8656_v53 }
  0x5c   :  { %7190 = vmatmul.msk.f32.gmra.mxu0 %vm257_vm0, %v7082_v54  ;;  %7290 = vmatmul.msk.f32.gmra.mxu1 %vm257_vm0, %v7081_v52 }
  0x5d   :  { %7498 = vmatmul.msk.f32.gmra.mxu2 %vm257_vm0, %v8656_v53  ;;  %7706 = vmatmul.msk.f32.gmra.mxu3 %vm257_vm0, %v8670_v55 }
  0x64   :  { %7191 = vmatmul.msk.f32.gmra.mxu0 %vm257_vm0, %v8538_v35  ;;  %7291 = vmatmul.msk.f32.gmra.mxu1 %vm257_vm0, %v8533_v34 }
  0x65   :  { %7499 = vmatmul.msk.f32.gmra.mxu2 %vm257_vm0, %v8681_v56  ;;  %7707 = vmatmul.msk.f32.gmra.mxu3 %vm257_vm0, %v8686_v57 }
  0x6c   :  { %7192 = vmatmul.msk.f32.gmra.mxu0 %vm257_vm0, %v8558_v39  ;;  %7292 = vmatmul.msk.f32.gmra.mxu1 %vm257_vm0, %v8538_v35 }
  0x6d   :  { %7500 = vmatmul.msk.f32.gmra.mxu2 %vm257_vm0, %v8686_v57  ;;  %7708 = vmatmul.msk.f32.gmra.mxu3 %vm257_vm0, %v8699_v58 }
  0x74   :  { %7193 = vmatmul.msk.f32.gmra.mxu0 %vm257_vm0, %v8572_v41  ;;  %7293 = vmatmul.msk.f32.gmra.mxu1 %vm257_vm0, %v8558_v39  ;;  %v8827_v39 = vld [vmem:[%s11997_s0 + $0x108] sm:$0xff] }
  0x75   :  { %7501 = vmatmul.msk.f32.gmra.mxu2 %vm257_vm0, %v8699_v58  ;;  %7709 = vmatmul.msk.f32.gmra.mxu3 %vm257_vm0, %v8712_v59 }
  0x7c   :  { %7194 = vmatmul.msk.f32.gmra.mxu0 %vm257_vm0, %v8586_v43  ;;  %7294 = vmatmul.msk.f32.gmra.mxu1 %vm257_vm0, %v8572_v41 }
  0x7d   :  { %7502 = vmatmul.msk.f32.gmra.mxu2 %vm257_vm0, %v8712_v59  ;;  %7710 = vmatmul.msk.f32.gmra.mxu3 %vm257_vm0, %v8725_v60 }
  0x84   :  { %7195 = vmatmul.msk.f32.gmra.mxu0 %vm257_vm0, %v8600_v45  ;;  %7295 = vmatmul.msk.f32.gmra.mxu1 %vm257_vm0, %v8586_v43 }
  0x85   :  { %7503 = vmatmul.msk.f32.gmra.mxu2 %vm257_vm0, %v8725_v60  ;;  %7711 = vmatmul.msk.f32.gmra.mxu3 %vm257_vm0, %v8738_v61 }
  0x8c   :  { %7196 = vmatmul.msk.f32.gmra.mxu0 %vm257_vm0, %v8614_v47  ;;  %7296 = vmatmul.msk.f32.gmra.mxu1 %vm257_vm0, %v8600_v45 }
  0x8d   :  { %7504 = vmatmul.msk.f32.gmra.mxu2 %vm257_vm0, %v8738_v61  ;;  %7712 = vmatmul.msk.f32.gmra.mxu3 %vm257_vm0, %v8751_v62 }
  0x91   :  { %v575_v63 = vpop.f32.mrf.mxu0  ;;  %v1192_v0 = vpop.f32.mrf.mxu1 }
  0x92   :  { %v1193_v2 = vadd.f32 %v1192_v0, %v575_v63 }
  0x94   :  { %7197 = vmatmul.msk.f32.gmra.mxu0 %vm257_vm0, %v8628_v49  ;;  %7297 = vmatmul.msk.f32.gmra.mxu1 %vm257_vm0, %v8614_v47 }
  0x95   :  { %7505 = vmatmul.msk.f32.gmra.mxu2 %vm257_vm0, %v8751_v62  ;;  %7713 = vmatmul.msk.f32.gmra.mxu3 %vm257_vm0, %v8764_v1 }
  0x98   :  { %v1919_v3 = vpop.f32.mrf.mxu2  ;;  %v2746_v4 = vpop.f32.mrf.mxu3 }
  0x99   :  { %v2219_v5 = vadd.f32 %v1919_v3, %v1193_v2  ;;  %v578_v7 = vpop.f32.mrf.mxu0  ;;  %v1195_v8 = vpop.f32.mrf.mxu1 }
  0x9a   :  { %v1196_v12 = vadd.f32 %v1195_v8, %v578_v7 }
  0x9b   :  { %v3046_v10 = vadd.f32 %v2746_v4, %v2219_v5 }
  0x9c   :  { %7198 = vmatmul.msk.f32.gmra.mxu0 %vm257_vm0, %v8642_v51  ;;  %7298 = vmatmul.msk.f32.gmra.mxu1 %vm257_vm0, %v8628_v49 }
  0x9d   :  { %v3150_v11 = vadd.f32 %v8777_v6, %v3046_v10  ;;  %7506 = vmatmul.msk.f32.gmra.mxu2 %vm257_vm0, %v8764_v1  ;;  %7714 = vmatmul.msk.f32.gmra.mxu3 %vm257_vm0, %v8782_v9 }
  0x9f   :  { %v3250_v13 = vmax.f32 %v3150_v11, 0.0 }
  0xa0   :  { %v1922_v14 = vpop.f32.mrf.mxu2  ;;  %v2749_v15 = vpop.f32.mrf.mxu3 }
  0xa1   :  { %3351 = vst.msk [vmem:[#allocation2] sm:$0xff] %vm3350_vm1, %v3250_v13  ;;  %v2220_v16 = vadd.f32 %v1922_v14, %v1196_v12  ;;  %v581_v17 = vpop.f32.mrf.mxu0  ;;  %v1198_v18 = vpop.f32.mrf.mxu1  ;;  %v3469_v14 = vld [vmem:[%s12000_s3 + $0x10] sm:$0xff] }
  0xa2   :  { %v1199_v22 = vadd.f32 %v1198_v18, %v581_v17  ;;  %8330 = vmatpush.msrb.mxu3 %v3469_v14  ;;  %3667 = vmatpush.msrb.mxu1 %v3469_v14 }
  0xa3   :  { %v3047_v20 = vadd.f32 %v2749_v15, %v2220_v16  ;;  %v8883_v15 = vld [vmem:[%s11997_s0 + $0x128] sm:$0xff] }
  0xa4   :  { %7199 = vmatmul.msk.f32.gmra.mxu0 %vm257_vm0, %v8656_v53  ;;  %7299 = vmatmul.msk.f32.gmra.mxu1 %vm257_vm0, %v8642_v51 }
  0xa5   :  { %v3151_v21 = vadd.f32 %v8777_v6, %v3047_v20  ;;  %7507 = vmatmul.msk.f32.gmra.mxu2 %vm257_vm0, %v8782_v9  ;;  %7715 = vmatmul.msk.f32.gmra.mxu3 %vm257_vm0, %v8797_v19 }
  0xa7   :  { %v3251_v23 = vmax.f32 %v3151_v21, 0.0 }
  0xa8   :  { %v1925_v24 = vpop.f32.mrf.mxu2  ;;  %v2752_v25 = vpop.f32.mrf.mxu3 }
  0xa9   :  { %3352 = vst.msk [vmem:[#allocation2 + $0x8] sm:$0xff] %vm3350_vm1, %v3251_v23  ;;  %v2221_v26 = vadd.f32 %v1925_v24, %v1199_v22  ;;  %v584_v27 = vpop.f32.mrf.mxu0  ;;  %v1201_v28 = vpop.f32.mrf.mxu1 }
  0xaa   :  { %v1202_v32 = vadd.f32 %v1201_v28, %v584_v27 }
  0xab   :  { %v3048_v30 = vadd.f32 %v2752_v25, %v2221_v26 }
  0xac   :  { %7200 = vmatmul.msk.f32.gmra.mxu0 %vm257_vm0, %v8670_v55  ;;  %7300 = vmatmul.msk.f32.gmra.mxu1 %vm257_vm0, %v8656_v53 }
  0xad   :  { %v3152_v31 = vadd.f32 %v8777_v6, %v3048_v30  ;;  %7508 = vmatmul.msk.f32.gmra.mxu2 %vm257_vm0, %v8797_v19  ;;  %7716 = vmatmul.msk.f32.gmra.mxu3 %vm257_vm0, %v8812_v29 }
  0xaf   :  { %v3252_v33 = vmax.f32 %v3152_v31, 0.0 }
  0xb0   :  { %v1928_v34 = vpop.f32.mrf.mxu2  ;;  %v2755_v35 = vpop.f32.mrf.mxu3 }
  0xb1   :  { %3353 = vst.msk [vmem:[#allocation2 + $0x10] sm:$0xff] %vm3350_vm1, %v3252_v33  ;;  %v2222_v36 = vadd.f32 %v1928_v34, %v1202_v32  ;;  %v587_v37 = vpop.f32.mrf.mxu0  ;;  %v1204_v38 = vpop.f32.mrf.mxu1 }
  0xb2   :  { %v1205_v43 = vadd.f32 %v1204_v38, %v587_v37 }
  0xb3   :  { %v3049_v41 = vadd.f32 %v2755_v35, %v2222_v36 }
  0xb4   :  { %7201 = vmatmul.msk.f32.gmra.mxu0 %vm257_vm0, %v8686_v57  ;;  %7301 = vmatmul.msk.f32.gmra.mxu1 %vm257_vm0, %v8681_v56 }
  0xb5   :  { %v3153_v42 = vadd.f32 %v8777_v6, %v3049_v41  ;;  %7509 = vmatmul.msk.f32.gmra.mxu2 %vm257_vm0, %v8827_v39  ;;  %7717 = vmatmul.msk.f32.gmra.mxu3 %vm257_vm0, %v8832_v40 }
  0xb7   :  { %v3253_v44 = vmax.f32 %v3153_v42, 0.0 }
  0xb8   :  { %v1931_v45 = vpop.f32.mrf.mxu2  ;;  %v2758_v46 = vpop.f32.mrf.mxu3 }
  0xb9   :  { %3354 = vst.msk [vmem:[#allocation2 + $0x18] sm:$0xff] %vm3350_vm1, %v3253_v44  ;;  %v2223_v47 = vadd.f32 %v1931_v45, %v1205_v43  ;;  %v590_v48 = vpop.f32.mrf.mxu0  ;;  %v1207_v49 = vpop.f32.mrf.mxu1 }
  0xba   :  { %v1208_v53 = vadd.f32 %v1207_v49, %v590_v48 }
  0xbb   :  { %v3050_v51 = vadd.f32 %v2758_v46, %v2223_v47 }
  0xbc   :  { %7202 = vmatmul.msk.f32.gmra.mxu0 %vm257_vm0, %v8699_v58  ;;  %7302 = vmatmul.msk.f32.gmra.mxu1 %vm257_vm0, %v8686_v57  ;;  %v8862_v57 = vld [vmem:[%s11997_s0 + $0x120] sm:$0xff] }
  0xbd   :  { %v3154_v52 = vadd.f32 %v8777_v6, %v3050_v51  ;;  %7510 = vmatmul.msk.f32.gmra.mxu2 %vm257_vm0, %v8832_v40  ;;  %7718 = vmatmul.msk.f32.gmra.mxu3 %vm257_vm0, %v8847_v50 }
  0xbf   :  { %v3254_v54 = vmax.f32 %v3154_v52, 0.0 }
  0xc0   :  { %v1934_v55 = vpop.f32.mrf.mxu2  ;;  %v2761_v56 = vpop.f32.mrf.mxu3 }
  0xc1   :  { %3355 = vst.msk [vmem:[#allocation2 + $0x20] sm:$0xff] %vm3350_vm1, %v3254_v54  ;;  %v2224_v63 = vadd.f32 %v1934_v55, %v1208_v53  ;;  %v593_v0 = vpop.f32.mrf.mxu0  ;;  %v1210_v2 = vpop.f32.mrf.mxu1 }
  0xc2   :  { %v1211_v5 = vadd.f32 %v1210_v2, %v593_v0 }
  0xc3   :  { %v3051_v3 = vadd.f32 %v2761_v56, %v2224_v63 }
  0xc4   :  { %7203 = vmatmul.msk.f32.gmra.mxu0 %vm257_vm0, %v8712_v59  ;;  %7303 = vmatmul.msk.f32.gmra.mxu1 %vm257_vm0, %v8699_v58  ;;  %v7799_v58 = vld [vmem:[%s12000_s3 + $0x30] sm:$0xff] }
  0xc5   :  { %v3155_v4 = vadd.f32 %v8777_v6, %v3051_v3  ;;  %7511 = vmatmul.msk.f32.gmra.mxu2 %vm257_vm0, %v8847_v50  ;;  %7719 = vmatmul.msk.f32.gmra.mxu3 %vm257_vm0, %v8862_v57 }
  0xc6   :  { %8326 = vmatpush.msrb.mxu2 %v7799_v58  ;;  %3554 = vmatpush.msrb.mxu0 %v7799_v58 }
  0xc7   :  { %v3255_v7 = vmax.f32 %v3155_v4, 0.0 }
  0xc8   :  { %v1937_v8 = vpop.f32.mrf.mxu2  ;;  %v2764_v10 = vpop.f32.mrf.mxu3 }
  0xc9   :  { %3356 = vst.msk [vmem:[#allocation2 + $0x28] sm:$0xff] %vm3350_vm1, %v3255_v7  ;;  %v2225_v11 = vadd.f32 %v1937_v8, %v1211_v5  ;;  %v596_v12 = vpop.f32.mrf.mxu0  ;;  %v1213_v13 = vpop.f32.mrf.mxu1 }
  0xca   :  { %v1214_v18 = vadd.f32 %v1213_v13, %v596_v12 }
  0xcb   :  { %v3052_v16 = vadd.f32 %v2764_v10, %v2225_v11 }
  0xcc   :  { %7204 = vmatmul.msk.f32.gmra.mxu0 %vm257_vm0, %v8725_v60  ;;  %7304 = vmatmul.msk.f32.gmra.mxu1 %vm257_vm0, %v8712_v59  ;;  %v8898_v59 = vld [vmem:[%s11997_s0 + $0x130] sm:$0xff] }
  0xcd   :  { %v3156_v17 = vadd.f32 %v8777_v6, %v3052_v16  ;;  %7512 = vmatmul.msk.f32.gmra.mxu2 %vm257_vm0, %v8862_v57  ;;  %7720 = vmatmul.msk.f32.gmra.mxu3 %vm257_vm0, %v8883_v15 }
  0xcf   :  { %v3256_v20 = vmax.f32 %v3156_v17, 0.0 }
  0xd0   :  { %v1940_v21 = vpop.f32.mrf.mxu2  ;;  %v2767_v22 = vpop.f32.mrf.mxu3 }
  0xd1   :  { %3357 = vst.msk [vmem:[#allocation2 + $0x30] sm:$0xff] %vm3350_vm1, %v3256_v20  ;;  %v2226_v23 = vadd.f32 %v1940_v21, %v1214_v18  ;;  %v599_v24 = vpop.f32.mrf.mxu0  ;;  %v1216_v25 = vpop.f32.mrf.mxu1 }
  0xd2   :  { %v1217_v28 = vadd.f32 %v1216_v25, %v599_v24 }
  0xd3   :  { %v3053_v26 = vadd.f32 %v2767_v22, %v2226_v23 }
  0xd4   :  { %7205 = vmatmul.msk.f32.gmra.mxu0 %vm257_vm0, %v8738_v61  ;;  %7305 = vmatmul.msk.f32.gmra.mxu1 %vm257_vm0, %v8725_v60  ;;  %v8913_v60 = vld [vmem:[%s11997_s0 + $0x138] sm:$0xff] }
  0xd5   :  { %v3157_v27 = vadd.f32 %v8777_v6, %v3053_v26  ;;  %7513 = vmatmul.msk.f32.gmra.mxu2 %vm257_vm0, %v8883_v15  ;;  %7721 = vmatmul.msk.f32.gmra.mxu3 %vm257_vm0, %v8898_v59 }
  0xd7   :  { %v3257_v30 = vmax.f32 %v3157_v27, 0.0 }
  0xd8   :  { %v1943_v31 = vpop.f32.mrf.mxu2  ;;  %v2770_v32 = vpop.f32.mrf.mxu3 }
  0xd9   :  { %3358 = vst.msk [vmem:[#allocation2 + $0x38] sm:$0xff] %vm3350_vm1, %v3257_v30  ;;  %v2227_v33 = vadd.f32 %v1943_v31, %v1217_v28  ;;  %v602_v34 = vpop.f32.mrf.mxu0  ;;  %v1219_v35 = vpop.f32.mrf.mxu1  ;;  %v8993_v30 = vld [vmem:[%s11997_s0 + $0x168] sm:$0xff] }
  0xda   :  { %v1220_v38 = vadd.f32 %v1219_v35, %v602_v34 }
  0xdb   :  { %v3054_v36 = vadd.f32 %v2770_v32, %v2227_v33 }
  0xdc   :  { %7206 = vmatmul.msk.f32.gmra.mxu0 %vm257_vm0, %v8751_v62  ;;  %7306 = vmatmul.msk.f32.gmra.mxu1 %vm257_vm0, %v8738_v61  ;;  %v8928_v61 = vld [vmem:[%s11997_s0 + $0x140] sm:$0xff] }
  0xdd   :  { %v3158_v37 = vadd.f32 %v8777_v6, %v3054_v36  ;;  %7514 = vmatmul.msk.f32.gmra.mxu2 %vm257_vm0, %v8898_v59  ;;  %7722 = vmatmul.msk.f32.gmra.mxu3 %vm257_vm0, %v8913_v60 }
  0xdf   :  { %v3258_v41 = vmax.f32 %v3158_v37, 0.0 }
  0xe0   :  { %v1946_v42 = vpop.f32.mrf.mxu2  ;;  %v2773_v43 = vpop.f32.mrf.mxu3 }
  0xe1   :  { %3359 = vst.msk [vmem:[#allocation2 + $0x40] sm:$0xff] %vm3350_vm1, %v3258_v41  ;;  %v2228_v44 = vadd.f32 %v1946_v42, %v1220_v38  ;;  %v605_v45 = vpop.f32.mrf.mxu0  ;;  %v1222_v46 = vpop.f32.mrf.mxu1 }
  0xe2   :  { %v1223_v49 = vadd.f32 %v1222_v46, %v605_v45 }
  0xe3   :  { %v3055_v47 = vadd.f32 %v2773_v43, %v2228_v44 }
  0xe4   :  { %7207 = vmatmul.msk.f32.gmra.mxu0 %vm257_vm0, %v8764_v1  ;;  %7307 = vmatmul.msk.f32.gmra.mxu1 %vm257_vm0, %v8751_v62  ;;  %v8943_v62 = vld [vmem:[%s11997_s0 + $0x148] sm:$0xff] }
  0xe5   :  { %v3159_v48 = vadd.f32 %v8777_v6, %v3055_v47  ;;  %7515 = vmatmul.msk.f32.gmra.mxu2 %vm257_vm0, %v8913_v60  ;;  %7723 = vmatmul.msk.f32.gmra.mxu3 %vm257_vm0, %v8928_v61 }
  0xe7   :  { %v3259_v51 = vmax.f32 %v3159_v48, 0.0 }
  0xe8   :  { %v1949_v52 = vpop.f32.mrf.mxu2  ;;  %v2776_v53 = vpop.f32.mrf.mxu3 }
  0xe9   :  { %3360 = vst.msk [vmem:[#allocation2 + $0x48] sm:$0xff] %vm3350_vm1, %v3259_v51  ;;  %v2229_v54 = vadd.f32 %v1949_v52, %v1223_v49  ;;  %v608_v55 = vpop.f32.mrf.mxu0  ;;  %v1225_v56 = vpop.f32.mrf.mxu1 }
  0xea   :  { %v1226_v2 = vadd.f32 %v1225_v56, %v608_v55 }
  0xeb   :  { %v3056_v63 = vadd.f32 %v2776_v53, %v2229_v54 }
  0xec   :  { %7208 = vmatmul.msk.f32.gmra.mxu0 %vm257_vm0, %v8782_v9  ;;  %7308 = vmatmul.msk.f32.gmra.mxu1 %vm257_vm0, %v8764_v1  ;;  %v8958_v1 = vld [vmem:[%s11997_s0 + $0x150] sm:$0xff] }
  0xed   :  { %v3160_v0 = vadd.f32 %v8777_v6, %v3056_v63  ;;  %7516 = vmatmul.msk.f32.gmra.mxu2 %vm257_vm0, %v8928_v61  ;;  %7724 = vmatmul.msk.f32.gmra.mxu3 %vm257_vm0, %v8943_v62 }
  0xef   :  { %v3260_v3 = vmax.f32 %v3160_v0, 0.0 }
  0xf0   :  { %v1952_v4 = vpop.f32.mrf.mxu2  ;;  %v2779_v5 = vpop.f32.mrf.mxu3 }
  0xf1   :  { %3361 = vst.msk [vmem:[#allocation2 + $0x50] sm:$0xff] %vm3350_vm1, %v3260_v3  ;;  %v2230_v7 = vadd.f32 %v1952_v4, %v1226_v2  ;;  %v611_v8 = vpop.f32.mrf.mxu0  ;;  %v1228_v10 = vpop.f32.mrf.mxu1 }
  0xf2   :  { %v1229_v13 = vadd.f32 %v1228_v10, %v611_v8 }
  0xf3   :  { %v3057_v11 = vadd.f32 %v2779_v5, %v2230_v7 }
  0xf4   :  { %7209 = vmatmul.msk.f32.gmra.mxu0 %vm257_vm0, %v8797_v19  ;;  %7309 = vmatmul.msk.f32.gmra.mxu1 %vm257_vm0, %v8782_v9  ;;  %v8973_v9 = vld [vmem:[%s11997_s0 + $0x158] sm:$0xff] }
  0xf5   :  { %v3161_v12 = vadd.f32 %v8777_v6, %v3057_v11  ;;  %7517 = vmatmul.msk.f32.gmra.mxu2 %vm257_vm0, %v8943_v62  ;;  %7725 = vmatmul.msk.f32.gmra.mxu3 %vm257_vm0, %v8958_v1 }
  0xf7   :  { %v3261_v58 = vmax.f32 %v3161_v12, 0.0 }
  0xf8   :  { %v1955_v14 = vpop.f32.mrf.mxu2  ;;  %v2782_v16 = vpop.f32.mrf.mxu3 }
  0xf9   :  { %3362 = vst.msk [vmem:[#allocation2 + $0x58] sm:$0xff] %vm3350_vm1, %v3261_v58  ;;  %v2231_v17 = vadd.f32 %v1955_v14, %v1229_v13  ;;  %v614_v18 = vpop.f32.mrf.mxu0  ;;  %v1231_v20 = vpop.f32.mrf.mxu1 }
  0xfa   :  { %v1232_v23 = vadd.f32 %v1231_v20, %v614_v18 }
  0xfb   :  { %v3058_v21 = vadd.f32 %v2782_v16, %v2231_v17 }
  0xfc   :  { %7210 = vmatmul.msk.f32.gmra.mxu0 %vm257_vm0, %v8812_v29  ;;  %7310 = vmatmul.msk.f32.gmra.mxu1 %vm257_vm0, %v8797_v19  ;;  %v8988_v19 = vld [vmem:[%s11997_s0 + $0x160] sm:$0xff] }
  0xfd   :  { %v3162_v22 = vadd.f32 %v8777_v6, %v3058_v21  ;;  %7518 = vmatmul.msk.f32.gmra.mxu2 %vm257_vm0, %v8958_v1  ;;  %7726 = vmatmul.msk.f32.gmra.mxu3 %vm257_vm0, %v8973_v9 }
  0xff   :  { %v3262_v24 = vmax.f32 %v3162_v22, 0.0 }
 0x100   :  { %v1958_v25 = vpop.f32.mrf.mxu2  ;;  %v2785_v26 = vpop.f32.mrf.mxu3 }
 0x101   :  { %3363 = vst.msk [vmem:[#allocation2 + $0x60] sm:$0xff] %vm3350_vm1, %v3262_v24  ;;  %v2232_v27 = vadd.f32 %v1958_v25, %v1232_v23  ;;  %v617_v28 = vpop.f32.mrf.mxu0  ;;  %v1234_v29 = vpop.f32.mrf.mxu1 }
 0x102   :  { %v1235_v33 = vadd.f32 %v1234_v29, %v617_v28 }
 0x103   :  { %v3059_v31 = vadd.f32 %v2785_v26, %v2232_v27 }
 0x104   :  { %7211 = vmatmul.msk.f32.gmra.mxu0 %vm257_vm0, %v8832_v40  ;;  %7311 = vmatmul.msk.f32.gmra.mxu1 %vm257_vm0, %v8827_v39  ;;  %v9008_v39 = vld [vmem:[%s11997_s0 + $0x170] sm:$0xff] }
 0x105   :  { %v3163_v32 = vadd.f32 %v8777_v6, %v3059_v31  ;;  %7519 = vmatmul.msk.f32.gmra.mxu2 %vm257_vm0, %v8988_v19  ;;  %7727 = vmatmul.msk.f32.gmra.mxu3 %vm257_vm0, %v8993_v30 }
 0x107   :  { %v3263_v34 = vmax.f32 %v3163_v32, 0.0 }
 0x108   :  { %v1961_v35 = vpop.f32.mrf.mxu2  ;;  %v2788_v36 = vpop.f32.mrf.mxu3 }
 0x109   :  { %3364 = vst.msk [vmem:[#allocation2 + $0x68] sm:$0xff] %vm3350_vm1, %v3263_v34  ;;  %v2233_v37 = vadd.f32 %v1961_v35, %v1235_v33  ;;  %v620_v38 = vpop.f32.mrf.mxu0  ;;  %v1237_v41 = vpop.f32.mrf.mxu1 }
 0x10a   :  { %v1238_v44 = vadd.f32 %v1237_v41, %v620_v38 }
 0x10b   :  { %v3060_v42 = vadd.f32 %v2788_v36, %v2233_v37 }
 0x10c   :  { %7212 = vmatmul.msk.f32.gmra.mxu0 %vm257_vm0, %v8847_v50  ;;  %7312 = vmatmul.msk.f32.gmra.mxu1 %vm257_vm0, %v8832_v40  ;;  %v9023_v40 = vld [vmem:[%s11997_s0 + $0x178] sm:$0xff] }
 0x10d   :  { %v3164_v43 = vadd.f32 %v8777_v6, %v3060_v42  ;;  %7520 = vmatmul.msk.f32.gmra.mxu2 %vm257_vm0, %v8993_v30  ;;  %7728 = vmatmul.msk.f32.gmra.mxu3 %vm257_vm0, %v9008_v39 }
 0x10f   :  { %v3264_v45 = vmax.f32 %v3164_v43, 0.0 }
 0x110   :  { %v1964_v46 = vpop.f32.mrf.mxu2  ;;  %v2791_v47 = vpop.f32.mrf.mxu3 }
 0x111   :  { %3365 = vst.msk [vmem:[#allocation2 + $0x70] sm:$0xff] %vm3350_vm1, %v3264_v45  ;;  %v2234_v48 = vadd.f32 %v1964_v46, %v1238_v44  ;;  %v623_v49 = vpop.f32.mrf.mxu0  ;;  %v1240_v51 = vpop.f32.mrf.mxu1 }
 0x112   :  { %v1241_v54 = vadd.f32 %v1240_v51, %v623_v49 }
 0x113   :  { %v3061_v52 = vadd.f32 %v2791_v47, %v2234_v48 }
 0x114   :  { %7213 = vmatmul.msk.f32.gmra.mxu0 %vm257_vm0, %v8862_v57  ;;  %7313 = vmatmul.msk.f32.gmra.mxu1 %vm257_vm0, %v8847_v50  ;;  %v9038_v50 = vld [vmem:[%s11997_s0 + $0x180] sm:$0xff] }
 0x115   :  { %v3165_v53 = vadd.f32 %v8777_v6, %v3061_v52  ;;  %7521 = vmatmul.msk.f32.gmra.mxu2 %vm257_vm0, %v9008_v39  ;;  %7729 = vmatmul.msk.f32.gmra.mxu3 %vm257_vm0, %v9023_v40 }
 0x117   :  { %v3265_v55 = vmax.f32 %v3165_v53, 0.0 }
 0x118   :  { %v1967_v56 = vpop.f32.mrf.mxu2  ;;  %v2794_v63 = vpop.f32.mrf.mxu3 }
 0x119   :  { %3366 = vst.msk [vmem:[#allocation2 + $0x78] sm:$0xff] %vm3350_vm1, %v3265_v55  ;;  %v2235_v0 = vadd.f32 %v1967_v56, %v1241_v54  ;;  %v626_v2 = vpop.f32.mrf.mxu0  ;;  %v1243_v3 = vpop.f32.mrf.mxu1 }
 0x11a   :  { %v1244_v7 = vadd.f32 %v1243_v3, %v626_v2 }
 0x11b   :  { %v3062_v4 = vadd.f32 %v2794_v63, %v2235_v0 }
 0x11c   :  { %7214 = vmatmul.msk.f32.gmra.mxu0 %vm257_vm0, %v8883_v15  ;;  %7314 = vmatmul.msk.f32.gmra.mxu1 %vm257_vm0, %v8862_v57  ;;  %v9053_v57 = vld [vmem:[%s11997_s0 + $0x188] sm:$0xff] }
 0x11d   :  { %v3166_v5 = vadd.f32 %v8777_v6, %v3062_v4  ;;  %7522 = vmatmul.msk.f32.gmra.mxu2 %vm257_vm0, %v9023_v40  ;;  %7730 = vmatmul.msk.f32.gmra.mxu3 %vm257_vm0, %v9038_v50 }
 0x11f   :  { %v3266_v8 = vmax.f32 %v3166_v5, 0.0 }
 0x120   :  { %v1970_v10 = vpop.f32.mrf.mxu2  ;;  %v2797_v11 = vpop.f32.mrf.mxu3 }
 0x121   :  { %3367 = vst.msk [vmem:[#allocation2 + $0x80] sm:$0xff] %vm3350_vm1, %v3266_v8  ;;  %v2236_v12 = vadd.f32 %v1970_v10, %v1244_v7  ;;  %v629_v13 = vpop.f32.mrf.mxu0  ;;  %v1246_v58 = vpop.f32.mrf.mxu1 }
 0x122   :  { %v1247_v17 = vadd.f32 %v1246_v58, %v629_v13 }
 0x123   :  { %v3063_v14 = vadd.f32 %v2797_v11, %v2236_v12 }
 0x124   :  { %7215 = vmatmul.msk.f32.gmra.mxu0 %vm257_vm0, %v8898_v59  ;;  %7315 = vmatmul.msk.f32.gmra.mxu1 %vm257_vm0, %v8883_v15  ;;  %v9068_v15 = vld [vmem:[%s11997_s0 + $0x190] sm:$0xff] }
 0x125   :  { %v3167_v16 = vadd.f32 %v8777_v6, %v3063_v14  ;;  %7523 = vmatmul.msk.f32.gmra.mxu2 %vm257_vm0, %v9038_v50  ;;  %7731 = vmatmul.msk.f32.gmra.mxu3 %vm257_vm0, %v9053_v57 }
 0x127   :  { %v3267_v18 = vmax.f32 %v3167_v16, 0.0 }
 0x128   :  { %v1973_v20 = vpop.f32.mrf.mxu2  ;;  %v2800_v21 = vpop.f32.mrf.mxu3 }
 0x129   :  { %3368 = vst.msk [vmem:[#allocation2 + $0x88] sm:$0xff] %vm3350_vm1, %v3267_v18  ;;  %v2237_v22 = vadd.f32 %v1973_v20, %v1247_v17  ;;  %v632_v23 = vpop.f32.mrf.mxu0  ;;  %v1249_v24 = vpop.f32.mrf.mxu1  ;;  %v9148_v18 = vld [vmem:[%s11997_s0 + $0x1c0] sm:$0xff] }
 0x12a   :  { %v1250_v27 = vadd.f32 %v1249_v24, %v632_v23 }
 0x12b   :  { %v3064_v25 = vadd.f32 %v2800_v21, %v2237_v22 }
 0x12c   :  { %7216 = vmatmul.msk.f32.gmra.mxu0 %vm257_vm0, %v8913_v60  ;;  %7316 = vmatmul.msk.f32.gmra.mxu1 %vm257_vm0, %v8898_v59  ;;  %v9083_v59 = vld [vmem:[%s11997_s0 + $0x198] sm:$0xff] }
 0x12d   :  { %v3168_v26 = vadd.f32 %v8777_v6, %v3064_v25  ;;  %7524 = vmatmul.msk.f32.gmra.mxu2 %vm257_vm0, %v9053_v57  ;;  %7732 = vmatmul.msk.f32.gmra.mxu3 %vm257_vm0, %v9068_v15 }
 0x12f   :  { %v3268_v28 = vmax.f32 %v3168_v26, 0.0 }
 0x130   :  { %v1976_v29 = vpop.f32.mrf.mxu2  ;;  %v2803_v31 = vpop.f32.mrf.mxu3 }
 0x131   :  { %3369 = vst.msk [vmem:[#allocation2 + $0x90] sm:$0xff] %vm3350_vm1, %v3268_v28  ;;  %v2238_v32 = vadd.f32 %v1976_v29, %v1250_v27  ;;  %v635_v33 = vpop.f32.mrf.mxu0  ;;  %v1252_v34 = vpop.f32.mrf.mxu1 }
 0x132   :  { %v1253_v37 = vadd.f32 %v1252_v34, %v635_v33 }
 0x133   :  { %v3065_v35 = vadd.f32 %v2803_v31, %v2238_v32 }
 0x134   :  { %7217 = vmatmul.msk.f32.gmra.mxu0 %vm257_vm0, %v8928_v61  ;;  %7317 = vmatmul.msk.f32.gmra.mxu1 %vm257_vm0, %v8913_v60  ;;  %v9098_v60 = vld [vmem:[%s11997_s0 + $0x1a0] sm:$0xff] }
 0x135   :  { %v3169_v36 = vadd.f32 %v8777_v6, %v3065_v35  ;;  %7525 = vmatmul.msk.f32.gmra.mxu2 %vm257_vm0, %v9068_v15  ;;  %7733 = vmatmul.msk.f32.gmra.mxu3 %vm257_vm0, %v9083_v59 }
 0x137   :  { %v3269_v38 = vmax.f32 %v3169_v36, 0.0 }
 0x138   :  { %v1979_v41 = vpop.f32.mrf.mxu2  ;;  %v2806_v42 = vpop.f32.mrf.mxu3 }
 0x139   :  { %3370 = vst.msk [vmem:[#allocation2 + $0x98] sm:$0xff] %vm3350_vm1, %v3269_v38  ;;  %v2239_v43 = vadd.f32 %v1979_v41, %v1253_v37  ;;  %v638_v44 = vpop.f32.mrf.mxu0  ;;  %v1255_v45 = vpop.f32.mrf.mxu1 }
 0x13a   :  { %v1256_v48 = vadd.f32 %v1255_v45, %v638_v44 }
 0x13b   :  { %v3066_v46 = vadd.f32 %v2806_v42, %v2239_v43 }
 0x13c   :  { %7218 = vmatmul.msk.f32.gmra.mxu0 %vm257_vm0, %v8943_v62  ;;  %7318 = vmatmul.msk.f32.gmra.mxu1 %vm257_vm0, %v8928_v61  ;;  %v9113_v61 = vld [vmem:[%s11997_s0 + $0x1a8] sm:$0xff] }
 0x13d   :  { %v3170_v47 = vadd.f32 %v8777_v6, %v3066_v46  ;;  %7526 = vmatmul.msk.f32.gmra.mxu2 %vm257_vm0, %v9083_v59  ;;  %7734 = vmatmul.msk.f32.gmra.mxu3 %vm257_vm0, %v9098_v60 }
 0x13f   :  { %v3270_v49 = vmax.f32 %v3170_v47, 0.0 }
 0x140   :  { %v1982_v51 = vpop.f32.mrf.mxu2  ;;  %v2809_v52 = vpop.f32.mrf.mxu3 }
 0x141   :  { %3371 = vst.msk [vmem:[#allocation2 + $0xa0] sm:$0xff] %vm3350_vm1, %v3270_v49  ;;  %v2240_v53 = vadd.f32 %v1982_v51, %v1256_v48  ;;  %v641_v54 = vpop.f32.mrf.mxu0  ;;  %v1258_v55 = vpop.f32.mrf.mxu1 }
 0x142   :  { %v1259_v0 = vadd.f32 %v1258_v55, %v641_v54 }
 0x143   :  { %v3067_v56 = vadd.f32 %v2809_v52, %v2240_v53 }
 0x144   :  { %7219 = vmatmul.msk.f32.gmra.mxu0 %vm257_vm0, %v8958_v1  ;;  %7319 = vmatmul.msk.f32.gmra.mxu1 %vm257_vm0, %v8943_v62  ;;  %v9128_v62 = vld [vmem:[%s11997_s0 + $0x1b0] sm:$0xff] }
 0x145   :  { %v3171_v63 = vadd.f32 %v8777_v6, %v3067_v56  ;;  %7527 = vmatmul.msk.f32.gmra.mxu2 %vm257_vm0, %v9098_v60  ;;  %7735 = vmatmul.msk.f32.gmra.mxu3 %vm257_vm0, %v9113_v61 }
 0x147   :  { %v3271_v2 = vmax.f32 %v3171_v63, 0.0 }
 0x148   :  { %v1985_v3 = vpop.f32.mrf.mxu2  ;;  %v2812_v4 = vpop.f32.mrf.mxu3 }
 0x149   :  { %3372 = vst.msk [vmem:[#allocation2 + $0xa8] sm:$0xff] %vm3350_vm1, %v3271_v2  ;;  %v2241_v5 = vadd.f32 %v1985_v3, %v1259_v0  ;;  %v644_v7 = vpop.f32.mrf.mxu0  ;;  %v1261_v8 = vpop.f32.mrf.mxu1 }
 0x14a   :  { %v1262_v12 = vadd.f32 %v1261_v8, %v644_v7 }
 0x14b   :  { %v3068_v10 = vadd.f32 %v2812_v4, %v2241_v5 }
 0x14c   :  { %7220 = vmatmul.msk.f32.gmra.mxu0 %vm257_vm0, %v8973_v9  ;;  %7320 = vmatmul.msk.f32.gmra.mxu1 %vm257_vm0, %v8958_v1  ;;  %v9143_v1 = vld [vmem:[%s11997_s0 + $0x1b8] sm:$0xff] }
 0x14d   :  { %v3172_v11 = vadd.f32 %v8777_v6, %v3068_v10  ;;  %7528 = vmatmul.msk.f32.gmra.mxu2 %vm257_vm0, %v9113_v61  ;;  %7736 = vmatmul.msk.f32.gmra.mxu3 %vm257_vm0, %v9128_v62 }
 0x14f   :  { %v3272_v13 = vmax.f32 %v3172_v11, 0.0 }
 0x150   :  { %v1988_v58 = vpop.f32.mrf.mxu2  ;;  %v2815_v14 = vpop.f32.mrf.mxu3 }
 0x151   :  { %3373 = vst.msk [vmem:[#allocation2 + $0xb0] sm:$0xff] %vm3350_vm1, %v3272_v13  ;;  %v2242_v16 = vadd.f32 %v1988_v58, %v1262_v12  ;;  %v647_v17 = vpop.f32.mrf.mxu0  ;;  %v1264_v9 = vpop.f32.mrf.mxu1 }
 0x152   :  { %v1265_v22 = vadd.f32 %v1264_v9, %v647_v17 }
 0x153   :  { %v3069_v20 = vadd.f32 %v2815_v14, %v2242_v16 }
 0x154   :  { %7221 = vmatmul.msk.f32.gmra.mxu0 %vm257_vm0, %v8993_v30  ;;  %7321 = vmatmul.msk.f32.gmra.mxu1 %vm257_vm0, %v8988_v19  ;;  %v9163_v19 = vld [vmem:[%s11997_s0 + $0x1c8] sm:$0xff] }
 0x155   :  { %v3173_v21 = vadd.f32 %v8777_v6, %v3069_v20  ;;  %7529 = vmatmul.msk.f32.gmra.mxu2 %vm257_vm0, %v9143_v1  ;;  %7737 = vmatmul.msk.f32.gmra.mxu3 %vm257_vm0, %v9148_v18 }
 0x157   :  { %v3273_v23 = vmax.f32 %v3173_v21, 0.0 }
 0x158   :  { %v1991_v24 = vpop.f32.mrf.mxu2  ;;  %v2818_v25 = vpop.f32.mrf.mxu3 }
 0x159   :  { %3374 = vst.msk [vmem:[#allocation2 + $0xb8] sm:$0xff] %vm3350_vm1, %v3273_v23  ;;  %v2243_v26 = vadd.f32 %v1991_v24, %v1265_v22  ;;  %v650_v27 = vpop.f32.mrf.mxu0  ;;  %v1267_v28 = vpop.f32.mrf.mxu1 }
 0x15a   :  { %v1268_v32 = vadd.f32 %v1267_v28, %v650_v27 }
 0x15b   :  { %v3070_v29 = vadd.f32 %v2818_v25, %v2243_v26 }
 0x15c   :  { %7222 = vmatmul.msk.f32.gmra.mxu0 %vm257_vm0, %v9008_v39  ;;  %7322 = vmatmul.msk.f32.gmra.mxu1 %vm257_vm0, %v8993_v30  ;;  %v9178_v30 = vld [vmem:[%s11997_s0 + $0x1d0] sm:$0xff] }
 0x15d   :  { %v3174_v31 = vadd.f32 %v8777_v6, %v3070_v29  ;;  %7530 = vmatmul.msk.f32.gmra.mxu2 %vm257_vm0, %v9148_v18  ;;  %7738 = vmatmul.msk.f32.gmra.mxu3 %vm257_vm0, %v9163_v19 }
 0x15f   :  { %v3274_v33 = vmax.f32 %v3174_v31, 0.0 }
 0x160   :  { %v1994_v34 = vpop.f32.mrf.mxu2  ;;  %v2821_v35 = vpop.f32.mrf.mxu3 }
 0x161   :  { %3375 = vst.msk [vmem:[#allocation2 + $0xc0] sm:$0xff] %vm3350_vm1, %v3274_v33  ;;  %v2244_v36 = vadd.f32 %v1994_v34, %v1268_v32  ;;  %v653_v37 = vpop.f32.mrf.mxu0  ;;  %v1270_v38 = vpop.f32.mrf.mxu1 }
 0x162   :  { %v1271_v43 = vadd.f32 %v1270_v38, %v653_v37 }
 0x163   :  { %v3071_v41 = vadd.f32 %v2821_v35, %v2244_v36 }
 0x164   :  { %7223 = vmatmul.msk.f32.gmra.mxu0 %vm257_vm0, %v9023_v40  ;;  %7323 = vmatmul.msk.f32.gmra.mxu1 %vm257_vm0, %v9008_v39  ;;  %v9193_v39 = vld [vmem:[%s11997_s0 + $0x1d8] sm:$0xff] }
 0x165   :  { %v3175_v42 = vadd.f32 %v8777_v6, %v3071_v41  ;;  %7531 = vmatmul.msk.f32.gmra.mxu2 %vm257_vm0, %v9163_v19  ;;  %7739 = vmatmul.msk.f32.gmra.mxu3 %vm257_vm0, %v9178_v30 }
 0x167   :  { %v3275_v44 = vmax.f32 %v3175_v42, 0.0 }
 0x168   :  { %v1997_v45 = vpop.f32.mrf.mxu2  ;;  %v2824_v46 = vpop.f32.mrf.mxu3 }
 0x169   :  { %3376 = vst.msk [vmem:[#allocation2 + $0xc8] sm:$0xff] %vm3350_vm1, %v3275_v44  ;;  %v2245_v47 = vadd.f32 %v1997_v45, %v1271_v43  ;;  %v656_v48 = vpop.f32.mrf.mxu0  ;;  %v1273_v49 = vpop.f32.mrf.mxu1  ;;  %v3468_v45 = vld [vmem:[%s12000_s3 + $0x8] sm:$0xff] }
 0x16a   :  { %v1274_v53 = vadd.f32 %v1273_v49, %v656_v48  ;;  %8331 = vmatpush.msrb.mxu3 %v3468_v45  ;;  %3668 = vmatpush.msrb.mxu1 %v3468_v45 }
 0x16b   :  { %v3072_v51 = vadd.f32 %v2824_v46, %v2245_v47  ;;  %v9274_v46 = vld [vmem:[%s11997_s0 + $0x200] sm:$0xff] }
 0x16c   :  { %7224 = vmatmul.msk.f32.gmra.mxu0 %vm257_vm0, %v9038_v50  ;;  %7324 = vmatmul.msk.f32.gmra.mxu1 %vm257_vm0, %v9023_v40  ;;  %v9208_v40 = vld [vmem:[%s11997_s0 + $0x1e0] sm:$0xff] }
 0x16d   :  { %v3176_v52 = vadd.f32 %v8777_v6, %v3072_v51  ;;  %7532 = vmatmul.msk.f32.gmra.mxu2 %vm257_vm0, %v9178_v30  ;;  %7740 = vmatmul.msk.f32.gmra.mxu3 %vm257_vm0, %v9193_v39 }
 0x16f   :  { %v3276_v54 = vmax.f32 %v3176_v52, 0.0 }
 0x170   :  { %v2000_v55 = vpop.f32.mrf.mxu2  ;;  %v2827_v56 = vpop.f32.mrf.mxu3 }
 0x171   :  { %3377 = vst.msk [vmem:[#allocation2 + $0xd0] sm:$0xff] %vm3350_vm1, %v3276_v54  ;;  %v2246_v63 = vadd.f32 %v2000_v55, %v1274_v53  ;;  %v659_v0 = vpop.f32.mrf.mxu0  ;;  %v1276_v2 = vpop.f32.mrf.mxu1 }
 0x172   :  { %v1277_v5 = vadd.f32 %v1276_v2, %v659_v0 }
 0x173   :  { %v3073_v3 = vadd.f32 %v2827_v56, %v2246_v63 }
 0x174   :  { %7225 = vmatmul.msk.f32.gmra.mxu0 %vm257_vm0, %v9053_v57  ;;  %7325 = vmatmul.msk.f32.gmra.mxu1 %vm257_vm0, %v9038_v50  ;;  %v9223_v50 = vld [vmem:[%s11997_s0 + $0x1e8] sm:$0xff] }
 0x175   :  { %v3177_v4 = vadd.f32 %v8777_v6, %v3073_v3  ;;  %7533 = vmatmul.msk.f32.gmra.mxu2 %vm257_vm0, %v9193_v39  ;;  %7741 = vmatmul.msk.f32.gmra.mxu3 %vm257_vm0, %v9208_v40 }
 0x177   :  { %v3277_v7 = vmax.f32 %v3177_v4, 0.0 }
 0x178   :  { %v2003_v8 = vpop.f32.mrf.mxu2  ;;  %v2830_v10 = vpop.f32.mrf.mxu3 }
 0x179   :  { %3378 = vst.msk [vmem:[#allocation2 + $0xd8] sm:$0xff] %vm3350_vm1, %v3277_v7  ;;  %v2247_v11 = vadd.f32 %v2003_v8, %v1277_v5  ;;  %v662_v12 = vpop.f32.mrf.mxu0  ;;  %v1279_v13 = vpop.f32.mrf.mxu1 }
 0x17a   :  { %v1280_v16 = vadd.f32 %v1279_v13, %v662_v12 }
 0x17b   :  { %v3074_v58 = vadd.f32 %v2830_v10, %v2247_v11  ;;  %v9318_v11 = vld [vmem:[%s11999_s2] ss:$0 sm:$0xff] }
 0x17c   :  { %7226 = vmatmul.msk.f32.gmra.mxu0 %vm257_vm0, %v9068_v15  ;;  %7326 = vmatmul.msk.f32.gmra.mxu1 %vm257_vm0, %v9053_v57  ;;  %v9238_v57 = vld [vmem:[%s11997_s0 + $0x1f0] sm:$0xff] }
 0x17d   :  { %v3178_v14 = vadd.f32 %v8777_v6, %v3074_v58  ;;  %7534 = vmatmul.msk.f32.gmra.mxu2 %vm257_vm0, %v9208_v40  ;;  %7742 = vmatmul.msk.f32.gmra.mxu3 %vm257_vm0, %v9223_v50 }
 0x17f   :  { %v3278_v17 = vmax.f32 %v3178_v14, 0.0 }
 0x180   :  { %v2006_v9 = vpop.f32.mrf.mxu2  ;;  %v2833_v20 = vpop.f32.mrf.mxu3 }
 0x181   :  { %3379 = vst.msk [vmem:[#allocation2 + $0xe0] sm:$0xff] %vm3350_vm1, %v3278_v17  ;;  %v2248_v21 = vadd.f32 %v2006_v9, %v1280_v16  ;;  %v665_v22 = vpop.f32.mrf.mxu0  ;;  %v1282_v23 = vpop.f32.mrf.mxu1 }
 0x182   :  { %v1283_v26 = vadd.f32 %v1282_v23, %v665_v22 }
 0x183   :  { %v3075_v24 = vadd.f32 %v2833_v20, %v2248_v21  ;;  %v9329_v20 = vld [vmem:[%s11997_s0 + $0x220] sm:$0xff] }
 0x184   :  { %7227 = vmatmul.msk.f32.gmra.mxu0 %vm257_vm0, %v9083_v59  ;;  %7327 = vmatmul.msk.f32.gmra.mxu1 %vm257_vm0, %v9068_v15  ;;  %v9253_v15 = vld [vmem:[%s11997_s0 + $0x1f8] sm:$0xff] }
 0x185   :  { %v3179_v25 = vadd.f32 %v8777_v6, %v3075_v24  ;;  %7535 = vmatmul.msk.f32.gmra.mxu2 %vm257_vm0, %v9223_v50  ;;  %7743 = vmatmul.msk.f32.gmra.mxu3 %vm257_vm0, %v9238_v57 }
 0x187   :  { %v3279_v27 = vmax.f32 %v3179_v25, 0.0 }
 0x188   :  { %v2009_v28 = vpop.f32.mrf.mxu2  ;;  %v2836_v29 = vpop.f32.mrf.mxu3 }
 0x189   :  { %3380 = vst.msk [vmem:[#allocation2 + $0xe8] sm:$0xff] %vm3350_vm1, %v3279_v27  ;;  %v2249_v31 = vadd.f32 %v2009_v28, %v1283_v26  ;;  %v668_v32 = vpop.f32.mrf.mxu0  ;;  %v1285_v33 = vpop.f32.mrf.mxu1 }
 0x18a   :  { %v1286_v36 = vadd.f32 %v1285_v33, %v668_v32 }
 0x18b   :  { %v3076_v34 = vadd.f32 %v2836_v29, %v2249_v31 }
 0x18c   :  { %7228 = vmatmul.msk.f32.gmra.mxu0 %vm257_vm0, %v9098_v60  ;;  %7328 = vmatmul.msk.f32.gmra.mxu1 %vm257_vm0, %v9083_v59  ;;  %v7798_v59 = vld [vmem:[%s12000_s3 + $0x28] sm:$0xff] }
 0x18d   :  { %v3180_v35 = vadd.f32 %v8777_v6, %v3076_v34  ;;  %7536 = vmatmul.msk.f32.gmra.mxu2 %vm257_vm0, %v9238_v57  ;;  %7744 = vmatmul.msk.f32.gmra.mxu3 %vm257_vm0, %v9253_v15 }
 0x18e   :  { %8327 = vmatpush.msrb.mxu2 %v7798_v59  ;;  %3555 = vmatpush.msrb.mxu0 %v7798_v59 }
 0x18f   :  { %v3280_v37 = vmax.f32 %v3180_v35, 0.0 }
 0x190   :  { %v2012_v38 = vpop.f32.mrf.mxu2  ;;  %v2839_v41 = vpop.f32.mrf.mxu3 }
 0x191   :  { %3381 = vst.msk [vmem:[#allocation2 + $0xf0] sm:$0xff] %vm3350_vm1, %v3280_v37  ;;  %v2250_v42 = vadd.f32 %v2012_v38, %v1286_v36  ;;  %v671_v43 = vpop.f32.mrf.mxu0  ;;  %v1288_v44 = vpop.f32.mrf.mxu1 }
 0x192   :  { %v1289_v49 = vadd.f32 %v1288_v44, %v671_v43 }
 0x193   :  { %v3077_v47 = vadd.f32 %v2839_v41, %v2250_v42 }
 0x194   :  { %7229 = vmatmul.msk.f32.gmra.mxu0 %vm257_vm0, %v9113_v61  ;;  %7329 = vmatmul.msk.f32.gmra.mxu1 %vm257_vm0, %v9098_v60  ;;  %v9289_v60 = vld [vmem:[%s11997_s0 + $0x208] sm:$0xff] }
 0x195   :  { %v3181_v48 = vadd.f32 %v8777_v6, %v3077_v47  ;;  %7537 = vmatmul.msk.f32.gmra.mxu2 %vm257_vm0, %v9253_v15  ;;  %7745 = vmatmul.msk.f32.gmra.mxu3 %vm257_vm0, %v9274_v46 }
 0x197   :  { %v3281_v51 = vmax.f32 %v3181_v48, 0.0 }
 0x198   :  { %v2015_v52 = vpop.f32.mrf.mxu2  ;;  %v2842_v53 = vpop.f32.mrf.mxu3 }
 0x199   :  { %3382 = vst.msk [vmem:[#allocation2 + $0xf8] sm:$0xff] %vm3350_vm1, %v3281_v51  ;;  %v2251_v54 = vadd.f32 %v2015_v52, %v1289_v49  ;;  %v674_v55 = vpop.f32.mrf.mxu0  ;;  %v1291_v56 = vpop.f32.mrf.mxu1 }
 0x19a   :  { %v1292_v2 = vadd.f32 %v1291_v56, %v674_v55 }
 0x19b   :  { %v3078_v63 = vadd.f32 %v2842_v53, %v2251_v54 }
 0x19c   :  { %7230 = vmatmul.msk.f32.gmra.mxu0 %vm257_vm0, %v9128_v62  ;;  %7330 = vmatmul.msk.f32.gmra.mxu1 %vm257_vm0, %v9113_v61  ;;  %v9304_v61 = vld [vmem:[%s11997_s0 + $0x210] sm:$0xff] }
 0x19d   :  { %v3182_v0 = vadd.f32 %v8777_v6, %v3078_v63  ;;  %7538 = vmatmul.msk.f32.gmra.mxu2 %vm257_vm0, %v9274_v46  ;;  %7746 = vmatmul.msk.f32.gmra.mxu3 %vm257_vm0, %v9289_v60  ;;  %v9309_v6 = vld [vmem:[%s11997_s0 + $0x218] sm:$0xff] }
 0x19f   :  { %v3282_v3 = vmax.f32 %v3182_v0, 0.0 }
 0x1a0   :  { %v2018_v4 = vpop.f32.mrf.mxu2  ;;  %v2845_v5 = vpop.f32.mrf.mxu3 }
 0x1a1   :  { %3383 = vst.msk [vmem:[#allocation2 + $0x100] sm:$0xff] %vm3350_vm1, %v3282_v3  ;;  %v2252_v7 = vadd.f32 %v2018_v4, %v1292_v2  ;;  %v677_v8 = vpop.f32.mrf.mxu0  ;;  %v1294_v62 = vpop.f32.mrf.mxu1 }
 0x1a2   :  { %v1295_v13 = vadd.f32 %v1294_v62, %v677_v8 }
 0x1a3   :  { %v3079_v10 = vadd.f32 %v2845_v5, %v2252_v7 }
 0x1a4   :  { %7231 = vmatmul.msk.f32.gmra.mxu0 %vm257_vm0, %v9148_v18  ;;  %7331 = vmatmul.msk.f32.gmra.mxu1 %vm257_vm0, %v9143_v1 }
 0x1a5   :  { %v3183_v12 = vadd.f32 %v9318_v11, %v3079_v10  ;;  %7539 = vmatmul.msk.f32.gmra.mxu2 %vm257_vm0, %v9304_v61  ;;  %7747 = vmatmul.msk.f32.gmra.mxu3 %vm257_vm0, %v9309_v6 }
 0x1a7   :  { %v3283_v58 = vmax.f32 %v3183_v12, 0.0 }
 0x1a8   :  { %v2021_v14 = vpop.f32.mrf.mxu2  ;;  %v2848_v16 = vpop.f32.mrf.mxu3 }
 0x1a9   :  { %3384 = vst.msk [vmem:[#allocation2 + $0x108] sm:$0xff] %vm3350_vm1, %v3283_v58  ;;  %v2253_v1 = vadd.f32 %v2021_v14, %v1295_v13  ;;  %v680_v17 = vpop.f32.mrf.mxu0  ;;  %v1297_v9 = vpop.f32.mrf.mxu1 }
 0x1aa   :  { %v1298_v23 = vadd.f32 %v1297_v9, %v680_v17 }
 0x1ab   :  { %v3080_v21 = vadd.f32 %v2848_v16, %v2253_v1 }
 0x1ac   :  { %7232 = vmatmul.msk.f32.gmra.mxu0 %vm257_vm0, %v9163_v19  ;;  %7332 = vmatmul.msk.f32.gmra.mxu1 %vm257_vm0, %v9148_v18  ;;  %v9344_v18 = vld [vmem:[%s11997_s0 + $0x228] sm:$0xff] }
 0x1ad   :  { %v3184_v22 = vadd.f32 %v9318_v11, %v3080_v21  ;;  %7540 = vmatmul.msk.f32.gmra.mxu2 %vm257_vm0, %v9309_v6  ;;  %7748 = vmatmul.msk.f32.gmra.mxu3 %vm257_vm0, %v9329_v20 }
 0x1af   :  { %v3284_v24 = vmax.f32 %v3184_v22, 0.0 }
 0x1b0   :  { %v2024_v25 = vpop.f32.mrf.mxu2  ;;  %v2851_v26 = vpop.f32.mrf.mxu3 }
 0x1b1   :  { %3385 = vst.msk [vmem:[#allocation2 + $0x110] sm:$0xff] %vm3350_vm1, %v3284_v24  ;;  %v2254_v27 = vadd.f32 %v2024_v25, %v1298_v23  ;;  %v683_v28 = vpop.f32.mrf.mxu0  ;;  %v1300_v29 = vpop.f32.mrf.mxu1 }
 0x1b2   :  { %v1301_v33 = vadd.f32 %v1300_v29, %v683_v28 }
 0x1b3   :  { %v3081_v31 = vadd.f32 %v2851_v26, %v2254_v27 }
 0x1b4   :  { %7233 = vmatmul.msk.f32.gmra.mxu0 %vm257_vm0, %v9178_v30  ;;  %7333 = vmatmul.msk.f32.gmra.mxu1 %vm257_vm0, %v9163_v19  ;;  %v9359_v19 = vld [vmem:[%s11997_s0 + $0x230] sm:$0xff] }
 0x1b5   :  { %v3185_v32 = vadd.f32 %v9318_v11, %v3081_v31  ;;  %7541 = vmatmul.msk.f32.gmra.mxu2 %vm257_vm0, %v9329_v20  ;;  %7749 = vmatmul.msk.f32.gmra.mxu3 %vm257_vm0, %v9344_v18 }
 0x1b7   :  { %v3285_v34 = vmax.f32 %v3185_v32, 0.0 }
 0x1b8   :  { %v2027_v35 = vpop.f32.mrf.mxu2  ;;  %v2854_v36 = vpop.f32.mrf.mxu3 }
 0x1b9   :  { %3386 = vst.msk [vmem:[#allocation2 + $0x118] sm:$0xff] %vm3350_vm1, %v3285_v34  ;;  %v2255_v37 = vadd.f32 %v2027_v35, %v1301_v33  ;;  %v686_v38 = vpop.f32.mrf.mxu0  ;;  %v1303_v41 = vpop.f32.mrf.mxu1 }
 0x1ba   :  { %v1304_v44 = vadd.f32 %v1303_v41, %v686_v38 }
 0x1bb   :  { %v3082_v42 = vadd.f32 %v2854_v36, %v2255_v37 }
 0x1bc   :  { %7234 = vmatmul.msk.f32.gmra.mxu0 %vm257_vm0, %v9193_v39  ;;  %7334 = vmatmul.msk.f32.gmra.mxu1 %vm257_vm0, %v9178_v30  ;;  %v9374_v30 = vld [vmem:[%s11997_s0 + $0x238] sm:$0xff] }
 0x1bd   :  { %v3186_v43 = vadd.f32 %v9318_v11, %v3082_v42  ;;  %7542 = vmatmul.msk.f32.gmra.mxu2 %vm257_vm0, %v9344_v18  ;;  %7750 = vmatmul.msk.f32.gmra.mxu3 %vm257_vm0, %v9359_v19 }
 0x1bf   :  { %v3286_v59 = vmax.f32 %v3186_v43, 0.0 }
 0x1c0   :  { %v2030_v45 = vpop.f32.mrf.mxu2  ;;  %v2857_v47 = vpop.f32.mrf.mxu3 }
 0x1c1   :  { %3387 = vst.msk [vmem:[#allocation2 + $0x120] sm:$0xff] %vm3350_vm1, %v3286_v59  ;;  %v2256_v48 = vadd.f32 %v2030_v45, %v1304_v44  ;;  %v689_v49 = vpop.f32.mrf.mxu0  ;;  %v1306_v51 = vpop.f32.mrf.mxu1 }
 0x1c2   :  { %v1307_v54 = vadd.f32 %v1306_v51, %v689_v49 }
 0x1c3   :  { %v3083_v52 = vadd.f32 %v2857_v47, %v2256_v48 }
 0x1c4   :  { %7235 = vmatmul.msk.f32.gmra.mxu0 %vm257_vm0, %v9208_v40  ;;  %7335 = vmatmul.msk.f32.gmra.mxu1 %vm257_vm0, %v9193_v39  ;;  %v9389_v39 = vld [vmem:[%s11997_s0 + $0x240] sm:$0xff] }
 0x1c5   :  { %v3187_v53 = vadd.f32 %v9318_v11, %v3083_v52  ;;  %7543 = vmatmul.msk.f32.gmra.mxu2 %vm257_vm0, %v9359_v19  ;;  %7751 = vmatmul.msk.f32.gmra.mxu3 %vm257_vm0, %v9374_v30 }
 0x1c7   :  { %v3287_v55 = vmax.f32 %v3187_v53, 0.0 }
 0x1c8   :  { %v2033_v56 = vpop.f32.mrf.mxu2  ;;  %v2860_v63 = vpop.f32.mrf.mxu3 }
 0x1c9   :  { %3388 = vst.msk [vmem:[#allocation2 + $0x128] sm:$0xff] %vm3350_vm1, %v3287_v55  ;;  %v2257_v0 = vadd.f32 %v2033_v56, %v1307_v54  ;;  %v692_v2 = vpop.f32.mrf.mxu0  ;;  %v1309_v3 = vpop.f32.mrf.mxu1  ;;  %v9469_v55 = vld [vmem:[%s11997_s0 + $0x270] sm:$0xff] }
 0x1ca   :  { %v1310_v7 = vadd.f32 %v1309_v3, %v692_v2 }
 0x1cb   :  { %v3084_v4 = vadd.f32 %v2860_v63, %v2257_v0 }
 0x1cc   :  { %7236 = vmatmul.msk.f32.gmra.mxu0 %vm257_vm0, %v9223_v50  ;;  %7336 = vmatmul.msk.f32.gmra.mxu1 %vm257_vm0, %v9208_v40  ;;  %v9404_v40 = vld [vmem:[%s11997_s0 + $0x248] sm:$0xff] }
 0x1cd   :  { %v3188_v5 = vadd.f32 %v9318_v11, %v3084_v4  ;;  %7544 = vmatmul.msk.f32.gmra.mxu2 %vm257_vm0, %v9374_v30  ;;  %7752 = vmatmul.msk.f32.gmra.mxu3 %vm257_vm0, %v9389_v39 }
 0x1cf   :  { %v3288_v8 = vmax.f32 %v3188_v5, 0.0 }
 0x1d0   :  { %v2036_v62 = vpop.f32.mrf.mxu2  ;;  %v2863_v10 = vpop.f32.mrf.mxu3 }
 0x1d1   :  { %3389 = vst.msk [vmem:[#allocation2 + $0x130] sm:$0xff] %vm3350_vm1, %v3288_v8  ;;  %v2258_v12 = vadd.f32 %v2036_v62, %v1310_v7  ;;  %v695_v13 = vpop.f32.mrf.mxu0  ;;  %v1312_v58 = vpop.f32.mrf.mxu1 }
 0x1d2   :  { %v1313_v1 = vadd.f32 %v1312_v58, %v695_v13 }
 0x1d3   :  { %v3085_v14 = vadd.f32 %v2863_v10, %v2258_v12 }
 0x1d4   :  { %7237 = vmatmul.msk.f32.gmra.mxu0 %vm257_vm0, %v9238_v57  ;;  %7337 = vmatmul.msk.f32.gmra.mxu1 %vm257_vm0, %v9223_v50  ;;  %v9419_v50 = vld [vmem:[%s11997_s0 + $0x250] sm:$0xff] }
 0x1d5   :  { %v3189_v16 = vadd.f32 %v9318_v11, %v3085_v14  ;;  %7545 = vmatmul.msk.f32.gmra.mxu2 %vm257_vm0, %v9389_v39  ;;  %7753 = vmatmul.msk.f32.gmra.mxu3 %vm257_vm0, %v9404_v40 }
 0x1d7   :  { %v3289_v17 = vmax.f32 %v3189_v16, 0.0 }
 0x1d8   :  { %v2039_v9 = vpop.f32.mrf.mxu2  ;;  %v2866_v21 = vpop.f32.mrf.mxu3 }
 0x1d9   :  { %3390 = vst.msk [vmem:[#allocation2 + $0x138] sm:$0xff] %vm3350_vm1, %v3289_v17  ;;  %v2259_v22 = vadd.f32 %v2039_v9, %v1313_v1  ;;  %v698_v23 = vpop.f32.mrf.mxu0  ;;  %v1315_v24 = vpop.f32.mrf.mxu1 }
 0x1da   :  { %v1316_v27 = vadd.f32 %v1315_v24, %v698_v23 }
 0x1db   :  { %v3086_v25 = vadd.f32 %v2866_v21, %v2259_v22 }
 0x1dc   :  { %7238 = vmatmul.msk.f32.gmra.mxu0 %vm257_vm0, %v9253_v15  ;;  %7338 = vmatmul.msk.f32.gmra.mxu1 %vm257_vm0, %v9238_v57  ;;  %v9434_v57 = vld [vmem:[%s11997_s0 + $0x258] sm:$0xff] }
 0x1dd   :  { %v3190_v26 = vadd.f32 %v9318_v11, %v3086_v25  ;;  %7546 = vmatmul.msk.f32.gmra.mxu2 %vm257_vm0, %v9404_v40  ;;  %7754 = vmatmul.msk.f32.gmra.mxu3 %vm257_vm0, %v9419_v50 }
 0x1df   :  { %v3290_v28 = vmax.f32 %v3190_v26, 0.0 }
 0x1e0   :  { %v2042_v29 = vpop.f32.mrf.mxu2  ;;  %v2869_v31 = vpop.f32.mrf.mxu3 }
 0x1e1   :  { %3391 = vst.msk [vmem:[#allocation2 + $0x140] sm:$0xff] %vm3350_vm1, %v3290_v28  ;;  %v2260_v32 = vadd.f32 %v2042_v29, %v1316_v27  ;;  %v701_v33 = vpop.f32.mrf.mxu0  ;;  %v1318_v34 = vpop.f32.mrf.mxu1 }
 0x1e2   :  { %v1319_v37 = vadd.f32 %v1318_v34, %v701_v33 }
 0x1e3   :  { %v3087_v35 = vadd.f32 %v2869_v31, %v2260_v32 }
 0x1e4   :  { %7239 = vmatmul.msk.f32.gmra.mxu0 %vm257_vm0, %v9274_v46  ;;  %7339 = vmatmul.msk.f32.gmra.mxu1 %vm257_vm0, %v9253_v15  ;;  %v9449_v15 = vld [vmem:[%s11997_s0 + $0x260] sm:$0xff] }
 0x1e5   :  { %v3191_v36 = vadd.f32 %v9318_v11, %v3087_v35  ;;  %7547 = vmatmul.msk.f32.gmra.mxu2 %vm257_vm0, %v9419_v50  ;;  %7755 = vmatmul.msk.f32.gmra.mxu3 %vm257_vm0, %v9434_v57 }
 0x1e7   :  { %v3291_v38 = vmax.f32 %v3191_v36, 0.0 }
 0x1e8   :  { %v2045_v41 = vpop.f32.mrf.mxu2  ;;  %v2872_v42 = vpop.f32.mrf.mxu3 }
 0x1e9   :  { %3392 = vst.msk [vmem:[#allocation2 + $0x148] sm:$0xff] %vm3350_vm1, %v3291_v38  ;;  %v2261_v43 = vadd.f32 %v2045_v41, %v1319_v37  ;;  %v704_v44 = vpop.f32.mrf.mxu0  ;;  %v1321_v59 = vpop.f32.mrf.mxu1 }
 0x1ea   :  { %v1322_v48 = vadd.f32 %v1321_v59, %v704_v44 }
 0x1eb   :  { %v3088_v45 = vadd.f32 %v2872_v42, %v2261_v43 }
 0x1ec   :  { %7240 = vmatmul.msk.f32.gmra.mxu0 %vm257_vm0, %v9289_v60  ;;  %7340 = vmatmul.msk.f32.gmra.mxu1 %vm257_vm0, %v9274_v46  ;;  %v9464_v46 = vld [vmem:[%s11997_s0 + $0x268] sm:$0xff] }
 0x1ed   :  { %v3192_v47 = vadd.f32 %v9318_v11, %v3088_v45  ;;  %7548 = vmatmul.msk.f32.gmra.mxu2 %vm257_vm0, %v9434_v57  ;;  %7756 = vmatmul.msk.f32.gmra.mxu3 %vm257_vm0, %v9449_v15 }
 0x1ef   :  { %v3292_v49 = vmax.f32 %v3192_v47, 0.0 }
 0x1f0   :  { %v2048_v51 = vpop.f32.mrf.mxu2  ;;  %v2875_v52 = vpop.f32.mrf.mxu3 }
 0x1f1   :  { %3393 = vst.msk [vmem:[#allocation2 + $0x150] sm:$0xff] %vm3350_vm1, %v3292_v49  ;;  %v2262_v53 = vadd.f32 %v2048_v51, %v1322_v48  ;;  %v707_v54 = vpop.f32.mrf.mxu0  ;;  %v1324_v60 = vpop.f32.mrf.mxu1 }
 0x1f2   :  { %v1325_v0 = vadd.f32 %v1324_v60, %v707_v54 }
 0x1f3   :  { %v3089_v56 = vadd.f32 %v2875_v52, %v2262_v53 }
 0x1f4   :  { %7241 = vmatmul.msk.f32.gmra.mxu0 %vm257_vm0, %v9309_v6  ;;  %7341 = vmatmul.msk.f32.gmra.mxu1 %vm257_vm0, %v9304_v61  ;;  %v9484_v61 = vld [vmem:[%s11997_s0 + $0x278] sm:$0xff] }
 0x1f5   :  { %v3193_v63 = vadd.f32 %v9318_v11, %v3089_v56  ;;  %7549 = vmatmul.msk.f32.gmra.mxu2 %vm257_vm0, %v9464_v46  ;;  %7757 = vmatmul.msk.f32.gmra.mxu3 %vm257_vm0, %v9469_v55 }
 0x1f7   :  { %v3293_v2 = vmax.f32 %v3193_v63, 0.0 }
 0x1f8   :  { %v2051_v3 = vpop.f32.mrf.mxu2  ;;  %v2878_v4 = vpop.f32.mrf.mxu3 }
 0x1f9   :  { %3394 = vst.msk [vmem:[#allocation2 + $0x158] sm:$0xff] %vm3350_vm1, %v3293_v2  ;;  %v2263_v5 = vadd.f32 %v2051_v3, %v1325_v0  ;;  %v710_v7 = vpop.f32.mrf.mxu0  ;;  %v1327_v8 = vpop.f32.mrf.mxu1 }
 0x1fa   :  { %v1328_v12 = vadd.f32 %v1327_v8, %v710_v7 }
 0x1fb   :  { %v3090_v62 = vadd.f32 %v2878_v4, %v2263_v5 }
 0x1fc   :  { %7242 = vmatmul.msk.f32.gmra.mxu0 %vm257_vm0, %v9329_v20  ;;  %7342 = vmatmul.msk.f32.gmra.mxu1 %vm257_vm0, %v9309_v6  ;;  %v9499_v6 = vld [vmem:[%s11997_s0 + $0x280] sm:$0xff] }
 0x1fd   :  { %v3194_v10 = vadd.f32 %v9318_v11, %v3090_v62  ;;  %7550 = vmatmul.msk.f32.gmra.mxu2 %vm257_vm0, %v9469_v55  ;;  %7758 = vmatmul.msk.f32.gmra.mxu3 %vm257_vm0, %v9484_v61 }
 0x1ff   :  { %v3294_v13 = vmax.f32 %v3194_v10, 0.0 }
 0x200   :  { %v2054_v58 = vpop.f32.mrf.mxu2  ;;  %v2881_v14 = vpop.f32.mrf.mxu3 }
 0x201   :  { %3395 = vst.msk [vmem:[#allocation2 + $0x160] sm:$0xff] %vm3350_vm1, %v3294_v13  ;;  %v2264_v16 = vadd.f32 %v2054_v58, %v1328_v12  ;;  %v713_v1 = vpop.f32.mrf.mxu0  ;;  %v1330_v17 = vpop.f32.mrf.mxu1 }
 0x202   :  { %v1331_v22 = vadd.f32 %v1330_v17, %v713_v1 }
 0x203   :  { %v3091_v9 = vadd.f32 %v2881_v14, %v2264_v16 }
 0x204   :  { %7243 = vmatmul.msk.f32.gmra.mxu0 %vm257_vm0, %v9344_v18  ;;  %7343 = vmatmul.msk.f32.gmra.mxu1 %vm257_vm0, %v9329_v20  ;;  %v9514_v20 = vld [vmem:[%s11997_s0 + $0x288] sm:$0xff] }
 0x205   :  { %v3195_v21 = vadd.f32 %v9318_v11, %v3091_v9  ;;  %7551 = vmatmul.msk.f32.gmra.mxu2 %vm257_vm0, %v9484_v61  ;;  %7759 = vmatmul.msk.f32.gmra.mxu3 %vm257_vm0, %v9499_v6 }
 0x207   :  { %v3295_v23 = vmax.f32 %v3195_v21, 0.0 }
 0x208   :  { %v2057_v24 = vpop.f32.mrf.mxu2  ;;  %v2884_v25 = vpop.f32.mrf.mxu3 }
 0x209   :  { %3396 = vst.msk [vmem:[#allocation2 + $0x168] sm:$0xff] %vm3350_vm1, %v3295_v23  ;;  %v2265_v26 = vadd.f32 %v2057_v24, %v1331_v22  ;;  %v716_v27 = vpop.f32.mrf.mxu0  ;;  %v1333_v28 = vpop.f32.mrf.mxu1 }
 0x20a   :  { %v1334_v32 = vadd.f32 %v1333_v28, %v716_v27 }
 0x20b   :  { %v3092_v29 = vadd.f32 %v2884_v25, %v2265_v26 }
 0x20c   :  { %7244 = vmatmul.msk.f32.gmra.mxu0 %vm257_vm0, %v9359_v19  ;;  %7344 = vmatmul.msk.f32.gmra.mxu1 %vm257_vm0, %v9344_v18  ;;  %v9529_v18 = vld [vmem:[%s11997_s0 + $0x290] sm:$0xff] }
 0x20d   :  { %v3196_v31 = vadd.f32 %v9318_v11, %v3092_v29  ;;  %7552 = vmatmul.msk.f32.gmra.mxu2 %vm257_vm0, %v9499_v6  ;;  %7760 = vmatmul.msk.f32.gmra.mxu3 %vm257_vm0, %v9514_v20 }
 0x20f   :  { %v3296_v33 = vmax.f32 %v3196_v31, 0.0 }
 0x210   :  { %v2060_v34 = vpop.f32.mrf.mxu2  ;;  %v2887_v35 = vpop.f32.mrf.mxu3 }
 0x211   :  { %3397 = vst.msk [vmem:[#allocation2 + $0x170] sm:$0xff] %vm3350_vm1, %v3296_v33  ;;  %v2266_v36 = vadd.f32 %v2060_v34, %v1334_v32  ;;  %v719_v37 = vpop.f32.mrf.mxu0  ;;  %v1336_v38 = vpop.f32.mrf.mxu1 }
 0x212   :  { %v1337_v43 = vadd.f32 %v1336_v38, %v719_v37 }
 0x213   :  { %v3093_v41 = vadd.f32 %v2887_v35, %v2266_v36 }
 0x214   :  { %7245 = vmatmul.msk.f32.gmra.mxu0 %vm257_vm0, %v9374_v30  ;;  %7345 = vmatmul.msk.f32.gmra.mxu1 %vm257_vm0, %v9359_v19  ;;  %v9544_v19 = vld [vmem:[%s11997_s0 + $0x298] sm:$0xff] }
 0x215   :  { %v3197_v42 = vadd.f32 %v9318_v11, %v3093_v41  ;;  %7553 = vmatmul.msk.f32.gmra.mxu2 %vm257_vm0, %v9514_v20  ;;  %7761 = vmatmul.msk.f32.gmra.mxu3 %vm257_vm0, %v9529_v18 }
 0x217   :  { %v3297_v44 = vmax.f32 %v3197_v42, 0.0 }
 0x218   :  { %v2063_v59 = vpop.f32.mrf.mxu2  ;;  %v2890_v45 = vpop.f32.mrf.mxu3 }
 0x219   :  { %3398 = vst.msk [vmem:[#allocation2 + $0x178] sm:$0xff] %vm3350_vm1, %v3297_v44  ;;  %v2267_v47 = vadd.f32 %v2063_v59, %v1337_v43  ;;  %v722_v48 = vpop.f32.mrf.mxu0  ;;  %v1339_v49 = vpop.f32.mrf.mxu1  ;;  %v9624_v44 = vld [vmem:[%s11997_s0 + $0x2c8] sm:$0xff] }
 0x21a   :  { %v1340_v53 = vadd.f32 %v1339_v49, %v722_v48 }
 0x21b   :  { %v3094_v51 = vadd.f32 %v2890_v45, %v2267_v47 }
 0x21c   :  { %7246 = vmatmul.msk.f32.gmra.mxu0 %vm257_vm0, %v9389_v39  ;;  %7346 = vmatmul.msk.f32.gmra.mxu1 %vm257_vm0, %v9374_v30  ;;  %v9559_v30 = vld [vmem:[%s11997_s0 + $0x2a0] sm:$0xff] }
 0x21d   :  { %v3198_v52 = vadd.f32 %v9318_v11, %v3094_v51  ;;  %7554 = vmatmul.msk.f32.gmra.mxu2 %vm257_vm0, %v9529_v18  ;;  %7762 = vmatmul.msk.f32.gmra.mxu3 %vm257_vm0, %v9544_v19 }
 0x21f   :  { %v3298_v54 = vmax.f32 %v3198_v52, 0.0 }
 0x220   :  { %v2066_v60 = vpop.f32.mrf.mxu2  ;;  %v2893_v56 = vpop.f32.mrf.mxu3 }
 0x221   :  { %3399 = vst.msk [vmem:[#allocation2 + $0x180] sm:$0xff] %vm3350_vm1, %v3298_v54  ;;  %v2268_v63 = vadd.f32 %v2066_v60, %v1340_v53  ;;  %v725_v0 = vpop.f32.mrf.mxu0  ;;  %v1342_v2 = vpop.f32.mrf.mxu1 }
 0x222   :  { %v1343_v5 = vadd.f32 %v1342_v2, %v725_v0 }
 0x223   :  { %v3095_v3 = vadd.f32 %v2893_v56, %v2268_v63 }
 0x224   :  { %7247 = vmatmul.msk.f32.gmra.mxu0 %vm257_vm0, %v9404_v40  ;;  %7347 = vmatmul.msk.f32.gmra.mxu1 %vm257_vm0, %v9389_v39  ;;  %v9574_v39 = vld [vmem:[%s11997_s0 + $0x2a8] sm:$0xff] }
 0x225   :  { %v3199_v4 = vadd.f32 %v9318_v11, %v3095_v3  ;;  %7555 = vmatmul.msk.f32.gmra.mxu2 %vm257_vm0, %v9544_v19  ;;  %7763 = vmatmul.msk.f32.gmra.mxu3 %vm257_vm0, %v9559_v30 }
 0x227   :  { %v3299_v7 = vmax.f32 %v3199_v4, 0.0 }
 0x228   :  { %v2069_v8 = vpop.f32.mrf.mxu2  ;;  %v2896_v62 = vpop.f32.mrf.mxu3 }
 0x229   :  { %3400 = vst.msk [vmem:[#allocation2 + $0x188] sm:$0xff] %vm3350_vm1, %v3299_v7  ;;  %v2269_v10 = vadd.f32 %v2069_v8, %v1343_v5  ;;  %v728_v12 = vpop.f32.mrf.mxu0  ;;  %v1345_v13 = vpop.f32.mrf.mxu1 }
 0x22a   :  { %v1346_v16 = vadd.f32 %v1345_v13, %v728_v12 }
 0x22b   :  { %v3096_v58 = vadd.f32 %v2896_v62, %v2269_v10 }
 0x22c   :  { %7248 = vmatmul.msk.f32.gmra.mxu0 %vm257_vm0, %v9419_v50  ;;  %7348 = vmatmul.msk.f32.gmra.mxu1 %vm257_vm0, %v9404_v40  ;;  %v9589_v40 = vld [vmem:[%s11997_s0 + $0x2b0] sm:$0xff] }
 0x22d   :  { %v3200_v14 = vadd.f32 %v9318_v11, %v3096_v58  ;;  %7556 = vmatmul.msk.f32.gmra.mxu2 %vm257_vm0, %v9559_v30  ;;  %7764 = vmatmul.msk.f32.gmra.mxu3 %vm257_vm0, %v9574_v39 }
 0x22f   :  { %v3300_v1 = vmax.f32 %v3200_v14, 0.0 }
 0x230   :  { %v2072_v17 = vpop.f32.mrf.mxu2  ;;  %v2899_v9 = vpop.f32.mrf.mxu3 }
 0x231   :  { %3401 = vst.msk [vmem:[#allocation2 + $0x190] sm:$0xff] %vm3350_vm1, %v3300_v1  ;;  %v2270_v21 = vadd.f32 %v2072_v17, %v1346_v16  ;;  %v731_v22 = vpop.f32.mrf.mxu0  ;;  %v1348_v23 = vpop.f32.mrf.mxu1  ;;  %v3467_v17 = vld [vmem:[%s12000_s3] sm:$0xff] }
 0x232   :  { %v1349_v26 = vadd.f32 %v1348_v23, %v731_v22  ;;  %8332 = vmatpush.msrb.mxu3 %v3467_v17  ;;  %3669 = vmatpush.msrb.mxu1 %v3467_v17 }
 0x233   :  { %v3097_v24 = vadd.f32 %v2899_v9, %v2270_v21  ;;  %v9675_v9 = vld [vmem:[%s11997_s0 + $0x2e0] sm:$0xff] }
 0x234   :  { %7249 = vmatmul.msk.f32.gmra.mxu0 %vm257_vm0, %v9434_v57  ;;  %7349 = vmatmul.msk.f32.gmra.mxu1 %vm257_vm0, %v9419_v50  ;;  %v9604_v50 = vld [vmem:[%s11997_s0 + $0x2b8] sm:$0xff] }
 0x235   :  { %v3201_v25 = vadd.f32 %v9318_v11, %v3097_v24  ;;  %7557 = vmatmul.msk.f32.gmra.mxu2 %vm257_vm0, %v9574_v39  ;;  %7765 = vmatmul.msk.f32.gmra.mxu3 %vm257_vm0, %v9589_v40 }
 0x237   :  { %v3301_v27 = vmax.f32 %v3201_v25, 0.0 }
 0x238   :  { %v2075_v28 = vpop.f32.mrf.mxu2  ;;  %v2902_v29 = vpop.f32.mrf.mxu3 }
 0x239   :  { %3402 = vst.msk [vmem:[#allocation2 + $0x198] sm:$0xff] %vm3350_vm1, %v3301_v27  ;;  %v2271_v31 = vadd.f32 %v2075_v28, %v1349_v26  ;;  %v734_v32 = vpop.f32.mrf.mxu0  ;;  %v1351_v33 = vpop.f32.mrf.mxu1 }
 0x23a   :  { %v1352_v36 = vadd.f32 %v1351_v33, %v734_v32 }
 0x23b   :  { %v3098_v34 = vadd.f32 %v2902_v29, %v2271_v31 }
 0x23c   :  { %7250 = vmatmul.msk.f32.gmra.mxu0 %vm257_vm0, %v9449_v15  ;;  %7350 = vmatmul.msk.f32.gmra.mxu1 %vm257_vm0, %v9434_v57  ;;  %v9619_v57 = vld [vmem:[%s11997_s0 + $0x2c0] sm:$0xff] }
 0x23d   :  { %v3202_v35 = vadd.f32 %v9318_v11, %v3098_v34  ;;  %7558 = vmatmul.msk.f32.gmra.mxu2 %vm257_vm0, %v9589_v40  ;;  %7766 = vmatmul.msk.f32.gmra.mxu3 %vm257_vm0, %v9604_v50 }
 0x23f   :  { %v3302_v37 = vmax.f32 %v3202_v35, 0.0 }
 0x240   :  { %v2078_v38 = vpop.f32.mrf.mxu2  ;;  %v2905_v41 = vpop.f32.mrf.mxu3 }
 0x241   :  { %3403 = vst.msk [vmem:[#allocation2 + $0x1a0] sm:$0xff] %vm3350_vm1, %v3302_v37  ;;  %v2272_v42 = vadd.f32 %v2078_v38, %v1352_v36  ;;  %v737_v43 = vpop.f32.mrf.mxu0  ;;  %v1354_v15 = vpop.f32.mrf.mxu1 }
 0x242   :  { %v1355_v47 = vadd.f32 %v1354_v15, %v737_v43 }
 0x243   :  { %v3099_v59 = vadd.f32 %v2905_v41, %v2272_v42 }
 0x244   :  { %7251 = vmatmul.msk.f32.gmra.mxu0 %vm257_vm0, %v9469_v55  ;;  %7351 = vmatmul.msk.f32.gmra.mxu1 %vm257_vm0, %v9464_v46  ;;  %v9639_v46 = vld [vmem:[%s11997_s0 + $0x2d0] sm:$0xff] }
 0x245   :  { %v3203_v45 = vadd.f32 %v9318_v11, %v3099_v59  ;;  %7559 = vmatmul.msk.f32.gmra.mxu2 %vm257_vm0, %v9619_v57  ;;  %7767 = vmatmul.msk.f32.gmra.mxu3 %vm257_vm0, %v9624_v44 }
 0x247   :  { %v3303_v48 = vmax.f32 %v3203_v45, 0.0 }
 0x248   :  { %v2081_v49 = vpop.f32.mrf.mxu2  ;;  %v2908_v51 = vpop.f32.mrf.mxu3 }
 0x249   :  { %3404 = vst.msk [vmem:[#allocation2 + $0x1a8] sm:$0xff] %vm3350_vm1, %v3303_v48  ;;  %v2273_v52 = vadd.f32 %v2081_v49, %v1355_v47  ;;  %v740_v53 = vpop.f32.mrf.mxu0  ;;  %v1357_v54 = vpop.f32.mrf.mxu1 }
 0x24a   :  { %v1358_v63 = vadd.f32 %v1357_v54, %v740_v53 }
 0x24b   :  { %v3100_v60 = vadd.f32 %v2908_v51, %v2273_v52 }
 0x24c   :  { %7252 = vmatmul.msk.f32.gmra.mxu0 %vm257_vm0, %v9484_v61  ;;  %7352 = vmatmul.msk.f32.gmra.mxu1 %vm257_vm0, %v9469_v55  ;;  %v9654_v55 = vld [vmem:[%s11997_s0 + $0x2d8] sm:$0xff] }
 0x24d   :  { %v3204_v56 = vadd.f32 %v9318_v11, %v3100_v60  ;;  %7560 = vmatmul.msk.f32.gmra.mxu2 %vm257_vm0, %v9624_v44  ;;  %7768 = vmatmul.msk.f32.gmra.mxu3 %vm257_vm0, %v9639_v46 }
 0x24f   :  { %v3304_v0 = vmax.f32 %v3204_v56, 0.0 }
 0x250   :  { %v2084_v2 = vpop.f32.mrf.mxu2  ;;  %v2911_v3 = vpop.f32.mrf.mxu3 }
 0x251   :  { %3405 = vst.msk [vmem:[#allocation2 + $0x1b0] sm:$0xff] %vm3350_vm1, %v3304_v0  ;;  %v2274_v4 = vadd.f32 %v2084_v2, %v1358_v63  ;;  %v743_v5 = vpop.f32.mrf.mxu0  ;;  %v1360_v7 = vpop.f32.mrf.mxu1 }
 0x252   :  { %v1361_v10 = vadd.f32 %v1360_v7, %v743_v5 }
 0x253   :  { %v3101_v8 = vadd.f32 %v2911_v3, %v2274_v4 }
 0x254   :  { %7253 = vmatmul.msk.f32.gmra.mxu0 %vm257_vm0, %v9499_v6  ;;  %7353 = vmatmul.msk.f32.gmra.mxu1 %vm257_vm0, %v9484_v61  ;;  %v7797_v61 = vld [vmem:[%s12000_s3 + $0x20] sm:$0xff] }
 0x255   :  { %v3205_v62 = vadd.f32 %v9318_v11, %v3101_v8  ;;  %7561 = vmatmul.msk.f32.gmra.mxu2 %vm257_vm0, %v9639_v46  ;;  %7769 = vmatmul.msk.f32.gmra.mxu3 %vm257_vm0, %v9654_v55 }
 0x256   :  { %8328 = vmatpush.msrb.mxu2 %v7797_v61  ;;  %3556 = vmatpush.msrb.mxu0 %v7797_v61 }
 0x257   :  { %v3305_v12 = vmax.f32 %v3205_v62, 0.0 }
 0x258   :  { %v2087_v13 = vpop.f32.mrf.mxu2  ;;  %v2914_v58 = vpop.f32.mrf.mxu3 }
 0x259   :  { %3406 = vst.msk [vmem:[#allocation2 + $0x1b8] sm:$0xff] %vm3350_vm1, %v3305_v12  ;;  %v2275_v14 = vadd.f32 %v2087_v13, %v1361_v10  ;;  %v746_v16 = vpop.f32.mrf.mxu0  ;;  %v1363_v1 = vpop.f32.mrf.mxu1 }
 0x25a   :  { %v1364_v23 = vadd.f32 %v1363_v1, %v746_v16 }
 0x25b   :  { %v3102_v21 = vadd.f32 %v2914_v58, %v2275_v14 }
 0x25c   :  { %7254 = vmatmul.msk.f32.gmra.mxu0 %vm257_vm0, %v9514_v20  ;;  %7354 = vmatmul.msk.f32.gmra.mxu1 %vm257_vm0, %v9499_v6  ;;  %v9690_v6 = vld [vmem:[%s11997_s0 + $0x2e8] sm:$0xff] }
 0x25d   :  { %v3206_v22 = vadd.f32 %v9318_v11, %v3102_v21  ;;  %7562 = vmatmul.msk.f32.gmra.mxu2 %vm257_vm0, %v9654_v55  ;;  %7770 = vmatmul.msk.f32.gmra.mxu3 %vm257_vm0, %v9675_v9 }
 0x25f   :  { %v3306_v24 = vmax.f32 %v3206_v22, 0.0 }
 0x260   :  { %v2090_v25 = vpop.f32.mrf.mxu2  ;;  %v2917_v26 = vpop.f32.mrf.mxu3 }
 0x261   :  { %3407 = vst.msk [vmem:[#allocation2 + $0x1c0] sm:$0xff] %vm3350_vm1, %v3306_v24  ;;  %v2276_v27 = vadd.f32 %v2090_v25, %v1364_v23  ;;  %v749_v28 = vpop.f32.mrf.mxu0  ;;  %v1366_v29 = vpop.f32.mrf.mxu1 }
 0x262   :  { %v1367_v33 = vadd.f32 %v1366_v29, %v749_v28 }
 0x263   :  { %v3103_v31 = vadd.f32 %v2917_v26, %v2276_v27 }
 0x264   :  { %7255 = vmatmul.msk.f32.gmra.mxu0 %vm257_vm0, %v9529_v18  ;;  %7355 = vmatmul.msk.f32.gmra.mxu1 %vm257_vm0, %v9514_v20  ;;  %v9705_v20 = vld [vmem:[%s11997_s0 + $0x2f0] sm:$0xff] }
 0x265   :  { %v3207_v32 = vadd.f32 %v9318_v11, %v3103_v31  ;;  %7563 = vmatmul.msk.f32.gmra.mxu2 %vm257_vm0, %v9675_v9  ;;  %7771 = vmatmul.msk.f32.gmra.mxu3 %vm257_vm0, %v9690_v6 }
 0x267   :  { %v3307_v34 = vmax.f32 %v3207_v32, 0.0 }
 0x268   :  { %v2093_v35 = vpop.f32.mrf.mxu2  ;;  %v2920_v36 = vpop.f32.mrf.mxu3 }
 0x269   :  { %3408 = vst.msk [vmem:[#allocation2 + $0x1c8] sm:$0xff] %vm3350_vm1, %v3307_v34  ;;  %v2277_v37 = vadd.f32 %v2093_v35, %v1367_v33  ;;  %v752_v38 = vpop.f32.mrf.mxu0  ;;  %v1369_v41 = vpop.f32.mrf.mxu1  ;;  %v9785_v34 = vld [vmem:[%s11997_s0 + $0x320] sm:$0xff] }
 0x26a   :  { %v1370_v15 = vadd.f32 %v1369_v41, %v752_v38 }
 0x26b   :  { %v3104_v42 = vadd.f32 %v2920_v36, %v2277_v37 }
 0x26c   :  { %7256 = vmatmul.msk.f32.gmra.mxu0 %vm257_vm0, %v9544_v19  ;;  %7356 = vmatmul.msk.f32.gmra.mxu1 %vm257_vm0, %v9529_v18  ;;  %v9720_v18 = vld [vmem:[%s11997_s0 + $0x2f8] sm:$0xff] }
 0x26d   :  { %v3208_v43 = vadd.f32 %v9318_v11, %v3104_v42  ;;  %7564 = vmatmul.msk.f32.gmra.mxu2 %vm257_vm0, %v9690_v6  ;;  %7772 = vmatmul.msk.f32.gmra.mxu3 %vm257_vm0, %v9705_v20 }
 0x26f   :  { %v3308_v59 = vmax.f32 %v3208_v43, 0.0 }
 0x270   :  { %v2096_v45 = vpop.f32.mrf.mxu2  ;;  %v2923_v47 = vpop.f32.mrf.mxu3 }
 0x271   :  { %3409 = vst.msk [vmem:[#allocation2 + $0x1d0] sm:$0xff] %vm3350_vm1, %v3308_v59  ;;  %v2278_v48 = vadd.f32 %v2096_v45, %v1370_v15  ;;  %v755_v49 = vpop.f32.mrf.mxu0  ;;  %v1372_v51 = vpop.f32.mrf.mxu1 }
 0x272   :  { %v1373_v54 = vadd.f32 %v1372_v51, %v755_v49 }
 0x273   :  { %v3105_v52 = vadd.f32 %v2923_v47, %v2278_v48 }
 0x274   :  { %7257 = vmatmul.msk.f32.gmra.mxu0 %vm257_vm0, %v9559_v30  ;;  %7357 = vmatmul.msk.f32.gmra.mxu1 %vm257_vm0, %v9544_v19  ;;  %v9735_v19 = vld [vmem:[%s11997_s0 + $0x300] sm:$0xff] }
 0x275   :  { %v3209_v53 = vadd.f32 %v9318_v11, %v3105_v52  ;;  %7565 = vmatmul.msk.f32.gmra.mxu2 %vm257_vm0, %v9705_v20  ;;  %7773 = vmatmul.msk.f32.gmra.mxu3 %vm257_vm0, %v9720_v18 }
 0x277   :  { %v3309_v60 = vmax.f32 %v3209_v53, 0.0 }
 0x278   :  { %v2099_v56 = vpop.f32.mrf.mxu2  ;;  %v2926_v63 = vpop.f32.mrf.mxu3 }
 0x279   :  { %3410 = vst.msk [vmem:[#allocation2 + $0x1d8] sm:$0xff] %vm3350_vm1, %v3309_v60  ;;  %v2279_v0 = vadd.f32 %v2099_v56, %v1373_v54  ;;  %v758_v2 = vpop.f32.mrf.mxu0  ;;  %v1375_v3 = vpop.f32.mrf.mxu1 }
 0x27a   :  { %v1376_v7 = vadd.f32 %v1375_v3, %v758_v2 }
 0x27b   :  { %v3106_v4 = vadd.f32 %v2926_v63, %v2279_v0 }
 0x27c   :  { %7258 = vmatmul.msk.f32.gmra.mxu0 %vm257_vm0, %v9574_v39  ;;  %7358 = vmatmul.msk.f32.gmra.mxu1 %vm257_vm0, %v9559_v30  ;;  %v9750_v30 = vld [vmem:[%s11997_s0 + $0x308] sm:$0xff] }
 0x27d   :  { %v3210_v5 = vadd.f32 %v9318_v11, %v3106_v4  ;;  %7566 = vmatmul.msk.f32.gmra.mxu2 %vm257_vm0, %v9720_v18  ;;  %7774 = vmatmul.msk.f32.gmra.mxu3 %vm257_vm0, %v9735_v19 }
 0x27f   :  { %v3310_v8 = vmax.f32 %v3210_v5, 0.0 }
 0x280   :  { %v2102_v62 = vpop.f32.mrf.mxu2  ;;  %v2929_v10 = vpop.f32.mrf.mxu3 }
 0x281   :  { %3411 = vst.msk [vmem:[#allocation2 + $0x1e0] sm:$0xff] %vm3350_vm1, %v3310_v8  ;;  %v2280_v12 = vadd.f32 %v2102_v62, %v1376_v7  ;;  %v761_v13 = vpop.f32.mrf.mxu0  ;;  %v1378_v58 = vpop.f32.mrf.mxu1 }
 0x282   :  { %v1379_v1 = vadd.f32 %v1378_v58, %v761_v13 }
 0x283   :  { %v3107_v14 = vadd.f32 %v2929_v10, %v2280_v12 }
 0x284   :  { %7259 = vmatmul.msk.f32.gmra.mxu0 %vm257_vm0, %v9589_v40  ;;  %7359 = vmatmul.msk.f32.gmra.mxu1 %vm257_vm0, %v9574_v39  ;;  %v9765_v39 = vld [vmem:[%s11997_s0 + $0x310] sm:$0xff] }
 0x285   :  { %v3211_v16 = vadd.f32 %v9318_v11, %v3107_v14  ;;  %7567 = vmatmul.msk.f32.gmra.mxu2 %vm257_vm0, %v9735_v19  ;;  %7775 = vmatmul.msk.f32.gmra.mxu3 %vm257_vm0, %v9750_v30 }
 0x287   :  { %v3311_v61 = vmax.f32 %v3211_v16, 0.0 }
 0x288   :  { %v2105_v17 = vpop.f32.mrf.mxu2  ;;  %v2932_v21 = vpop.f32.mrf.mxu3 }
 0x289   :  { %3412 = vst.msk [vmem:[#allocation2 + $0x1e8] sm:$0xff] %vm3350_vm1, %v3311_v61  ;;  %v2281_v22 = vadd.f32 %v2105_v17, %v1379_v1  ;;  %v764_v23 = vpop.f32.mrf.mxu0  ;;  %v1381_v24 = vpop.f32.mrf.mxu1  ;;  %v9854_v17 = vld [vmem:[%s11999_s2] ss:$0 sm:$0xff] }
 0x28a   :  { %v1382_v27 = vadd.f32 %v1381_v24, %v764_v23 }
 0x28b   :  { %v3108_v25 = vadd.f32 %v2932_v21, %v2281_v22 }
 0x28c   :  { %7260 = vmatmul.msk.f32.gmra.mxu0 %vm257_vm0, %v9604_v50  ;;  %7360 = vmatmul.msk.f32.gmra.mxu1 %vm257_vm0, %v9589_v40  ;;  %v9780_v40 = vld [vmem:[%s11997_s0 + $0x318] sm:$0xff] }
 0x28d   :  { %v3212_v26 = vadd.f32 %v9318_v11, %v3108_v25  ;;  %7568 = vmatmul.msk.f32.gmra.mxu2 %vm257_vm0, %v9750_v30  ;;  %7776 = vmatmul.msk.f32.gmra.mxu3 %vm257_vm0, %v9765_v39 }
 0x28f   :  { %v3312_v28 = vmax.f32 %v3212_v26, 0.0 }
 0x290   :  { %v2108_v29 = vpop.f32.mrf.mxu2  ;;  %v2935_v31 = vpop.f32.mrf.mxu3 }
 0x291   :  { %3413 = vst.msk [vmem:[#allocation2 + $0x1f0] sm:$0xff] %vm3350_vm1, %v3312_v28  ;;  %v2282_v32 = vadd.f32 %v2108_v29, %v1382_v27  ;;  %v767_v33 = vpop.f32.mrf.mxu0  ;;  %v1384_v50 = vpop.f32.mrf.mxu1  ;;  %v9865_v28 = vld [vmem:[%s11997_s0 + $0x348] sm:$0xff] }
 0x292   :  { %v1385_v37 = vadd.f32 %v1384_v50, %v767_v33 }
 0x293   :  { %v3109_v35 = vadd.f32 %v2935_v31, %v2282_v32 }
 0x294   :  { %7261 = vmatmul.msk.f32.gmra.mxu0 %vm257_vm0, %v9624_v44  ;;  %7361 = vmatmul.msk.f32.gmra.mxu1 %vm257_vm0, %v9619_v57  ;;  %v9800_v57 = vld [vmem:[%s11997_s0 + $0x328] sm:$0xff] }
 0x295   :  { %v3213_v36 = vadd.f32 %v9318_v11, %v3109_v35  ;;  %7569 = vmatmul.msk.f32.gmra.mxu2 %vm257_vm0, %v9780_v40  ;;  %7777 = vmatmul.msk.f32.gmra.mxu3 %vm257_vm0, %v9785_v34 }
 0x297   :  { %v3313_v38 = vmax.f32 %v3213_v36, 0.0 }
 0x298   :  { %v2111_v41 = vpop.f32.mrf.mxu2  ;;  %v2938_v42 = vpop.f32.mrf.mxu3 }
 0x299   :  { %3414 = vst.msk [vmem:[#allocation2 + $0x1f8] sm:$0xff] %vm3350_vm1, %v3313_v38  ;;  %v2283_v43 = vadd.f32 %v2111_v41, %v1385_v37  ;;  %v770_v15 = vpop.f32.mrf.mxu0  ;;  %v1387_v59 = vpop.f32.mrf.mxu1 }
 0x29a   :  { %v1388_v48 = vadd.f32 %v1387_v59, %v770_v15 }
 0x29b   :  { %v3110_v45 = vadd.f32 %v2938_v42, %v2283_v43 }
 0x29c   :  { %7262 = vmatmul.msk.f32.gmra.mxu0 %vm257_vm0, %v9639_v46  ;;  %7362 = vmatmul.msk.f32.gmra.mxu1 %vm257_vm0, %v9624_v44  ;;  %v9815_v44 = vld [vmem:[%s11997_s0 + $0x330] sm:$0xff] }
 0x29d   :  { %v3214_v47 = vadd.f32 %v9318_v11, %v3110_v45  ;;  %7570 = vmatmul.msk.f32.gmra.mxu2 %vm257_vm0, %v9785_v34  ;;  %7778 = vmatmul.msk.f32.gmra.mxu3 %vm257_vm0, %v9800_v57 }
 0x29f   :  { %v3314_v49 = vmax.f32 %v3214_v47, 0.0 }
 0x2a0   :  { %v2114_v51 = vpop.f32.mrf.mxu2  ;;  %v2941_v52 = vpop.f32.mrf.mxu3 }
 0x2a1   :  { %3415 = vst.msk [vmem:[#allocation2 + $0x200] sm:$0xff] %vm3350_vm1, %v3314_v49  ;;  %v2284_v53 = vadd.f32 %v2114_v51, %v1388_v48  ;;  %v773_v54 = vpop.f32.mrf.mxu0  ;;  %v1390_v60 = vpop.f32.mrf.mxu1 }
 0x2a2   :  { %v1391_v0 = vadd.f32 %v1390_v60, %v773_v54 }
 0x2a3   :  { %v3111_v56 = vadd.f32 %v2941_v52, %v2284_v53 }
 0x2a4   :  { %7263 = vmatmul.msk.f32.gmra.mxu0 %vm257_vm0, %v9654_v55  ;;  %7363 = vmatmul.msk.f32.gmra.mxu1 %vm257_vm0, %v9639_v46  ;;  %v9830_v46 = vld [vmem:[%s11997_s0 + $0x338] sm:$0xff] }
 0x2a5   :  { %v3215_v63 = vadd.f32 %v9318_v11, %v3111_v56  ;;  %7571 = vmatmul.msk.f32.gmra.mxu2 %vm257_vm0, %v9800_v57  ;;  %7779 = vmatmul.msk.f32.gmra.mxu3 %vm257_vm0, %v9815_v44 }
 0x2a7   :  { %v3315_v2 = vmax.f32 %v3215_v63, 0.0 }
 0x2a8   :  { %v2117_v3 = vpop.f32.mrf.mxu2  ;;  %v2944_v4 = vpop.f32.mrf.mxu3 }
 0x2a9   :  { %3416 = vst.msk [vmem:[#allocation2 + $0x208] sm:$0xff] %vm3350_vm1, %v3315_v2  ;;  %v2285_v5 = vadd.f32 %v2117_v3, %v1391_v0  ;;  %v776_v7 = vpop.f32.mrf.mxu0  ;;  %v1393_v8 = vpop.f32.mrf.mxu1 }
 0x2aa   :  { %v1394_v12 = vadd.f32 %v1393_v8, %v776_v7 }
 0x2ab   :  { %v3112_v62 = vadd.f32 %v2944_v4, %v2285_v5 }
 0x2ac   :  { %7264 = vmatmul.msk.f32.gmra.mxu0 %vm257_vm0, %v9675_v9  ;;  %7364 = vmatmul.msk.f32.gmra.mxu1 %vm257_vm0, %v9654_v55  ;;  %v9845_v55 = vld [vmem:[%s11997_s0 + $0x340] sm:$0xff] }
 0x2ad   :  { %v3216_v10 = vadd.f32 %v9318_v11, %v3112_v62  ;;  %7572 = vmatmul.msk.f32.gmra.mxu2 %vm257_vm0, %v9815_v44  ;;  %7780 = vmatmul.msk.f32.gmra.mxu3 %vm257_vm0, %v9830_v46 }
 0x2af   :  { %v3316_v13 = vmax.f32 %v3216_v10, 0.0 }
 0x2b0   :  { %v2120_v58 = vpop.f32.mrf.mxu2  ;;  %v2947_v14 = vpop.f32.mrf.mxu3 }
 0x2b1   :  { %3417 = vst.msk [vmem:[#allocation2 + $0x210] sm:$0xff] %vm3350_vm1, %v3316_v13  ;;  %v2286_v16 = vadd.f32 %v2120_v58, %v1394_v12  ;;  %v779_v1 = vpop.f32.mrf.mxu0  ;;  %v1396_v61 = vpop.f32.mrf.mxu1 }
 0x2b2   :  { %v1397_v22 = vadd.f32 %v1396_v61, %v779_v1 }
 0x2b3   :  { %v3113_v11 = vadd.f32 %v2947_v14, %v2286_v16 }
 0x2b4   :  { %7265 = vmatmul.msk.f32.gmra.mxu0 %vm257_vm0, %v9690_v6  ;;  %7365 = vmatmul.msk.f32.gmra.mxu1 %vm257_vm0, %v9675_v9 }
 0x2b5   :  { %v3217_v21 = vadd.f32 %v9854_v17, %v3113_v11  ;;  %7573 = vmatmul.msk.f32.gmra.mxu2 %vm257_vm0, %v9830_v46  ;;  %7781 = vmatmul.msk.f32.gmra.mxu3 %vm257_vm0, %v9845_v55 }
 0x2b7   :  { %v3317_v23 = vmax.f32 %v3217_v21, 0.0 }
 0x2b8   :  { %v2123_v24 = vpop.f32.mrf.mxu2  ;;  %v2950_v25 = vpop.f32.mrf.mxu3 }
 0x2b9   :  { %3418 = vst.msk [vmem:[#allocation2 + $0x218] sm:$0xff] %vm3350_vm1, %v3317_v23  ;;  %v2287_v9 = vadd.f32 %v2123_v24, %v1397_v22  ;;  %v782_v26 = vpop.f32.mrf.mxu0  ;;  %v1399_v27 = vpop.f32.mrf.mxu1  ;;  %v7679_v23 = vld [vmem:[%s11997_s0 + $0x378] sm:$0xff] }
 0x2ba   :  { %v1400_v32 = vadd.f32 %v1399_v27, %v782_v26 }
 0x2bb   :  { %v3114_v29 = vadd.f32 %v2950_v25, %v2287_v9 }
 0x2bc   :  { %7266 = vmatmul.msk.f32.gmra.mxu0 %vm257_vm0, %v9705_v20  ;;  %7366 = vmatmul.msk.f32.gmra.mxu1 %vm257_vm0, %v9690_v6  ;;  %v9880_v6 = vld [vmem:[%s11997_s0 + $0x350] sm:$0xff] }
 0x2bd   :  { %v3218_v31 = vadd.f32 %v9854_v17, %v3114_v29  ;;  %7574 = vmatmul.msk.f32.gmra.mxu2 %vm257_vm0, %v9845_v55  ;;  %7782 = vmatmul.msk.f32.gmra.mxu3 %vm257_vm0, %v9865_v28 }
 0x2bf   :  { %v3318_v33 = vmax.f32 %v3218_v31, 0.0 }
 0x2c0   :  { %v2126_v50 = vpop.f32.mrf.mxu2  ;;  %v2953_v35 = vpop.f32.mrf.mxu3 }
 0x2c1   :  { %3419 = vst.msk [vmem:[#allocation2 + $0x220] sm:$0xff] %vm3350_vm1, %v3318_v33  ;;  %v2288_v36 = vadd.f32 %v2126_v50, %v1400_v32  ;;  %v785_v37 = vpop.f32.mrf.mxu0  ;;  %v1402_v38 = vpop.f32.mrf.mxu1  ;;  %v7680_v50 = vld [vmem:[%s11997_s0 + $0x380] sm:$0xff] }
 0x2c2   :  { %v1403_v43 = vadd.f32 %v1402_v38, %v785_v37 }
 0x2c3   :  { %v3115_v41 = vadd.f32 %v2953_v35, %v2288_v36 }
 0x2c4   :  { %7267 = vmatmul.msk.f32.gmra.mxu0 %vm257_vm0, %v9720_v18  ;;  %7367 = vmatmul.msk.f32.gmra.mxu1 %vm257_vm0, %v9705_v20  ;;  %v9895_v20 = vld [vmem:[%s11997_s0 + $0x358] sm:$0xff] }
 0x2c5   :  { %v3219_v42 = vadd.f32 %v9854_v17, %v3115_v41  ;;  %7575 = vmatmul.msk.f32.gmra.mxu2 %vm257_vm0, %v9865_v28  ;;  %7783 = vmatmul.msk.f32.gmra.mxu3 %vm257_vm0, %v9880_v6 }
 0x2c7   :  { %v3319_v15 = vmax.f32 %v3219_v42, 0.0 }
 0x2c8   :  { %v2129_v59 = vpop.f32.mrf.mxu2  ;;  %v2956_v45 = vpop.f32.mrf.mxu3 }
 0x2c9   :  { %3420 = vst.msk [vmem:[#allocation2 + $0x228] sm:$0xff] %vm3350_vm1, %v3319_v15  ;;  %v2289_v47 = vadd.f32 %v2129_v59, %v1403_v43  ;;  %v788_v48 = vpop.f32.mrf.mxu0  ;;  %v1405_v49 = vpop.f32.mrf.mxu1  ;;  %v7681_v59 = vld [vmem:[%s11997_s0 + $0x388] sm:$0xff] }
 0x2ca   :  { %v1406_v53 = vadd.f32 %v1405_v49, %v788_v48 }
 0x2cb   :  { %v3116_v51 = vadd.f32 %v2956_v45, %v2289_v47 }
 0x2cc   :  { %7268 = vmatmul.msk.f32.gmra.mxu0 %vm257_vm0, %v9735_v19  ;;  %7368 = vmatmul.msk.f32.gmra.mxu1 %vm257_vm0, %v9720_v18  ;;  %v9910_v18 = vld [vmem:[%s11997_s0 + $0x360] sm:$0xff] }
 0x2cd   :  { %v3220_v52 = vadd.f32 %v9854_v17, %v3116_v51  ;;  %7576 = vmatmul.msk.f32.gmra.mxu2 %vm257_vm0, %v9880_v6  ;;  %7784 = vmatmul.msk.f32.gmra.mxu3 %vm257_vm0, %v9895_v20 }
 0x2cf   :  { %v3320_v54 = vmax.f32 %v3220_v52, 0.0 }
 0x2d0   :  { %v2132_v60 = vpop.f32.mrf.mxu2  ;;  %v2959_v56 = vpop.f32.mrf.mxu3 }
 0x2d1   :  { %3421 = vst.msk [vmem:[#allocation2 + $0x230] sm:$0xff] %vm3350_vm1, %v3320_v54  ;;  %v2290_v63 = vadd.f32 %v2132_v60, %v1406_v53  ;;  %v791_v0 = vpop.f32.mrf.mxu0  ;;  %v1408_v2 = vpop.f32.mrf.mxu1  ;;  %v7682_v60 = vld [vmem:[%s11997_s0 + $0x390] sm:$0xff] }
 0x2d2   :  { %v1409_v5 = vadd.f32 %v1408_v2, %v791_v0 }
 0x2d3   :  { %v3117_v3 = vadd.f32 %v2959_v56, %v2290_v63 }
 0x2d4   :  { %7269 = vmatmul.msk.f32.gmra.mxu0 %vm257_vm0, %v9750_v30  ;;  %7369 = vmatmul.msk.f32.gmra.mxu1 %vm257_vm0, %v9735_v19  ;;  %v9925_v19 = vld [vmem:[%s11997_s0 + $0x368] sm:$0xff] }
 0x2d5   :  { %v3221_v4 = vadd.f32 %v9854_v17, %v3117_v3  ;;  %7577 = vmatmul.msk.f32.gmra.mxu2 %vm257_vm0, %v9895_v20  ;;  %7785 = vmatmul.msk.f32.gmra.mxu3 %vm257_vm0, %v9910_v18 }
 0x2d7   :  { %v3321_v7 = vmax.f32 %v3221_v4, 0.0 }
 0x2d8   :  { %v2135_v8 = vpop.f32.mrf.mxu2  ;;  %v2962_v62 = vpop.f32.mrf.mxu3 }
 0x2d9   :  { %3422 = vst.msk [vmem:[#allocation2 + $0x238] sm:$0xff] %vm3350_vm1, %v3321_v7  ;;  %v2291_v10 = vadd.f32 %v2135_v8, %v1409_v5  ;;  %v794_v12 = vpop.f32.mrf.mxu0  ;;  %v1411_v13 = vpop.f32.mrf.mxu1  ;;  %v7683_v8 = vld [vmem:[%s11997_s0 + $0x398] sm:$0xff] }
 0x2da   :  { %v1412_v16 = vadd.f32 %v1411_v13, %v794_v12 }
 0x2db   :  { %v3118_v58 = vadd.f32 %v2962_v62, %v2291_v10 }
 0x2dc   :  { %7270 = vmatmul.msk.f32.gmra.mxu0 %vm257_vm0, %v9765_v39  ;;  %7370 = vmatmul.msk.f32.gmra.mxu1 %vm257_vm0, %v9750_v30  ;;  %v7471_v30 = vld [vmem:[%s11997_s0 + $0x370] sm:$0xff] }
 0x2dd   :  { %v3222_v14 = vadd.f32 %v9854_v17, %v3118_v58  ;;  %7578 = vmatmul.msk.f32.gmra.mxu2 %vm257_vm0, %v9910_v18  ;;  %7786 = vmatmul.msk.f32.gmra.mxu3 %vm257_vm0, %v9925_v19 }
 0x2df   :  { %v3322_v1 = vmax.f32 %v3222_v14, 0.0 }
 0x2e0   :  { %v2138_v61 = vpop.f32.mrf.mxu2  ;;  %v2965_v11 = vpop.f32.mrf.mxu3 }
 0x2e1   :  { %3423 = vst.msk [vmem:[#allocation2 + $0x240] sm:$0xff] %vm3350_vm1, %v3322_v1  ;;  %v2292_v21 = vadd.f32 %v2138_v61, %v1412_v16  ;;  %v797_v22 = vpop.f32.mrf.mxu0  ;;  %v1414_v39 = vpop.f32.mrf.mxu1  ;;  %v7684_v61 = vld [vmem:[%s11997_s0 + $0x3a0] sm:$0xff] }
 0x2e2   :  { %v1415_v9 = vadd.f32 %v1414_v39, %v797_v22 }
 0x2e3   :  { %v3119_v24 = vadd.f32 %v2965_v11, %v2292_v21 }
 0x2e4   :  { %7271 = vmatmul.msk.f32.gmra.mxu0 %vm257_vm0, %v9785_v34  ;;  %7371 = vmatmul.msk.f32.gmra.mxu1 %vm257_vm0, %v9780_v40 }
 0x2e5   :  { %v3223_v25 = vadd.f32 %v9854_v17, %v3119_v24  ;;  %7579 = vmatmul.msk.f32.gmra.mxu2 %vm257_vm0, %v7471_v30  ;;  %7787 = vmatmul.msk.f32.gmra.mxu3 %vm257_vm0, %v7679_v23 }
 0x2e7   :  { %v3323_v26 = vmax.f32 %v3223_v25, 0.0 }
 0x2e8   :  { %v2141_v27 = vpop.f32.mrf.mxu2  ;;  %v2968_v29 = vpop.f32.mrf.mxu3 }
 0x2e9   :  { %3424 = vst.msk [vmem:[#allocation2 + $0x248] sm:$0xff] %vm3350_vm1, %v3323_v26  ;;  %v2293_v31 = vadd.f32 %v2141_v27, %v1415_v9  ;;  %v800_v32 = vpop.f32.mrf.mxu0  ;;  %v1417_v33 = vpop.f32.mrf.mxu1  ;;  %v7685_v9 = vld [vmem:[%s11997_s0 + $0x3a8] sm:$0xff] }
 0x2ea   :  { %v1418_v36 = vadd.f32 %v1417_v33, %v800_v32  ;;  %v7855_v33 = vld [vmem:[%s12000_s3 + $0x70] sm:$0xff] }
 0x2eb   :  { %v3120_v40 = vadd.f32 %v2968_v29, %v2293_v31  ;;  %v7836_v29 = vld [vmem:[%s12000_s3 + $0x58] sm:$0xff] }
 0x2ec   :  { %7272 = vmatmul.msk.f32.gmra.mxu0 %vm257_vm0, %v9800_v57  ;;  %7372 = vmatmul.msk.f32.gmra.mxu1 %vm257_vm0, %v9785_v34  ;;  %v7856_v31 = vld [vmem:[%s12000_s3 + $0x78] sm:$0xff] }
 0x2ed   :  { %v3224_v35 = vadd.f32 %v9854_v17, %v3120_v40  ;;  %7580 = vmatmul.msk.f32.gmra.mxu2 %vm257_vm0, %v7679_v23  ;;  %7788 = vmatmul.msk.f32.gmra.mxu3 %vm257_vm0, %v7680_v50 }
 0x2ee   :  { %3801 = vmatpush.msra.mxu2 %v7836_v29  ;;  %3952 = vmatpush.msra.mxu3 %v7856_v31  ;;  %v3452_v29 = vld [vmem:[#allocation2 + $0x10] sm:$0xff] }
 0x2ef   :  { %v3324_v37 = vmax.f32 %v3224_v35, 0.0 }
 0x2f0   :  { %v2144_v38 = vpop.f32.mrf.mxu2  ;;  %v2971_v41 = vpop.f32.mrf.mxu3  ;;  %3953 = vmatpush.msra.mxu3 %v7855_v33 }
 0x2f1   :  { %3425 = vst.msk [vmem:[#allocation2 + $0x250] sm:$0xff] %vm3350_vm1, %v3324_v37  ;;  %v2294_v42 = vadd.f32 %v2144_v38, %v1418_v36  ;;  %v803_v43 = vpop.f32.mrf.mxu0  ;;  %v1420_v15 = vpop.f32.mrf.mxu1  ;;  %v7834_v38 = vld [vmem:[%s12000_s3 + $0x48] sm:$0xff] }
 0x2f2   :  { %v1421_v47 = vadd.f32 %v1420_v15, %v803_v43  ;;  %v7833_v15 = vld [vmem:[%s12000_s3 + $0x40] sm:$0xff] }
 0x2f3   :  { %v3121_v34 = vadd.f32 %v2971_v41, %v2294_v42  ;;  %v7854_v41 = vld [vmem:[%s12000_s3 + $0x68] sm:$0xff]  ;;  %v7686_v42 = vld [vmem:[%s11997_s0 + $0x3b0] sm:$0xff] }
 0x2f4   :  { %7273 = vmatmul.msk.f32.gmra.mxu0 %vm257_vm0, %v9815_v44  ;;  %7373 = vmatmul.msk.f32.gmra.mxu1 %vm257_vm0, %v9800_v57 }
 0x2f5   :  { %v3225_v45 = vadd.f32 %v9854_v17, %v3121_v34  ;;  %7581 = vmatmul.msk.f32.gmra.mxu2 %vm257_vm0, %v7680_v50  ;;  %7789 = vmatmul.msk.f32.gmra.mxu3 %vm257_vm0, %v7681_v59 }
 0x2f6   :  { %3954 = vmatpush.msra.mxu3 %v7854_v41  ;;  %v3453_v41 = vld [vmem:[#allocation2 + $0x20] sm:$0xff] }
 0x2f7   :  { %v3325_v48 = vmax.f32 %v3225_v45, 0.0 }
 0x2f8   :  { %v2147_v49 = vpop.f32.mrf.mxu2  ;;  %v2974_v51 = vpop.f32.mrf.mxu3 }
 0x2f9   :  { %3426 = vst.msk [vmem:[#allocation2 + $0x258] sm:$0xff] %vm3350_vm1, %v3325_v48  ;;  %v2295_v52 = vadd.f32 %v2147_v49, %v1421_v47  ;;  %v806_v53 = vpop.f32.mrf.mxu0  ;;  %v1423_v54 = vpop.f32.mrf.mxu1 }
 0x2fa   :  { %v1424_v63 = vadd.f32 %v1423_v54, %v806_v53 }
 0x2fb   :  { %v3122_v57 = vadd.f32 %v2974_v51, %v2295_v52 }
 0x2fc   :  { %7274 = vmatmul.msk.f32.gmra.mxu0 %vm257_vm0, %v9830_v46  ;;  %7374 = vmatmul.msk.f32.gmra.mxu1 %vm257_vm0, %v9815_v44 }
 0x2fd   :  { %v3226_v56 = vadd.f32 %v9854_v17, %v3122_v57  ;;  %7582 = vmatmul.msk.f32.gmra.mxu2 %vm257_vm0, %v7681_v59  ;;  %7790 = vmatmul.msk.f32.gmra.mxu3 %vm257_vm0, %v7682_v60  ;;  %v7853_v59 = vld [vmem:[%s12000_s3 + $0x60] sm:$0xff] }
 0x2fe   :  { %3955 = vmatpush.msra.mxu3 %v7853_v59 }
 0x2ff   :  { %v3326_v0 = vmax.f32 %v3226_v56, 0.0 }
 0x300   :  { %v2150_v2 = vpop.f32.mrf.mxu2  ;;  %v2977_v3 = vpop.f32.mrf.mxu3 }
 0x301   :  { %3427 = vst.msk [vmem:[#allocation2 + $0x260] sm:$0xff] %vm3350_vm1, %v3326_v0  ;;  %v2296_v4 = vadd.f32 %v2150_v2, %v1424_v63  ;;  %v809_v5 = vpop.f32.mrf.mxu0  ;;  %v1426_v7 = vpop.f32.mrf.mxu1 }
 0x302   :  { %v1427_v10 = vadd.f32 %v1426_v7, %v809_v5  ;;  %v7688_v5 = vld [vmem:[%s11997_s0 + $0x3c0] sm:$0xff] }
 0x303   :  { %v3123_v44 = vadd.f32 %v2977_v3, %v2296_v4 }
 0x304   :  { %7275 = vmatmul.msk.f32.gmra.mxu0 %vm257_vm0, %v9845_v55  ;;  %7375 = vmatmul.msk.f32.gmra.mxu1 %vm257_vm0, %v9830_v46 }
 0x305   :  { %v3227_v62 = vadd.f32 %v9854_v17, %v3123_v44  ;;  %7583 = vmatmul.msk.f32.gmra.mxu2 %vm257_vm0, %v7682_v60  ;;  %7791 = vmatmul.msk.f32.gmra.mxu3 %vm257_vm0, %v7683_v8 }
 0x307   :  { %v3327_v12 = vmax.f32 %v3227_v62, 0.0 }
 0x308   :  { %v2153_v13 = vpop.f32.mrf.mxu2  ;;  %v2980_v58 = vpop.f32.mrf.mxu3 }
 0x309   :  { %3428 = vst.msk [vmem:[#allocation2 + $0x268] sm:$0xff] %vm3350_vm1, %v3327_v12  ;;  %v2297_v14 = vadd.f32 %v2153_v13, %v1427_v10  ;;  %v812_v16 = vpop.f32.mrf.mxu0  ;;  %v1429_v1 = vpop.f32.mrf.mxu1 }
 0x30a   :  { %v1430_v21 = vadd.f32 %v1429_v1, %v812_v16  ;;  %v3472_v1 = vld [vmem:[#allocation2 + $0x8] sm:$0xff] }
 0x30b   :  { %v3124_v46 = vadd.f32 %v2980_v58, %v2297_v14  ;;  %v3451_v14 = vld [vmem:[#allocation2] sm:$0xff] }
 0x30c   :  { %7276 = vmatmul.msk.f32.gmra.mxu0 %vm257_vm0, %v9865_v28  ;;  %7376 = vmatmul.msk.f32.gmra.mxu1 %vm257_vm0, %v9845_v55 }
 0x30d   :  { %v3228_v11 = vadd.f32 %v9854_v17, %v3124_v46  ;;  %7584 = vmatmul.msk.f32.gmra.mxu2 %vm257_vm0, %v7683_v8  ;;  %7792 = vmatmul.msk.f32.gmra.mxu3 %vm257_vm0, %v7684_v61  ;;  %v7936_v46 = vld [vmem:[%s12000_s3 + $0xf8] sm:$0xff] }
 0x30f   :  { %v3328_v22 = vmax.f32 %v3228_v11, 0.0  ;;  %v10087_v11 = vld [vmem:[#allocation2 + $0x218] sm:$0xff] }
 0x310   :  { %v2156_v39 = vpop.f32.mrf.mxu2  ;;  %v2983_v30 = vpop.f32.mrf.mxu3 }
 0x311   :  { %3429 = vst.msk [vmem:[#allocation2 + $0x270] sm:$0xff] %vm3350_vm1, %v3328_v22  ;;  %v2298_v23 = vadd.f32 %v2156_v39, %v1430_v21  ;;  %v815_v24 = vpop.f32.mrf.mxu0  ;;  %v1432_v25 = vpop.f32.mrf.mxu1  ;;  %v10090_v21 = vld [vmem:[#allocation2 + $0x210] sm:$0xff] }
 0x312   :  { %v1433_v27 = vadd.f32 %v1432_v25, %v815_v24 }
 0x313   :  { %v3125_v55 = vadd.f32 %v2983_v30, %v2298_v23 }
 0x314   :  { %7277 = vmatmul.msk.f32.gmra.mxu0 %vm257_vm0, %v9880_v6  ;;  %7377 = vmatmul.msk.f32.gmra.mxu1 %vm257_vm0, %v9865_v28  ;;  %v7835_v28 = vld [vmem:[%s12000_s3 + $0x50] sm:$0xff] }
 0x315   :  { %v3229_v26 = vadd.f32 %v9854_v17, %v3125_v55  ;;  %7585 = vmatmul.msk.f32.gmra.mxu2 %vm257_vm0, %v7684_v61  ;;  %7793 = vmatmul.msk.f32.gmra.mxu3 %vm257_vm0, %v7685_v9  ;;  %v7916_v61 = vld [vmem:[%s12000_s3 + $0xd8] sm:$0xff] }
 0x316   :  { %3802 = vmatpush.msra.mxu2 %v7835_v28 }
 0x317   :  { %v3329_v32 = vmax.f32 %v3229_v26, 0.0 }
 0x318   :  { %v2159_v50 = vpop.f32.mrf.mxu2  ;;  %v2986_v40 = vpop.f32.mrf.mxu3  ;;  %3803 = vmatpush.msra.mxu2 %v7834_v38  ;;  %v3474_v38 = vld [vmem:[#allocation2 + $0x28] sm:$0xff] }
 0x319   :  { %3430 = vst.msk [vmem:[#allocation2 + $0x278] sm:$0xff] %vm3350_vm1, %v3329_v32  ;;  %v2299_v35 = vadd.f32 %v2159_v50, %v1433_v27  ;;  %v818_v36 = vpop.f32.mrf.mxu0  ;;  %v1435_v37 = vpop.f32.mrf.mxu1  ;;  %v3473_v27 = vld [vmem:[#allocation2 + $0x18] sm:$0xff] }
 0x31a   :  { %v1436_v45 = vadd.f32 %v1435_v37, %v818_v36  ;;  %3804 = vmatpush.msra.mxu2 %v7833_v15 }
 0x31b   :  { %v3126_v43 = vadd.f32 %v2986_v40, %v2299_v35 }
 0x31c   :  { %7278 = vmatmul.msk.f32.gmra.mxu0 %vm257_vm0, %v9895_v20  ;;  %7378 = vmatmul.msk.f32.gmra.mxu1 %vm257_vm0, %v9880_v6  ;;  %v7687_v6 = vld [vmem:[%s11997_s0 + $0x3b8] sm:$0xff] }
 0x31d   :  { %v3230_v34 = vadd.f32 %v9854_v17, %v3126_v43  ;;  %7586 = vmatmul.msk.f32.gmra.mxu2 %vm257_vm0, %v7685_v9  ;;  %7794 = vmatmul.msk.f32.gmra.mxu3 %vm257_vm0, %v7686_v42 }
 0x31f   :  { %v3330_v47 = vmax.f32 %v3230_v34, 0.0 }
 0x320   :  { %v2162_v48 = vpop.f32.mrf.mxu2  ;;  %v2989_v49 = vpop.f32.mrf.mxu3 }
 0x321   :  { %3431 = vst.msk [vmem:[#allocation2 + $0x280] sm:$0xff] %vm3350_vm1, %v3330_v47  ;;  %v2300_v51 = vadd.f32 %v2162_v48, %v1436_v45  ;;  %v821_v52 = vpop.f32.mrf.mxu0  ;;  %v1438_v53 = vpop.f32.mrf.mxu1 }
 0x322   :  { %v1439_v57 = vadd.f32 %v1438_v53, %v821_v52  ;;  %v3475_v53 = vld [vmem:[#allocation2 + $0x38] sm:$0xff] }
 0x323   :  { %v3127_v54 = vadd.f32 %v2989_v49, %v2300_v51  ;;  %v7915_v49 = vld [vmem:[%s12000_s3 + $0xd0] sm:$0xff] }
 0x324   :  { %7279 = vmatmul.msk.f32.gmra.mxu0 %vm257_vm0, %v9910_v18  ;;  %7379 = vmatmul.msk.f32.gmra.mxu1 %vm257_vm0, %v9895_v20  ;;  %v7935_v51 = vld [vmem:[%s12000_s3 + $0xf0] sm:$0xff] }
 0x325   :  { %v3231_v60 = vadd.f32 %v9854_v17, %v3127_v54  ;;  %7587 = vmatmul.msk.f32.gmra.mxu2 %vm257_vm0, %v7686_v42  ;;  %7795 = vmatmul.msk.f32.gmra.mxu3 %vm257_vm0, %v7687_v6 }
 0x327   :  { %v3331_v56 = vmax.f32 %v3231_v60, 0.0 }
 0x328   :  { %v2165_v63 = vpop.f32.mrf.mxu2  ;;  %v2992_v0 = vpop.f32.mrf.mxu3 }
 0x329   :  { %3432 = vst.msk [vmem:[#allocation2 + $0x288] sm:$0xff] %vm3350_vm1, %v3331_v56  ;;  %v2301_v2 = vadd.f32 %v2165_v63, %v1439_v57  ;;  %v824_v3 = vpop.f32.mrf.mxu0  ;;  %v1441_v4 = vpop.f32.mrf.mxu1 }
 0x32a   :  { %v1442_v8 = vadd.f32 %v1441_v4, %v824_v3  ;;  %v7875_v4 = vld [vmem:[%s12000_s3 + $0x90] sm:$0xff] }
 0x32b   :  { %v3128_v20 = vadd.f32 %v2992_v0, %v2301_v2 }
 0x32c   :  { %7280 = vmatmul.msk.f32.gmra.mxu0 %vm257_vm0, %v9925_v19  ;;  %7380 = vmatmul.msk.f32.gmra.mxu1 %vm257_vm0, %v9910_v18  ;;  %v7876_v19 = vld [vmem:[%s12000_s3 + $0x98] sm:$0xff] }
 0x32d   :  { %v3232_v7 = vadd.f32 %v9854_v17, %v3128_v20  ;;  %7588 = vmatmul.msk.f32.gmra.mxu2 %vm257_vm0, %v7687_v6  ;;  %7796 = vmatmul.msk.f32.gmra.mxu3 %vm257_vm0, %v7688_v5  ;;  %v7896_v18 = vld [vmem:[%s12000_s3 + $0xb8] sm:$0xff]  ;;  %v3454_v6 = vld [vmem:[#allocation2 + $0x30] sm:$0xff] }
 0x32e   :  { %4103 = vmatpush.msra.mxu0 %v7876_v19  ;;  %4254 = vmatpush.msra.mxu1 %v7896_v18  ;;  %v7895_v5 = vld [vmem:[%s12000_s3 + $0xb0] sm:$0xff] }
 0x32f   :  { %v3332_v44 = vmax.f32 %v3232_v7, 0.0  ;;  %v10128_v7 = vld [vmem:[#allocation2 + $0xa8] sm:$0xff] }
 0x330   :  { %v2168_v62 = vpop.f32.mrf.mxu2  ;;  %v2995_v10 = vpop.f32.mrf.mxu3  ;;  %4104 = vmatpush.msra.mxu0 %v7875_v4  ;;  %4255 = vmatpush.msra.mxu1 %v7895_v5 }
 0x331   :  { %3433 = vst.msk [vmem:[#allocation2 + $0x290] sm:$0xff] %vm3350_vm1, %v3332_v44  ;;  %v2302_v12 = vadd.f32 %v2168_v62, %v1442_v8  ;;  %v827_v13 = vpop.f32.mrf.mxu0  ;;  %v1444_v58 = vpop.f32.mrf.mxu1  ;;  %v10130_v8 = vld [vmem:[#allocation2 + $0xa0] sm:$0xff]  ;;  %v3874_v62 = vld [vmem:[#allocation2 + $0x48] sm:$0xff] }
 0x332   :  { %v1445_v39 = vadd.f32 %v1444_v58, %v827_v13  ;;  %v3723_v44 = vld [vmem:[#allocation2 + $0x40] sm:$0xff] }
 0x333   :  { %v3129_v16 = vadd.f32 %v2995_v10, %v2302_v12 }
 0x334   :  { %7801 = vmatmul.msk.f32.vlgmr.msrb.gmra.mxu0 %vm3350_vm1, %v3472_v1  ;;  %7817 = vmatmul.msk.f32.vlgmr.msrb.gmra.mxu1 %vm3350_vm1, %v3451_v14 }
 0x335   :  { %v3233_v22 = vadd.f32 %v9854_v17, %v3129_v16  ;;  %7816 = vmatmul.msk.f32.vlgmr.msrb.gmra.mxu2 %vm3350_vm1, %v10087_v11  ;;  %7832 = vmatmul.msk.f32.vlgmr.msrb.gmra.mxu3 %vm3350_vm1, %v10090_v21 }
 0x336   :  { %4405 = vmatpush.msrb.mxu2 %v7916_v61  ;;  %4556 = vmatpush.msrb.mxu3 %v7936_v46  ;;  %v10140_v61 = vld [vmem:[#allocation2 + $0xb8] sm:$0xff]  ;;  %v10142_v46 = vld [vmem:[#allocation2 + $0xb0] sm:$0xff] }
 0x337   :  { %v3333_v30 = vmax.f32 %v3233_v22, 0.0 }
 0x338   :  { %v2171_v23 = vpop.f32.mrf.mxu2  ;;  %v2998_v24 = vpop.f32.mrf.mxu3  ;;  %4406 = vmatpush.msrb.mxu2 %v7915_v49  ;;  %4557 = vmatpush.msrb.mxu3 %v7935_v51 }
 0x339   :  { %3434 = vst.msk [vmem:[#allocation2 + $0x298] sm:$0xff] %vm3350_vm1, %v3333_v30  ;;  %v2303_v25 = vadd.f32 %v2171_v23, %v1445_v39  ;;  %v830_v9 = vpop.f32.mrf.mxu0  ;;  %v1447_v55 = vpop.f32.mrf.mxu1 }
 0x33a   :  { %v1448_v32 = vadd.f32 %v1447_v55, %v830_v9 }
 0x33b   :  { %v3130_v26 = vadd.f32 %v2998_v24, %v2303_v25 }
 0x33c   :  { %7802 = vmatmul.msk.f32.gmra.mxu0 %vm3350_vm1, %v3473_v27  ;;  %7818 = vmatmul.msk.f32.gmra.mxu1 %vm3350_vm1, %v3452_v29 }
 0x33d   :  { %v3234_v31 = vadd.f32 %v9854_v17, %v3130_v26  ;;  %7837 = vmatmul.msk.f32.vlgmr.msra.gmra.mxu2 %vm3350_vm1, %v3452_v29  ;;  %7857 = vmatmul.msk.f32.vlgmr.msra.gmra.mxu3 %vm3350_vm1, %v3473_v27  ;;  %v10154_v27 = vld [vmem:[#allocation2 + $0xc8] sm:$0xff]  ;;  %v10156_v29 = vld [vmem:[#allocation2 + $0xc0] sm:$0xff] }
 0x33f   :  { %v3334_v28 = vmax.f32 %v3234_v31, 0.0 }
 0x340   :  { %v2174_v33 = vpop.f32.mrf.mxu2  ;;  %v3001_v50 = vpop.f32.mrf.mxu3 }
 0x341   :  { %3435 = vst.msk [vmem:[#allocation2 + $0x2a0] sm:$0xff] %vm3350_vm1, %v3334_v28  ;;  %v2304_v40 = vadd.f32 %v2174_v33, %v1448_v32  ;;  %v833_v35 = vpop.f32.mrf.mxu0  ;;  %v1450_v36 = vpop.f32.mrf.mxu1 }
 0x342   :  { %v1451_v43 = vadd.f32 %v1450_v36, %v833_v35 }
 0x343   :  { %v3131_v37 = vadd.f32 %v3001_v50, %v2304_v40 }
 0x344   :  { %7803 = vmatmul.msk.f32.gmra.mxu0 %vm3350_vm1, %v3474_v38  ;;  %7819 = vmatmul.msk.f32.gmra.mxu1 %vm3350_vm1, %v3453_v41 }
 0x345   :  { %v3235_v42 = vadd.f32 %v9854_v17, %v3131_v37  ;;  %7838 = vmatmul.msk.f32.gmra.mxu2 %vm3350_vm1, %v3453_v41  ;;  %7858 = vmatmul.msk.f32.gmra.mxu3 %vm3350_vm1, %v3474_v38  ;;  %v7914_v37 = vld [vmem:[%s12000_s3 + $0xc8] sm:$0xff] }
 0x346   :  { %v7934_v38 = vld [vmem:[%s12000_s3 + $0xe8] sm:$0xff]  ;;  %4407 = vmatpush.msrb.mxu2 %v7914_v37  ;;  %v10251_v37 = vld [vmem:[#allocation2 + $0x170] sm:$0xff] }
 0x347   :  { %v3335_v15 = vmax.f32 %v3235_v42, 0.0  ;;  %4558 = vmatpush.msrb.mxu3 %v7934_v38  ;;  %v10174_v42 = vld [vmem:[#allocation2 + $0xd8] sm:$0xff]  ;;  %v7893_v38 = vld [vmem:[%s12000_s3 + $0xa0] sm:$0xff] }
 0x348   :  { %v2177_v59 = vpop.f32.mrf.mxu2  ;;  %v3004_v34 = vpop.f32.mrf.mxu3 }
 0x349   :  { %3436 = vst.msk [vmem:[#allocation2 + $0x2a8] sm:$0xff] %vm3350_vm1, %v3335_v15  ;;  %v2305_v45 = vadd.f32 %v2177_v59, %v1451_v43  ;;  %v836_v47 = vpop.f32.mrf.mxu0  ;;  %v1453_v48 = vpop.f32.mrf.mxu1  ;;  %v10176_v43 = vld [vmem:[#allocation2 + $0xd0] sm:$0xff] }
 0x34a   :  { %v1454_v60 = vadd.f32 %v1453_v48, %v836_v47 }
 0x34b   :  { %v3132_v52 = vadd.f32 %v3004_v34, %v2305_v45 }
 0x34c   :  { %7804 = vmatmul.msk.f32.gmra.mxu0 %vm3350_vm1, %v3475_v53  ;;  %7820 = vmatmul.msk.f32.gmra.mxu1 %vm3350_vm1, %v3454_v6 }
 0x34d   :  { %v3236_v54 = vadd.f32 %v9854_v17, %v3132_v52  ;;  %7839 = vmatmul.msk.f32.gmra.mxu2 %vm3350_vm1, %v3454_v6  ;;  %7859 = vmatmul.msk.f32.gmra.mxu3 %vm3350_vm1, %v3475_v53  ;;  %v7874_v52 = vld [vmem:[%s12000_s3 + $0x88] sm:$0xff] }
 0x34e   :  { %v7894_v53 = vld [vmem:[%s12000_s3 + $0xa8] sm:$0xff]  ;;  %4105 = vmatpush.msra.mxu0 %v7874_v52 }
 0x34f   :  { %v3336_v57 = vmax.f32 %v3236_v54, 0.0  ;;  %4256 = vmatpush.msra.mxu1 %v7894_v53  ;;  %v10194_v54 = vld [vmem:[#allocation2 + $0x148] sm:$0xff]  ;;  %v10268_v53 = vld [vmem:[#allocation2 + $0x1e0] sm:$0xff] }
 0x350   :  { %v2180_v56 = vpop.f32.mrf.mxu2  ;;  %v3007_v63 = vpop.f32.mrf.mxu3  ;;  %v10266_v52 = vld [vmem:[#allocation2 + $0x1e8] sm:$0xff] }
 0x351   :  { %3437 = vst.msk [vmem:[#allocation2 + $0x2b0] sm:$0xff] %vm3350_vm1, %v3336_v57  ;;  %v2306_v0 = vadd.f32 %v2180_v56, %v1454_v60  ;;  %v839_v2 = vpop.f32.mrf.mxu0  ;;  %v1456_v3 = vpop.f32.mrf.mxu1  ;;  %v10196_v60 = vld [vmem:[#allocation2 + $0x140] sm:$0xff]  ;;  %v10204_v56 = vld [vmem:[#allocation2 + $0xe8] sm:$0xff]  ;;  %4257 = vmatpush.msra.mxu1 %v7893_v38 }
 0x352   :  { %v1457_v12 = vadd.f32 %v1456_v3, %v839_v2  ;;  %v10202_v57 = vld [vmem:[#allocation2 + $0xe0] sm:$0xff] }
 0x353   :  { %v3133_v20 = vadd.f32 %v3007_v63, %v2306_v0 }
 0x354   :  { %7805 = vmatmul.msk.f32.gmra.mxu0 %vm3350_vm1, %v10128_v7  ;;  %7821 = vmatmul.msk.f32.gmra.mxu1 %vm3350_vm1, %v10130_v8 }
 0x355   :  { %v3237_v10 = vadd.f32 %v9854_v17, %v3133_v20  ;;  %7840 = vmatmul.msk.f32.gmra.mxu2 %vm3350_vm1, %v3723_v44  ;;  %7860 = vmatmul.msk.f32.gmra.mxu3 %vm3350_vm1, %v3874_v62 }
 0x357   :  { %v3337_v13 = vmax.f32 %v3237_v10, 0.0  ;;  %v10212_v10 = vld [vmem:[#allocation2 + $0x158] sm:$0xff] }
 0x358   :  { %v2183_v58 = vpop.f32.mrf.mxu2  ;;  %v3010_v19 = vpop.f32.mrf.mxu3 }
 0x359   :  { %3438 = vst.msk [vmem:[#allocation2 + $0x2b8] sm:$0xff] %vm3350_vm1, %v3337_v13  ;;  %v2307_v18 = vadd.f32 %v2183_v58, %v1457_v12  ;;  %v842_v14 = vpop.f32.mrf.mxu0  ;;  %v1459_v16 = vpop.f32.mrf.mxu1  ;;  %v10214_v12 = vld [vmem:[#allocation2 + $0x150] sm:$0xff] }
 0x35a   :  { %v1460_v39 = vadd.f32 %v1459_v16, %v842_v14 }
 0x35b   :  { %v3134_v1 = vadd.f32 %v3010_v19, %v2307_v18 }
 0x35c   :  { %7806 = vmatmul.msk.f32.gmra.mxu0 %vm3350_vm1, %v10140_v61  ;;  %7822 = vmatmul.msk.f32.gmra.mxu1 %vm3350_vm1, %v10142_v46 }
 0x35d   :  { %v3238_v22 = vadd.f32 %v9854_v17, %v3134_v1  ;;  %7841 = vmatmul.msk.f32.gmra.mxu2 %vm3350_vm1, %v10142_v46  ;;  %7861 = vmatmul.msk.f32.gmra.mxu3 %vm3350_vm1, %v10140_v61 }
 0x35f   :  { %v3338_v30 = vmax.f32 %v3238_v22, 0.0 }
 0x360   :  { %v2186_v23 = vpop.f32.mrf.mxu2  ;;  %v3013_v24 = vpop.f32.mrf.mxu3 }
 0x361   :  { %3439 = vst.msk [vmem:[#allocation2 + $0x2c0] sm:$0xff] %vm3350_vm1, %v3338_v30  ;;  %v2308_v25 = vadd.f32 %v2186_v23, %v1460_v39  ;;  %v845_v9 = vpop.f32.mrf.mxu0  ;;  %v1462_v55 = vpop.f32.mrf.mxu1  ;;  %v10226_v30 = vld [vmem:[#allocation2 + $0x168] sm:$0xff]  ;;  %v10228_v23 = vld [vmem:[#allocation2 + $0x160] sm:$0xff] }
 0x362   :  { %v1463_v32 = vadd.f32 %v1462_v55, %v845_v9 }
 0x363   :  { %v3135_v26 = vadd.f32 %v3013_v24, %v2308_v25 }
 0x364   :  { %7807 = vmatmul.msk.f32.gmra.mxu0 %vm3350_vm1, %v10154_v27  ;;  %7823 = vmatmul.msk.f32.gmra.mxu1 %vm3350_vm1, %v10156_v29 }
 0x365   :  { %v3239_v31 = vadd.f32 %v9854_v17, %v3135_v26  ;;  %7842 = vmatmul.msk.f32.gmra.mxu2 %vm3350_vm1, %v10156_v29  ;;  %7862 = vmatmul.msk.f32.gmra.mxu3 %vm3350_vm1, %v10154_v27 }
 0x367   :  { %v3339_v28 = vmax.f32 %v3239_v31, 0.0 }
 0x368   :  { %v2189_v33 = vpop.f32.mrf.mxu2  ;;  %v3016_v50 = vpop.f32.mrf.mxu3 }
 0x369   :  { %3440 = vst.msk [vmem:[#allocation2 + $0x2c8] sm:$0xff] %vm3350_vm1, %v3339_v28  ;;  %v2309_v40 = vadd.f32 %v2189_v33, %v1463_v32  ;;  %v848_v35 = vpop.f32.mrf.mxu0  ;;  %v1465_v36 = vpop.f32.mrf.mxu1  ;;  %v7913_v33 = vld [vmem:[%s12000_s3 + $0xc0] sm:$0xff] }
 0x36a   :  { %v1466_v59 = vadd.f32 %v1465_v36, %v848_v35  ;;  %4408 = vmatpush.msrb.mxu2 %v7913_v33  ;;  %v10249_v36 = vld [vmem:[#allocation2 + $0x178] sm:$0xff] }
 0x36b   :  { %v3136_v41 = vadd.f32 %v3016_v50, %v2309_v40  ;;  %v7933_v50 = vld [vmem:[%s12000_s3 + $0xe0] sm:$0xff]  ;;  %v7956_v33 = vld [vmem:[%s12000_s3 + $0x118] sm:$0xff] }
 0x36c   :  { %7808 = vmatmul.msk.f32.gmra.mxu0 %vm3350_vm1, %v10174_v42  ;;  %7824 = vmatmul.msk.f32.gmra.mxu1 %vm3350_vm1, %v10176_v43  ;;  %v7873_v40 = vld [vmem:[%s12000_s3 + $0x80] sm:$0xff] }
 0x36d   :  { %v3240_v15 = vadd.f32 %v9854_v17, %v3136_v41  ;;  %7843 = vmatmul.msk.f32.gmra.mxu2 %vm3350_vm1, %v10176_v43  ;;  %7863 = vmatmul.msk.f32.gmra.mxu3 %vm3350_vm1, %v10174_v42 }
 0x36e   :  { %4559 = vmatpush.msrb.mxu3 %v7933_v50  ;;  %4106 = vmatpush.msra.mxu0 %v7873_v40  ;;  %v8016_v50 = vld [vmem:[%s12000_s3 + $0x178] sm:$0xff] }
 0x36f   :  { %v3340_v34 = vmax.f32 %v3240_v15, 0.0  ;;  %v7976_v40 = vld [vmem:[%s12000_s3 + $0x138] sm:$0xff] }
 0x370   :  { %v2192_v45 = vpop.f32.mrf.mxu2  ;;  %v3019_v47 = vpop.f32.mrf.mxu3  ;;  %4707 = vmatpush.msrb.mxu0 %v7956_v33  ;;  %5160 = vmatpush.msra.mxu3 %v8016_v50 }
 0x371   :  { %3441 = vst.msk [vmem:[#allocation2 + $0x2d0] sm:$0xff] %vm3350_vm1, %v3340_v34  ;;  %v2310_v48 = vadd.f32 %v2192_v45, %v1466_v59  ;;  %v851_v49 = vpop.f32.mrf.mxu0  ;;  %v1468_v51 = vpop.f32.mrf.mxu1  ;;  %4858 = vmatpush.msrb.mxu1 %v7976_v40 }
 0x372   :  { %v1469_v0 = vadd.f32 %v1468_v51, %v851_v49 }
 0x373   :  { %v3137_v6 = vadd.f32 %v3019_v47, %v2310_v48 }
 0x374   :  { %7809 = vmatmul.msk.f32.gmra.mxu0 %vm3350_vm1, %v10194_v54  ;;  %7825 = vmatmul.msk.f32.gmra.mxu1 %vm3350_vm1, %v10196_v60 }
 0x375   :  { %v3241_v63 = vadd.f32 %v9854_v17, %v3137_v6  ;;  %7844 = vmatmul.msk.f32.gmra.mxu2 %vm3350_vm1, %v10202_v57  ;;  %7864 = vmatmul.msk.f32.gmra.mxu3 %vm3350_vm1, %v10204_v56  ;;  %v10274_v6 = vld [vmem:[#allocation2 + $0x180] sm:$0xff] }
 0x377   :  { %v3341_v2 = vmax.f32 %v3241_v63, 0.0  ;;  %v10276_v63 = vld [vmem:[#allocation2 + $0x188] sm:$0xff] }
 0x378   :  { %v2195_v3 = vpop.f32.mrf.mxu2  ;;  %v3022_v4 = vpop.f32.mrf.mxu3 }
 0x379   :  { %3442 = vst.msk [vmem:[#allocation2 + $0x2d8] sm:$0xff] %vm3350_vm1, %v3341_v2  ;;  %v2311_v5 = vadd.f32 %v2195_v3, %v1469_v0  ;;  %v854_v20 = vpop.f32.mrf.mxu0  ;;  %v1471_v44 = vpop.f32.mrf.mxu1 }
 0x37a   :  { %v1472_v58 = vadd.f32 %v1471_v44, %v854_v20 }
 0x37b   :  { %v3138_v62 = vadd.f32 %v3022_v4, %v2311_v5 }
 0x37c   :  { %7810 = vmatmul.msk.f32.gmra.mxu0 %vm3350_vm1, %v10212_v10  ;;  %7826 = vmatmul.msk.f32.gmra.mxu1 %vm3350_vm1, %v10214_v12 }
 0x37d   :  { %v3242_v13 = vadd.f32 %v9854_v17, %v3138_v62  ;;  %7845 = vmatmul.msk.f32.gmra.mxu2 %vm3350_vm1, %v10214_v12  ;;  %7865 = vmatmul.msk.f32.gmra.mxu3 %vm3350_vm1, %v10212_v10 }
 0x37f   :  { %v3342_v19 = vmax.f32 %v3242_v13, 0.0 }
 0x380   :  { %v2198_v18 = vpop.f32.mrf.mxu2  ;;  %v3025_v14 = vpop.f32.mrf.mxu3 }
 0x381   :  { %3443 = vst.msk [vmem:[#allocation2 + $0x2e0] sm:$0xff] %vm3350_vm1, %v3342_v19  ;;  %v2312_v16 = vadd.f32 %v2198_v18, %v1472_v58  ;;  %v857_v1 = vpop.f32.mrf.mxu0  ;;  %v1474_v22 = vpop.f32.mrf.mxu1  ;;  %v10284_v58 = vld [vmem:[#allocation2 + $0x1f8] sm:$0xff]  ;;  %v10286_v19 = vld [vmem:[#allocation2 + $0x1f0] sm:$0xff] }
 0x382   :  { %v1475_v25 = vadd.f32 %v1474_v22, %v857_v1 }
 0x383   :  { %v3139_v39 = vadd.f32 %v3025_v14, %v2312_v16 }
 0x384   :  { %7811 = vmatmul.msk.f32.gmra.mxu0 %vm3350_vm1, %v10226_v30  ;;  %7827 = vmatmul.msk.f32.gmra.mxu1 %vm3350_vm1, %v10228_v23 }
 0x385   :  { %v3243_v24 = vadd.f32 %v9854_v17, %v3139_v39  ;;  %7846 = vmatmul.msk.f32.gmra.mxu2 %vm3350_vm1, %v10228_v23  ;;  %7866 = vmatmul.msk.f32.gmra.mxu3 %vm3350_vm1, %v10226_v30 }
 0x387   :  { %v3343_v9 = vmax.f32 %v3243_v24, 0.0 }
 0x388   :  { %v2201_v55 = vpop.f32.mrf.mxu2  ;;  %v3028_v26 = vpop.f32.mrf.mxu3 }
 0x389   :  { %3444 = vst.msk [vmem:[#allocation2 + $0x2e8] sm:$0xff] %vm3350_vm1, %v3343_v9  ;;  %v2313_v31 = vadd.f32 %v2201_v55, %v1475_v25  ;;  %v860_v32 = vpop.f32.mrf.mxu0  ;;  %v1477_v28 = vpop.f32.mrf.mxu1  ;;  %v10298_v55 = vld [vmem:[#allocation2 + $0x208] sm:$0xff] }
 0x38a   :  { %v1478_v15 = vadd.f32 %v1477_v28, %v860_v32 }
 0x38b   :  { %v3140_v35 = vadd.f32 %v3028_v26, %v2313_v31  ;;  %v10300_v26 = vld [vmem:[#allocation2 + $0x200] sm:$0xff] }
 0x38c   :  { %7812 = vmatmul.msk.f32.gmra.mxu0 %vm3350_vm1, %v10249_v36  ;;  %7828 = vmatmul.msk.f32.gmra.mxu1 %vm3350_vm1, %v10251_v37  ;;  %v8340_v31 = vld [vmem:[%s11999_s2] ss:$0 sm:$0xff] }
 0x38d   :  { %v3244_v41 = vadd.f32 %v9854_v17, %v3140_v35  ;;  %7847 = vmatmul.msk.f32.gmra.mxu2 %vm3350_vm1, %v10251_v37  ;;  %7867 = vmatmul.msk.f32.gmra.mxu3 %vm3350_vm1, %v10249_v36 }
 0x38f   :  { %v3344_v59 = vmax.f32 %v3244_v41, 0.0 }
 0x390   :  { %v2204_v34 = vpop.f32.mrf.mxu2  ;;  %v3031_v45 = vpop.f32.mrf.mxu3 }
 0x391   :  { %3445 = vst.msk [vmem:[#allocation2 + $0x2f0] sm:$0xff] %vm3350_vm1, %v3344_v59  ;;  %v2314_v47 = vadd.f32 %v2204_v34, %v1478_v15  ;;  %v863_v48 = vpop.f32.mrf.mxu0  ;;  %v1480_v49 = vpop.f32.mrf.mxu1 }
 0x392   :  { %v1481_v2 = vadd.f32 %v1480_v49, %v863_v48  ;;  %v4173_v48 = vld [vmem:[#allocation2 + $0x58] sm:$0xff] }
 0x393   :  { %v3141_v51 = vadd.f32 %v3031_v45, %v2314_v47  ;;  %v4022_v47 = vld [vmem:[#allocation2 + $0x50] sm:$0xff] }
 0x394   :  { %7813 = vmatmul.msk.f32.gmra.mxu0 %vm3350_vm1, %v10266_v52  ;;  %7829 = vmatmul.msk.f32.gmra.mxu1 %vm3350_vm1, %v10268_v53 }
 0x395   :  { %v3245_v0 = vadd.f32 %v9854_v17, %v3141_v51  ;;  %7848 = vmatmul.msk.f32.gmra.mxu2 %vm3350_vm1, %v10274_v6  ;;  %7868 = vmatmul.msk.f32.gmra.mxu3 %vm3350_vm1, %v10276_v63 }
 0x397   :  { %v3345_v3 = vmax.f32 %v3245_v0, 0.0 }
 0x398   :  { %v2207_v4 = vpop.f32.mrf.mxu2  ;;  %v3034_v5 = vpop.f32.mrf.mxu3 }
 0x399   :  { %3446 = vst.msk [vmem:[#allocation2 + $0x2f8] sm:$0xff] %vm3350_vm1, %v3345_v3  ;;  %v2315_v20 = vadd.f32 %v2207_v4, %v1481_v2  ;;  %v866_v44 = vpop.f32.mrf.mxu0  ;;  %v1483_v62 = vpop.f32.mrf.mxu1 }
 0x39a   :  { %v1484_v14 = vadd.f32 %v1483_v62, %v866_v44  ;;  %v4023_v62 = vld [vmem:[#allocation2 + $0x60] sm:$0xff] }
 0x39b   :  { %v3142_v13 = vadd.f32 %v3034_v5, %v2315_v20 }
 0x39c   :  { %7814 = vmatmul.msk.f32.gmra.mxu0 %vm3350_vm1, %v10284_v58  ;;  %7830 = vmatmul.msk.f32.gmra.mxu1 %vm3350_vm1, %v10286_v19 }
 0x39d   :  { %v3246_v18 = vadd.f32 %v9854_v17, %v3142_v13  ;;  %7849 = vmatmul.msk.f32.gmra.mxu2 %vm3350_vm1, %v10286_v19  ;;  %7869 = vmatmul.msk.f32.gmra.mxu3 %vm3350_vm1, %v10284_v58  ;;  %v7996_v17 = vld [vmem:[%s12000_s3 + $0x158] sm:$0xff]  ;;  %v4174_v13 = vld [vmem:[#allocation2 + $0x68] sm:$0xff] }
 0x39e   :  { %5009 = vmatpush.msra.mxu2 %v7996_v17 }
 0x39f   :  { %v3346_v16 = vmax.f32 %v3246_v18, 0.0  ;;  %v10333_v18 = vld [vmem:[#allocation2 + $0x220] sm:$0xff] }
 0x3a0   :  { %v2210_v1 = vpop.f32.mrf.mxu2  ;;  %v3037_v22 = vpop.f32.mrf.mxu3 }
 0x3a1   :  { %3447 = vst.msk [vmem:[#allocation2 + $0x300] sm:$0xff] %vm3350_vm1, %v3346_v16  ;;  %v2316_v39 = vadd.f32 %v2210_v1, %v1484_v14  ;;  %v869_v24 = vpop.f32.mrf.mxu0  ;;  %v1486_v25 = vpop.f32.mrf.mxu1  ;;  %v10335_v14 = vld [vmem:[#allocation2 + $0x228] sm:$0xff] }
 0x3a2   :  { %v1487_v28 = vadd.f32 %v1486_v25, %v869_v24  ;;  %v4024_v25 = vld [vmem:[#allocation2 + $0x70] sm:$0xff] }
 0x3a3   :  { %v3143_v9 = vadd.f32 %v3037_v22, %v2316_v39 }
 0x3a4   :  { %7815 = vmatmul.msk.f32.gmra.mxu0 %vm3350_vm1, %v10298_v55  ;;  %7831 = vmatmul.msk.f32.gmra.mxu1 %vm3350_vm1, %v10300_v26 }
 0x3a5   :  { %v3247_v32 = vadd.f32 %v8340_v31, %v3143_v9  ;;  %7850 = vmatmul.msk.f32.gmra.mxu2 %vm3350_vm1, %v10300_v26  ;;  %7870 = vmatmul.msk.f32.gmra.mxu3 %vm3350_vm1, %v10298_v55  ;;  %v4175_v9 = vld [vmem:[#allocation2 + $0x78] sm:$0xff] }
 0x3a7   :  { %v3347_v35 = vmax.f32 %v3247_v32, 0.0 }
 0x3a8   :  { %v2213_v38 = vpop.f32.mrf.mxu2  ;;  %v3040_v41 = vpop.f32.mrf.mxu3 }
 0x3a9   :  { %3448 = vst.msk [vmem:[#allocation2 + $0x308] sm:$0xff] %vm3350_vm1, %v3347_v35  ;;  %v2317_v15 = vadd.f32 %v2213_v38, %v1487_v28  ;;  %v872_v59 = vpop.f32.mrf.mxu0  ;;  %v1489_v34 = vpop.f32.mrf.mxu1  ;;  %v4025_v35 = vld [vmem:[#allocation2 + $0x80] sm:$0xff]  ;;  %v4176_v38 = vld [vmem:[#allocation2 + $0x88] sm:$0xff] }
 0x3aa   :  { %v1490_v51 = vadd.f32 %v1489_v34, %v872_v59  ;;  %v8015_v59 = vld [vmem:[%s12000_s3 + $0x170] sm:$0xff] }
 0x3ab   :  { %v3144_v45 = vadd.f32 %v3040_v41, %v2317_v15  ;;  %v7995_v41 = vld [vmem:[%s12000_s3 + $0x150] sm:$0xff]  ;;  %5161 = vmatpush.msra.mxu3 %v8015_v59 }
 0x3ac   :  { %7877 = vmatmul.msk.f32.vlgmr.msra.gmra.mxu0 %vm3350_vm1, %v4022_v47  ;;  %7897 = vmatmul.msk.f32.vlgmr.msra.gmra.mxu1 %vm3350_vm1, %v4173_v48  ;;  %v7955_v15 = vld [vmem:[%s12000_s3 + $0x110] sm:$0xff] }
 0x3ad   :  { %v3248_v49 = vadd.f32 %v8340_v31, %v3144_v45  ;;  %7851 = vmatmul.msk.f32.gmra.mxu2 %vm3350_vm1, %v10090_v21  ;;  %7871 = vmatmul.msk.f32.gmra.mxu3 %vm3350_vm1, %v10087_v11  ;;  %v7975_v34 = vld [vmem:[%s12000_s3 + $0x130] sm:$0xff] }
 0x3ae   :  { %5010 = vmatpush.msra.mxu2 %v7995_v41  ;;  %4708 = vmatpush.msrb.mxu0 %v7955_v15 }
 0x3af   :  { %v3348_v0 = vmax.f32 %v3248_v49, 0.0  ;;  %4859 = vmatpush.msrb.mxu1 %v7975_v34 }
 0x3b0   :  { %v2216_v2 = vpop.f32.mrf.mxu2  ;;  %v3043_v3 = vpop.f32.mrf.mxu3 }
 0x3b1   :  { %3449 = vst.msk [vmem:[#allocation2 + $0x310] sm:$0xff] %vm3350_vm1, %v3348_v0  ;;  %v2318_v4 = vadd.f32 %v2216_v2, %v1490_v51  ;;  %v3558_v5 = vpop.f32.mrf.mxu0  ;;  %v3671_v20 = vpop.f32.mrf.mxu1 }
 0x3b2   :  { %v3672_v17 = vadd.f32 %v3671_v20, %v3558_v5 }
 0x3b3   :  { %v3145_v44 = vadd.f32 %v3043_v3, %v2318_v4  ;;  %v10370_v3 = vld [vmem:[#allocation2 + $0xf0] sm:$0xff]  ;;  %v10372_v4 = vld [vmem:[#allocation2 + $0xf8] sm:$0xff] }
 0x3b4   :  { %7878 = vmatmul.msk.f32.gmra.mxu0 %vm3350_vm1, %v4023_v62  ;;  %7898 = vmatmul.msk.f32.gmra.mxu1 %vm3350_vm1, %v4174_v13 }
 0x3b5   :  { %v3249_v11 = vadd.f32 %v8340_v31, %v3145_v44  ;;  %7852 = vmatmul.msk.f32.gmra.mxu2 %vm3350_vm1, %v10333_v18  ;;  %7872 = vmatmul.msk.f32.gmra.mxu3 %vm3350_vm1, %v10335_v14 }
 0x3b7   :  { %v3349_v21 = vmax.f32 %v3249_v11, 0.0 }
 0x3b8   :  { %v3603_v16 = vpop.f32.mrf.mxu2  ;;  %v3716_v1 = vpop.f32.mrf.mxu3 }
 0x3b9   :  { %3450 = vst.msk [vmem:[#allocation2 + $0x318] sm:$0xff] %vm3350_vm1, %v3349_v21  ;;  %v10344_v22 = vadd.f32 %v3716_v1, %v3603_v16  ;;  %v3561_v39 = vpop.f32.mrf.mxu0  ;;  %v3674_v24 = vpop.f32.mrf.mxu1  ;;  %v10382_v16 = vld [vmem:[#allocation2 + $0x100] sm:$0xff]  ;;  %v10384_v1 = vld [vmem:[#allocation2 + $0x108] sm:$0xff] }
 0x3ba   :  { %v3675_v45 = vadd.f32 %v3674_v24, %v3561_v39  ;;  %12042 = vst [vmem:[#allocation7_spill] sm:$0xff] %v10384_v1  ;;  %v4327_v39 = vld [vmem:[#allocation2 + $0x90] sm:$0xff]  ;;  %v4478_v24 = vld [vmem:[#allocation2 + $0x98] sm:$0xff] }
 0x3bc   :  { %7879 = vmatmul.msk.f32.gmra.mxu0 %vm3350_vm1, %v4024_v25  ;;  %7899 = vmatmul.msk.f32.gmra.mxu1 %vm3350_vm1, %v4175_v9 }
 0x3bd   :  { %7917 = vmatmul.msk.f32.vlgmr.msrb.gmra.mxu2 %vm3350_vm1, %v4023_v62  ;;  %7937 = vmatmul.msk.f32.vlgmr.msrb.gmra.mxu3 %vm3350_vm1, %v4174_v13 }
 0x3c0   :  { %v3806_v31 = vpop.f32.mrf.mxu2  ;;  %v3957_v32 = vpop.f32.mrf.mxu3 }
 0x3c1   :  { %v3854_v28 = vadd.f32 %v3806_v31, %v3672_v17  ;;  %v3564_v33 = vpop.f32.mrf.mxu0  ;;  %v3677_v50 = vpop.f32.mrf.mxu1 }
 0x3c2   :  { %v3678_v5 = vadd.f32 %v3677_v50, %v3564_v33  ;;  %v10394_v50 = vld [vmem:[#allocation2 + $0x110] sm:$0xff] }
 0x3c3   :  { %v10350_v40 = vadd.f32 %v3957_v32, %v3854_v28  ;;  %12043 = vst [vmem:[#allocation8_spill] sm:$0xff] %v10394_v50 }
 0x3c4   :  { %7880 = vmatmul.msk.f32.gmra.mxu0 %vm3350_vm1, %v4025_v35  ;;  %7900 = vmatmul.msk.f32.gmra.mxu1 %vm3350_vm1, %v4176_v38 }
 0x3c5   :  { %7918 = vmatmul.msk.f32.gmra.mxu2 %vm3350_vm1, %v4024_v25  ;;  %7938 = vmatmul.msk.f32.gmra.mxu3 %vm3350_vm1, %v4175_v9 }
 0x3c8   :  { %v3809_v47 = vpop.f32.mrf.mxu2  ;;  %v3960_v48 = vpop.f32.mrf.mxu3 }
 0x3c9   :  { %v3855_v49 = vadd.f32 %v3809_v47, %v3675_v45  ;;  %v3567_v51 = vpop.f32.mrf.mxu0  ;;  %v3680_v0 = vpop.f32.mrf.mxu1 }
 0x3ca   :  { %v3681_v25 = vadd.f32 %v3680_v0, %v3567_v51  ;;  %v7994_v51 = vld [vmem:[%s12000_s3 + $0x148] sm:$0xff] }
 0x3cb   :  { %v10368_v2 = vadd.f32 %v3960_v48, %v3855_v49  ;;  %v10408_v48 = vld [vmem:[#allocation2 + $0x120] sm:$0xff]  ;;  %v10410_v49 = vld [vmem:[#allocation2 + $0x128] sm:$0xff]  ;;  %5011 = vmatpush.msra.mxu2 %v7994_v51 }
 0x3cc   :  { %7881 = vmatmul.msk.f32.gmra.mxu0 %vm3350_vm1, %v10370_v3  ;;  %7901 = vmatmul.msk.f32.gmra.mxu1 %vm3350_vm1, %v10372_v4  ;;  %12045 = vst [vmem:[#allocation10_spill] sm:$0xff] %v10408_v48  ;;  %v7954_v0 = vld [vmem:[%s12000_s3 + $0x108] sm:$0xff]  ;;  %v10448_v51 = vld [vmem:[#allocation2 + $0x1a0] sm:$0xff] }
 0x3cd   :  { %7919 = vmatmul.msk.f32.gmra.mxu2 %vm3350_vm1, %v4025_v35  ;;  %7939 = vmatmul.msk.f32.gmra.mxu3 %vm3350_vm1, %v4176_v38  ;;  %v10396_v35 = vld [vmem:[#allocation2 + $0x118] sm:$0xff]  ;;  %12046 = vst [vmem:[#allocation11_spill] sm:$0xff] %v10410_v49 }
 0x3ce   :  { %12044 = vst [vmem:[#allocation9_spill] sm:$0xff] %v10396_v35  ;;  %4709 = vmatpush.msrb.mxu0 %v7954_v0  ;;  %v10450_v0 = vld [vmem:[#allocation2 + $0x1a8] sm:$0xff] }
 0x3cf   :  { %12049 = vst [vmem:[#allocation14_spill] sm:$0xff] %v10448_v51 }
 0x3d0   :  { %v3812_v20 = vpop.f32.mrf.mxu2  ;;  %v3963_v44 = vpop.f32.mrf.mxu3  ;;  %12050 = vst [vmem:[#allocation15_spill] sm:$0xff] %v10450_v0 }
 0x3d1   :  { %v3856_v62 = vadd.f32 %v3812_v20, %v3678_v5  ;;  %v3570_v13 = vpop.f32.mrf.mxu0  ;;  %v3683_v11 = vpop.f32.mrf.mxu1  ;;  %v8014_v5 = vld [vmem:[%s12000_s3 + $0x168] sm:$0xff] }
 0x3d2   :  { %v3684_v38 = vadd.f32 %v3683_v11, %v3570_v13  ;;  %v7974_v20 = vld [vmem:[%s12000_s3 + $0x128] sm:$0xff]  ;;  %5162 = vmatpush.msra.mxu3 %v8014_v5  ;;  %v10456_v5 = vld [vmem:[#allocation2 + $0x130] sm:$0xff] }
 0x3d3   :  { %v10380_v21 = vadd.f32 %v3963_v44, %v3856_v62  ;;  %4860 = vmatpush.msrb.mxu1 %v7974_v20  ;;  %12051 = vst [vmem:[#allocation16_spill] sm:$0xff] %v10456_v5 }
 0x3d4   :  { %7882 = vmatmul.msk.f32.gmra.mxu0 %vm3350_vm1, %v10382_v16  ;;  %7902 = vmatmul.msk.f32.gmra.mxu1 %vm3350_vm1, %v10384_v1 }
 0x3d5   :  { %7920 = vmatmul.msk.f32.gmra.mxu2 %vm3350_vm1, %v4327_v39  ;;  %7940 = vmatmul.msk.f32.gmra.mxu3 %vm3350_vm1, %v4478_v24 }
 0x3d8   :  { %v3815_v9 = vpop.f32.mrf.mxu2  ;;  %v3966_v17 = vpop.f32.mrf.mxu3 }
 0x3d9   :  { %v3857_v31 = vadd.f32 %v3815_v9, %v3681_v25  ;;  %v3573_v32 = vpop.f32.mrf.mxu0  ;;  %v3686_v28 = vpop.f32.mrf.mxu1  ;;  %v10434_v9 = vld [vmem:[#allocation2 + $0x190] sm:$0xff] }
 0x3da   :  { %v3687_v44 = vadd.f32 %v3686_v28, %v3573_v32  ;;  %12047 = vst [vmem:[#allocation12_spill] sm:$0xff] %v10434_v9 }
 0x3db   :  { %v10392_v33 = vadd.f32 %v3966_v17, %v3857_v31  ;;  %v10436_v17 = vld [vmem:[#allocation2 + $0x198] sm:$0xff] }
 0x3dc   :  { %7883 = vmatmul.msk.f32.gmra.mxu0 %vm3350_vm1, %v10394_v50  ;;  %7903 = vmatmul.msk.f32.gmra.mxu1 %vm3350_vm1, %v10396_v35  ;;  %12048 = vst [vmem:[#allocation13_spill] sm:$0xff] %v10436_v17 }
 0x3dd   :  { %7921 = vmatmul.msk.f32.gmra.mxu2 %vm3350_vm1, %v10382_v16  ;;  %7941 = vmatmul.msk.f32.gmra.mxu3 %vm3350_vm1, %v10384_v1 }
 0x3e0   :  { %v3818_v41 = vpop.f32.mrf.mxu2  ;;  %v3969_v15 = vpop.f32.mrf.mxu3 }
 0x3e1   :  { %v3858_v59 = vadd.f32 %v3818_v41, %v3684_v38  ;;  %v3576_v34 = vpop.f32.mrf.mxu0  ;;  %v3689_v45 = vpop.f32.mrf.mxu1 }
 0x3e2   :  { %v3690_v31 = vadd.f32 %v3689_v45, %v3576_v34  ;;  %v10458_v34 = vld [vmem:[#allocation2 + $0x138] sm:$0xff] }
 0x3e3   :  { %v10406_v47 = vadd.f32 %v3969_v15, %v3858_v59  ;;  %12052 = vst [vmem:[#allocation17_spill] sm:$0xff] %v10458_v34 }
 0x3e4   :  { %7884 = vmatmul.msk.f32.gmra.mxu0 %vm3350_vm1, %v10408_v48  ;;  %7904 = vmatmul.msk.f32.gmra.mxu1 %vm3350_vm1, %v10410_v49 }
 0x3e5   :  { %7922 = vmatmul.msk.f32.gmra.mxu2 %vm3350_vm1, %v10394_v50  ;;  %7942 = vmatmul.msk.f32.gmra.mxu3 %vm3350_vm1, %v10396_v35 }
 0x3e8   :  { %v3821_v62 = vpop.f32.mrf.mxu2  ;;  %v3972_v13 = vpop.f32.mrf.mxu3 }
 0x3e9   :  { %v3859_v11 = vadd.f32 %v3821_v62, %v3687_v44  ;;  %v3579_v39 = vpop.f32.mrf.mxu0  ;;  %v3692_v24 = vpop.f32.mrf.mxu1 }
 0x3ea   :  { %v3693_v45 = vadd.f32 %v3692_v24, %v3579_v39 }
 0x3eb   :  { %v10432_v25 = vadd.f32 %v3972_v13, %v3859_v11 }
 0x3ec   :  { %7885 = vmatmul.msk.f32.gmra.mxu0 %vm3350_vm1, %v10434_v9  ;;  %7905 = vmatmul.msk.f32.gmra.mxu1 %vm3350_vm1, %v10436_v17  ;;  %v7993_v17 = vld [vmem:[%s12000_s3 + $0x140] sm:$0xff]  ;;  %v10506_v9 = vld [vmem:[#allocation2 + $0x230] sm:$0xff] }
 0x3ed   :  { %7923 = vmatmul.msk.f32.gmra.mxu2 %vm3350_vm1, %v10408_v48  ;;  %7943 = vmatmul.msk.f32.gmra.mxu3 %vm3350_vm1, %v10410_v49  ;;  %12057 = vst [vmem:[#allocation22_spill] sm:$0xff] %v10506_v9  ;;  %v10508_v49 = vld [vmem:[#allocation2 + $0x238] sm:$0xff]  ;;  %v10554_v48 = vld [vmem:[#allocation2 + $0x268] sm:$0xff] }
 0x3ee   :  { %5012 = vmatpush.msra.mxu2 %v7993_v17  ;;  %12058 = vst [vmem:[#allocation23_spill] sm:$0xff] %v10508_v49 }
 0x3f0   :  { %v3824_v32 = vpop.f32.mrf.mxu2  ;;  %v3975_v28 = vpop.f32.mrf.mxu3 }
 0x3f1   :  { %v3860_v38 = vadd.f32 %v3824_v32, %v3690_v31  ;;  %v3582_v41 = vpop.f32.mrf.mxu0  ;;  %v3695_v15 = vpop.f32.mrf.mxu1  ;;  %v10466_v32 = vld [vmem:[#allocation2 + $0x1b0] sm:$0xff] }
 0x3f2   :  { %12053 = vst [vmem:[#allocation18_spill] sm:$0xff] %v10466_v32  ;;  %v3696_v39 = vadd.f32 %v3695_v15, %v3582_v41  ;;  %v7953_v41 = vld [vmem:[%s12000_s3 + $0x100] sm:$0xff] }
 0x3f3   :  { %v10446_v59 = vadd.f32 %v3975_v28, %v3860_v38  ;;  %v10468_v28 = vld [vmem:[#allocation2 + $0x1b8] sm:$0xff]  ;;  %v8013_v15 = vld [vmem:[%s12000_s3 + $0x160] sm:$0xff]  ;;  %4710 = vmatpush.msrb.mxu0 %v7953_v41 }
 0x3f4   :  { %7886 = vmatmul.msk.f32.gmra.mxu0 %vm3350_vm1, %v10448_v51  ;;  %7906 = vmatmul.msk.f32.gmra.mxu1 %vm3350_vm1, %v10450_v0  ;;  %12054 = vst [vmem:[#allocation19_spill] sm:$0xff] %v10468_v28 }
 0x3f5   :  { %7924 = vmatmul.msk.f32.gmra.mxu2 %vm3350_vm1, %v10456_v5  ;;  %7944 = vmatmul.msk.f32.gmra.mxu3 %vm3350_vm1, %v10458_v34  ;;  %v10480_v34 = vld [vmem:[#allocation2 + $0x1c0] sm:$0xff]  ;;  %v10482_v5 = vld [vmem:[#allocation2 + $0x1c8] sm:$0xff] }
 0x3f6   :  { %12055 = vst [vmem:[#allocation20_spill] sm:$0xff] %v10480_v34  ;;  %5163 = vmatpush.msra.mxu3 %v8013_v15 }
 0x3f7   :  { %12056 = vst [vmem:[#allocation21_spill] sm:$0xff] %v10482_v5 }
 0x3f8   :  { %v3827_v20 = vpop.f32.mrf.mxu2  ;;  %v3978_v44 = vpop.f32.mrf.mxu3 }
 0x3f9   :  { %v3861_v62 = vadd.f32 %v3827_v20, %v3693_v45  ;;  %v3585_v13 = vpop.f32.mrf.mxu0  ;;  %v3698_v11 = vpop.f32.mrf.mxu1 }
 0x3fb   :  { %v10464_v31 = vadd.f32 %v3978_v44, %v3861_v62 }
 0x3fc   :  { %7887 = vmatmul.msk.f32.gmra.mxu0 %vm3350_vm1, %v10466_v32  ;;  %7907 = vmatmul.msk.f32.gmra.mxu1 %vm3350_vm1, %v10468_v28 }
 0x3fd   :  { %7925 = vmatmul.msk.f32.gmra.mxu2 %vm3350_vm1, %v10448_v51  ;;  %7945 = vmatmul.msk.f32.gmra.mxu3 %vm3350_vm1, %v10450_v0 }
 0x400   :  { %v3830_v24 = vpop.f32.mrf.mxu2  ;;  %v3981_v38 = vpop.f32.mrf.mxu3 }
 0x401   :  { %v3862_v45 = vadd.f32 %v3830_v24, %v3696_v39  ;;  %v3588_v20 = vpop.f32.mrf.mxu0  ;;  %v3701_v44 = vpop.f32.mrf.mxu1  ;;  %v7973_v39 = vld [vmem:[%s12000_s3 + $0x120] sm:$0xff]  ;;  %v3699_v24 = vadd.f32 %v3698_v11, %v3585_v13 }
 0x402   :  { %4861 = vmatpush.msrb.mxu1 %v7973_v39  ;;  %v3702_v17 = vadd.f32 %v3701_v44, %v3588_v20  ;;  %v10530_v20 = vld [vmem:[#allocation2 + $0x1d8] sm:$0xff] }
 0x403   :  { %v10478_v62 = vadd.f32 %v3981_v38, %v3862_v45  ;;  %12062 = vst [vmem:[#allocation27_spill] sm:$0xff] %v10530_v20 }
 0x404   :  { %7888 = vmatmul.msk.f32.gmra.mxu0 %vm3350_vm1, %v10480_v34  ;;  %7908 = vmatmul.msk.f32.gmra.mxu1 %vm3350_vm1, %v10482_v5 }
 0x405   :  { %7926 = vmatmul.msk.f32.gmra.mxu2 %vm3350_vm1, %v10466_v32  ;;  %7946 = vmatmul.msk.f32.gmra.mxu3 %vm3350_vm1, %v10468_v28 }
 0x408   :  { %v3833_v38 = vpop.f32.mrf.mxu2  ;;  %v3984_v45 = vpop.f32.mrf.mxu3 }
 0x409   :  { %v3863_v28 = vadd.f32 %v3833_v38, %v3699_v24  ;;  %v3591_v32 = vpop.f32.mrf.mxu0  ;;  %v3704_v0 = vpop.f32.mrf.mxu1  ;;  %v10520_v24 = vld [vmem:[#allocation2 + $0x240] sm:$0xff]  ;;  %v10522_v38 = vld [vmem:[#allocation2 + $0x248] sm:$0xff] }
 0x40a   :  { %12059 = vst [vmem:[#allocation24_spill] sm:$0xff] %v10520_v24  ;;  %v3705_v44 = vadd.f32 %v3704_v0, %v3591_v32 }
 0x40b   :  { %v10504_v51 = vadd.f32 %v3984_v45, %v3863_v28  ;;  %12060 = vst [vmem:[#allocation25_spill] sm:$0xff] %v10522_v38  ;;  %v10528_v45 = vld [vmem:[#allocation2 + $0x1d0] sm:$0xff] }
 0x40c   :  { %7889 = vmatmul.msk.f32.gmra.mxu0 %vm3350_vm1, %v10506_v9  ;;  %7909 = vmatmul.msk.f32.gmra.mxu1 %vm3350_vm1, %v10508_v49  ;;  %12061 = vst [vmem:[#allocation26_spill] sm:$0xff] %v10528_v45 }
 0x40d   :  { %7927 = vmatmul.msk.f32.gmra.mxu2 %vm3350_vm1, %v10480_v34  ;;  %7947 = vmatmul.msk.f32.gmra.mxu3 %vm3350_vm1, %v10482_v5  ;;  %v10538_v5 = vld [vmem:[#allocation2 + $0x250] sm:$0xff]  ;;  %v10540_v34 = vld [vmem:[#allocation2 + $0x258] sm:$0xff] }
 0x40e   :  { %12063 = vst [vmem:[#allocation28_spill] sm:$0xff] %v10538_v5 }
 0x40f   :  { %12064 = vst [vmem:[#allocation29_spill] sm:$0xff] %v10540_v34 }
 0x410   :  { %v3836_v13 = vpop.f32.mrf.mxu2  ;;  %v3987_v11 = vpop.f32.mrf.mxu3 }
 0x411   :  { %v3864_v28 = vadd.f32 %v3836_v13, %v3702_v17  ;;  %v3594_v41 = vpop.f32.mrf.mxu0  ;;  %v3707_v15 = vpop.f32.mrf.mxu1 }
 0x412   :  { %v3708_v0 = vadd.f32 %v3707_v15, %v3594_v41  ;;  %v8076_v41 = vld [vmem:[%s12000_s3 + $0x1d8] sm:$0xff] }
 0x413   :  { %v10518_v39 = vadd.f32 %v3987_v11, %v3864_v28  ;;  %v8036_v15 = vld [vmem:[%s12000_s3 + $0x198] sm:$0xff]  ;;  %5613 = vmatpush.msrb.mxu2 %v8076_v41 }
 0x414   :  { %7890 = vmatmul.msk.f32.gmra.mxu0 %vm3350_vm1, %v10520_v24  ;;  %7910 = vmatmul.msk.f32.gmra.mxu1 %vm3350_vm1, %v10522_v38 }
 0x415   :  { %7928 = vmatmul.msk.f32.gmra.mxu2 %vm3350_vm1, %v10528_v45  ;;  %7948 = vmatmul.msk.f32.gmra.mxu3 %vm3350_vm1, %v10530_v20  ;;  %v10552_v45 = vld [vmem:[#allocation2 + $0x260] sm:$0xff] }
 0x416   :  { %5311 = vmatpush.msra.mxu0 %v8036_v15 }
 0x418   :  { %v3839_v17 = vpop.f32.mrf.mxu2  ;;  %v3990_v13 = vpop.f32.mrf.mxu3 }
 0x419   :  { %v3865_v11 = vadd.f32 %v3839_v17, %v3705_v44  ;;  %v3597_v28 = vpop.f32.mrf.mxu0  ;;  %v3710_v49 = vpop.f32.mrf.mxu1 }
 0x41b   :  { %v10536_v9 = vadd.f32 %v3990_v13, %v3865_v11 }
 0x41c   :  { %7891 = vmatmul.msk.f32.gmra.mxu0 %vm3350_vm1, %v10538_v5  ;;  %7911 = vmatmul.msk.f32.gmra.mxu1 %vm3350_vm1, %v10540_v34 }
 0x41d   :  { %7929 = vmatmul.msk.f32.gmra.mxu2 %vm3350_vm1, %v10520_v24  ;;  %7949 = vmatmul.msk.f32.gmra.mxu3 %vm3350_vm1, %v10522_v38 }
 0x420   :  { %v3842_v32 = vpop.f32.mrf.mxu2  ;;  %v3993_v44 = vpop.f32.mrf.mxu3 }
 0x421   :  { %v3866_v17 = vadd.f32 %v3842_v32, %v3708_v0  ;;  %v3600_v13 = vpop.f32.mrf.mxu0  ;;  %v3713_v11 = vpop.f32.mrf.mxu1  ;;  %v8096_v0 = vld [vmem:[%s12000_s3 + $0x1f8] sm:$0xff] }
 0x422   :  { %v8056_v32 = vld [vmem:[%s12000_s3 + $0x1b8] sm:$0xff]  ;;  %5764 = vmatpush.msrb.mxu3 %v8096_v0 }
 0x423   :  { %v10550_v20 = vadd.f32 %v3993_v44, %v3866_v17  ;;  %v3711_v44 = vadd.f32 %v3710_v49, %v3597_v28  ;;  %5462 = vmatpush.msra.mxu1 %v8056_v32  ;;  %v3714_v49 = vadd.f32 %v3713_v11, %v3600_v13 }
 0x424   :  { %7892 = vmatmul.msk.f32.gmra.mxu0 %vm3350_vm1, %v10552_v45  ;;  %7912 = vmatmul.msk.f32.gmra.mxu1 %vm3350_vm1, %v10554_v48 }
 0x425   :  { %7930 = vmatmul.msk.f32.gmra.mxu2 %vm3350_vm1, %v10538_v5  ;;  %7950 = vmatmul.msk.f32.gmra.mxu3 %vm3350_vm1, %v10540_v34 }
 0x428   :  { %v3845_v17 = vpop.f32.mrf.mxu2  ;;  %v3996_v5 = vpop.f32.mrf.mxu3 }
 0x429   :  { %v3867_v34 = vadd.f32 %v3845_v17, %v3711_v44  ;;  %v4108_v38 = vpop.f32.mrf.mxu0  ;;  %v4259_v24 = vpop.f32.mrf.mxu1  ;;  %v5079_v17 = vld [vmem:[#allocation2 + $0xb8] sm:$0xff] }
 0x42a   :  { %v4156_v35 = vadd.f32 %v4108_v38, %v10350_v40 }
 0x42b   :  { %v10577_v50 = vadd.f32 %v3996_v5, %v3867_v34 }
 0x42c   :  { %v4307_v1 = vadd.f32 %v4259_v24, %v4156_v35  ;;  %7957 = vmatmul.msk.f32.vlgmr.msrb.gmra.mxu0 %vm3350_vm1, %v10130_v8  ;;  %7977 = vmatmul.msk.f32.vlgmr.msrb.gmra.mxu1 %vm3350_vm1, %v10128_v7  ;;  %v10590_v24 = vld [vmem:[#allocation2 + $0x270] sm:$0xff]  ;;  %v10592_v7 = vld [vmem:[#allocation2 + $0x278] sm:$0xff] }
 0x42d   :  { %7931 = vmatmul.msk.f32.gmra.mxu2 %vm3350_vm1, %v10552_v45  ;;  %7951 = vmatmul.msk.f32.gmra.mxu3 %vm3350_vm1, %v10554_v48 }
 0x430   :  { %v3848_v28 = vpop.f32.mrf.mxu2  ;;  %v3999_v41 = vpop.f32.mrf.mxu3 }
 0x431   :  { %v3868_v15 = vadd.f32 %v3848_v28, %v3714_v49  ;;  %v4111_v40 = vpop.f32.mrf.mxu0  ;;  %v4262_v5 = vpop.f32.mrf.mxu1 }
 0x432   :  { %v4157_v35 = vadd.f32 %v4111_v40, %v10368_v2 }
 0x433   :  { %v10588_v34 = vadd.f32 %v3999_v41, %v3868_v15 }
 0x434   :  { %v4308_v8 = vadd.f32 %v4262_v5, %v4157_v35  ;;  %7958 = vmatmul.msk.f32.gmra.mxu0 %vm3350_vm1, %v10142_v46  ;;  %7978 = vmatmul.msk.f32.gmra.mxu1 %vm3350_vm1, %v10140_v61  ;;  %v4928_v61 = vld [vmem:[#allocation2 + $0xb0] sm:$0xff] }
 0x435   :  { %7932 = vmatmul.msk.f32.gmra.mxu2 %vm3350_vm1, %v10590_v24  ;;  %7952 = vmatmul.msk.f32.gmra.mxu3 %vm3350_vm1, %v10592_v7  ;;  %v8075_v35 = vld [vmem:[%s12000_s3 + $0x1d0] sm:$0xff] }
 0x436   :  { %5614 = vmatpush.msrb.mxu2 %v8075_v35 }
 0x438   :  { %v3851_v2 = vpop.f32.mrf.mxu2  ;;  %v4002_v38 = vpop.f32.mrf.mxu3 }
 0x439   :  { %v3869_v13 = vadd.f32 %v3851_v2, %v10344_v22  ;;  %v4114_v11 = vpop.f32.mrf.mxu0  ;;  %v4265_v0 = vpop.f32.mrf.mxu1 }
 0x43a   :  { %v4158_v32 = vadd.f32 %v4114_v11, %v10380_v21 }
 0x43b   :  { %v10604_v44 = vadd.f32 %v4002_v38, %v3869_v13 }
 0x43c   :  { %v4309_v46 = vadd.f32 %v4265_v0, %v4158_v32  ;;  %7959 = vmatmul.msk.f32.gmra.mxu0 %vm3350_vm1, %v10156_v29  ;;  %7979 = vmatmul.msk.f32.gmra.mxu1 %vm3350_vm1, %v10154_v27  ;;  %v5080_v27 = vld [vmem:[#allocation2 + $0xc8] sm:$0xff] }
 0x43d   :  { %7997 = vmatmul.msk.f32.vlgmr.msra.gmra.mxu2 %vm3350_vm1, %v4928_v61  ;;  %8017 = vmatmul.msk.f32.vlgmr.msra.gmra.mxu3 %vm3350_vm1, %v5079_v17  ;;  %v5081_v17 = vld [vmem:[#allocation2 + $0xd8] sm:$0xff] }
 0x440   :  { %v4410_v22 = vpop.f32.mrf.mxu2  ;;  %v4561_v49 = vpop.f32.mrf.mxu3 }
 0x441   :  { %v4458_v28 = vadd.f32 %v4410_v22, %v4307_v1  ;;  %v4117_v41 = vpop.f32.mrf.mxu0  ;;  %v4268_v21 = vpop.f32.mrf.mxu1  ;;  %v8035_v1 = vld [vmem:[%s12000_s3 + $0x190] sm:$0xff] }
 0x442   :  { %v4159_v15 = vadd.f32 %v4117_v41, %v10392_v33  ;;  %v8095_v33 = vld [vmem:[%s12000_s3 + $0x1f0] sm:$0xff]  ;;  %5312 = vmatpush.msra.mxu0 %v8035_v1 }
 0x443   :  { %v10613_v40 = vadd.f32 %v4561_v49, %v4458_v28  ;;  %5765 = vmatpush.msrb.mxu3 %v8095_v33 }
 0x444   :  { %v4310_v5 = vadd.f32 %v4268_v21, %v4159_v15  ;;  %7960 = vmatmul.msk.f32.gmra.mxu0 %vm3350_vm1, %v10176_v43  ;;  %7980 = vmatmul.msk.f32.gmra.mxu1 %vm3350_vm1, %v10174_v42  ;;  %v8055_v42 = vld [vmem:[%s12000_s3 + $0x1b0] sm:$0xff] }
 0x445   :  { %7998 = vmatmul.msk.f32.gmra.mxu2 %vm3350_vm1, %v10156_v29  ;;  %8018 = vmatmul.msk.f32.gmra.mxu3 %vm3350_vm1, %v5080_v27 }
 0x446   :  { %5463 = vmatpush.msra.mxu1 %v8055_v42 }
 0x448   :  { %v4413_v2 = vpop.f32.mrf.mxu2  ;;  %v4564_v29 = vpop.f32.mrf.mxu3 }
 0x449   :  { %v4459_v38 = vadd.f32 %v4413_v2, %v4308_v8  ;;  %v4120_v13 = vpop.f32.mrf.mxu0  ;;  %v4271_v11 = vpop.f32.mrf.mxu1 }
 0x44a   :  { %v4160_v0 = vadd.f32 %v4120_v13, %v10406_v47 }
 0x44b   :  { %v10635_v32 = vadd.f32 %v4564_v29, %v4459_v38  ;;  %v8054_v38 = vld [vmem:[%s12000_s3 + $0x1a8] sm:$0xff] }
 0x44c   :  { %v4311_v61 = vadd.f32 %v4271_v11, %v4160_v0  ;;  %7961 = vmatmul.msk.f32.gmra.mxu0 %vm3350_vm1, %v10196_v60  ;;  %7981 = vmatmul.msk.f32.gmra.mxu1 %vm3350_vm1, %v10194_v54 }
 0x44d   :  { %7999 = vmatmul.msk.f32.gmra.mxu2 %vm3350_vm1, %v10176_v43  ;;  %8019 = vmatmul.msk.f32.gmra.mxu3 %vm3350_vm1, %v5081_v17 }
 0x44e   :  { %5464 = vmatpush.msra.mxu1 %v8054_v38  ;;  %v4638_v38 = vld [vmem:[#allocation2 + $0x280] sm:$0xff] }
 0x450   :  { %v4416_v8 = vpop.f32.mrf.mxu2  ;;  %v4567_v22 = vpop.f32.mrf.mxu3 }
 0x451   :  { %v4460_v49 = vadd.f32 %v4416_v8, %v4309_v46  ;;  %v4123_v28 = vpop.f32.mrf.mxu0  ;;  %v4274_v47 = vpop.f32.mrf.mxu1 }
 0x452   :  { %v4161_v41 = vadd.f32 %v4123_v28, %v10432_v25 }
 0x453   :  { %v10645_v21 = vadd.f32 %v4567_v22, %v4460_v49 }
 0x454   :  { %v4312_v15 = vadd.f32 %v4274_v47, %v4161_v41  ;;  %7962 = vmatmul.msk.f32.gmra.mxu0 %vm3350_vm1, %v10214_v12  ;;  %7982 = vmatmul.msk.f32.gmra.mxu1 %vm3350_vm1, %v10212_v10 }
 0x455   :  { %8000 = vmatmul.msk.f32.gmra.mxu2 %vm3350_vm1, %v10202_v57  ;;  %8020 = vmatmul.msk.f32.gmra.mxu3 %vm3350_vm1, %v10204_v56 }
 0x458   :  { %v4419_v43 = vpop.f32.mrf.mxu2  ;;  %v4570_v54 = vpop.f32.mrf.mxu3 }
 0x459   :  { %v4461_v60 = vadd.f32 %v4419_v43, %v4310_v5  ;;  %v4126_v46 = vpop.f32.mrf.mxu0  ;;  %v4277_v25 = vpop.f32.mrf.mxu1 }
 0x45a   :  { %v4162_v27 = vadd.f32 %v4126_v46, %v10446_v59 }
 0x45b   :  { %v10656_v35 = vadd.f32 %v4570_v54, %v4461_v60 }
 0x45c   :  { %v4313_v1 = vadd.f32 %v4277_v25, %v4162_v27  ;;  %7963 = vmatmul.msk.f32.gmra.mxu0 %vm3350_vm1, %v10228_v23  ;;  %7983 = vmatmul.msk.f32.gmra.mxu1 %vm3350_vm1, %v10226_v30 }
 0x45d   :  { %8001 = vmatmul.msk.f32.gmra.mxu2 %vm3350_vm1, %v10214_v12  ;;  %8021 = vmatmul.msk.f32.gmra.mxu3 %vm3350_vm1, %v10212_v10  ;;  %v8074_v10 = vld [vmem:[%s12000_s3 + $0x1c8] sm:$0xff] }
 0x45e   :  { %v8034_v12 = vld [vmem:[%s12000_s3 + $0x188] sm:$0xff]  ;;  %5615 = vmatpush.msrb.mxu2 %v8074_v10 }
 0x45f   :  { %5313 = vmatpush.msra.mxu0 %v8034_v12 }
 0x460   :  { %v4422_v57 = vpop.f32.mrf.mxu2  ;;  %v4573_v56 = vpop.f32.mrf.mxu3 }
 0x461   :  { %v4462_v5 = vadd.f32 %v4422_v57, %v4311_v61  ;;  %v4129_v33 = vpop.f32.mrf.mxu0  ;;  %v4280_v59 = vpop.f32.mrf.mxu1 }
 0x462   :  { %v4163_v42 = vadd.f32 %v4129_v33, %v10464_v31  ;;  %v8094_v31 = vld [vmem:[%s12000_s3 + $0x1e8] sm:$0xff] }
 0x463   :  { %v10667_v2 = vadd.f32 %v4573_v56, %v4462_v5  ;;  %5766 = vmatpush.msrb.mxu3 %v8094_v31  ;;  %v4637_v56 = vld [vmem:[#allocation2 + $0x210] sm:$0xff]  ;;  %v4788_v5 = vld [vmem:[#allocation2 + $0x218] sm:$0xff] }
 0x464   :  { %v4314_v29 = vadd.f32 %v4280_v59, %v4163_v42  ;;  %7964 = vmatmul.msk.f32.gmra.mxu0 %vm3350_vm1, %v10251_v37  ;;  %7984 = vmatmul.msk.f32.gmra.mxu1 %vm3350_vm1, %v10249_v36  ;;  %v8053_v59 = vld [vmem:[%s12000_s3 + $0x1a0] sm:$0xff] }
 0x465   :  { %8002 = vmatmul.msk.f32.gmra.mxu2 %vm3350_vm1, %v10228_v23  ;;  %8022 = vmatmul.msk.f32.gmra.mxu3 %vm3350_vm1, %v10226_v30 }
 0x466   :  { %5465 = vmatpush.msra.mxu1 %v8053_v59 }
 0x468   :  { %v4425_v23 = vpop.f32.mrf.mxu2  ;;  %v4576_v13 = vpop.f32.mrf.mxu3 }
 0x469   :  { %v4463_v11 = vadd.f32 %v4425_v23, %v4312_v15  ;;  %v4132_v30 = vpop.f32.mrf.mxu0  ;;  %v4283_v0 = vpop.f32.mrf.mxu1  ;;  %v4789_v23 = vld [vmem:[#allocation2 + $0x288] sm:$0xff] }
 0x46a   :  { %v4164_v61 = vadd.f32 %v4132_v30, %v10478_v62 }
 0x46b   :  { %v10690_v17 = vadd.f32 %v4576_v13, %v4463_v11 }
 0x46c   :  { %v4315_v8 = vadd.f32 %v4283_v0, %v4164_v61  ;;  %7965 = vmatmul.msk.f32.gmra.mxu0 %vm3350_vm1, %v10268_v53  ;;  %7985 = vmatmul.msk.f32.gmra.mxu1 %vm3350_vm1, %v10266_v52 }
 0x46d   :  { %8003 = vmatmul.msk.f32.gmra.mxu2 %vm3350_vm1, %v10251_v37  ;;  %8023 = vmatmul.msk.f32.gmra.mxu3 %vm3350_vm1, %v10249_v36 }
 0x470   :  { %v4428_v22 = vpop.f32.mrf.mxu2  ;;  %v4579_v49 = vpop.f32.mrf.mxu3 }
 0x471   :  { %v4464_v28 = vadd.f32 %v4428_v22, %v4313_v1  ;;  %v4135_v47 = vpop.f32.mrf.mxu0  ;;  %v4286_v62 = vpop.f32.mrf.mxu1 }
 0x472   :  { %v4165_v41 = vadd.f32 %v4135_v47, %v10504_v51 }
 0x473   :  { %v10701_v15 = vadd.f32 %v4579_v49, %v4464_v28  ;;  %v4639_v49 = vld [vmem:[#allocation2 + $0x290] sm:$0xff]  ;;  %v4790_v28 = vld [vmem:[#allocation2 + $0x298] sm:$0xff] }
 0x474   :  { %v4316_v43 = vadd.f32 %v4286_v62, %v4165_v41  ;;  %7966 = vmatmul.msk.f32.gmra.mxu0 %vm3350_vm1, %v10286_v19  ;;  %7986 = vmatmul.msk.f32.gmra.mxu1 %vm3350_vm1, %v10284_v58 }
 0x475   :  { %8004 = vmatmul.msk.f32.gmra.mxu2 %vm3350_vm1, %v10274_v6  ;;  %8024 = vmatmul.msk.f32.gmra.mxu3 %vm3350_vm1, %v10276_v63 }
 0x478   :  { %v4431_v36 = vpop.f32.mrf.mxu2  ;;  %v4582_v37 = vpop.f32.mrf.mxu3 }
 0x479   :  { %v4465_v52 = vadd.f32 %v4431_v36, %v4314_v29  ;;  %v4138_v53 = vpop.f32.mrf.mxu0  ;;  %v4289_v51 = vpop.f32.mrf.mxu1 }
 0x47a   :  { %v4166_v54 = vadd.f32 %v4138_v53, %v10518_v39  ;;  %v4640_v53 = vld [vmem:[#allocation2 + $0x2a0] sm:$0xff] }
 0x47b   :  { %v10712_v60 = vadd.f32 %v4582_v37, %v4465_v52 }
 0x47c   :  { %v4317_v46 = vadd.f32 %v4289_v51, %v4166_v54  ;;  %7967 = vmatmul.msk.f32.gmra.mxu0 %vm3350_vm1, %v10300_v26  ;;  %7987 = vmatmul.msk.f32.gmra.mxu1 %vm3350_vm1, %v10298_v55  ;;  %v4791_v51 = vld [vmem:[#allocation2 + $0x2a8] sm:$0xff] }
 0x47d   :  { %8005 = vmatmul.msk.f32.gmra.mxu2 %vm3350_vm1, %v10286_v19  ;;  %8025 = vmatmul.msk.f32.gmra.mxu3 %vm3350_vm1, %v10284_v58  ;;  %v8073_v58 = vld [vmem:[%s12000_s3 + $0x1c0] sm:$0xff] }
 0x47e   :  { %v8033_v19 = vld [vmem:[%s12000_s3 + $0x180] sm:$0xff]  ;;  %5616 = vmatpush.msrb.mxu2 %v8073_v58 }
 0x47f   :  { %5314 = vmatpush.msra.mxu0 %v8033_v19 }
 0x480   :  { %v4434_v6 = vpop.f32.mrf.mxu2  ;;  %v4585_v63 = vpop.f32.mrf.mxu3 }
 0x481   :  { %v4466_v25 = vadd.f32 %v4434_v6, %v4315_v8  ;;  %v4141_v27 = vpop.f32.mrf.mxu0  ;;  %v4292_v39 = vpop.f32.mrf.mxu1 }
 0x482   :  { %v4167_v1 = vadd.f32 %v4141_v27, %v10536_v9  ;;  %v8093_v9 = vld [vmem:[%s12000_s3 + $0x1e0] sm:$0xff]  ;;  %v4641_v27 = vld [vmem:[#allocation2 + $0x2b0] sm:$0xff] }
 0x483   :  { %v10723_v57 = vadd.f32 %v4585_v63, %v4466_v25  ;;  %5767 = vmatpush.msrb.mxu3 %v8093_v9 }
 0x484   :  { %v4318_v33 = vadd.f32 %v4292_v39, %v4167_v1  ;;  %7968 = vmatmul.msk.f32.gmra.mxu0 %vm3350_vm1, %v4637_v56  ;;  %7988 = vmatmul.msk.f32.gmra.mxu1 %vm3350_vm1, %v4788_v5  ;;  %v4792_v39 = vld [vmem:[#allocation2 + $0x2b8] sm:$0xff] }
 0x485   :  { %8006 = vmatmul.msk.f32.gmra.mxu2 %vm3350_vm1, %v10300_v26  ;;  %8026 = vmatmul.msk.f32.gmra.mxu3 %vm3350_vm1, %v10298_v55 }
 0x488   :  { %v4437_v26 = vpop.f32.mrf.mxu2  ;;  %v4588_v42 = vpop.f32.mrf.mxu3 }
 0x489   :  { %v4467_v29 = vadd.f32 %v4437_v26, %v4316_v43  ;;  %v4144_v55 = vpop.f32.mrf.mxu0  ;;  %v4295_v10 = vpop.f32.mrf.mxu1 }
 0x48a   :  { %v4168_v12 = vadd.f32 %v4144_v55, %v10550_v20 }
 0x48b   :  { %v10744_v31 = vadd.f32 %v4588_v42, %v4467_v29 }
 0x48c   :  { %v4319_v13 = vadd.f32 %v4295_v10, %v4168_v12  ;;  %7969 = vmatmul.msk.f32.gmra.mxu0 %vm3350_vm1, %v4638_v38  ;;  %7989 = vmatmul.msk.f32.gmra.mxu1 %vm3350_vm1, %v4789_v23  ;;  %v4943_v23 = vld [vmem:[#allocation2 + $0x2c0] sm:$0xff] }
 0x48d   :  { %8007 = vmatmul.msk.f32.gmra.mxu2 %vm3350_vm1, %v4637_v56  ;;  %8027 = vmatmul.msk.f32.gmra.mxu3 %vm3350_vm1, %v4788_v5 }
 0x490   :  { %v4440_v11 = vpop.f32.mrf.mxu2  ;;  %v4591_v30 = vpop.f32.mrf.mxu3 }
 0x491   :  { %v4468_v0 = vadd.f32 %v4440_v11, %v4317_v46  ;;  %v4147_v61 = vpop.f32.mrf.mxu0  ;;  %v4298_v8 = vpop.f32.mrf.mxu1 }
 0x492   :  { %v4169_v20 = vadd.f32 %v4147_v61, %v10577_v50 }
 0x493   :  { %v10751_v22 = vadd.f32 %v4591_v30, %v4468_v0 }
 0x494   :  { %v4320_v47 = vadd.f32 %v4298_v8, %v4169_v20  ;;  %7970 = vmatmul.msk.f32.gmra.mxu0 %vm3350_vm1, %v4639_v49  ;;  %7990 = vmatmul.msk.f32.gmra.mxu1 %vm3350_vm1, %v4790_v28 }
 0x495   :  { %8008 = vmatmul.msk.f32.gmra.mxu2 %vm3350_vm1, %v10333_v18  ;;  %8028 = vmatmul.msk.f32.gmra.mxu3 %vm3350_vm1, %v10335_v14 }
 0x498   :  { %v4443_v62 = vpop.f32.mrf.mxu2  ;;  %v4594_v41 = vpop.f32.mrf.mxu3 }
 0x499   :  { %v4469_v43 = vadd.f32 %v4443_v62, %v4318_v33  ;;  %v4150_v36 = vpop.f32.mrf.mxu0  ;;  %v4301_v50 = vpop.f32.mrf.mxu1 }
 0x49a   :  { %v4170_v37 = vadd.f32 %v4150_v36, %v10588_v34 }
 0x49b   :  { %v10760_v52 = vadd.f32 %v4594_v41, %v4469_v43 }
 0x49c   :  { %v4321_v54 = vadd.f32 %v4301_v50, %v4170_v37  ;;  %7971 = vmatmul.msk.f32.gmra.mxu0 %vm3350_vm1, %v4640_v53  ;;  %7991 = vmatmul.msk.f32.gmra.mxu1 %vm3350_vm1, %v4791_v51 }
 0x49d   :  { %8009 = vmatmul.msk.f32.gmra.mxu2 %vm3350_vm1, %v4639_v49  ;;  %8029 = vmatmul.msk.f32.gmra.mxu3 %vm3350_vm1, %v4790_v28  ;;  %v12066_v49 = vld [vmem:[#allocation8_spill] sm:$0xff]  ;;  %v5532_v28 = vld [vmem:[#allocation2 + $0x100] sm:$0xff] }
 0x4a0   :  { %v4446_v18 = vpop.f32.mrf.mxu2  ;;  %v4597_v14 = vpop.f32.mrf.mxu3 }
 0x4a1   :  { %v4470_v46 = vadd.f32 %v4446_v18, %v4319_v13  ;;  %v4153_v6 = vpop.f32.mrf.mxu0  ;;  %v4304_v63 = vpop.f32.mrf.mxu1  ;;  %v5094_v13 = vld [vmem:[#allocation2 + $0x2c8] sm:$0xff]  ;;  %v5533_v18 = vld [vmem:[#allocation2 + $0x110] sm:$0xff] }
 0x4a2   :  { %v4171_v34 = vadd.f32 %v4153_v6, %v10604_v44 }
 0x4a3   :  { %v10767_v25 = vadd.f32 %v4597_v14, %v4470_v46  ;;  %v5684_v14 = vld [vmem:[#allocation2 + $0x118] sm:$0xff] }
 0x4a4   :  { %v4322_v1 = vadd.f32 %v4304_v63, %v4171_v34  ;;  %7972 = vmatmul.msk.f32.gmra.mxu0 %vm3350_vm1, %v4641_v27  ;;  %7992 = vmatmul.msk.f32.gmra.mxu1 %vm3350_vm1, %v4792_v39 }
 0x4a5   :  { %8010 = vmatmul.msk.f32.gmra.mxu2 %vm3350_vm1, %v4640_v53  ;;  %8030 = vmatmul.msk.f32.gmra.mxu3 %vm3350_vm1, %v4791_v51  ;;  %v12068_v51 = vld [vmem:[#allocation10_spill] sm:$0xff] }
 0x4a8   :  { %v4449_v56 = vpop.f32.mrf.mxu2  ;;  %v4600_v5 = vpop.f32.mrf.mxu3 }
 0x4a9   :  { %v4471_v33 = vadd.f32 %v4449_v56, %v4320_v47  ;;  %v4712_v58 = vpop.f32.mrf.mxu0  ;;  %v4863_v19 = vpop.f32.mrf.mxu1  ;;  %v5683_v47 = vld [vmem:[#allocation2 + $0x108] sm:$0xff]  ;;  %v12070_v56 = vld [vmem:[#allocation12_spill] sm:$0xff] }
 0x4aa   :  { %v4760_v44 = vadd.f32 %v4712_v58, %v10613_v40  ;;  %v5685_v58 = vld [vmem:[#allocation2 + $0x128] sm:$0xff] }
 0x4ab   :  { %v10774_v9 = vadd.f32 %v4600_v5, %v4471_v33  ;;  %v12071_v5 = vld [vmem:[#allocation13_spill] sm:$0xff]  ;;  %v5534_v33 = vld [vmem:[#allocation2 + $0x120] sm:$0xff] }
 0x4ac   :  { %v4911_v59 = vadd.f32 %v4863_v19, %v4760_v44  ;;  %8037 = vmatmul.msk.f32.vlgmr.msra.gmra.mxu0 %vm3350_vm1, %v10370_v3  ;;  %8057 = vmatmul.msk.f32.vlgmr.msra.gmra.mxu1 %vm3350_vm1, %v10372_v4  ;;  %v12065_v3 = vld [vmem:[#allocation7_spill] sm:$0xff]  ;;  %v8120_v19 = vld [vmem:[%s12002_s5 + $0x78] sm:$0xff] }
 0x4ad   :  { %8011 = vmatmul.msk.f32.gmra.mxu2 %vm3350_vm1, %v4641_v27  ;;  %8031 = vmatmul.msk.f32.gmra.mxu3 %vm3350_vm1, %v4792_v39 }
 0x4ae   :  { %5931 = vmatpush.msrb.mxu0 %v8120_v19 }
 0x4b0   :  { %v4452_v26 = vpop.f32.mrf.mxu2  ;;  %v4603_v42 = vpop.f32.mrf.mxu3 }
 0x4b1   :  { %v4472_v29 = vadd.f32 %v4452_v26, %v4321_v54  ;;  %v4715_v55 = vpop.f32.mrf.mxu0  ;;  %v4866_v10 = vpop.f32.mrf.mxu1  ;;  %v12069_v54 = vld [vmem:[#allocation11_spill] sm:$0xff] }
 0x4b2   :  { %v4761_v40 = vadd.f32 %v4715_v55, %v10635_v32 }
 0x4b3   :  { %v10783_v12 = vadd.f32 %v4603_v42, %v4472_v29 }
 0x4b4   :  { %v4912_v38 = vadd.f32 %v4866_v10, %v4761_v40  ;;  %8038 = vmatmul.msk.f32.gmra.mxu0 %vm3350_vm1, %v10382_v16  ;;  %8058 = vmatmul.msk.f32.gmra.mxu1 %vm3350_vm1, %v12065_v3  ;;  %v12067_v16 = vld [vmem:[#allocation9_spill] sm:$0xff]  ;;  %v12072_v40 = vld [vmem:[#allocation14_spill] sm:$0xff] }
 0x4b5   :  { %8012 = vmatmul.msk.f32.gmra.mxu2 %vm3350_vm1, %v4943_v23  ;;  %8032 = vmatmul.msk.f32.gmra.mxu3 %vm3350_vm1, %v5094_v13  ;;  %v12074_v23 = vld [vmem:[#allocation16_spill] sm:$0xff]  ;;  %v12075_v13 = vld [vmem:[#allocation17_spill] sm:$0xff] }
 0x4b8   :  { %v4455_v4 = vpop.f32.mrf.mxu2  ;;  %v4606_v11 = vpop.f32.mrf.mxu3 }
 0x4b9   :  { %v4473_v30 = vadd.f32 %v4455_v4, %v4322_v1  ;;  %v4718_v0 = vpop.f32.mrf.mxu0  ;;  %v4869_v32 = vpop.f32.mrf.mxu1 }
 0x4ba   :  { %v4762_v61 = vadd.f32 %v4718_v0, %v10645_v21 }
 0x4bb   :  { %v10792_v8 = vadd.f32 %v4606_v11, %v4473_v30 }
 0x4bc   :  { %v4913_v20 = vadd.f32 %v4869_v32, %v4762_v61  ;;  %8039 = vmatmul.msk.f32.gmra.mxu0 %vm3350_vm1, %v12066_v49  ;;  %8059 = vmatmul.msk.f32.gmra.mxu1 %vm3350_vm1, %v12067_v16  ;;  %v12077_v49 = vld [vmem:[#allocation19_spill] sm:$0xff]  ;;  %v8119_v16 = vld [vmem:[%s12002_s5 + $0x70] sm:$0xff] }
 0x4bd   :  { %8077 = vmatmul.msk.f32.vlgmr.msrb.gmra.mxu2 %vm3350_vm1, %v5532_v28  ;;  %8097 = vmatmul.msk.f32.vlgmr.msrb.gmra.mxu3 %vm3350_vm1, %v5683_v47 }
 0x4be   :  { %5932 = vmatpush.msrb.mxu0 %v8119_v16 }
 0x4c0   :  { %v5014_v62 = vpop.f32.mrf.mxu2  ;;  %v5165_v41 = vpop.f32.mrf.mxu3 }
 0x4c1   :  { %v5062_v43 = vadd.f32 %v5014_v62, %v4911_v59  ;;  %v4721_v36 = vpop.f32.mrf.mxu0  ;;  %v4872_v21 = vpop.f32.mrf.mxu1 }
 0x4c2   :  { %v4763_v50 = vadd.f32 %v4721_v36, %v10656_v35 }
 0x4c3   :  { %v10801_v37 = vadd.f32 %v5165_v41, %v5062_v43 }
 0x4c4   :  { %v4914_v53 = vadd.f32 %v4872_v21, %v4763_v50  ;;  %8040 = vmatmul.msk.f32.gmra.mxu0 %vm3350_vm1, %v12068_v51  ;;  %8060 = vmatmul.msk.f32.gmra.mxu1 %vm3350_vm1, %v12069_v54  ;;  %v12078_v50 = vld [vmem:[#allocation20_spill] sm:$0xff]  ;;  %v8136_v51 = vld [vmem:[%s12002_s5 + $0xb8] sm:$0xff] }
 0x4c5   :  { %8078 = vmatmul.msk.f32.gmra.mxu2 %vm3350_vm1, %v5533_v18  ;;  %8098 = vmatmul.msk.f32.gmra.mxu3 %vm3350_vm1, %v5684_v14 }
 0x4c6   :  { %6027 = vmatpush.msra.mxu2 %v8136_v51  ;;  %v8116_v51 = vld [vmem:[%s12002_s5 + $0x58] sm:$0xff] }
 0x4c8   :  { %v5017_v46 = vpop.f32.mrf.mxu2  ;;  %v5168_v6 = vpop.f32.mrf.mxu3 }
 0x4c9   :  { %v5063_v63 = vadd.f32 %v5017_v46, %v4912_v38  ;;  %v4724_v34 = vpop.f32.mrf.mxu0  ;;  %v4875_v35 = vpop.f32.mrf.mxu1  ;;  %v12073_v38 = vld [vmem:[#allocation15_spill] sm:$0xff] }
 0x4ca   :  { %v4764_v27 = vadd.f32 %v4724_v34, %v10667_v2  ;;  %v5896_v34 = vld [vmem:[%s12002_s5 + $0x38] sm:$0xff] }
 0x4cb   :  { %v10810_v39 = vadd.f32 %v5168_v6, %v5063_v63  ;;  %5972 = vmatpush.msrb.mxu1 %v5896_v34  ;;  %v5243_v34 = vld [vmem:[#allocation2 + $0x2e0] sm:$0xff] }
 0x4cc   :  { %v4915_v1 = vadd.f32 %v4875_v35, %v4764_v27  ;;  %8041 = vmatmul.msk.f32.gmra.mxu0 %vm3350_vm1, %v12070_v56  ;;  %8061 = vmatmul.msk.f32.gmra.mxu1 %vm3350_vm1, %v12071_v5  ;;  %v12080_v35 = vld [vmem:[#allocation22_spill] sm:$0xff]  ;;  %v12081_v27 = vld [vmem:[#allocation23_spill] sm:$0xff] }
 0x4cd   :  { %8079 = vmatmul.msk.f32.gmra.mxu2 %vm3350_vm1, %v5534_v33  ;;  %8099 = vmatmul.msk.f32.gmra.mxu3 %vm3350_vm1, %v5685_v58 }
 0x4d0   :  { %v5020_v2 = vpop.f32.mrf.mxu2  ;;  %v5171_v44 = vpop.f32.mrf.mxu3 }
 0x4d1   :  { %v5064_v59 = vadd.f32 %v5020_v2, %v4913_v20  ;;  %v4727_v26 = vpop.f32.mrf.mxu0  ;;  %v4878_v42 = vpop.f32.mrf.mxu1  ;;  %v12076_v20 = vld [vmem:[#allocation18_spill] sm:$0xff] }
 0x4d2   :  { %v4765_v29 = vadd.f32 %v4727_v26, %v10690_v17  ;;  %v12084_v26 = vld [vmem:[#allocation26_spill] sm:$0xff] }
 0x4d3   :  { %v10822_v55 = vadd.f32 %v5171_v44, %v5064_v59  ;;  %v12082_v44 = vld [vmem:[#allocation24_spill] sm:$0xff]  ;;  %v12083_v59 = vld [vmem:[#allocation25_spill] sm:$0xff] }
 0x4d4   :  { %v4916_v10 = vadd.f32 %v4878_v42, %v4765_v29  ;;  %8042 = vmatmul.msk.f32.gmra.mxu0 %vm3350_vm1, %v12072_v40  ;;  %8062 = vmatmul.msk.f32.gmra.mxu1 %vm3350_vm1, %v12073_v38  ;;  %v12085_v42 = vld [vmem:[#allocation27_spill] sm:$0xff]  ;;  %v8135_v29 = vld [vmem:[%s12002_s5 + $0xb0] sm:$0xff] }
 0x4d5   :  { %8080 = vmatmul.msk.f32.gmra.mxu2 %vm3350_vm1, %v12074_v23  ;;  %8100 = vmatmul.msk.f32.gmra.mxu3 %vm3350_vm1, %v12075_v13 }
 0x4d6   :  { %6028 = vmatpush.msra.mxu2 %v8135_v29 }
 0x4d8   :  { %v5023_v3 = vpop.f32.mrf.mxu2  ;;  %v5174_v4 = vpop.f32.mrf.mxu3 }
 0x4d9   :  { %v5065_v11 = vadd.f32 %v5023_v3, %v4914_v53  ;;  %v4730_v30 = vpop.f32.mrf.mxu0  ;;  %v4881_v17 = vpop.f32.mrf.mxu1  ;;  %v12079_v53 = vld [vmem:[#allocation21_spill] sm:$0xff] }
 0x4da   :  { %v4766_v0 = vadd.f32 %v4730_v30, %v10701_v15  ;;  %v12086_v30 = vld [vmem:[#allocation28_spill] sm:$0xff] }
 0x4db   :  { %v10833_v32 = vadd.f32 %v5174_v4, %v5065_v11  ;;  %v5895_v11 = vld [vmem:[%s12002_s5 + $0x30] sm:$0xff] }
 0x4dc   :  { %v4917_v61 = vadd.f32 %v4881_v17, %v4766_v0  ;;  %8043 = vmatmul.msk.f32.gmra.mxu0 %vm3350_vm1, %v12076_v20  ;;  %8063 = vmatmul.msk.f32.gmra.mxu1 %vm3350_vm1, %v12077_v49  ;;  %v12087_v17 = vld [vmem:[#allocation29_spill] sm:$0xff]  ;;  %v8117_v0 = vld [vmem:[%s12002_s5 + $0x60] sm:$0xff] }
 0x4dd   :  { %8081 = vmatmul.msk.f32.gmra.mxu2 %vm3350_vm1, %v12072_v40  ;;  %8101 = vmatmul.msk.f32.gmra.mxu3 %vm3350_vm1, %v12073_v38 }
 0x4de   :  { %5973 = vmatpush.msrb.mxu1 %v5895_v11 }
 0x4e0   :  { %v5026_v15 = vpop.f32.mrf.mxu2  ;;  %v5177_v28 = vpop.f32.mrf.mxu3 }
 0x4e1   :  { %v5066_v47 = vadd.f32 %v5026_v15, %v4915_v1  ;;  %v4733_v62 = vpop.f32.mrf.mxu0  ;;  %v4884_v41 = vpop.f32.mrf.mxu1  ;;  %v8118_v1 = vld [vmem:[%s12002_s5 + $0x68] sm:$0xff] }
 0x4e2   :  { %v4767_v43 = vadd.f32 %v4733_v62, %v10712_v60  ;;  %v8148_v60 = vld [vmem:[%s12002_s5 + $0xf8] sm:$0xff]  ;;  %5933 = vmatpush.msrb.mxu0 %v8118_v1  ;;  %v8134_v15 = vld [vmem:[%s12002_s5 + $0xa8] sm:$0xff]  ;;  %v8145_v1 = vld [vmem:[%s12002_s5 + $0xe0] sm:$0xff] }
 0x4e3   :  { %v10847_v36 = vadd.f32 %v5177_v28, %v5066_v47  ;;  %6086 = vmatpush.msra.mxu3 %v8148_v60  ;;  %v8146_v28 = vld [vmem:[%s12002_s5 + $0xe8] sm:$0xff]  ;;  %6029 = vmatpush.msra.mxu2 %v8134_v15  ;;  %v8132_v15 = vld [vmem:[%s12002_s5 + $0x98] sm:$0xff] }
 0x4e4   :  { %v4918_v21 = vadd.f32 %v4884_v41, %v4767_v43  ;;  %8044 = vmatmul.msk.f32.gmra.mxu0 %vm3350_vm1, %v12078_v50  ;;  %8064 = vmatmul.msk.f32.gmra.mxu1 %vm3350_vm1, %v12079_v53  ;;  %v5242_v41 = vld [vmem:[#allocation2 + $0x2d0] sm:$0xff]  ;;  %v5393_v43 = vld [vmem:[#allocation2 + $0x2d8] sm:$0xff] }
 0x4e5   :  { %8082 = vmatmul.msk.f32.gmra.mxu2 %vm3350_vm1, %v12076_v20  ;;  %8102 = vmatmul.msk.f32.gmra.mxu3 %vm3350_vm1, %v12077_v49 }
 0x4e6   :  { %5934 = vmatpush.msrb.mxu0 %v8117_v0 }
 0x4e8   :  { %v5029_v54 = vpop.f32.mrf.mxu2  ;;  %v5180_v18 = vpop.f32.mrf.mxu3  ;;  %5935 = vmatpush.msrb.mxu0 %v8116_v51 }
 0x4e9   :  { %v5067_v14 = vadd.f32 %v5029_v54, %v4916_v10  ;;  %v10863_v46 = vpop.f32.mrf.mxu0  ;;  %v10865_v6 = vpop.f32.mrf.mxu1  ;;  %v8147_v10 = vld [vmem:[%s12002_s5 + $0xf0] sm:$0xff] }
 0x4ea   :  { %6087 = vmatpush.msra.mxu3 %v8147_v10 }
 0x4eb   :  { %v10867_v63 = vadd.f32 %v5180_v18, %v5067_v14 }
 0x4ec   :  { %8045 = vmatmul.msk.f32.gmra.mxu0 %vm3350_vm1, %v12080_v35  ;;  %8065 = vmatmul.msk.f32.gmra.mxu1 %vm3350_vm1, %v12081_v27  ;;  %v5394_v35 = vld [vmem:[#allocation2 + $0x2e8] sm:$0xff]  ;;  %v8133_v27 = vld [vmem:[%s12002_s5 + $0xa0] sm:$0xff] }
 0x4ed   :  { %8083 = vmatmul.msk.f32.gmra.mxu2 %vm3350_vm1, %v12078_v50  ;;  %8103 = vmatmul.msk.f32.gmra.mxu3 %vm3350_vm1, %v12079_v53  ;;  %v5542_v50 = vld [vmem:[#allocation2 + $0x260] sm:$0xff]  ;;  %v5693_v53 = vld [vmem:[#allocation2 + $0x268] sm:$0xff] }
 0x4ee   :  { %6088 = vmatpush.msra.mxu3 %v8146_v28  ;;  %6030 = vmatpush.msra.mxu2 %v8133_v27  ;;  %v8144_v28 = vld [vmem:[%s12002_s5 + $0xd8] sm:$0xff]  ;;  %v8114_v27 = vld [vmem:[%s12002_s5 + $0x48] sm:$0xff] }
 0x4f0   :  { %v5032_v56 = vpop.f32.mrf.mxu2  ;;  %v5183_v5 = vpop.f32.mrf.mxu3  ;;  %6089 = vmatpush.msra.mxu3 %v8145_v1  ;;  %6031 = vmatpush.msra.mxu2 %v8132_v15  ;;  %v5547_v1 = vld [vmem:[#allocation2 + $0x310] sm:$0xff] }
 0x4f1   :  { %v5068_v33 = vadd.f32 %v5032_v56, %v4917_v61  ;;  %v10883_v58 = vpop.f32.mrf.mxu0  ;;  %v10885_v19 = vpop.f32.mrf.mxu1  ;;  %v8131_v15 = vld [vmem:[%s12002_s5 + $0x90] sm:$0xff] }
 0x4f2   :  { %6090 = vmatpush.msra.mxu3 %v8144_v28  ;;  %v8143_v28 = vld [vmem:[%s12002_s5 + $0xd0] sm:$0xff]  ;;  %6032 = vmatpush.msra.mxu2 %v8131_v15 }
 0x4f3   :  { %v10887_v2 = vadd.f32 %v5183_v5, %v5068_v33 }
 0x4f4   :  { %8046 = vmatmul.msk.f32.gmra.mxu0 %vm3350_vm1, %v12082_v44  ;;  %8066 = vmatmul.msk.f32.gmra.mxu1 %vm3350_vm1, %v12083_v59 }
 0x4f5   :  { %8084 = vmatmul.msk.f32.gmra.mxu2 %vm3350_vm1, %v12084_v26  ;;  %8104 = vmatmul.msk.f32.gmra.mxu3 %vm3350_vm1, %v12085_v42  ;;  %v8115_v26 = vld [vmem:[%s12002_s5 + $0x50] sm:$0xff] }
 0x4f6   :  { %5936 = vmatpush.msrb.mxu0 %v8115_v26  ;;  %6091 = vmatpush.msra.mxu3 %v8143_v28 }
 0x4f8   :  { %v5035_v40 = vpop.f32.mrf.mxu2  ;;  %v5186_v38 = vpop.f32.mrf.mxu3  ;;  %5937 = vmatpush.msrb.mxu0 %v8114_v27 }
 0x4f9   :  { %v5069_v23 = vadd.f32 %v5035_v40, %v4918_v21  ;;  %v10903_v13 = vpop.f32.mrf.mxu0  ;;  %v10905_v3 = vpop.f32.mrf.mxu1  ;;  %v5894_v21 = vld [vmem:[%s12002_s5 + $0x28] sm:$0xff] }
 0x4fa   :  { %5974 = vmatpush.msrb.mxu1 %v5894_v21  ;;  %v5890_v21 = vld [vmem:[%s12002_s5 + $0x8] sm:$0xff] }
 0x4fb   :  { %v10907_v4 = vadd.f32 %v5186_v38, %v5069_v23  ;;  %v5245_v38 = vld [vmem:[#allocation2 + $0x300] sm:$0xff]  ;;  %v5396_v23 = vld [vmem:[#allocation2 + $0x308] sm:$0xff] }
 0x4fc   :  { %8047 = vmatmul.msk.f32.gmra.mxu0 %vm3350_vm1, %v12086_v30  ;;  %8067 = vmatmul.msk.f32.gmra.mxu1 %vm3350_vm1, %v12087_v17 }
 0x4fd   :  { %8085 = vmatmul.msk.f32.gmra.mxu2 %vm3350_vm1, %v12082_v44  ;;  %8105 = vmatmul.msk.f32.gmra.mxu3 %vm3350_vm1, %v12083_v59  ;;  %v5244_v44 = vld [vmem:[#allocation2 + $0x2f0] sm:$0xff]  ;;  %v5893_v59 = vld [vmem:[%s12002_s5 + $0x20] sm:$0xff] }
 0x4fe   :  { %5975 = vmatpush.msrb.mxu1 %v5893_v59 }
 0x500   :  { %v10923_v61 = vpop.f32.mrf.mxu2  ;;  %v10925_v20 = vpop.f32.mrf.mxu3 }
 0x501   :  { %v10927_v49 = vpop.f32.mrf.mxu0  ;;  %v10929_v16 = vpop.f32.mrf.mxu1 }
 0x504   :  { %8048 = vmatmul.msk.f32.gmra.mxu0 %vm3350_vm1, %v10552_v45  ;;  %8068 = vmatmul.msk.f32.gmra.mxu1 %vm3350_vm1, %v10554_v48 }
 0x505   :  { %8086 = vmatmul.msk.f32.gmra.mxu2 %vm3350_vm1, %v12086_v30  ;;  %8106 = vmatmul.msk.f32.gmra.mxu3 %vm3350_vm1, %v12087_v17 }
 0x508   :  { %v10945_v45 = vpop.f32.mrf.mxu2  ;;  %v10947_v47 = vpop.f32.mrf.mxu3 }
 0x509   :  { %v10949_v48 = vpop.f32.mrf.mxu0  ;;  %v10951_v62 = vpop.f32.mrf.mxu1 }
 0x50c   :  { %8049 = vmatmul.msk.f32.gmra.mxu0 %vm3350_vm1, %v5242_v41  ;;  %8069 = vmatmul.msk.f32.gmra.mxu1 %vm3350_vm1, %v5393_v43  ;;  %v5892_v41 = vld [vmem:[%s12002_s5 + $0x18] sm:$0xff]  ;;  %v5891_v43 = vld [vmem:[%s12002_s5 + $0x10] sm:$0xff] }
 0x50d   :  { %8087 = vmatmul.msk.f32.gmra.mxu2 %vm3350_vm1, %v5542_v50  ;;  %8107 = vmatmul.msk.f32.gmra.mxu3 %vm3350_vm1, %v5693_v53  ;;  %v5889_v50 = vld [vmem:[%s12002_s5] sm:$0xff] }
 0x50e   :  { %5976 = vmatpush.msrb.mxu1 %v5892_v41 }
 0x510   :  { %v10963_v60 = vpop.f32.mrf.mxu2  ;;  %v10965_v54 = vpop.f32.mrf.mxu3  ;;  %5977 = vmatpush.msrb.mxu1 %v5891_v43  ;;  %v8130_v43 = vld [vmem:[%s12002_s5 + $0x88] sm:$0xff] }
 0x511   :  { %v10967_v18 = vpop.f32.mrf.mxu0  ;;  %v10969_v14 = vpop.f32.mrf.mxu1  ;;  %6033 = vmatpush.msra.mxu2 %v8130_v43 }
 0x512   :  { %5978 = vmatpush.msrb.mxu1 %v5890_v21 }
 0x514   :  { %8050 = vmatmul.msk.f32.gmra.mxu0 %vm3350_vm1, %v5243_v34  ;;  %8070 = vmatmul.msk.f32.gmra.mxu1 %vm3350_vm1, %v5394_v35 }
 0x515   :  { %8088 = vmatmul.msk.f32.gmra.mxu2 %vm3350_vm1, %v10590_v24  ;;  %8108 = vmatmul.msk.f32.gmra.mxu3 %vm3350_vm1, %v10592_v7  ;;  %v5395_v7 = vld [vmem:[#allocation2 + $0x2f8] sm:$0xff] }
 0x516   :  { %5979 = vmatpush.msrb.mxu1 %v5889_v50  ;;  %v8129_v50 = vld [vmem:[%s12002_s5 + $0x80] sm:$0xff] }
 0x517   :  { %6034 = vmatpush.msra.mxu2 %v8129_v50 }
 0x518   :  { %v10983_v56 = vpop.f32.mrf.mxu2  ;;  %v10985_v5 = vpop.f32.mrf.mxu3 }
 0x519   :  { %v10987_v33 = vpop.f32.mrf.mxu0  ;;  %v10989_v24 = vpop.f32.mrf.mxu1 }
 0x51c   :  { %8051 = vmatmul.msk.f32.gmra.mxu0 %vm3350_vm1, %v5244_v44  ;;  %8071 = vmatmul.msk.f32.gmra.mxu1 %vm3350_vm1, %v5395_v7 }
 0x51d   :  { %8089 = vmatmul.msk.f32.gmra.mxu2 %vm3350_vm1, %v5243_v34  ;;  %8109 = vmatmul.msk.f32.gmra.mxu3 %vm3350_vm1, %v5394_v35 }
 0x520   :  { %v11001_v42 = vpop.f32.mrf.mxu2  ;;  %v11003_v29 = vpop.f32.mrf.mxu3 }
 0x521   :  { %v11005_v10 = vpop.f32.mrf.mxu0  ;;  %v11007_v40 = vpop.f32.mrf.mxu1 }
 0x522   :  { %12088 = vst [vmem:[#allocation7_spill] sm:$0xff] %v11007_v40  ;;  %v8142_v40 = vld [vmem:[%s12002_s5 + $0xc8] sm:$0xff] }
 0x523   :  { %6092 = vmatpush.msra.mxu3 %v8142_v40 }
 0x524   :  { %8052 = vmatmul.msk.f32.gmra.mxu0 %vm3350_vm1, %v5245_v38  ;;  %8072 = vmatmul.msk.f32.gmra.mxu1 %vm3350_vm1, %v5396_v23 }
 0x525   :  { %8090 = vmatmul.msk.f32.gmra.mxu2 %vm3350_vm1, %v5244_v44  ;;  %8110 = vmatmul.msk.f32.gmra.mxu3 %vm3350_vm1, %v5395_v7  ;;  %v5698_v44 = vld [vmem:[#allocation2 + $0x318] sm:$0xff]  ;;  %v8113_v7 = vld [vmem:[%s12002_s5 + $0x40] sm:$0xff] }
 0x526   :  { %5938 = vmatpush.msrb.mxu0 %v8113_v7  ;;  %v11069_v7 = vld [vmem:[%s12001_s4] ss:$0 sm:$0xff] }
 0x528   :  { %v11013_v11 = vpop.f32.mrf.mxu2  ;;  %v11015_v30 = vpop.f32.mrf.mxu3 }
 0x529   :  { %v5316_v17 = vpop.f32.mrf.mxu0  ;;  %v5467_v0 = vpop.f32.mrf.mxu1 }
 0x52a   :  { %v5364_v41 = vadd.f32 %v5316_v17, %v10801_v37 }
 0x52c   :  { %v5515_v21 = vadd.f32 %v5467_v0, %v5364_v41 }
 0x52d   :  { %8091 = vmatmul.msk.f32.gmra.mxu2 %vm3350_vm1, %v5245_v38  ;;  %8111 = vmatmul.msk.f32.gmra.mxu3 %vm3350_vm1, %v5396_v23 }
 0x530   :  { %v11037_v53 = vpop.f32.mrf.mxu2  ;;  %v11039_v51 = vpop.f32.mrf.mxu3 }
 0x531   :  { %12089 = vst [vmem:[#allocation8_spill] sm:$0xff] %v11039_v51  ;;  %v5319_v34 = vpop.f32.mrf.mxu0  ;;  %v5470_v35 = vpop.f32.mrf.mxu1 }
 0x532   :  { %v5365_v15 = vadd.f32 %v5319_v34, %v10810_v39 }
 0x534   :  { %v5516_v41 = vadd.f32 %v5470_v35, %v5365_v15 }
 0x535   :  { %8092 = vmatmul.msk.f32.gmra.mxu2 %vm3350_vm1, %v5547_v1  ;;  %8112 = vmatmul.msk.f32.gmra.mxu3 %vm3350_vm1, %v5698_v44 }
 0x538   :  { %v11049_v59 = vpop.f32.mrf.mxu2  ;;  %v11051_v26 = vpop.f32.mrf.mxu3 }
 0x539   :  { %12090 = vst [vmem:[#allocation9_spill] sm:$0xff] %v11049_v59  ;;  %v5322_v38 = vpop.f32.mrf.mxu0  ;;  %v5473_v23 = vpop.f32.mrf.mxu1 }
 0x53a   :  { %12091 = vst [vmem:[#allocation10_spill] sm:$0xff] %v11051_v26  ;;  %v5366_v51 = vadd.f32 %v5322_v38, %v10822_v55 }
 0x540   :  { %v5618_v27 = vpop.f32.mrf.mxu2  ;;  %v5769_v1 = vpop.f32.mrf.mxu3 }
 0x541   :  { %v5666_v44 = vadd.f32 %v5618_v27, %v5515_v21  ;;  %v5325_v37 = vpop.f32.mrf.mxu0  ;;  %v5476_v17 = vpop.f32.mrf.mxu1 }
 0x542   :  { %v5367_v38 = vadd.f32 %v5325_v37, %v10833_v32 }
 0x543   :  { %v5817_v28 = vadd.f32 %v5769_v1, %v5666_v44  ;;  %v5517_v1 = vadd.f32 %v5473_v23, %v5366_v51  ;;  %v8141_v44 = vld [vmem:[%s12002_s5 + $0xc0] sm:$0xff]  ;;  %v8160_v51 = vld [vmem:[%s12002_s5 + $0x138] sm:$0xff] }
 0x544   :  { %6093 = vmatpush.msra.mxu3 %v8141_v44  ;;  %6145 = vmatpush.msra.mxu0 %v8160_v51 }
 0x545   :  { %v5837_v0 = vadd.f32 %v11069_v7, %v5817_v28 }
 0x547   :  { %v5853_v43 = vmax.f32 %v5837_v0, 0.0 }
 0x548   :  { %v5621_v26 = vpop.f32.mrf.mxu2  ;;  %v5772_v59 = vpop.f32.mrf.mxu3 }
 0x549   :  { %5869 = vst.msk [vmem:[#allocation3] sm:$0xff] %vm257_vm0, %v5853_v43  ;;  %v5667_v50 = vadd.f32 %v5621_v26, %v5516_v41  ;;  %v5328_v21 = vpop.f32.mrf.mxu0  ;;  %v5479_v27 = vpop.f32.mrf.mxu1  ;;  %v8171_v41 = vld [vmem:[%s12002_s5 + $0x170] sm:$0xff] }
 0x54b   :  { %v5818_v39 = vadd.f32 %v5772_v59, %v5667_v50  ;;  %v8172_v59 = vld [vmem:[%s12002_s5 + $0x178] sm:$0xff]  ;;  %v8170_v50 = vld [vmem:[%s12002_s5 + $0x168] sm:$0xff] }
 0x54c   :  { %6204 = vmatpush.msra.mxu1 %v8172_v59 }
 0x54d   :  { %v5838_v34 = vadd.f32 %v11069_v7, %v5818_v39  ;;  %v5518_v39 = vadd.f32 %v5476_v17, %v5367_v38  ;;  %v8159_v17 = vld [vmem:[%s12002_s5 + $0x130] sm:$0xff] }
 0x54e   :  { %6205 = vmatpush.msra.mxu1 %v8171_v41  ;;  %6146 = vmatpush.msra.mxu0 %v8159_v17  ;;  %v8167_v38 = vld [vmem:[%s12002_s5 + $0x150] sm:$0xff]  ;;  %v8166_v41 = vld [vmem:[%s12002_s5 + $0x148] sm:$0xff] }
 0x54f   :  { %v5854_v35 = vmax.f32 %v5838_v34, 0.0 }
 0x550   :  { %v5624_v15 = vpop.f32.mrf.mxu2  ;;  %v5775_v26 = vpop.f32.mrf.mxu3  ;;  %v5885_v28 = vld [vmem:[#allocation3] sm:$0xff]  ;;  %6206 = vmatpush.msra.mxu1 %v8170_v50 }
 0x551   :  { %5870 = vst.msk [vmem:[#allocation3 + $0x8] sm:$0xff] %vm257_vm0, %v5854_v35  ;;  %v5668_v0 = vadd.f32 %v5624_v15, %v5517_v1  ;;  %8125 = vmatmul.msk.f32.vlgmr.msrb.gmra.mxu1 %vm257_vm0, %v5885_v28  ;;  %v5331_v40 = vpop.f32.mrf.mxu0  ;;  %v11084_v55 = vpop.f32.mrf.mxu1  ;;  %v8169_v1 = vld [vmem:[%s12002_s5 + $0x160] sm:$0xff]  ;;  %v8168_v28 = vld [vmem:[%s12002_s5 + $0x158] sm:$0xff] }
 0x552   :  { %6207 = vmatpush.msra.mxu1 %v8169_v1  ;;  %v8165_v1 = vld [vmem:[%s12002_s5 + $0x140] sm:$0xff] }
 0x553   :  { %v5819_v23 = vadd.f32 %v5775_v26, %v5668_v0  ;;  %v8158_v26 = vld [vmem:[%s12002_s5 + $0x128] sm:$0xff]  ;;  %v5368_v0 = vadd.f32 %v5328_v21, %v10847_v36 }
 0x554   :  { %6208 = vmatpush.msra.mxu1 %v8168_v28  ;;  %6147 = vmatpush.msra.mxu0 %v8158_v26  ;;  %v8155_v26 = vld [vmem:[%s12002_s5 + $0x110] sm:$0xff] }
 0x555   :  { %v5839_v43 = vadd.f32 %v11069_v7, %v5819_v23  ;;  %v8183_v28 = vld [vmem:[%s12002_s5 + $0x1b0] sm:$0xff] }
 0x556   :  { %6209 = vmatpush.msra.mxu1 %v8167_v38 }
 0x557   :  { %v5855_v34 = vmax.f32 %v5839_v43, 0.0  ;;  %v5519_v43 = vadd.f32 %v5479_v27, %v5368_v0 }
 0x558   :  { %v5627_v32 = vpop.f32.mrf.mxu2  ;;  %v5778_v37 = vpop.f32.mrf.mxu3  ;;  %v5898_v35 = vld [vmem:[#allocation3 + $0x8] sm:$0xff]  ;;  %6210 = vmatpush.msra.mxu1 %v8166_v41 }
 0x559   :  { %5871 = vst.msk [vmem:[#allocation3 + $0x10] sm:$0xff] %vm257_vm0, %v5855_v34  ;;  %v5669_v44 = vadd.f32 %v5627_v32, %v5518_v39  ;;  %8121 = vmatmul.msk.f32.vlgmr.msrb.gmra.mxu0 %vm257_vm0, %v5898_v35  ;;  %8126 = vmatmul.msk.f32.gmra.mxu1 %vm257_vm0, %v5898_v35  ;;  %v5334_v15 = vpop.f32.mrf.mxu0  ;;  %v5485_v59 = vpop.f32.mrf.mxu1  ;;  %v8157_v34 = vld [vmem:[%s12002_s5 + $0x120] sm:$0xff]  ;;  %v8184_v35 = vld [vmem:[%s12002_s5 + $0x1b8] sm:$0xff] }
 0x55a   :  { %6148 = vmatpush.msra.mxu0 %v8157_v34  ;;  %6211 = vmatpush.msra.mxu1 %v8165_v1  ;;  %v8196_v34 = vld [vmem:[%s12002_s5 + $0x1f8] sm:$0xff] }
 0x55b   :  { %v5820_v51 = vadd.f32 %v5778_v37, %v5669_v44  ;;  %v8156_v37 = vld [vmem:[%s12002_s5 + $0x118] sm:$0xff]  ;;  %v5369_v44 = vadd.f32 %v5331_v40, %v10867_v63  ;;  %6263 = vmatpush.msrb.mxu2 %v8184_v35  ;;  %v8154_v63 = vld [vmem:[%s12002_s5 + $0x108] sm:$0xff]  ;;  %6322 = vmatpush.msrb.mxu3 %v8196_v34  ;;  %v8179_v35 = vld [vmem:[%s12002_s5 + $0x190] sm:$0xff]  ;;  %v4769_v34 = vadd.f32 %v10883_v58, %v10744_v31 }
 0x55c   :  { %6149 = vmatpush.msra.mxu0 %v8156_v37  ;;  %v8182_v40 = vld [vmem:[%s12002_s5 + $0x1a8] sm:$0xff]  ;;  %v8180_v1 = vld [vmem:[%s12002_s5 + $0x198] sm:$0xff]  ;;  %v8207_v31 = vld [vmem:[%s12002_s5 + $0x230] sm:$0xff] }
 0x55d   :  { %v5840_v23 = vadd.f32 %v11069_v7, %v5820_v51  ;;  %6264 = vmatpush.msrb.mxu2 %v8183_v28  ;;  %v5520_v38 = vadd.f32 %v11084_v55, %v5369_v44  ;;  %v8206_v58 = vld [vmem:[%s12002_s5 + $0x228] sm:$0xff] }
 0x55e   :  { %6150 = vmatpush.msra.mxu0 %v8155_v26 }
 0x55f   :  { %v5856_v50 = vmax.f32 %v5840_v23, 0.0  ;;  %6265 = vmatpush.msrb.mxu2 %v8182_v40 }
 0x560   :  { %v5630_v39 = vpop.f32.mrf.mxu2  ;;  %v5781_v36 = vpop.f32.mrf.mxu3  ;;  %v5899_v21 = vld [vmem:[#allocation3 + $0x10] sm:$0xff]  ;;  %6151 = vmatpush.msra.mxu0 %v8154_v63 }
 0x561   :  { %5872 = vst.msk [vmem:[#allocation3 + $0x18] sm:$0xff] %vm257_vm0, %v5856_v50  ;;  %v5670_v32 = vadd.f32 %v5630_v39, %v5519_v43  ;;  %8122 = vmatmul.msk.f32.gmra.mxu0 %vm257_vm0, %v5899_v21  ;;  %8137 = vmatmul.msk.f32.vlgmr.msra.gmra.mxu2 %vm257_vm0, %v5899_v21  ;;  %v5337_v27 = vpop.f32.mrf.mxu0  ;;  %v5488_v51 = vpop.f32.mrf.mxu1  ;;  %v8153_v39 = vld [vmem:[%s12002_s5 + $0x100] sm:$0xff] }
 0x562   :  { %6152 = vmatpush.msra.mxu0 %v8153_v39 }
 0x563   :  { %v5821_v17 = vadd.f32 %v5781_v36, %v5670_v32  ;;  %v8181_v36 = vld [vmem:[%s12002_s5 + $0x1a0] sm:$0xff]  ;;  %v5370_v32 = vadd.f32 %v5334_v15, %v10887_v2  ;;  %v8178_v2 = vld [vmem:[%s12002_s5 + $0x188] sm:$0xff] }
 0x564   :  { %6266 = vmatpush.msrb.mxu2 %v8181_v36 }
 0x565   :  { %v5841_v0 = vadd.f32 %v11069_v7, %v5821_v17  ;;  %v4768_v17 = vadd.f32 %v10863_v46, %v10723_v57  ;;  %v5521_v26 = vadd.f32 %v5485_v59, %v5370_v32  ;;  %v8195_v57 = vld [vmem:[%s12002_s5 + $0x1f0] sm:$0xff]  ;;  %v8194_v46 = vld [vmem:[%s12002_s5 + $0x1e8] sm:$0xff]  ;;  %v8208_v59 = vld [vmem:[%s12002_s5 + $0x238] sm:$0xff] }
 0x566   :  { %6267 = vmatpush.msrb.mxu2 %v8180_v1  ;;  %6323 = vmatpush.msrb.mxu3 %v8195_v57 }
 0x567   :  { %v5857_v23 = vmax.f32 %v5841_v0, 0.0  ;;  %6381 = vmatpush.msrb.mxu0 %v8208_v59 }
 0x568   :  { %v5633_v41 = vpop.f32.mrf.mxu2  ;;  %v5784_v43 = vpop.f32.mrf.mxu3  ;;  %v5995_v50 = vld [vmem:[#allocation3 + $0x18] sm:$0xff]  ;;  %6268 = vmatpush.msrb.mxu2 %v8179_v35  ;;  %6324 = vmatpush.msrb.mxu3 %v8194_v46  ;;  %v8205_v46 = vld [vmem:[%s12002_s5 + $0x220] sm:$0xff] }
 0x569   :  { %5873 = vst.msk [vmem:[#allocation3 + $0x20] sm:$0xff] %vm257_vm0, %v5857_v23  ;;  %v5671_v21 = vadd.f32 %v5633_v41, %v5520_v38  ;;  %8138 = vmatmul.msk.f32.gmra.mxu2 %vm257_vm0, %v5995_v50  ;;  %v5340_v55 = vpop.f32.mrf.mxu0  ;;  %v5491_v0 = vpop.f32.mrf.mxu1  ;;  %v8177_v38 = vld [vmem:[%s12002_s5 + $0x180] sm:$0xff]  ;;  %v4919_v41 = vadd.f32 %v10865_v6, %v4768_v17  ;;  %6382 = vmatpush.msrb.mxu0 %v8207_v31 }
 0x56a   :  { %6269 = vmatpush.msrb.mxu2 %v8178_v2  ;;  %v8193_v6 = vld [vmem:[%s12002_s5 + $0x1e0] sm:$0xff] }
 0x56b   :  { %v5822_v37 = vadd.f32 %v5784_v43, %v5671_v21  ;;  %v5371_v43 = vadd.f32 %v5337_v27, %v10907_v4  ;;  %v5070_v36 = vadd.f32 %v10923_v61, %v4919_v41  ;;  %6325 = vmatpush.msrb.mxu3 %v8193_v6  ;;  %6383 = vmatpush.msrb.mxu0 %v8206_v58 }
 0x56c   :  { %6270 = vmatpush.msrb.mxu2 %v8177_v38 }
 0x56d   :  { %v5842_v44 = vadd.f32 %v11069_v7, %v5822_v37  ;;  %v5522_v1 = vadd.f32 %v5488_v51, %v5371_v43  ;;  %v5221_v4 = vadd.f32 %v10925_v20, %v5070_v36  ;;  %v8192_v20 = vld [vmem:[%s12002_s5 + $0x1d8] sm:$0xff]  ;;  %v4920_v51 = vadd.f32 %v10885_v19, %v4769_v34  ;;  %6384 = vmatpush.msrb.mxu0 %v8205_v46  ;;  %v8203_v36 = vld [vmem:[%s12002_s5 + $0x210] sm:$0xff] }
 0x56e   :  { %6326 = vmatpush.msrb.mxu3 %v8192_v20 }
 0x56f   :  { %v5858_v28 = vmax.f32 %v5842_v44, 0.0  ;;  %v5372_v17 = vadd.f32 %v5340_v55, %v5221_v4  ;;  %v5071_v2 = vadd.f32 %v10945_v45, %v4920_v51  ;;  %v8190_v45 = vld [vmem:[%s12002_s5 + $0x1c8] sm:$0xff]  ;;  %v4772_v51 = vadd.f32 %v10949_v48, %v10767_v25 }
 0x570   :  { %v5636_v15 = vpop.f32.mrf.mxu2  ;;  %v5787_v63 = vpop.f32.mrf.mxu3  ;;  %v5887_v40 = vld [vmem:[#allocation3 + $0x20] sm:$0xff] }
 0x571   :  { %5874 = vst.msk [vmem:[#allocation3 + $0x28] sm:$0xff] %vm257_vm0, %v5858_v28  ;;  %v5672_v23 = vadd.f32 %v5636_v15, %v5521_v26  ;;  %8127 = vmatmul.msk.f32.gmra.mxu1 %vm257_vm0, %v5887_v40  ;;  %8149 = vmatmul.msk.f32.vlgmr.msra.gmra.mxu3 %vm257_vm0, %v5887_v40  ;;  %v5343_v39 = vpop.f32.mrf.mxu0  ;;  %v5494_v61 = vpop.f32.mrf.mxu1  ;;  %v8191_v28 = vld [vmem:[%s12002_s5 + $0x1d0] sm:$0xff]  ;;  %v4770_v40 = vadd.f32 %v10903_v13, %v10751_v22  ;;  %v8204_v22 = vld [vmem:[%s12002_s5 + $0x218] sm:$0xff]  ;;  %v8189_v13 = vld [vmem:[%s12002_s5 + $0x1c0] sm:$0xff] }
 0x572   :  { %v5523_v38 = vadd.f32 %v5491_v0, %v5372_v17  ;;  %6327 = vmatpush.msrb.mxu3 %v8191_v28  ;;  %v5222_v59 = vadd.f32 %v10947_v47, %v5071_v2  ;;  %6385 = vmatpush.msrb.mxu0 %v8204_v22 }
 0x573   :  { %v5823_v50 = vadd.f32 %v5787_v63, %v5672_v23  ;;  %v4921_v47 = vadd.f32 %v10905_v3, %v4770_v40  ;;  %v4771_v3 = vadd.f32 %v10927_v49, %v10760_v52 }
 0x574   :  { %v5373_v0 = vadd.f32 %v5343_v39, %v5222_v59  ;;  %6328 = vmatpush.msrb.mxu3 %v8190_v45  ;;  %6386 = vmatpush.msrb.mxu0 %v8203_v36 }
 0x575   :  { %v5843_v21 = vadd.f32 %v11069_v7, %v5823_v50  ;;  %v4922_v52 = vadd.f32 %v10929_v16, %v4771_v3 }
 0x576   :  { %6329 = vmatpush.msrb.mxu3 %v8189_v13  ;;  %v5524_v39 = vadd.f32 %v5494_v61, %v5373_v0 }
 0x577   :  { %v5859_v32 = vmax.f32 %v5843_v21, 0.0  ;;  %v5072_v21 = vadd.f32 %v10963_v60, %v4921_v47  ;;  %v8201_v60 = vld [vmem:[%s12002_s5 + $0x200] sm:$0xff]  ;;  %v5073_v58 = vadd.f32 %v10983_v56, %v4922_v52  ;;  %v4923_v56 = vadd.f32 %v10951_v62, %v4772_v51 }
 0x578   :  { %v5639_v37 = vpop.f32.mrf.mxu2  ;;  %v5790_v35 = vpop.f32.mrf.mxu3  ;;  %v11198_v44 = vld [vmem:[#allocation3 + $0x28] sm:$0xff] }
 0x579   :  { %5875 = vst.msk [vmem:[#allocation3 + $0x30] sm:$0xff] %vm257_vm0, %v5859_v32  ;;  %v5673_v27 = vadd.f32 %v5639_v37, %v5522_v1  ;;  %8123 = vmatmul.msk.f32.gmra.mxu0 %vm257_vm0, %v11198_v44  ;;  %8128 = vmatmul.msk.f32.gmra.mxu1 %vm257_vm0, %v11198_v44  ;;  %v5346_v63 = vpop.f32.mrf.mxu0  ;;  %v5497_v43 = vpop.f32.mrf.mxu1  ;;  %v8202_v1 = vld [vmem:[%s12002_s5 + $0x208] sm:$0xff]  ;;  %v5074_v40 = vadd.f32 %v11001_v42, %v4923_v56 }
 0x57a   :  { %8150 = vmatmul.msk.f32.gmra.mxu3 %vm257_vm0, %v11198_v44  ;;  %6387 = vmatpush.msrb.mxu0 %v8202_v1 }
 0x57b   :  { %v5824_v26 = vadd.f32 %v5790_v35, %v5673_v27  ;;  %v5223_v27 = vadd.f32 %v10965_v54, %v5072_v21 }
 0x57c   :  { %6388 = vmatpush.msrb.mxu0 %v8201_v60  ;;  %v12092_v60 = vld [vmem:[#allocation8_spill] sm:$0xff] }
 0x57d   :  { %v5844_v15 = vadd.f32 %v11069_v7, %v5824_v26  ;;  %v5374_v49 = vadd.f32 %v5346_v63, %v5223_v27 }
 0x57f   :  { %v5860_v23 = vmax.f32 %v5844_v15, 0.0  ;;  %v5525_v17 = vadd.f32 %v5497_v43, %v5374_v49  ;;  %v5224_v15 = vadd.f32 %v10985_v5, %v5073_v58  ;;  %v4773_v5 = vadd.f32 %v10967_v18, %v10774_v9  ;;  %v12094_v49 = vld [vmem:[#allocation9_spill] sm:$0xff] }
 0x580   :  { %v5642_v19 = vpop.f32.mrf.mxu2  ;;  %v5793_v55 = vpop.f32.mrf.mxu3  ;;  %v5901_v57 = vld [vmem:[#allocation3 + $0x30] sm:$0xff] }
 0x581   :  { %5876 = vst.msk [vmem:[#allocation3 + $0x38] sm:$0xff] %vm257_vm0, %v5860_v23  ;;  %v5674_v41 = vadd.f32 %v5642_v19, %v5523_v38  ;;  %8124 = vmatmul.msk.f32.gmra.mxu0 %vm257_vm0, %v5901_v57  ;;  %8139 = vmatmul.msk.f32.gmra.mxu2 %vm257_vm0, %v5901_v57  ;;  %v5349_v37 = vpop.f32.mrf.mxu0  ;;  %v5500_v20 = vpop.f32.mrf.mxu1  ;;  %v4924_v42 = vadd.f32 %v10969_v14, %v4773_v5 }
 0x582   :  { %8173 = vmatmul.msk.f32.vlgmr.msra.gmra.mxu1 %vm257_vm0, %v5901_v57  ;;  %v5375_v25 = vadd.f32 %v5349_v37, %v5224_v15 }
 0x583   :  { %v5825_v50 = vadd.f32 %v5793_v55, %v5674_v41  ;;  %v5075_v22 = vadd.f32 %v11013_v11, %v4924_v42 }
 0x584   :  { %v5526_v23 = vadd.f32 %v5500_v20, %v5375_v25 }
 0x585   :  { %v5845_v34 = vadd.f32 %v11069_v7, %v5825_v50  ;;  %v5226_v21 = vadd.f32 %v11015_v30, %v5075_v22  ;;  %v4775_v30 = vadd.f32 %v11005_v10, %v10792_v8  ;;  %v8237_v22 = vld [vmem:[%s12004_s7 + $0x1c0] sm:$0xff] }
 0x587   :  { %v5861_v32 = vmax.f32 %v5845_v34, 0.0 }
 0x588   :  { %v5645_v35 = vpop.f32.mrf.mxu2  ;;  %v5796_v6 = vpop.f32.mrf.mxu3  ;;  %v5997_v4 = vld [vmem:[#allocation3 + $0x38] sm:$0xff] }
 0x589   :  { %5877 = vst.msk [vmem:[#allocation3 + $0x40] sm:$0xff] %vm257_vm0, %v5861_v32  ;;  %v5675_v31 = vadd.f32 %v5645_v35, %v5524_v39  ;;  %8140 = vmatmul.msk.f32.gmra.mxu2 %vm257_vm0, %v5997_v4  ;;  %8161 = vmatmul.msk.f32.vlgmr.msra.gmra.mxu0 %vm257_vm0, %v11198_v44  ;;  %v5352_v16 = vpop.f32.mrf.mxu0  ;;  %v5503_v19 = vpop.f32.mrf.mxu1 }
 0x58a   :  { %8174 = vmatmul.msk.f32.gmra.mxu1 %vm257_vm0, %v5997_v4 }
 0x58b   :  { %v5826_v61 = vadd.f32 %v5796_v6, %v5675_v31 }
 0x58d   :  { %v5846_v54 = vadd.f32 %v11069_v7, %v5826_v61 }
 0x58f   :  { %v5862_v26 = vmax.f32 %v5846_v54, 0.0 }
 0x590   :  { %v5648_v28 = vpop.f32.mrf.mxu2  ;;  %v5799_v2 = vpop.f32.mrf.mxu3  ;;  %v6055_v44 = vld [vmem:[#allocation3 + $0x40] sm:$0xff] }
 0x591   :  { %5878 = vst.msk [vmem:[#allocation3 + $0x48] sm:$0xff] %vm257_vm0, %v5862_v26  ;;  %v5676_v63 = vadd.f32 %v5648_v28, %v5525_v17  ;;  %8151 = vmatmul.msk.f32.gmra.mxu3 %vm257_vm0, %v6055_v44  ;;  %8162 = vmatmul.msk.f32.gmra.mxu0 %vm257_vm0, %v5901_v57  ;;  %v5225_v57 = vadd.f32 %v11003_v29, %v5074_v40  ;;  %v5355_v18 = vpop.f32.mrf.mxu0  ;;  %v5506_v11 = vpop.f32.mrf.mxu1 }
 0x592   :  { %8185 = vmatmul.msk.f32.vlgmr.msrb.gmra.mxu2 %vm257_vm0, %v6055_v44  ;;  %v4774_v29 = vadd.f32 %v10987_v33, %v10783_v12  ;;  %v5377_v12 = vadd.f32 %v5355_v18, %v5226_v21  ;;  %v8242_v18 = vld [vmem:[%s12004_s7 + $0x1e8] sm:$0xff]  ;;  %v8229_v21 = vld [vmem:[%s12004_s7 + $0x180] sm:$0xff] }
 0x593   :  { %v5827_v48 = vadd.f32 %v5799_v2, %v5676_v63  ;;  %v5376_v9 = vadd.f32 %v5352_v16, %v5225_v57  ;;  %v12095_v2 = vld [vmem:[#allocation10_spill] sm:$0xff]  ;;  %6514 = vmatpush.msra.mxu2 %v8242_v18  ;;  %v8279_v18 = vld [vmem:[%s12004_s7 + $0x2d0] sm:$0xff] }
 0x594   :  { %v4925_v34 = vadd.f32 %v10989_v24, %v4774_v29  ;;  %v5528_v32 = vadd.f32 %v5506_v11, %v5377_v12  ;;  %v8239_v29 = vld [vmem:[%s12004_s7 + $0x1d0] sm:$0xff] }
 0x595   :  { %v5847_v38 = vadd.f32 %v11069_v7, %v5827_v48  ;;  %v5527_v47 = vadd.f32 %v5503_v19, %v5376_v9  ;;  %v8231_v11 = vld [vmem:[%s12004_s7 + $0x190] sm:$0xff] }
 0x596   :  { %v5076_v1 = vadd.f32 %v11037_v53, %v4925_v34  ;;  %v12093_v53 = vld [vmem:[#allocation7_spill] sm:$0xff]  ;;  %v6448_v12 = vld [vmem:[%s12004_s7 + $0xf0] sm:$0xff] }
 0x597   :  { %v5863_v55 = vmax.f32 %v5847_v38, 0.0  ;;  %v4926_v31 = vadd.f32 %v12093_v53, %v4775_v30  ;;  %6617 = vmatpush.msra.mxu0 %v6448_v12  ;;  %v8221_v30 = vld [vmem:[%s12004_s7 + $0x140] sm:$0xff] }
 0x598   :  { %v5651_v46 = vpop.f32.mrf.mxu2  ;;  %v5802_v45 = vpop.f32.mrf.mxu3  ;;  %v6056_v59 = vld [vmem:[#allocation3 + $0x48] sm:$0xff]  ;;  %v5227_v27 = vadd.f32 %v12092_v60, %v5076_v1 }
 0x599   :  { %5879 = vst.msk [vmem:[#allocation3 + $0x50] sm:$0xff] %vm257_vm0, %v5863_v55  ;;  %v5677_v62 = vadd.f32 %v5651_v46, %v5526_v23  ;;  %8152 = vmatmul.msk.f32.gmra.mxu3 %vm257_vm0, %v6056_v59  ;;  %8163 = vmatmul.msk.f32.gmra.mxu0 %vm257_vm0, %v6056_v59  ;;  %v5358_v3 = vpop.f32.mrf.mxu0  ;;  %v5509_v10 = vpop.f32.mrf.mxu1  ;;  %v5077_v61 = vadd.f32 %v12094_v49, %v4926_v31  ;;  %v8226_v1 = vld [vmem:[%s12004_s7 + $0x168] sm:$0xff]  ;;  %v6436_v31 = vld [vmem:[%s12004_s7 + $0x90] sm:$0xff] }
 0x59a   :  { %8186 = vmatmul.msk.f32.gmra.mxu2 %vm257_vm0, %v6056_v59  ;;  %v5378_v52 = vadd.f32 %v5358_v3, %v5227_v27  ;;  %v8227_v3 = vld [vmem:[%s12004_s7 + $0x170] sm:$0xff]  ;;  %v8218_v60 = vld [vmem:[%s12004_s7 + $0x128] sm:$0xff] }
 0x59b   :  { %v5828_v41 = vadd.f32 %v5802_v45, %v5677_v62  ;;  %v5228_v44 = vadd.f32 %v12095_v2, %v5077_v61  ;;  %v8219_v27 = vld [vmem:[%s12004_s7 + $0x130] sm:$0xff]  ;;  %v8244_v61 = vld [vmem:[%s12004_s7 + $0x1f8] sm:$0xff] }
 0x59c   :  { %v5529_v20 = vadd.f32 %v5509_v10, %v5378_v52  ;;  %v8213_v52 = vld [vmem:[%s12004_s7 + $0x100] sm:$0xff]  ;;  %v8215_v10 = vld [vmem:[%s12004_s7 + $0x110] sm:$0xff]  ;;  %v8236_v2 = vld [vmem:[%s12004_s7 + $0x1b8] sm:$0xff] }
 0x59d   :  { %v5848_v13 = vadd.f32 %v11069_v7, %v5828_v41  ;;  %v8243_v41 = vld [vmem:[%s12004_s7 + $0x1f0] sm:$0xff] }
 0x59e   :  { %6534 = vmatpush.msra.mxu3 %v8243_v41  ;;  %v8220_v41 = vld [vmem:[%s12004_s7 + $0x138] sm:$0xff] }
 0x59f   :  { %v5864_v0 = vmax.f32 %v5848_v13, 0.0  ;;  %v8238_v13 = vld [vmem:[%s12004_s7 + $0x1c8] sm:$0xff] }
 0x5a0   :  { %v5654_v43 = vpop.f32.mrf.mxu2  ;;  %v5805_v50 = vpop.f32.mrf.mxu3  ;;  %v6115_v36 = vld [vmem:[#allocation3 + $0x50] sm:$0xff]  ;;  %6515 = vmatpush.msra.mxu2 %v8238_v13  ;;  %6535 = vmatpush.msra.mxu3 %v8239_v29  ;;  %v6423_v13 = vld [vmem:[%s12004_s7 + $0x28] sm:$0xff] }
 0x5a1   :  { %5880 = vst.msk [vmem:[#allocation3 + $0x58] sm:$0xff] %vm257_vm0, %v5864_v0  ;;  %v5678_v14 = vadd.f32 %v5654_v43, %v5527_v47  ;;  %8164 = vmatmul.msk.f32.gmra.mxu0 %vm257_vm0, %v6115_v36  ;;  %8175 = vmatmul.msk.f32.gmra.mxu1 %vm257_vm0, %v6115_v36  ;;  %v5361_v54 = vpop.f32.mrf.mxu0  ;;  %v5512_v25 = vpop.f32.mrf.mxu1  ;;  %v8233_v43 = vld [vmem:[%s12004_s7 + $0x1a0] sm:$0xff]  ;;  %v8275_v29 = vld [vmem:[%s12004_s7 + $0x2b0] sm:$0xff] }
 0x5a2   :  { %8197 = vmatmul.msk.f32.vlgmr.msrb.gmra.mxu3 %vm257_vm0, %v6056_v59  ;;  %v5379_v16 = vadd.f32 %v5361_v54, %v5228_v44  ;;  %v6432_v54 = vld [vmem:[%s12004_s7 + $0x70] sm:$0xff]  ;;  %v6438_v44 = vld [vmem:[%s12004_s7 + $0xa0] sm:$0xff] }
 0x5a3   :  { %v5829_v33 = vadd.f32 %v5805_v50, %v5678_v14  ;;  %v8234_v50 = vld [vmem:[%s12004_s7 + $0x1a8] sm:$0xff] }
 0x5a4   :  { %v5530_v48 = vadd.f32 %v5512_v25, %v5379_v16  ;;  %6516 = vmatpush.msra.mxu2 %v8234_v50  ;;  %v8230_v14 = vld [vmem:[%s12004_s7 + $0x188] sm:$0xff]  ;;  %v8216_v50 = vld [vmem:[%s12004_s7 + $0x118] sm:$0xff] }
 0x5a5   :  { %v5849_v39 = vadd.f32 %v11069_v7, %v5829_v33  ;;  %v8225_v33 = vld [vmem:[%s12004_s7 + $0x160] sm:$0xff] }
 0x5a6   :  { %6517 = vmatpush.msra.mxu2 %v8230_v14 }
 0x5a7   :  { %v5865_v37 = vmax.f32 %v5849_v39, 0.0  ;;  %v6444_v39 = vld [vmem:[%s12004_s7 + $0xd0] sm:$0xff] }
 0x5a8   :  { %v5657_v35 = vpop.f32.mrf.mxu2  ;;  %v5808_v6 = vpop.f32.mrf.mxu3  ;;  %v6174_v4 = vld [vmem:[#allocation3 + $0x58] sm:$0xff]  ;;  %6518 = vmatpush.msra.mxu2 %v8226_v1  ;;  %6618 = vmatpush.msra.mxu0 %v6444_v39 }
 0x5a9   :  { %5881 = vst.msk [vmem:[#allocation3 + $0x60] sm:$0xff] %vm257_vm0, %v5865_v37  ;;  %v5679_v24 = vadd.f32 %v5657_v35, %v5528_v32  ;;  %8176 = vmatmul.msk.f32.gmra.mxu1 %vm257_vm0, %v6174_v4  ;;  %8209 = vmatmul.msk.f32.vlgmr.msrb.gmra.mxu0 %vm257_vm0, %v6115_v36  ;;  %v8222_v32 = vld [vmem:[%s12004_s7 + $0x148] sm:$0xff]  ;;  %v8223_v37 = vld [vmem:[%s12004_s7 + $0x150] sm:$0xff] }
 0x5aa   :  { %8198 = vmatmul.msk.f32.gmra.mxu3 %vm257_vm0, %v6115_v36  ;;  %v8235_v36 = vld [vmem:[%s12004_s7 + $0x1b0] sm:$0xff]  ;;  %6519 = vmatpush.msra.mxu2 %v8222_v32 }
 0x5ab   :  { %v5830_v8 = vadd.f32 %v5808_v6, %v5679_v24  ;;  %6536 = vmatpush.msra.mxu3 %v8235_v36  ;;  %v6440_v35 = vld [vmem:[%s12004_s7 + $0xb0] sm:$0xff]  ;;  %v8217_v6 = vld [vmem:[%s12004_s7 + $0x120] sm:$0xff] }
 0x5ac   :  { %6619 = vmatpush.msra.mxu0 %v6440_v35  ;;  %6520 = vmatpush.msra.mxu2 %v8218_v60  ;;  %v6418_v36 = vld [vmem:[%s12004_s7] sm:$0xff] }
 0x5ad   :  { %v5850_v58 = vadd.f32 %v11069_v7, %v5830_v8  ;;  %6537 = vmatpush.msra.mxu3 %v8231_v11  ;;  %v8214_v8 = vld [vmem:[%s12004_s7 + $0x108] sm:$0xff] }
 0x5ae   :  { %6620 = vmatpush.msra.mxu0 %v6436_v31  ;;  %6521 = vmatpush.msra.mxu2 %v8214_v8 }
 0x5af   :  { %v5866_v51 = vmax.f32 %v5850_v58, 0.0  ;;  %6538 = vmatpush.msra.mxu3 %v8227_v3  ;;  %v6446_v58 = vld [vmem:[%s12004_s7 + $0xe0] sm:$0xff]  ;;  %v8267_v3 = vld [vmem:[%s12004_s7 + $0x270] sm:$0xff] }
 0x5b0   :  { %v5660_v17 = vpop.f32.mrf.mxu2  ;;  %v5811_v26 = vpop.f32.mrf.mxu3  ;;  %v6232_v28 = vld [vmem:[#allocation3 + $0x60] sm:$0xff]  ;;  %6577 = vmatpush.msrb.mxu2 %v6446_v58  ;;  %6621 = vmatpush.msra.mxu0 %v6432_v54 }
 0x5b1   :  { %5882 = vst.msk [vmem:[#allocation3 + $0x68] sm:$0xff] %vm257_vm0, %v5866_v51  ;;  %v5680_v15 = vadd.f32 %v5660_v17, %v5529_v20  ;;  %8187 = vmatmul.msk.f32.gmra.mxu2 %vm257_vm0, %v6232_v28  ;;  %8210 = vmatmul.msk.f32.gmra.mxu0 %vm257_vm0, %v6174_v4  ;;  %v6447_v20 = vld [vmem:[%s12004_s7 + $0xe8] sm:$0xff]  ;;  %v8240_v51 = vld [vmem:[%s12004_s7 + $0x1d8] sm:$0xff]  ;;  %v6442_v17 = vld [vmem:[%s12004_s7 + $0xc0] sm:$0xff] }
 0x5b2   :  { %6539 = vmatpush.msra.mxu3 %v8223_v37  ;;  %v6428_v28 = vld [vmem:[%s12004_s7 + $0x50] sm:$0xff]  ;;  %6578 = vmatpush.msrb.mxu2 %v6442_v17 }
 0x5b3   :  { %v5831_v63 = vadd.f32 %v5811_v26, %v5680_v15  ;;  %v6443_v26 = vld [vmem:[%s12004_s7 + $0xc8] sm:$0xff]  ;;  %6622 = vmatpush.msra.mxu0 %v6428_v28  ;;  %v8319_v28 = vld [vmem:[%s12004_s7 + $0x3f0] sm:$0xff] }
 0x5b4   :  { %6540 = vmatpush.msra.mxu3 %v8219_v27  ;;  %v6439_v15 = vld [vmem:[%s12004_s7 + $0xa8] sm:$0xff]  ;;  %6579 = vmatpush.msrb.mxu2 %v6438_v44 }
 0x5b5   :  { %v5851_v56 = vadd.f32 %v11069_v7, %v5831_v63 }
 0x5b6   :  { %6541 = vmatpush.msra.mxu3 %v8215_v10 }
 0x5b7   :  { %v5867_v40 = vmax.f32 %v5851_v56, 0.0  ;;  %v6424_v56 = vld [vmem:[%s12004_s7 + $0x30] sm:$0xff] }
 0x5b8   :  { %v5663_v38 = vpop.f32.mrf.mxu2  ;;  %v6233_v5 = vld [vmem:[#allocation3 + $0x68] sm:$0xff]  ;;  %v5814_v19 = vpop.f32.mrf.mxu3  ;;  %6597 = vmatpush.msrb.mxu3 %v6447_v20  ;;  %6623 = vmatpush.msra.mxu0 %v6424_v56  ;;  %v11561_v20 = vld [vmem:[%s12003_s6] ss:$0 sm:$0xff]  ;;  %v8315_v56 = vld [vmem:[%s12004_s7 + $0x3d0] sm:$0xff] }
 0x5b9   :  { %5883 = vst.msk [vmem:[#allocation3 + $0x70] sm:$0xff] %vm257_vm0, %v5867_v40  ;;  %v5681_v23 = vadd.f32 %v5663_v38, %v5530_v48  ;;  %8188 = vmatmul.msk.f32.gmra.mxu2 %vm257_vm0, %v6233_v5  ;;  %8199 = vmatmul.msk.f32.gmra.mxu3 %vm257_vm0, %v6233_v5  ;;  %v8232_v48 = vld [vmem:[%s12004_s7 + $0x198] sm:$0xff]  ;;  %v6434_v40 = vld [vmem:[%s12004_s7 + $0x80] sm:$0xff]  ;;  %v6435_v38 = vld [vmem:[%s12004_s7 + $0x88] sm:$0xff] }
 0x5ba   :  { %6598 = vmatpush.msrb.mxu3 %v6443_v26  ;;  %v6420_v5 = vld [vmem:[%s12004_s7 + $0x10] sm:$0xff]  ;;  %6580 = vmatpush.msrb.mxu2 %v6434_v40 }
 0x5bb   :  { %v5832_v55 = vadd.f32 %v5814_v19, %v5681_v23  ;;  %v8228_v19 = vld [vmem:[%s12004_s7 + $0x178] sm:$0xff]  ;;  %6624 = vmatpush.msra.mxu0 %v6420_v5  ;;  %v8311_v40 = vld [vmem:[%s12004_s7 + $0x3b0] sm:$0xff] }
 0x5bc   :  { %6599 = vmatpush.msrb.mxu3 %v6439_v15 }
 0x5bd   :  { %v5852_v46 = vadd.f32 %v11069_v7, %v5832_v55  ;;  %v8241_v7 = vld [vmem:[%s12004_s7 + $0x1e0] sm:$0xff] }
 0x5be   :  { %6494 = vmatpush.msrb.mxu1 %v8241_v7  ;;  %6600 = vmatpush.msrb.mxu3 %v6435_v38  ;;  %v6430_v55 = vld [vmem:[%s12004_s7 + $0x60] sm:$0xff]  ;;  %v6427_v7 = vld [vmem:[%s12004_s7 + $0x48] sm:$0xff] }
 0x5bf   :  { %v5868_v45 = vmax.f32 %v5852_v46, 0.0  ;;  %v6431_v46 = vld [vmem:[%s12004_s7 + $0x68] sm:$0xff]  ;;  %6581 = vmatpush.msrb.mxu2 %v6430_v55 }
 0x5c0   :  { %v6292_v59 = vld [vmem:[#allocation3 + $0x70] sm:$0xff]  ;;  %6495 = vmatpush.msrb.mxu1 %v8237_v22  ;;  %6601 = vmatpush.msrb.mxu3 %v6431_v46  ;;  %v6422_v22 = vld [vmem:[%s12004_s7 + $0x20] sm:$0xff] }
 0x5c1   :  { %5884 = vst.msk [vmem:[#allocation3 + $0x78] sm:$0xff] %vm257_vm0, %v5868_v45  ;;  %8200 = vmatmul.msk.f32.gmra.mxu3 %vm257_vm0, %v6292_v59  ;;  %8211 = vmatmul.msk.f32.gmra.mxu0 %vm257_vm0, %v6292_v59  ;;  %v8283_v45 = vld [vmem:[%s12004_s7 + $0x2f0] sm:$0xff]  ;;  %v8224_v59 = vld [vmem:[%s12004_s7 + $0x158] sm:$0xff] }
 0x5c2   :  { %6496 = vmatpush.msrb.mxu1 %v8233_v43  ;;  %6733 = vmatpush.msrb.mxu0 %v8283_v45 }
 0x5c3   :  { %6602 = vmatpush.msrb.mxu3 %v6427_v7 }
 0x5c4   :  { %6497 = vmatpush.msrb.mxu1 %v8229_v21  ;;  %6734 = vmatpush.msrb.mxu0 %v8279_v18  ;;  %v6419_v21 = vld [vmem:[%s12004_s7 + $0x8] sm:$0xff] }
 0x5c5   :  { %6603 = vmatpush.msrb.mxu3 %v6423_v13  ;;  %v6441_v13 = vld [vmem:[%s12004_s7 + $0xb8] sm:$0xff] }
 0x5c6   :  { %6498 = vmatpush.msrb.mxu1 %v8225_v33  ;;  %6735 = vmatpush.msrb.mxu0 %v8275_v29  ;;  %v8271_v33 = vld [vmem:[%s12004_s7 + $0x290] sm:$0xff] }
 0x5c7   :  { %6604 = vmatpush.msrb.mxu3 %v6419_v21  ;;  %v6437_v21 = vld [vmem:[%s12004_s7 + $0x98] sm:$0xff] }
 0x5c8   :  { %v6351_v57 = vld [vmem:[#allocation3 + $0x78] sm:$0xff]  ;;  %6499 = vmatpush.msrb.mxu1 %v8221_v30  ;;  %6736 = vmatpush.msrb.mxu0 %v8271_v33  ;;  %v8263_v30 = vld [vmem:[%s12004_s7 + $0x250] sm:$0xff]  ;;  %v8269_v33 = vld [vmem:[%s12004_s7 + $0x280] sm:$0xff] }
 0x5c9   :  { %8212 = vmatmul.msk.f32.gmra.mxu0 %vm257_vm0, %v6351_v57  ;;  %v6426_v57 = vld [vmem:[%s12004_s7 + $0x40] sm:$0xff] }
 0x5ca   :  { %6500 = vmatpush.msrb.mxu1 %v8217_v6  ;;  %6582 = vmatpush.msrb.mxu2 %v6426_v57  ;;  %v8303_v57 = vld [vmem:[%s12004_s7 + $0x370] sm:$0xff] }
 0x5cb   :  { %6737 = vmatpush.msrb.mxu0 %v8267_v3 }
 0x5cc   :  { %6501 = vmatpush.msrb.mxu1 %v8213_v52  ;;  %6583 = vmatpush.msrb.mxu2 %v6422_v22  ;;  %v8278_v22 = vld [vmem:[%s12004_s7 + $0x2c8] sm:$0xff] }
 0x5cd   :  { %6738 = vmatpush.msrb.mxu0 %v8263_v30  ;;  %v6433_v30 = vld [vmem:[%s12004_s7 + $0x78] sm:$0xff] }
 0x5ce   :  { %v11345_v47 = vpop.f32.mrf.mxu1  ;;  %6554 = vmatpush.msra.mxu1 %v8244_v61  ;;  %6584 = vmatpush.msrb.mxu2 %v6418_v36  ;;  %v8274_v36 = vld [vmem:[%s12004_s7 + $0x2a8] sm:$0xff] }
 0x5d0   :  { %6555 = vmatpush.msra.mxu1 %v8240_v51 }
 0x5d2   :  { %6556 = vmatpush.msra.mxu1 %v8236_v2 }
 0x5d4   :  { %6557 = vmatpush.msra.mxu1 %v8232_v48 }
 0x5d6   :  { %v11321_v62 = vpop.f32.mrf.mxu0  ;;  %v11407_v24 = vpop.f32.mrf.mxu1  ;;  %6558 = vmatpush.msra.mxu1 %v8228_v19 }
 0x5d7   :  { %v5982_v1 = vadd.f32 %v11345_v47, %v11321_v62  ;;  %v8259_v62 = vld [vmem:[%s12004_s7 + $0x230] sm:$0xff] }
 0x5d8   :  { %6559 = vmatpush.msra.mxu1 %v8224_v59  ;;  %6739 = vmatpush.msrb.mxu0 %v8259_v62  ;;  %v6445_v59 = vld [vmem:[%s12004_s7 + $0xd8] sm:$0xff]  ;;  %v8266_v62 = vld [vmem:[%s12004_s7 + $0x268] sm:$0xff] }
 0x5da   :  { %6560 = vmatpush.msra.mxu1 %v8220_v41  ;;  %v8277_v41 = vld [vmem:[%s12004_s7 + $0x2c0] sm:$0xff] }
 0x5dc   :  { %6561 = vmatpush.msra.mxu1 %v8216_v50  ;;  %v8273_v50 = vld [vmem:[%s12004_s7 + $0x2a0] sm:$0xff] }
 0x5de   :  { %v11323_v42 = vpop.f32.mrf.mxu0 }
 0x5df   :  { %v5985_v60 = vadd.f32 %v11407_v24, %v11323_v42 }
 0x5e4   :  { %v11347_v0 = vpop.f32.mrf.mxu2 }
 0x5e5   :  { %v6048_v39 = vadd.f32 %v11347_v0, %v5982_v1  ;;  %v8270_v1 = vld [vmem:[%s12004_s7 + $0x288] sm:$0xff] }
 0x5ec   :  { %v11409_v53 = vpop.f32.mrf.mxu2 }
 0x5ed   :  { %v6049_v27 = vadd.f32 %v11409_v53, %v5985_v60  ;;  %v6429_v60 = vld [vmem:[%s12004_s7 + $0x58] sm:$0xff] }
 0x5ee   :  { %v11458_v16 = vpop.f32.mrf.mxu1 }
 0x5f4   :  { %v11399_v4 = vpop.f32.mrf.mxu3 }
 0x5f5   :  { %v6107_v32 = vadd.f32 %v11399_v4, %v6048_v39  ;;  %v8255_v4 = vld [vmem:[%s12004_s7 + $0x210] sm:$0xff] }
 0x5f6   :  { %v11325_v9 = vpop.f32.mrf.mxu0  ;;  %v11524_v14 = vpop.f32.mrf.mxu1  ;;  %6740 = vmatpush.msrb.mxu0 %v8255_v4  ;;  %v8291_v4 = vld [vmem:[%s12004_s7 + $0x310] sm:$0xff] }
 0x5fd   :  { %v11465_v25 = vpop.f32.mrf.mxu3 }
 0x5fe   :  { %v11367_v34 = vpop.f32.mrf.mxu0  ;;  %v6108_v52 = vadd.f32 %v11465_v25, %v6049_v27  ;;  %v5988_v25 = vadd.f32 %v11458_v16, %v11325_v9  ;;  %v6449_v9 = vld [vmem:[%s12004_s7 + $0xf8] sm:$0xff]  ;;  %v8281_v16 = vld [vmem:[%s12004_s7 + $0x2e0] sm:$0xff] }
 0x5ff   :  { %v6213_v0 = vpop.f32.mrf.mxu1  ;;  %v5991_v7 = vadd.f32 %v11524_v14, %v11367_v34  ;;  %v8299_v34 = vld [vmem:[%s12004_s7 + $0x350] sm:$0xff] }
 0x600   :  { %v8295_v14 = vld [vmem:[%s12004_s7 + $0x330] sm:$0xff] }
 0x604   :  { %v11460_v63 = vpop.f32.mrf.mxu2 }
 0x605   :  { %v6050_v38 = vadd.f32 %v11460_v63, %v5988_v25  ;;  %v8282_v63 = vld [vmem:[%s12004_s7 + $0x2e8] sm:$0xff]  ;;  %v8280_v25 = vld [vmem:[%s12004_s7 + $0x2d8] sm:$0xff] }
 0x606   :  { %v11423_v49 = vpop.f32.mrf.mxu0 }
 0x607   :  { %v6166_v47 = vadd.f32 %v11423_v49, %v6107_v32  ;;  %v6216_v24 = vpop.f32.mrf.mxu1 }
 0x609   :  { %v6225_v31 = vadd.f32 %v6213_v0, %v6166_v47 }
 0x60c   :  { %v11526_v11 = vpop.f32.mrf.mxu2 }
 0x60d   :  { %v6051_v29 = vadd.f32 %v11526_v11, %v5991_v7  ;;  %v8260_v7 = vld [vmem:[%s12004_s7 + $0x238] sm:$0xff] }
 0x60e   :  { %v6157_v23 = vpop.f32.mrf.mxu0 }
 0x60f   :  { %v6167_v49 = vadd.f32 %v6157_v23, %v6108_v52  ;;  %v8307_v23 = vld [vmem:[%s12004_s7 + $0x390] sm:$0xff] }
 0x611   :  { %v6226_v51 = vadd.f32 %v6216_v24, %v6167_v49  ;;  %v8257_v49 = vld [vmem:[%s12004_s7 + $0x220] sm:$0xff]  ;;  %v6421_v24 = vld [vmem:[%s12004_s7 + $0x18] sm:$0xff] }
 0x614   :  { %v6101_v43 = vpop.f32.mrf.mxu3 }
 0x615   :  { %v6272_v6 = vpop.f32.mrf.mxu2  ;;  %v6109_v19 = vadd.f32 %v6101_v43, %v6050_v38  ;;  %v8314_v38 = vld [vmem:[%s12004_s7 + $0x3c8] sm:$0xff] }
 0x616   :  { %v11528_v12 = vpop.f32.mrf.mxu0  ;;  %v6284_v8 = vadd.f32 %v6272_v6, %v6225_v31  ;;  %v8262_v31 = vld [vmem:[%s12004_s7 + $0x248] sm:$0xff] }
 0x617   :  { %v6168_v18 = vadd.f32 %v11528_v12, %v6109_v19  ;;  %v8272_v19 = vld [vmem:[%s12004_s7 + $0x298] sm:$0xff] }
 0x61c   :  { %v11543_v37 = vpop.f32.mrf.mxu3 }
 0x61d   :  { %v6275_v54 = vpop.f32.mrf.mxu2  ;;  %v6110_v11 = vadd.f32 %v11543_v37, %v6051_v29  ;;  %v8265_v37 = vld [vmem:[%s12004_s7 + $0x260] sm:$0xff]  ;;  %v8320_v29 = vld [vmem:[%s12004_s7 + $0x3f8] sm:$0xff] }
 0x61e   :  { %v11549_v35 = vpop.f32.mrf.mxu0  ;;  %v6285_v53 = vadd.f32 %v6275_v54, %v6226_v51  ;;  %v6219_v55 = vpop.f32.mrf.mxu1  ;;  %v8253_v54 = vld [vmem:[%s12004_s7 + $0x200] sm:$0xff]  ;;  %v8254_v51 = vld [vmem:[%s12004_s7 + $0x208] sm:$0xff] }
 0x61f   :  { %v6227_v43 = vadd.f32 %v6219_v55, %v6168_v18  ;;  %v6169_v0 = vadd.f32 %v11549_v35, %v6110_v11  ;;  %v8261_v35 = vld [vmem:[%s12004_s7 + $0x240] sm:$0xff]  ;;  %v8296_v11 = vld [vmem:[%s12004_s7 + $0x338] sm:$0xff] }
 0x620   :  { %v8305_v55 = vld [vmem:[%s12004_s7 + $0x380] sm:$0xff] }
 0x621   :  { %v8293_v18 = vld [vmem:[%s12004_s7 + $0x320] sm:$0xff] }
 0x625   :  { %v6331_v10 = vpop.f32.mrf.mxu3 }
 0x626   :  { %v6343_v61 = vadd.f32 %v6331_v10, %v6284_v8  ;;  %v6390_v58 = vpop.f32.mrf.mxu0  ;;  %v6222_v32 = vpop.f32.mrf.mxu1  ;;  %v6425_v10 = vld [vmem:[%s12004_s7 + $0x38] sm:$0xff] }
 0x627   :  { %v6228_v52 = vadd.f32 %v6222_v32, %v6169_v0  ;;  %v6922_v32 = vld [vmem:[%s12006_s9 + $0x78] sm:$0xff]  ;;  %v6921_v0 = vld [vmem:[%s12006_s9 + $0x70] sm:$0xff] }
 0x628   :  { %v6402_v42 = vadd.f32 %v6390_v58, %v6343_v61  ;;  %v8258_v61 = vld [vmem:[%s12004_s7 + $0x228] sm:$0xff] }
 0x62a   :  { %v6410_v17 = vadd.f32 %v11561_v20, %v6402_v42 }
 0x62c   :  { %v11564_v26 = vmax.f32 %v6410_v17, 0.0 }
 0x62d   :  { %v6334_v2 = vpop.f32.mrf.mxu3 }
 0x62e   :  { %v6344_v44 = vadd.f32 %v6334_v2, %v6285_v53  ;;  %8251 = vmatmul.msk.f32.vlgmr.msra.gmra.mxu0 %vm257_vm0, %v11564_v26  ;;  %v6393_v15 = vpop.f32.mrf.mxu0  ;;  %v8317_v2 = vld [vmem:[%s12004_s7 + $0x3e0] sm:$0xff] }
 0x62f   :  { %6853 = vmatpush.msra.mxu0 %v8319_v28  ;;  %v8284_v28 = vld [vmem:[%s12004_s7 + $0x2f8] sm:$0xff] }
 0x630   :  { %v6403_v48 = vadd.f32 %v6393_v15, %v6344_v44  ;;  %v8318_v44 = vld [vmem:[%s12004_s7 + $0x3e8] sm:$0xff] }
 0x631   :  { %6854 = vmatpush.msra.mxu0 %v8315_v56 }
 0x632   :  { %v6411_v5 = vadd.f32 %v11561_v20, %v6403_v48  ;;  %v8313_v48 = vld [vmem:[%s12004_s7 + $0x3c0] sm:$0xff] }
 0x633   :  { %6855 = vmatpush.msra.mxu0 %v8311_v40 }
 0x634   :  { %v6415_v46 = vmax.f32 %v6411_v5, 0.0  ;;  %v6278_v45 = vpop.f32.mrf.mxu2  ;;  %v8276_v5 = vld [vmem:[%s12004_s7 + $0x2b8] sm:$0xff] }
 0x635   :  { %6856 = vmatpush.msra.mxu0 %v8307_v23  ;;  %v6286_v12 = vadd.f32 %v6278_v45, %v6227_v43  ;;  %v8264_v45 = vld [vmem:[%s12004_s7 + $0x258] sm:$0xff] }
 0x636   :  { %8245 = vmatmul.msk.f32.vlgmr.msrb.gmra.mxu1 %vm257_vm0, %v6415_v46  ;;  %8246 = vmatmul.msk.f32.vlgmr.msra.gmra.mxu2 %vm257_vm0, %v6415_v46  ;;  %v8316_v43 = vld [vmem:[%s12004_s7 + $0x3d8] sm:$0xff] }
 0x637   :  { %8247 = vmatmul.msk.f32.vlgmr.msra.gmra.mxu3 %vm257_vm0, %v6415_v46  ;;  %6637 = vmatpush.msrb.mxu1 %v6449_v9  ;;  %v8268_v9 = vld [vmem:[%s12004_s7 + $0x278] sm:$0xff] }
 0x638   :  { %6693 = vmatpush.msra.mxu2 %v8281_v16  ;;  %6713 = vmatpush.msra.mxu3 %v8282_v63  ;;  %v8301_v16 = vld [vmem:[%s12004_s7 + $0x360] sm:$0xff]  ;;  %v8302_v63 = vld [vmem:[%s12004_s7 + $0x368] sm:$0xff] }
 0x639   :  { %6638 = vmatpush.msrb.mxu1 %v6445_v59  ;;  %6857 = vmatpush.msra.mxu0 %v8303_v57  ;;  %v8297_v59 = vld [vmem:[%s12004_s7 + $0x340] sm:$0xff]  ;;  %v8298_v57 = vld [vmem:[%s12004_s7 + $0x348] sm:$0xff] }
 0x63a   :  { %6694 = vmatpush.msra.mxu2 %v8277_v41  ;;  %6714 = vmatpush.msra.mxu3 %v8278_v22  ;;  %v8294_v41 = vld [vmem:[%s12004_s7 + $0x328] sm:$0xff]  ;;  %v8256_v22 = vld [vmem:[%s12004_s7 + $0x218] sm:$0xff] }
 0x63b   :  { %6639 = vmatpush.msrb.mxu1 %v6441_v13  ;;  %6858 = vmatpush.msra.mxu0 %v8299_v34  ;;  %v8289_v13 = vld [vmem:[%s12004_s7 + $0x300] sm:$0xff]  ;;  %v8290_v34 = vld [vmem:[%s12004_s7 + $0x308] sm:$0xff] }
 0x63c   :  { %6695 = vmatpush.msra.mxu2 %v8273_v50  ;;  %6715 = vmatpush.msra.mxu3 %v8274_v36  ;;  %v6337_v3 = vpop.f32.mrf.mxu3  ;;  %v6281_v27 = vpop.f32.mrf.mxu2  ;;  %v8312_v50 = vld [vmem:[%s12004_s7 + $0x3b8] sm:$0xff] }
 0x63d   :  { %6640 = vmatpush.msrb.mxu1 %v6437_v21  ;;  %v6345_v39 = vadd.f32 %v6337_v3, %v6286_v12  ;;  %6859 = vmatpush.msra.mxu0 %v8295_v14  ;;  %v6287_v58 = vadd.f32 %v6281_v27, %v6228_v52  ;;  %v8308_v36 = vld [vmem:[%s12004_s7 + $0x398] sm:$0xff]  ;;  %v6952_v3 = vld [vmem:[%s12006_s9 + $0x168] sm:$0xff]  ;;  %v6935_v52 = vld [vmem:[%s12006_s9 + $0xe0] sm:$0xff] }
 0x63e   :  { %6696 = vmatpush.msra.mxu2 %v8269_v33  ;;  %6716 = vmatpush.msra.mxu3 %v8270_v1  ;;  %v6396_v47 = vpop.f32.mrf.mxu0  ;;  %v8304_v21 = vld [vmem:[%s12004_s7 + $0x378] sm:$0xff]  ;;  %v6953_v1 = vld [vmem:[%s12006_s9 + $0x170] sm:$0xff]  ;;  %v6936_v27 = vld [vmem:[%s12006_s9 + $0xe8] sm:$0xff] }
 0x63f   :  { %8248 = vmatmul.msk.f32.vlgmr.msra.gmra.mxu1 %vm257_vm0, %v6415_v46  ;;  %8249 = vmatmul.msk.f32.vlgmr.msrb.gmra.mxu2 %vm257_vm0, %v11564_v26  ;;  %v6404_v6 = vadd.f32 %v6396_v47, %v6345_v39  ;;  %v8306_v46 = vld [vmem:[%s12004_s7 + $0x388] sm:$0xff]  ;;  %v8300_v14 = vld [vmem:[%s12004_s7 + $0x358] sm:$0xff]  ;;  %v6951_v39 = vld [vmem:[%s12006_s9 + $0x160] sm:$0xff] }
 0x640   :  { %8250 = vmatmul.msk.f32.vlgmr.msrb.gmra.mxu3 %vm257_vm0, %v11564_v26  ;;  %6641 = vmatpush.msrb.mxu1 %v6433_v30  ;;  %v8292_v12 = vld [vmem:[%s12004_s7 + $0x318] sm:$0xff]  ;;  %v6948_v47 = vld [vmem:[%s12006_s9 + $0x148] sm:$0xff] }
 0x641   :  { %6697 = vmatpush.msra.mxu2 %v8265_v37  ;;  %6717 = vmatpush.msra.mxu3 %v8266_v62  ;;  %v6412_v8 = vadd.f32 %v11561_v20, %v6404_v6  ;;  %v6954_v33 = vld [vmem:[%s12006_s9 + $0x178] sm:$0xff]  ;;  %v6949_v37 = vld [vmem:[%s12006_s9 + $0x150] sm:$0xff] }
 0x642   :  { %6642 = vmatpush.msrb.mxu1 %v6429_v60  ;;  %6860 = vmatpush.msra.mxu0 %v8291_v4  ;;  %v6950_v30 = vld [vmem:[%s12006_s9 + $0x158] sm:$0xff]  ;;  %v6937_v6 = vld [vmem:[%s12006_s9 + $0xf0] sm:$0xff]  ;;  %v6947_v60 = vld [vmem:[%s12006_s9 + $0x140] sm:$0xff] }
 0x643   :  { %v11674_v42 = vmax.f32 %v6412_v8, 0.0  ;;  %6698 = vmatpush.msra.mxu2 %v8261_v35  ;;  %6718 = vmatpush.msra.mxu3 %v8262_v31  ;;  %v6938_v62 = vld [vmem:[%s12006_s9 + $0xf8] sm:$0xff]  ;;  %v6920_v4 = vld [vmem:[%s12006_s9 + $0x68] sm:$0xff]  ;;  %v6919_v31 = vld [vmem:[%s12006_s9 + $0x60] sm:$0xff] }
 0x644   :  { %6643 = vmatpush.msrb.mxu1 %v6425_v10  ;;  %v6340_v17 = vpop.f32.mrf.mxu3  ;;  %v6946_v35 = vld [vmem:[%s12006_s9 + $0x138] sm:$0xff]  ;;  %v6945_v8 = vld [vmem:[%s12006_s9 + $0x130] sm:$0xff] }
 0x645   :  { %6699 = vmatpush.msra.mxu2 %v8257_v49  ;;  %6719 = vmatpush.msra.mxu3 %v8258_v61  ;;  %v6346_v53 = vadd.f32 %v6340_v17, %v6287_v58  ;;  %v6918_v10 = vld [vmem:[%s12006_s9 + $0x58] sm:$0xff]  ;;  %v6944_v61 = vld [vmem:[%s12006_s9 + $0x128] sm:$0xff] }
 0x646   :  { %6644 = vmatpush.msrb.mxu1 %v6421_v24  ;;  %8287 = vmatmul.msk.f32.vlgmr.msrb.gmra.mxu0 %vm257_vm0, %v11674_v42  ;;  %v6399_v15 = vpop.f32.mrf.mxu0  ;;  %v6934_v49 = vld [vmem:[%s12006_s9 + $0xd8] sm:$0xff]  ;;  %v6933_v24 = vld [vmem:[%s12006_s9 + $0xd0] sm:$0xff]  ;;  %v6916_v17 = vld [vmem:[%s12006_s9 + $0x48] sm:$0xff] }
 0x647   :  { %6700 = vmatpush.msra.mxu2 %v8253_v54  ;;  %6720 = vmatpush.msra.mxu3 %v8254_v51  ;;  %v6405_v56 = vadd.f32 %v6399_v15, %v6346_v53  ;;  %v6970_v58 = vld [vmem:[%s12006_s9 + $0x1f8] sm:$0xff]  ;;  %v6943_v54 = vld [vmem:[%s12006_s9 + $0x120] sm:$0xff]  ;;  %v6969_v51 = vld [vmem:[%s12006_s9 + $0x1f0] sm:$0xff] }
 0x648   :  { %6753 = vmatpush.msra.mxu1 %v8284_v28  ;;  %8285 = vmatmul.msk.f32.vlgmr.msra.gmra.mxu2 %vm257_vm0, %v11674_v42  ;;  %v6932_v53 = vld [vmem:[%s12006_s9 + $0xc8] sm:$0xff]  ;;  %v6942_v28 = vld [vmem:[%s12006_s9 + $0x118] sm:$0xff]  ;;  %v6931_v15 = vld [vmem:[%s12006_s9 + $0xc0] sm:$0xff] }
 0x649   :  { %6813 = vmatpush.msrb.mxu2 %v8317_v2  ;;  %6833 = vmatpush.msrb.mxu3 %v8318_v44  ;;  %v6413_v40 = vadd.f32 %v11561_v20, %v6405_v56  ;;  %v8310_v20 = vld [vmem:[%s12004_s7 + $0x3a8] sm:$0xff]  ;;  %v6915_v44 = vld [vmem:[%s12006_s9 + $0x40] sm:$0xff]  ;;  %v6941_v56 = vld [vmem:[%s12006_s9 + $0x110] sm:$0xff] }
 0x64a   :  { %8252 = vmatmul.msk.f32.vlgmr.msrb.gmra.mxu1 %vm257_vm0, %v11564_v26  ;;  %8286 = vmatmul.msk.f32.vlgmr.msra.gmra.mxu3 %vm257_vm0, %v11674_v42  ;;  %v8309_v26 = vld [vmem:[%s12004_s7 + $0x3a0] sm:$0xff]  ;;  %v6968_v2 = vld [vmem:[%s12006_s9 + $0x1e8] sm:$0xff] }
 0x64b   :  { %v6417_v23 = vmax.f32 %v6413_v40, 0.0  ;;  %6754 = vmatpush.msra.mxu1 %v8280_v25  ;;  %6814 = vmatpush.msrb.mxu2 %v8313_v48  ;;  %v6967_v25 = vld [vmem:[%s12006_s9 + $0x1e0] sm:$0xff]  ;;  %v6914_v48 = vld [vmem:[%s12006_s9 + $0x38] sm:$0xff] }
 0x64c   :  { %6834 = vmatpush.msrb.mxu3 %v8314_v38  ;;  %7015 = vmatpush.msrb.mxu0 %v6954_v33  ;;  %v6930_v40 = vld [vmem:[%s12006_s9 + $0xb8] sm:$0xff]  ;;  %v6940_v38 = vld [vmem:[%s12006_s9 + $0x108] sm:$0xff]  ;;  %v6959_v33 = vld [vmem:[%s12006_s9 + $0x1a0] sm:$0xff] }
 0x64d   :  { %6755 = vmatpush.msra.mxu1 %v8276_v5  ;;  %6815 = vmatpush.msrb.mxu2 %v8309_v26  ;;  %v6966_v5 = vld [vmem:[%s12006_s9 + $0x1d8] sm:$0xff]  ;;  %v6913_v26 = vld [vmem:[%s12006_s9 + $0x30] sm:$0xff] }
 0x64e   :  { %6835 = vmatpush.msrb.mxu3 %v8310_v20  ;;  %8323 = vmatmul.msk.f32.vlgmr.msra.gmra.mxu0 %vm257_vm0, %v6417_v23  ;;  %v6939_v20 = vld [vmem:[%s12006_s9 + $0x100] sm:$0xff] }
 0x64f   :  { %6756 = vmatpush.msra.mxu1 %v8272_v19  ;;  %6816 = vmatpush.msrb.mxu2 %v8305_v55  ;;  %v6965_v19 = vld [vmem:[%s12006_s9 + $0x1d0] sm:$0xff]  ;;  %v6912_v55 = vld [vmem:[%s12006_s9 + $0x28] sm:$0xff] }
 0x650   :  { %6836 = vmatpush.msrb.mxu3 %v8306_v46  ;;  %7016 = vmatpush.msrb.mxu0 %v6953_v1  ;;  %v6928_v46 = vld [vmem:[%s12006_s9 + $0xa8] sm:$0xff]  ;;  %v6958_v1 = vld [vmem:[%s12006_s9 + $0x198] sm:$0xff] }
 0x651   :  { %6757 = vmatpush.msra.mxu1 %v8268_v9  ;;  %6817 = vmatpush.msrb.mxu2 %v8301_v16  ;;  %v6964_v9 = vld [vmem:[%s12006_s9 + $0x1c8] sm:$0xff]  ;;  %v6911_v16 = vld [vmem:[%s12006_s9 + $0x20] sm:$0xff] }
 0x652   :  { %6837 = vmatpush.msrb.mxu3 %v8302_v63  ;;  %7017 = vmatpush.msrb.mxu0 %v6952_v3  ;;  %v6927_v63 = vld [vmem:[%s12006_s9 + $0xa0] sm:$0xff] }
 0x653   :  { %6758 = vmatpush.msra.mxu1 %v8264_v45  ;;  %6818 = vmatpush.msrb.mxu2 %v8297_v59  ;;  %v6963_v45 = vld [vmem:[%s12006_s9 + $0x1c0] sm:$0xff] }
 0x654   :  { %6838 = vmatpush.msrb.mxu3 %v8298_v57  ;;  %7018 = vmatpush.msrb.mxu0 %v6951_v39  ;;  %v6910_v57 = vld [vmem:[%s12006_s9 + $0x18] sm:$0xff]  ;;  %v6889_v3 = vld [vmem:[%s12005_s8] sm:$0xf]  ;;  %v6957_v39 = vld [vmem:[%s12006_s9 + $0x190] sm:$0xff] }
 0x655   :  { %6759 = vmatpush.msra.mxu1 %v8260_v7  ;;  %6819 = vmatpush.msrb.mxu2 %v8293_v18  ;;  %v6926_v7 = vld [vmem:[%s12006_s9 + $0x98] sm:$0xff] }
 0x656   :  { %6839 = vmatpush.msrb.mxu3 %v8294_v41  ;;  %7019 = vmatpush.msrb.mxu0 %v6950_v30  ;;  %v6962_v18 = vld [vmem:[%s12006_s9 + $0x1b8] sm:$0xff]  ;;  %v6909_v41 = vld [vmem:[%s12006_s9 + $0x10] sm:$0xff] }
 0x657   :  { %6760 = vmatpush.msra.mxu1 %v8256_v22  ;;  %6820 = vmatpush.msrb.mxu2 %v8289_v13  ;;  %v6925_v22 = vld [vmem:[%s12006_s9 + $0x90] sm:$0xff] }
 0x658   :  { %6840 = vmatpush.msrb.mxu3 %v8290_v34  ;;  %8288 = vmatmul.msk.f32.vlgmr.msra.gmra.mxu1 %vm257_vm0, %v11674_v42  ;;  %v6917_v42 = vld [vmem:[%s12006_s9 + $0x50] sm:$0xff] }
 0x659   :  { %8321 = vmatmul.msk.f32.vlgmr.msrb.gmra.mxu2 %vm257_vm0, %v6417_v23  ;;  %8322 = vmatmul.msk.f32.vlgmr.msrb.gmra.mxu3 %vm257_vm0, %v6417_v23  ;;  %v6961_v13 = vld [vmem:[%s12006_s9 + $0x1b0] sm:$0xff] }
 0x65a   :  { %6873 = vmatpush.msrb.mxu1 %v8320_v29  ;;  %6975 = vmatpush.msra.mxu2 %v6922_v32  ;;  %v6956_v32 = vld [vmem:[%s12006_s9 + $0x188] sm:$0xff] }
 0x65b   :  { %6995 = vmatpush.msra.mxu3 %v6938_v62  ;;  %7020 = vmatpush.msrb.mxu0 %v6949_v37 }
 0x65c   :  { %6874 = vmatpush.msrb.mxu1 %v8316_v43  ;;  %6976 = vmatpush.msra.mxu2 %v6921_v0  ;;  %v6908_v43 = vld [vmem:[%s12006_s9 + $0x8] sm:$0xff]  ;;  %v6893_v0 = vperm.slane %v6889_v3, 2 }
 0x65d   :  { %7021 = vmatpush.msrb.mxu0 %v6948_v47  ;;  %6996 = vmatpush.msra.mxu3 %v6937_v6 }
 0x65e   :  { %6875 = vmatpush.msrb.mxu1 %v8312_v50  ;;  %6977 = vmatpush.msra.mxu2 %v6920_v4  ;;  %v6924_v50 = vld [vmem:[%s12006_s9 + $0x88] sm:$0xff] }
 0x65f   :  { %7022 = vmatpush.msrb.mxu0 %v6947_v60  ;;  %6997 = vmatpush.msra.mxu3 %v6936_v27  ;;  %v6955_v60 = vld [vmem:[%s12006_s9 + $0x180] sm:$0xff] }
 0x660   :  { %6876 = vmatpush.msrb.mxu1 %v8308_v36  ;;  %6978 = vmatpush.msra.mxu2 %v6919_v31  ;;  %v6960_v36 = vld [vmem:[%s12006_s9 + $0x1a8] sm:$0xff] }
 0x661   :  { %7023 = vmatpush.msrb.mxu0 %v6946_v35  ;;  %6998 = vmatpush.msra.mxu3 %v6935_v52 }
 0x662   :  { %6877 = vmatpush.msrb.mxu1 %v8304_v21  ;;  %6979 = vmatpush.msra.mxu2 %v6918_v10  ;;  %v6907_v21 = vld [vmem:[%s12006_s9] sm:$0xff] }
 0x663   :  { %7024 = vmatpush.msrb.mxu0 %v6945_v8  ;;  %6999 = vmatpush.msra.mxu3 %v6934_v49 }
 0x664   :  { %6878 = vmatpush.msrb.mxu1 %v8300_v14  ;;  %6980 = vmatpush.msra.mxu2 %v6917_v42  ;;  %v6923_v14 = vld [vmem:[%s12006_s9 + $0x80] sm:$0xff] }
 0x665   :  { %7025 = vmatpush.msrb.mxu0 %v6944_v61  ;;  %7000 = vmatpush.msra.mxu3 %v6933_v24  ;;  %v6891_v24 = vperm.slane %v6889_v3, 0 }
 0x666   :  { %6879 = vmatpush.msrb.mxu1 %v8296_v11  ;;  %6981 = vmatpush.msra.mxu2 %v6916_v17 }
 0x667   :  { %7026 = vmatpush.msrb.mxu0 %v6943_v54  ;;  %7001 = vmatpush.msra.mxu3 %v6932_v53  ;;  %v6892_v54 = vperm.slane %v6889_v3, 1 }
 0x668   :  { %6880 = vmatpush.msrb.mxu1 %v8292_v12  ;;  %6982 = vmatpush.msra.mxu2 %v6915_v44 }
 0x669   :  { %8324 = vmatmul.msk.f32.vlgmr.msrb.gmra.mxu1 %vm257_vm0, %v6417_v23  ;;  %7027 = vmatpush.msrb.mxu0 %v6942_v28  ;;  %v6929_v23 = vld [vmem:[%s12006_s9 + $0xb0] sm:$0xff] }
 0x66a   :  { %7035 = vmatpush.msra.mxu1 %v6970_v58  ;;  %7002 = vmatpush.msra.mxu3 %v6931_v15 }
 0x66b   :  { %7028 = vmatpush.msrb.mxu0 %v6941_v56  ;;  %6983 = vmatpush.msra.mxu2 %v6914_v48 }
 0x66c   :  { %7036 = vmatpush.msra.mxu1 %v6969_v51  ;;  %7003 = vmatpush.msra.mxu3 %v6930_v40 }
 0x66d   :  { %7029 = vmatpush.msrb.mxu0 %v6940_v38  ;;  %6984 = vmatpush.msra.mxu2 %v6913_v26  ;;  %v6894_v38 = vperm.slane %v6889_v3, 3 }
 0x66e   :  { %7037 = vmatpush.msra.mxu1 %v6968_v2  ;;  %7004 = vmatpush.msra.mxu3 %v6929_v23 }
 0x66f   :  { %7030 = vmatpush.msrb.mxu0 %v6939_v20  ;;  %6985 = vmatpush.msra.mxu2 %v6912_v55 }
 0x670   :  { %7038 = vmatpush.msra.mxu1 %v6967_v25  ;;  %7005 = vmatpush.msra.mxu3 %v6928_v46 }
 0x671   :  { %6986 = vmatpush.msra.mxu2 %v6911_v16 }
 0x672   :  { %7039 = vmatpush.msra.mxu1 %v6966_v5  ;;  %7006 = vmatpush.msra.mxu3 %v6927_v63 }
 0x673   :  { %6987 = vmatpush.msra.mxu2 %v6910_v57 }
 0x674   :  { %7040 = vmatpush.msra.mxu1 %v6965_v19  ;;  %7007 = vmatpush.msra.mxu3 %v6926_v7  ;;  %v8337_v19 = vld [vmem:[%s12007_s10] ss:$0 sm:$0xff] }
 0x675   :  { %6988 = vmatpush.msra.mxu2 %v6909_v41 }
 0x676   :  { %7041 = vmatpush.msra.mxu1 %v6964_v9  ;;  %7008 = vmatpush.msra.mxu3 %v6925_v22 }
 0x677   :  { %6989 = vmatpush.msra.mxu2 %v6908_v43 }
 0x678   :  { %7042 = vmatpush.msra.mxu1 %v6963_v45  ;;  %7009 = vmatpush.msra.mxu3 %v6924_v50 }
 0x679   :  { %6990 = vmatpush.msra.mxu2 %v6907_v21 }
 0x67a   :  { %7043 = vmatpush.msra.mxu1 %v6962_v18  ;;  %7010 = vmatpush.msra.mxu3 %v6923_v14 }
 0x67c   :  { %7044 = vmatpush.msra.mxu1 %v6961_v13 }
 0x67e   :  { %7045 = vmatpush.msra.mxu1 %v6960_v36 }
 0x680   :  { %7046 = vmatpush.msra.mxu1 %v6959_v33 }
 0x682   :  { %7047 = vmatpush.msra.mxu1 %v6958_v1 }
 0x684   :  { %7048 = vmatpush.msra.mxu1 %v6957_v39 }
 0x686   :  { %7049 = vmatpush.msra.mxu1 %v6956_v32 }
 0x688   :  { %7050 = vmatpush.msra.mxu1 %v6955_v60 }
 0x6ab   :  { %v6626_v59 = vpop.f32.mrf.mxu0 }
 0x6b3   :  { %v6503_v11 = vpop.f32.mrf.mxu1 }
 0x6b9   :  { %v6523_v34 = vpop.f32.mrf.mxu2 }
 0x6ba   :  { %v6543_v29 = vpop.f32.mrf.mxu3 }
 0x6bb   :  { %v6627_v30 = vadd.f32 %v6626_v59, %v6543_v29 }
 0x6bc   :  { %v6563_v4 = vpop.f32.mrf.mxu1 }
 0x6c2   :  { %v6586_v37 = vpop.f32.mrf.mxu2 }
 0x6c3   :  { %v6742_v12 = vpop.f32.mrf.mxu0  ;;  %v6606_v62 = vpop.f32.mrf.mxu3  ;;  %v6587_v49 = vadd.f32 %v6586_v37, %v6503_v11 }
 0x6c4   :  { %v6767_v47 = vadd.f32 %v6742_v12, %v6627_v30  ;;  %v6607_v61 = vadd.f32 %v6606_v62, %v6523_v34 }
 0x6c7   :  { %v6646_v10 = vpop.f32.mrf.mxu1 }
 0x6c8   :  { %v6647_v48 = vadd.f32 %v6646_v10, %v6563_v4 }
 0x6cb   :  { %v6862_v6 = vpop.f32.mrf.mxu0  ;;  %v6702_v52 = vpop.f32.mrf.mxu2 }
 0x6cc   :  { %v6887_v27 = vadd.f32 %v6862_v6, %v6767_v47  ;;  %v6765_v58 = vadd.f32 %v6702_v52, %v6587_v49 }
 0x6cd   :  { %v6722_v8 = vpop.f32.mrf.mxu3 }
 0x6ce   :  { %v6901_v35 = vadd.f32 %v6893_v0, %v6887_v27  ;;  %v6766_v42 = vadd.f32 %v6722_v8, %v6607_v61 }
 0x6d0   :  { %v6905_v31 = vmax.f32 %v6901_v35, 0.0 }
 0x6d2   :  { %7031 = vmatmul.f32.vlgmr.msrb.gmra.mxu0 %v6905_v31 }
 0x6d5   :  { %v6762_v2 = vpop.f32.mrf.mxu1 }
 0x6d6   :  { %v6768_v40 = vadd.f32 %v6762_v2, %v6647_v48 }
 0x6dc   :  { %v6822_v51 = vpop.f32.mrf.mxu2  ;;  %v6842_v17 = vpop.f32.mrf.mxu3 }
 0x6dd   :  { %v6885_v53 = vadd.f32 %v6822_v51, %v6765_v58  ;;  %v6886_v28 = vadd.f32 %v6842_v17, %v6766_v42 }
 0x6df   :  { %v6899_v44 = vadd.f32 %v6891_v24, %v6885_v53  ;;  %v6900_v15 = vadd.f32 %v6892_v54, %v6886_v28 }
 0x6e1   :  { %v6903_v56 = vmax.f32 %v6899_v44, 0.0  ;;  %v6904_v25 = vmax.f32 %v6900_v15, 0.0 }
 0x6e3   :  { %6991 = vmatmul.f32.vlgmr.msra.gmra.mxu2 %v6903_v56  ;;  %7011 = vmatmul.f32.vlgmr.msra.gmra.mxu3 %v6904_v25 }
 0x6e6   :  { %v6882_v5 = vpop.f32.mrf.mxu1 }
 0x6e7   :  { %v6888_v26 = vadd.f32 %v6882_v5, %v6768_v40 }
 0x6e9   :  { %v6902_v23 = vadd.f32 %v6894_v38, %v6888_v26 }
 0x6eb   :  { %v6906_v20 = vmax.f32 %v6902_v23, 0.0 }
 0x6ed   :  { %7051 = vmatmul.f32.vlgmr.msra.gmra.mxu1 %v6906_v20 }
 0x74f   :  { %v7032_v63 = vpop.f32.mrf.mxu0 }
 0x766   :  { %v6992_v55 = vpop.f32.mrf.mxu2  ;;  %v7012_v9 = vpop.f32.mrf.mxu3 }
 0x767   :  { %v6993_v46 = vadd.f32 %v8337_v19, %v6992_v55 }
 0x769   :  { %v7013_v16 = vadd.f32 %v7012_v9, %v6993_v46 }
 0x76a   :  { %v7052_v59 = vpop.f32.mrf.mxu1 }
 0x76b   :  { %v7033_v45 = vadd.f32 %v7032_v63, %v7013_v16 }
 0x76d   :  { %v7053_v57 = vadd.f32 %v7052_v59, %v7033_v45 }
 0x76f   :  { %7056 = vst.msk [vmem:[#allocation4] sm:$0xff] %vm7055_vm2, %v7053_v57 }
 0x770   :  { %7067 = dma.vmem_to_hbm [thread:$0]  %s7063_s16, 128, %s7065_s18, [#allocation5]  }
 0x771   :  { %8365 = dma.done.wait [#allocation5], 128  }
 0x772   :  { %8366 = vsyncadd [#allocation5], 4294967168 }
 0x773   :  { %7072 = vsyncpa [#allocation5], 1 }

</bundles_post_ra>
